<compile_context>
chip_gen: v7x
topology: tpu7x:2x2x1
jax: 0.10.0
libtpu: 0.0.40
codegen_flags: <defaults>
</compile_context>

<pallas_src>
import functools

import jax
import jax.numpy as jnp
from jax import lax
from jax.experimental import pallas as pl
from jax.experimental.pallas import tpu as pltpu


# (stride, padding) of each ConvTranspose2d; kernel size is 4 everywhere.
LAYER_CFG = [(1, 0), (2, 1), (2, 1), (2, 1), (2, 1), (2, 1)]

# Phase decomposition of ConvTranspose2d(K=4, stride=2, pad=1) along one axis:
#   out[2*o + phase] = sum_r  x_pad[o + r] * W[..., kh]  with (phase, r) -> kh:
_TAP = {(0, 0): 3, (0, 1): 1, (1, 1): 2, (1, 2): 0}

_VMEM = pl.BlockSpec(memory_space=pltpu.MemorySpace.VMEM)
_VMEM_LIMIT = 8 * 1024 * 1024   # actual per-call working set is < 1 MiB


# --------------------------- Pallas kernels ---------------------------------

def _phase_mm_bn_lrelu_kernel(a_ref, b_ref, g_ref, bt_ref, o_ref, *,
                              nblk, slope, eps, inv_cnt):
    """o[k] = LeakyReLU(BN(A[k] @ B)) for k in [0, nblk).

    a: (nblk, Cout, Kc) bf16   b: (Kc, M) bf16   g, bt: (Cout, 1) f32
    o: (nblk, Cout, M) f32.  BatchNorm statistics are per output channel, i.e.
    over all nblk row-blocks and all M columns (training-mode batch stats).
    """
    b = b_ref[...]
    acc = [jnp.dot(a_ref[k], b, preferred_element_type=jnp.float32)
           for k in range(nblk)]
    ch_sum = acc[0].sum(axis=1, keepdims=True)
    ch_ssq = (acc[0] * acc[0]).sum(axis=1, keepdims=True)
    for k in range(1, nblk):
        ch_sum = ch_sum + acc[k].sum(axis=1, keepdims=True)
        ch_ssq = ch_ssq + (acc[k] * acc[k]).sum(axis=1, keepdims=True)
    mean = ch_sum * inv_cnt
    var = ch_ssq * inv_cnt - mean * mean
    s = g_ref[...] * lax.rsqrt(var + eps)      # fold BN into a single FMA pass
    t = bt_ref[...] - mean * s
    for k in range(nblk):
        y = acc[k] * s + t
        o_ref[k] = jnp.where(y >= 0.0, y, slope * y)


def _phase_mm_tanh_kernel(a_ref, b_ref, o_ref, *, nblk):
    """o[k] = tanh(A[k] @ B): final ConvTranspose2d + Tanh (no BatchNorm)."""
    b = b_ref[...]
    for k in range(nblk):
        o_ref[k] = jnp.tanh(jnp.dot(a_ref[k], b,
                                    preferred_element_type=jnp.float32))


# --------------------------- weight preparation ------------------------------

def _prep_weight_l0(W):
    """Layer 0 (stride 1, pad 0, 1x1 input): out[n,co,kh,kw] = W[:,co,kh,kw].x[n].
    Returns A = (16, Cout, Cin) bf16 with row-block index kk = kh*4 + kw."""
    Cin, Cout, K, _ = W.shape
    return W.transpose(2, 3, 1, 0).reshape(K * K, Cout, Cin).astype(jnp.bfloat16)


def _prep_weight_s2(W):
    """Stride-2 layers: A = (4, Cout, 9*Cin) bf16, phase-major blocks
    p = py*2 + px, columns (r*3 + c)*Cin + ci (zero where the phase has no tap)."""
    Cin, Cout, _, _ = W.shape
    zero = jnp.zeros((Cout, Cin), jnp.float32)
    blocks = []
    for py in range(2):
        for px in range(2):
            row = []
            for r in range(3):
                for c in range(3):
                    kh = _TAP.get((py, r))
                    kw = _TAP.get((px, c))
                    if kh is None or kw is None:
                        row.append(zero)
                    else:
                        row.append(W[:, :, kh, kw].T)          # (Cout, Cin)
            blocks.append(jnp.concatenate(row, axis=1))        # (Cout, 9*Cin)
    return jnp.stack(blocks, axis=0).astype(jnp.bfloat16)      # (4, Cout, 9*Cin)


def prepare_params(params):
    """One-time re-layout of torch ConvT weights (Cin,Cout,4,4) -> phase-major A."""
    prepped = []
    for i, (W, gamma, beta) in enumerate(params):
        A = _prep_weight_l0(W) if i == 0 else _prep_weight_s2(W)
        prepped.append((A,
                        gamma.reshape(-1, 1).astype(jnp.float32),
                        beta.reshape(-1, 1).astype(jnp.float32)))
    return prepped


# ------------------------------ layer wrappers -------------------------------

def _layer0(x, A, gamma, beta, slope):
    """x: (N, Cin, 1, 1) NCHW -> y: (Cout, N, 4, 4) channel-major."""
    N = x.shape[0]
    _, Cout, Cin = A.shape
    B = x.reshape(N, Cin).T.astype(jnp.bfloat16)                # (Cin, N)
    out = pl.pallas_call(
        functools.partial(_phase_mm_bn_lrelu_kernel, nblk=16, slope=slope,
                          eps=1e-5, inv_cnt=1.0 / (16 * N)),
        out_shape=jax.ShapeDtypeStruct((16, Cout, N), jnp.float32),
        in_specs=[_VMEM, _VMEM, _VMEM, _VMEM],
        out_specs=_VMEM,
        compiler_params=pltpu.CompilerParams(vmem_limit_bytes=_VMEM_LIMIT),
    )(A, B, gamma, beta)
    # row-block kk = kh*4 + kw  ->  (Cout, N, 4, 4)
    return out.reshape(4, 4, Cout, N).transpose(2, 3, 0, 1)


def _layer_s2(y, A, gamma, beta, slope, *, last, block_m=2048):
    """y: (Cin, N, H, W) channel-major -> (Cout, N, 2H, 2W)."""
    Cin, N, H, W = y.shape
    _, Cout, _ = A.shape
    M = N * H * W
    # The 9 shifted windows of the 1-padded input.  The zero-upsampled image
    # and the 16x im2col of the old design are never materialized.
    yp = jnp.pad(y, ((0, 0), (0, 0), (1, 1), (1, 1)))
    B = jnp.stack([yp[:, :, r:r + H, c:c + W]
                   for r in range(3) for c in range(3)], axis=0)
    B = B.reshape(9 * Cin, M).astype(jnp.bfloat16)

    if last:
        # Stream the M axis with lane-dense blocks; "parallel" lets the two
        # TensorCores of a v7x chip split the grid, and DMA overlaps compute.
        nb = M // block_m if (M % block_m == 0 and M > block_m
                              and block_m % 128 == 0) else 1
        bm = M // nb
        out = pl.pallas_call(
            functools.partial(_phase_mm_tanh_kernel, nblk=4),
            out_shape=jax.ShapeDtypeStruct((4, Cout, M), jnp.float32),
            grid=(nb,),
            in_specs=[pl.BlockSpec((4, Cout, 9 * Cin), lambda j: (0, 0, 0)),
                      pl.BlockSpec((9 * Cin, bm), lambda j: (0, j))],
            out_specs=pl.BlockSpec((4, Cout, bm), lambda j: (0, 0, j)),
            compiler_params=pltpu.CompilerParams(
                dimension_semantics=("parallel",),
                vmem_limit_bytes=_VMEM_LIMIT),
        )(A, B)
    else:
        # BN needs global per-channel batch stats; these layers are tiny
        # (B <= 144 KiB), so a single resident call keeps acc in VMEM.
        out = pl.pallas_call(
            functools.partial(_phase_mm_bn_lrelu_kernel, nblk=4, slope=slope,
                              eps=1e-5, inv_cnt=1.0 / (4 * M)),
            out_shape=jax.ShapeDtypeStruct((4, Cout, M), jnp.float32),
            in_specs=[_VMEM, _VMEM, _VMEM, _VMEM],
            out_specs=_VMEM,
            compiler_params=pltpu.CompilerParams(vmem_limit_bytes=_VMEM_LIMIT),
        )(A, B, gamma, beta)

    # interleave the 4 phases back to (Cout, N, 2H, 2W)
    out = out.reshape(2, 2, Cout, N, H, W)            # (py, px, co, n, oy, ox)
    return out.transpose(2, 3, 4, 0, 5, 1).reshape(Cout, N, 2 * H, 2 * W)


def generator_dc_forward(x, prepped, slope):
    """x: (N, in_size, 1, 1) NCHW -> (N, 3, 128, 128) NCHW."""
    A0, g0, b0 = prepped[0]
    y = _layer0(x, A0, g0, b0, slope)
    n = len(prepped)
    for i in range(1, n):
        A, g, b = prepped[i]
        y = _layer_s2(y, A, g, b, slope, last=(i == n - 1))
    return y.transpose(1, 0, 2, 3)


# ----------------------------- pure-JAX reference ----------------------------

def generator_dc_reference(x, params, slope, operand_dtype=jnp.float32):
    """Training-mode GeneratorDC forward in plain JAX (NCHW).  With
    operand_dtype=bfloat16 the conv operands are pre-rounded to bf16 to model
    the MXU's native input precision (accumulation stays f32)."""
    y = x
    n = len(params)
    for i, (W, gamma, beta) in enumerate(params):
        s, p = LAYER_CFG[i]
        K = W.shape[-1]
        rhs = jnp.flip(W, (2, 3)).transpose(1, 0, 2, 3)
        lhs = y.astype(operand_dtype).astype(jnp.float32)
        rhs = rhs.astype(operand_dtype).astype(jnp.float32)
        y = lax.conv_general_dilated(
            lhs, rhs, window_strides=(1, 1),
            padding=[(K - 1 - p, K - 1 - p)] * 2, lhs_dilation=(s, s),
            dimension_numbers=("NCHW", "OIHW", "NCHW"),
            precision=lax.Precision.HIGHEST)
        if i < n - 1:
            mean = y.mean(axis=(0, 2, 3), keepdims=True)
            var = jnp.square(y - mean).mean(axis=(0, 2, 3), keepdims=True)
            y = (y - mean) * lax.rsqrt(var + 1e-5)
            y = y * gamma.reshape(1, -1, 1, 1) + beta.reshape(1, -1, 1, 1)
            y = jnp.where(y >= 0.0, y, slope * y)
        else:
            y = jnp.tanh(y)
    return y


# ------------------------------------ main -----------------------------------

if __name__ == "__main__":
    in_size, ch, batch = 8, 4, 2
    dropout_rate = 0.2     # the module uses this as the LeakyReLU negative slope

    key = jax.random.PRNGKey(0)
    layer_ch = [(in_size, ch * 8), (ch * 8, ch * 4), (ch * 4, ch * 2),
                (ch * 2, ch), (ch, ch), (ch, 3)]
    params = []
    for ci, co in layer_ch:
        key, kw, kg, kb = jax.random.split(key, 4)
        W = 0.02 * jax.random.normal(kw, (ci, co, 4, 4), jnp.float32)  # torch ConvT layout (Cin,Cout,kH,kW)
        gamma = 1.0 + 0.1 * jax.random.normal(kg, (co,), jnp.float32)
        beta = 0.1 * jax.random.normal(kb, (co,), jnp.float32)
        params.append((W, gamma, beta))

    key, kx = jax.random.split(key)
    x = jax.random.normal(kx, (batch, in_size, 1, 1), jnp.float32)     # DCGAN latent, NCHW

    prepped = prepare_params(params)            # one-time weight re-layout
    fwd = jax.jit(generator_dc_forward, static_argnums=(2,))
    out = jax.block_until_ready(fwd(x, prepped, dropout_rate))
    assert out.shape == (batch, 3, 128, 128), out.shape

    # Matched-precision reference (bf16 operands, f32 accumulation): tight check.
    ref_bf16 = generator_dc_reference(x, params, dropout_rate, jnp.bfloat16)
    err = float(jnp.max(jnp.abs(out - ref_bf16)))
    assert jnp.allclose(out, ref_bf16, atol=2e-3, rtol=2e-2), err

    # Full-f32 reference: loose sanity check on the native-bf16 MXU path.
    ref_f32 = generator_dc_reference(x, params, dropout_rate, jnp.float32)
    err32 = float(jnp.max(jnp.abs(out - ref_f32)))
    assert jnp.allclose(out, ref_f32, atol=6e-2, rtol=6e-2), err32

    print("KERNEL_OK")
</pallas_src>

<mosaic_0001>
module attributes {stable_mosaic.version = 11 : i64} {
  func.func @_phase_mm_bn_lrelu_kernel(%arg0: memref<16x32x8xbf16, #tpu.memory_space<vmem>>, %arg1: memref<8x2xbf16, #tpu.memory_space<vmem>>, %arg2: memref<32x1xf32, #tpu.memory_space<vmem>>, %arg3: memref<32x1xf32, #tpu.memory_space<vmem>>, %arg4: memref<16x32x2xf32, #tpu.memory_space<vmem>>) attributes {dimension_semantics = [], scalar_prefetch = 0 : i64, scratch_operands = 0 : i64, tpu.core_type = #tpu.core_type<tc>} {
    %c0 = arith.constant 0 : index
    %c0_0 = arith.constant 0 : index
    %0 = vector.load %arg1[%c0, %c0_0] : memref<8x2xbf16, #tpu.memory_space<vmem>>, vector<8x2xbf16>
    %c0_1 = arith.constant 0 : index
    %c0_2 = arith.constant 0 : index
    %c0_3 = arith.constant 0 : index
    %1 = vector.load %arg0[%c0_1, %c0_2, %c0_3] : memref<16x32x8xbf16, #tpu.memory_space<vmem>>, vector<1x32x8xbf16>
    %2 = vector.shape_cast %1 : vector<1x32x8xbf16> to vector<32x8xbf16>
    %cst = arith.constant dense<0.000000e+00> : vector<32x2xf32>
    %3 = tpu.matmul %2, %0, %cst {dimension_numbers = #tpu.dot_dimension_numbers<[1], [0], [0], [1], [0, 0, 1, 1], [], []>} : vector<32x8xbf16>, vector<8x2xbf16>, vector<32x2xf32> -> vector<32x2xf32>
    %c1 = arith.constant 1 : index
    %c0_4 = arith.constant 0 : index
    %c0_5 = arith.constant 0 : index
    %4 = vector.load %arg0[%c1, %c0_4, %c0_5] : memref<16x32x8xbf16, #tpu.memory_space<vmem>>, vector<1x32x8xbf16>
    %5 = vector.shape_cast %4 : vector<1x32x8xbf16> to vector<32x8xbf16>
    %cst_6 = arith.constant dense<0.000000e+00> : vector<32x2xf32>
    %6 = tpu.matmul %5, %0, %cst_6 {dimension_numbers = #tpu.dot_dimension_numbers<[1], [0], [0], [1], [0, 0, 1, 1], [], []>} : vector<32x8xbf16>, vector<8x2xbf16>, vector<32x2xf32> -> vector<32x2xf32>
    %c2 = arith.constant 2 : index
    %c0_7 = arith.constant 0 : index
    %c0_8 = arith.constant 0 : index
    %7 = vector.load %arg0[%c2, %c0_7, %c0_8] : memref<16x32x8xbf16, #tpu.memory_space<vmem>>, vector<1x32x8xbf16>
    %8 = vector.shape_cast %7 : vector<1x32x8xbf16> to vector<32x8xbf16>
    %cst_9 = arith.constant dense<0.000000e+00> : vector<32x2xf32>
    %9 = tpu.matmul %8, %0, %cst_9 {dimension_numbers = #tpu.dot_dimension_numbers<[1], [0], [0], [1], [0, 0, 1, 1], [], []>} : vector<32x8xbf16>, vector<8x2xbf16>, vector<32x2xf32> -> vector<32x2xf32>
    %c3 = arith.constant 3 : index
    %c0_10 = arith.constant 0 : index
    %c0_11 = arith.constant 0 : index
    %10 = vector.load %arg0[%c3, %c0_10, %c0_11] : memref<16x32x8xbf16, #tpu.memory_space<vmem>>, vector<1x32x8xbf16>
    %11 = vector.shape_cast %10 : vector<1x32x8xbf16> to vector<32x8xbf16>
    %cst_12 = arith.constant dense<0.000000e+00> : vector<32x2xf32>
    %12 = tpu.matmul %11, %0, %cst_12 {dimension_numbers = #tpu.dot_dimension_numbers<[1], [0], [0], [1], [0, 0, 1, 1], [], []>} : vector<32x8xbf16>, vector<8x2xbf16>, vector<32x2xf32> -> vector<32x2xf32>
    %c4 = arith.constant 4 : index
    %c0_13 = arith.constant 0 : index
    %c0_14 = arith.constant 0 : index
    %13 = vector.load %arg0[%c4, %c0_13, %c0_14] : memref<16x32x8xbf16, #tpu.memory_space<vmem>>, vector<1x32x8xbf16>
    %14 = vector.shape_cast %13 : vector<1x32x8xbf16> to vector<32x8xbf16>
    %cst_15 = arith.constant dense<0.000000e+00> : vector<32x2xf32>
    %15 = tpu.matmul %14, %0, %cst_15 {dimension_numbers = #tpu.dot_dimension_numbers<[1], [0], [0], [1], [0, 0, 1, 1], [], []>} : vector<32x8xbf16>, vector<8x2xbf16>, vector<32x2xf32> -> vector<32x2xf32>
    %c5 = arith.constant 5 : index
    %c0_16 = arith.constant 0 : index
    %c0_17 = arith.constant 0 : index
    %16 = vector.load %arg0[%c5, %c0_16, %c0_17] : memref<16x32x8xbf16, #tpu.memory_space<vmem>>, vector<1x32x8xbf16>
    %17 = vector.shape_cast %16 : vector<1x32x8xbf16> to vector<32x8xbf16>
    %cst_18 = arith.constant dense<0.000000e+00> : vector<32x2xf32>
    %18 = tpu.matmul %17, %0, %cst_18 {dimension_numbers = #tpu.dot_dimension_numbers<[1], [0], [0], [1], [0, 0, 1, 1], [], []>} : vector<32x8xbf16>, vector<8x2xbf16>, vector<32x2xf32> -> vector<32x2xf32>
    %c6 = arith.constant 6 : index
    %c0_19 = arith.constant 0 : index
    %c0_20 = arith.constant 0 : index
    %19 = vector.load %arg0[%c6, %c0_19, %c0_20] : memref<16x32x8xbf16, #tpu.memory_space<vmem>>, vector<1x32x8xbf16>
    %20 = vector.shape_cast %19 : vector<1x32x8xbf16> to vector<32x8xbf16>
    %cst_21 = arith.constant dense<0.000000e+00> : vector<32x2xf32>
    %21 = tpu.matmul %20, %0, %cst_21 {dimension_numbers = #tpu.dot_dimension_numbers<[1], [0], [0], [1], [0, 0, 1, 1], [], []>} : vector<32x8xbf16>, vector<8x2xbf16>, vector<32x2xf32> -> vector<32x2xf32>
    %c7 = arith.constant 7 : index
    %c0_22 = arith.constant 0 : index
    %c0_23 = arith.constant 0 : index
    %22 = vector.load %arg0[%c7, %c0_22, %c0_23] : memref<16x32x8xbf16, #tpu.memory_space<vmem>>, vector<1x32x8xbf16>
    %23 = vector.shape_cast %22 : vector<1x32x8xbf16> to vector<32x8xbf16>
    %cst_24 = arith.constant dense<0.000000e+00> : vector<32x2xf32>
    %24 = tpu.matmul %23, %0, %cst_24 {dimension_numbers = #tpu.dot_dimension_numbers<[1], [0], [0], [1], [0, 0, 1, 1], [], []>} : vector<32x8xbf16>, vector<8x2xbf16>, vector<32x2xf32> -> vector<32x2xf32>
    %c8 = arith.constant 8 : index
    %c0_25 = arith.constant 0 : index
    %c0_26 = arith.constant 0 : index
    %25 = vector.load %arg0[%c8, %c0_25, %c0_26] : memref<16x32x8xbf16, #tpu.memory_space<vmem>>, vector<1x32x8xbf16>
    %26 = vector.shape_cast %25 : vector<1x32x8xbf16> to vector<32x8xbf16>
    %cst_27 = arith.constant dense<0.000000e+00> : vector<32x2xf32>
    %27 = tpu.matmul %26, %0, %cst_27 {dimension_numbers = #tpu.dot_dimension_numbers<[1], [0], [0], [1], [0, 0, 1, 1], [], []>} : vector<32x8xbf16>, vector<8x2xbf16>, vector<32x2xf32> -> vector<32x2xf32>
    %c9 = arith.constant 9 : index
    %c0_28 = arith.constant 0 : index
    %c0_29 = arith.constant 0 : index
    %28 = vector.load %arg0[%c9, %c0_28, %c0_29] : memref<16x32x8xbf16, #tpu.memory_space<vmem>>, vector<1x32x8xbf16>
    %29 = vector.shape_cast %28 : vector<1x32x8xbf16> to vector<32x8xbf16>
    %cst_30 = arith.constant dense<0.000000e+00> : vector<32x2xf32>
    %30 = tpu.matmul %29, %0, %cst_30 {dimension_numbers = #tpu.dot_dimension_numbers<[1], [0], [0], [1], [0, 0, 1, 1], [], []>} : vector<32x8xbf16>, vector<8x2xbf16>, vector<32x2xf32> -> vector<32x2xf32>
    %c10 = arith.constant 10 : index
    %c0_31 = arith.constant 0 : index
    %c0_32 = arith.constant 0 : index
    %31 = vector.load %arg0[%c10, %c0_31, %c0_32] : memref<16x32x8xbf16, #tpu.memory_space<vmem>>, vector<1x32x8xbf16>
    %32 = vector.shape_cast %31 : vector<1x32x8xbf16> to vector<32x8xbf16>
    %cst_33 = arith.constant dense<0.000000e+00> : vector<32x2xf32>
    %33 = tpu.matmul %32, %0, %cst_33 {dimension_numbers = #tpu.dot_dimension_numbers<[1], [0], [0], [1], [0, 0, 1, 1], [], []>} : vector<32x8xbf16>, vector<8x2xbf16>, vector<32x2xf32> -> vector<32x2xf32>
    %c11 = arith.constant 11 : index
    %c0_34 = arith.constant 0 : index
    %c0_35 = arith.constant 0 : index
    %34 = vector.load %arg0[%c11, %c0_34, %c0_35] : memref<16x32x8xbf16, #tpu.memory_space<vmem>>, vector<1x32x8xbf16>
    %35 = vector.shape_cast %34 : vector<1x32x8xbf16> to vector<32x8xbf16>
    %cst_36 = arith.constant dense<0.000000e+00> : vector<32x2xf32>
    %36 = tpu.matmul %35, %0, %cst_36 {dimension_numbers = #tpu.dot_dimension_numbers<[1], [0], [0], [1], [0, 0, 1, 1], [], []>} : vector<32x8xbf16>, vector<8x2xbf16>, vector<32x2xf32> -> vector<32x2xf32>
    %c12 = arith.constant 12 : index
    %c0_37 = arith.constant 0 : index
    %c0_38 = arith.constant 0 : index
    %37 = vector.load %arg0[%c12, %c0_37, %c0_38] : memref<16x32x8xbf16, #tpu.memory_space<vmem>>, vector<1x32x8xbf16>
    %38 = vector.shape_cast %37 : vector<1x32x8xbf16> to vector<32x8xbf16>
    %cst_39 = arith.constant dense<0.000000e+00> : vector<32x2xf32>
    %39 = tpu.matmul %38, %0, %cst_39 {dimension_numbers = #tpu.dot_dimension_numbers<[1], [0], [0], [1], [0, 0, 1, 1], [], []>} : vector<32x8xbf16>, vector<8x2xbf16>, vector<32x2xf32> -> vector<32x2xf32>
    %c13 = arith.constant 13 : index
    %c0_40 = arith.constant 0 : index
    %c0_41 = arith.constant 0 : index
    %40 = vector.load %arg0[%c13, %c0_40, %c0_41] : memref<16x32x8xbf16, #tpu.memory_space<vmem>>, vector<1x32x8xbf16>
    %41 = vector.shape_cast %40 : vector<1x32x8xbf16> to vector<32x8xbf16>
    %cst_42 = arith.constant dense<0.000000e+00> : vector<32x2xf32>
    %42 = tpu.matmul %41, %0, %cst_42 {dimension_numbers = #tpu.dot_dimension_numbers<[1], [0], [0], [1], [0, 0, 1, 1], [], []>} : vector<32x8xbf16>, vector<8x2xbf16>, vector<32x2xf32> -> vector<32x2xf32>
    %c14 = arith.constant 14 : index
    %c0_43 = arith.constant 0 : index
    %c0_44 = arith.constant 0 : index
    %43 = vector.load %arg0[%c14, %c0_43, %c0_44] : memref<16x32x8xbf16, #tpu.memory_space<vmem>>, vector<1x32x8xbf16>
    %44 = vector.shape_cast %43 : vector<1x32x8xbf16> to vector<32x8xbf16>
    %cst_45 = arith.constant dense<0.000000e+00> : vector<32x2xf32>
    %45 = tpu.matmul %44, %0, %cst_45 {dimension_numbers = #tpu.dot_dimension_numbers<[1], [0], [0], [1], [0, 0, 1, 1], [], []>} : vector<32x8xbf16>, vector<8x2xbf16>, vector<32x2xf32> -> vector<32x2xf32>
    %c15 = arith.constant 15 : index
    %c0_46 = arith.constant 0 : index
    %c0_47 = arith.constant 0 : index
    %46 = vector.load %arg0[%c15, %c0_46, %c0_47] : memref<16x32x8xbf16, #tpu.memory_space<vmem>>, vector<1x32x8xbf16>
    %47 = vector.shape_cast %46 : vector<1x32x8xbf16> to vector<32x8xbf16>
    %cst_48 = arith.constant dense<0.000000e+00> : vector<32x2xf32>
    %48 = tpu.matmul %47, %0, %cst_48 {dimension_numbers = #tpu.dot_dimension_numbers<[1], [0], [0], [1], [0, 0, 1, 1], [], []>} : vector<32x8xbf16>, vector<8x2xbf16>, vector<32x2xf32> -> vector<32x2xf32>
    %cst_49 = arith.constant dense<0.000000e+00> : vector<32xf32>
    %49 = vector.multi_reduction <add>, %3, %cst_49 [1] : vector<32x2xf32> to vector<32xf32>
    %50 = vector.shape_cast %49 : vector<32xf32> to vector<32x1xf32>
    %51 = arith.mulf %3, %3 : vector<32x2xf32>
    %cst_50 = arith.constant dense<0.000000e+00> : vector<32xf32>
    %52 = vector.multi_reduction <add>, %51, %cst_50 [1] : vector<32x2xf32> to vector<32xf32>
    %53 = vector.shape_cast %52 : vector<32xf32> to vector<32x1xf32>
    %cst_51 = arith.constant dense<0.000000e+00> : vector<32xf32>
    %54 = vector.multi_reduction <add>, %6, %cst_51 [1] : vector<32x2xf32> to vector<32xf32>
    %55 = vector.shape_cast %54 : vector<32xf32> to vector<32x1xf32>
    %56 = arith.addf %50, %55 : vector<32x1xf32>
    %57 = arith.mulf %6, %6 : vector<32x2xf32>
    %cst_52 = arith.constant dense<0.000000e+00> : vector<32xf32>
    %58 = vector.multi_reduction <add>, %57, %cst_52 [1] : vector<32x2xf32> to vector<32xf32>
    %59 = vector.shape_cast %58 : vector<32xf32> to vector<32x1xf32>
    %60 = arith.addf %53, %59 : vector<32x1xf32>
    %cst_53 = arith.constant dense<0.000000e+00> : vector<32xf32>
    %61 = vector.multi_reduction <add>, %9, %cst_53 [1] : vector<32x2xf32> to vector<32xf32>
    %62 = vector.shape_cast %61 : vector<32xf32> to vector<32x1xf32>
    %63 = arith.addf %56, %62 : vector<32x1xf32>
    %64 = arith.mulf %9, %9 : vector<32x2xf32>
    %cst_54 = arith.constant dense<0.000000e+00> : vector<32xf32>
    %65 = vector.multi_reduction <add>, %64, %cst_54 [1] : vector<32x2xf32> to vector<32xf32>
    %66 = vector.shape_cast %65 : vector<32xf32> to vector<32x1xf32>
    %67 = arith.addf %60, %66 : vector<32x1xf32>
    %cst_55 = arith.constant dense<0.000000e+00> : vector<32xf32>
    %68 = vector.multi_reduction <add>, %12, %cst_55 [1] : vector<32x2xf32> to vector<32xf32>
    %69 = vector.shape_cast %68 : vector<32xf32> to vector<32x1xf32>
    %70 = arith.addf %63, %69 : vector<32x1xf32>
    %71 = arith.mulf %12, %12 : vector<32x2xf32>
    %cst_56 = arith.constant dense<0.000000e+00> : vector<32xf32>
    %72 = vector.multi_reduction <add>, %71, %cst_56 [1] : vector<32x2xf32> to vector<32xf32>
    %73 = vector.shape_cast %72 : vector<32xf32> to vector<32x1xf32>
    %74 = arith.addf %67, %73 : vector<32x1xf32>
    %cst_57 = arith.constant dense<0.000000e+00> : vector<32xf32>
    %75 = vector.multi_reduction <add>, %15, %cst_57 [1] : vector<32x2xf32> to vector<32xf32>
    %76 = vector.shape_cast %75 : vector<32xf32> to vector<32x1xf32>
    %77 = arith.addf %70, %76 : vector<32x1xf32>
    %78 = arith.mulf %15, %15 : vector<32x2xf32>
    %cst_58 = arith.constant dense<0.000000e+00> : vector<32xf32>
    %79 = vector.multi_reduction <add>, %78, %cst_58 [1] : vector<32x2xf32> to vector<32xf32>
    %80 = vector.shape_cast %79 : vector<32xf32> to vector<32x1xf32>
    %81 = arith.addf %74, %80 : vector<32x1xf32>
    %cst_59 = arith.constant dense<0.000000e+00> : vector<32xf32>
    %82 = vector.multi_reduction <add>, %18, %cst_59 [1] : vector<32x2xf32> to vector<32xf32>
    %83 = vector.shape_cast %82 : vector<32xf32> to vector<32x1xf32>
    %84 = arith.addf %77, %83 : vector<32x1xf32>
    %85 = arith.mulf %18, %18 : vector<32x2xf32>
    %cst_60 = arith.constant dense<0.000000e+00> : vector<32xf32>
    %86 = vector.multi_reduction <add>, %85, %cst_60 [1] : vector<32x2xf32> to vector<32xf32>
    %87 = vector.shape_cast %86 : vector<32xf32> to vector<32x1xf32>
    %88 = arith.addf %81, %87 : vector<32x1xf32>
    %cst_61 = arith.constant dense<0.000000e+00> : vector<32xf32>
    %89 = vector.multi_reduction <add>, %21, %cst_61 [1] : vector<32x2xf32> to vector<32xf32>
    %90 = vector.shape_cast %89 : vector<32xf32> to vector<32x1xf32>
    %91 = arith.addf %84, %90 : vector<32x1xf32>
    %92 = arith.mulf %21, %21 : vector<32x2xf32>
    %cst_62 = arith.constant dense<0.000000e+00> : vector<32xf32>
    %93 = vector.multi_reduction <add>, %92, %cst_62 [1] : vector<32x2xf32> to vector<32xf32>
    %94 = vector.shape_cast %93 : vector<32xf32> to vector<32x1xf32>
    %95 = arith.addf %88, %94 : vector<32x1xf32>
    %cst_63 = arith.constant dense<0.000000e+00> : vector<32xf32>
    %96 = vector.multi_reduction <add>, %24, %cst_63 [1] : vector<32x2xf32> to vector<32xf32>
    %97 = vector.shape_cast %96 : vector<32xf32> to vector<32x1xf32>
    %98 = arith.addf %91, %97 : vector<32x1xf32>
    %99 = arith.mulf %24, %24 : vector<32x2xf32>
    %cst_64 = arith.constant dense<0.000000e+00> : vector<32xf32>
    %100 = vector.multi_reduction <add>, %99, %cst_64 [1] : vector<32x2xf32> to vector<32xf32>
    %101 = vector.shape_cast %100 : vector<32xf32> to vector<32x1xf32>
    %102 = arith.addf %95, %101 : vector<32x1xf32>
    %cst_65 = arith.constant dense<0.000000e+00> : vector<32xf32>
    %103 = vector.multi_reduction <add>, %27, %cst_65 [1] : vector<32x2xf32> to vector<32xf32>
    %104 = vector.shape_cast %103 : vector<32xf32> to vector<32x1xf32>
    %105 = arith.addf %98, %104 : vector<32x1xf32>
    %106 = arith.mulf %27, %27 : vector<32x2xf32>
    %cst_66 = arith.constant dense<0.000000e+00> : vector<32xf32>
    %107 = vector.multi_reduction <add>, %106, %cst_66 [1] : vector<32x2xf32> to vector<32xf32>
    %108 = vector.shape_cast %107 : vector<32xf32> to vector<32x1xf32>
    %109 = arith.addf %102, %108 : vector<32x1xf32>
    %cst_67 = arith.constant dense<0.000000e+00> : vector<32xf32>
    %110 = vector.multi_reduction <add>, %30, %cst_67 [1] : vector<32x2xf32> to vector<32xf32>
    %111 = vector.shape_cast %110 : vector<32xf32> to vector<32x1xf32>
    %112 = arith.addf %105, %111 : vector<32x1xf32>
    %113 = arith.mulf %30, %30 : vector<32x2xf32>
    %cst_68 = arith.constant dense<0.000000e+00> : vector<32xf32>
    %114 = vector.multi_reduction <add>, %113, %cst_68 [1] : vector<32x2xf32> to vector<32xf32>
    %115 = vector.shape_cast %114 : vector<32xf32> to vector<32x1xf32>
    %116 = arith.addf %109, %115 : vector<32x1xf32>
    %cst_69 = arith.constant dense<0.000000e+00> : vector<32xf32>
    %117 = vector.multi_reduction <add>, %33, %cst_69 [1] : vector<32x2xf32> to vector<32xf32>
    %118 = vector.shape_cast %117 : vector<32xf32> to vector<32x1xf32>
    %119 = arith.addf %112, %118 : vector<32x1xf32>
    %120 = arith.mulf %33, %33 : vector<32x2xf32>
    %cst_70 = arith.constant dense<0.000000e+00> : vector<32xf32>
    %121 = vector.multi_reduction <add>, %120, %cst_70 [1] : vector<32x2xf32> to vector<32xf32>
    %122 = vector.shape_cast %121 : vector<32xf32> to vector<32x1xf32>
    %123 = arith.addf %116, %122 : vector<32x1xf32>
    %cst_71 = arith.constant dense<0.000000e+00> : vector<32xf32>
    %124 = vector.multi_reduction <add>, %36, %cst_71 [1] : vector<32x2xf32> to vector<32xf32>
    %125 = vector.shape_cast %124 : vector<32xf32> to vector<32x1xf32>
    %126 = arith.addf %119, %125 : vector<32x1xf32>
    %127 = arith.mulf %36, %36 : vector<32x2xf32>
    %cst_72 = arith.constant dense<0.000000e+00> : vector<32xf32>
    %128 = vector.multi_reduction <add>, %127, %cst_72 [1] : vector<32x2xf32> to vector<32xf32>
    %129 = vector.shape_cast %128 : vector<32xf32> to vector<32x1xf32>
    %130 = arith.addf %123, %129 : vector<32x1xf32>
    %cst_73 = arith.constant dense<0.000000e+00> : vector<32xf32>
    %131 = vector.multi_reduction <add>, %39, %cst_73 [1] : vector<32x2xf32> to vector<32xf32>
    %132 = vector.shape_cast %131 : vector<32xf32> to vector<32x1xf32>
    %133 = arith.addf %126, %132 : vector<32x1xf32>
    %134 = arith.mulf %39, %39 : vector<32x2xf32>
    %cst_74 = arith.constant dense<0.000000e+00> : vector<32xf32>
    %135 = vector.multi_reduction <add>, %134, %cst_74 [1] : vector<32x2xf32> to vector<32xf32>
    %136 = vector.shape_cast %135 : vector<32xf32> to vector<32x1xf32>
    %137 = arith.addf %130, %136 : vector<32x1xf32>
    %cst_75 = arith.constant dense<0.000000e+00> : vector<32xf32>
    %138 = vector.multi_reduction <add>, %42, %cst_75 [1] : vector<32x2xf32> to vector<32xf32>
    %139 = vector.shape_cast %138 : vector<32xf32> to vector<32x1xf32>
    %140 = arith.addf %133, %139 : vector<32x1xf32>
    %141 = arith.mulf %42, %42 : vector<32x2xf32>
    %cst_76 = arith.constant dense<0.000000e+00> : vector<32xf32>
    %142 = vector.multi_reduction <add>, %141, %cst_76 [1] : vector<32x2xf32> to vector<32xf32>
    %143 = vector.shape_cast %142 : vector<32xf32> to vector<32x1xf32>
    %144 = arith.addf %137, %143 : vector<32x1xf32>
    %cst_77 = arith.constant dense<0.000000e+00> : vector<32xf32>
    %145 = vector.multi_reduction <add>, %45, %cst_77 [1] : vector<32x2xf32> to vector<32xf32>
    %146 = vector.shape_cast %145 : vector<32xf32> to vector<32x1xf32>
    %147 = arith.addf %140, %146 : vector<32x1xf32>
    %148 = arith.mulf %45, %45 : vector<32x2xf32>
    %cst_78 = arith.constant dense<0.000000e+00> : vector<32xf32>
    %149 = vector.multi_reduction <add>, %148, %cst_78 [1] : vector<32x2xf32> to vector<32xf32>
    %150 = vector.shape_cast %149 : vector<32xf32> to vector<32x1xf32>
    %151 = arith.addf %144, %150 : vector<32x1xf32>
    %cst_79 = arith.constant dense<0.000000e+00> : vector<32xf32>
    %152 = vector.multi_reduction <add>, %48, %cst_79 [1] : vector<32x2xf32> to vector<32xf32>
    %153 = vector.shape_cast %152 : vector<32xf32> to vector<32x1xf32>
    %154 = arith.addf %147, %153 : vector<32x1xf32>
    %155 = arith.mulf %48, %48 : vector<32x2xf32>
    %cst_80 = arith.constant dense<0.000000e+00> : vector<32xf32>
    %156 = vector.multi_reduction <add>, %155, %cst_80 [1] : vector<32x2xf32> to vector<32xf32>
    %157 = vector.shape_cast %156 : vector<32xf32> to vector<32x1xf32>
    %158 = arith.addf %151, %157 : vector<32x1xf32>
    %cst_81 = arith.constant 3.125000e-02 : f32
    %159 = vector.broadcast %cst_81 : f32 to vector<32x1xf32>
    %160 = arith.mulf %154, %159 : vector<32x1xf32>
    %cst_82 = arith.constant 3.125000e-02 : f32
    %161 = vector.broadcast %cst_82 : f32 to vector<32x1xf32>
    %162 = arith.mulf %158, %161 : vector<32x1xf32>
    %163 = arith.mulf %160, %160 : vector<32x1xf32>
    %164 = arith.subf %162, %163 : vector<32x1xf32>
    %c0_83 = arith.constant 0 : index
    %c0_84 = arith.constant 0 : index
    %165 = vector.load %arg2[%c0_83, %c0_84] : memref<32x1xf32, #tpu.memory_space<vmem>>, vector<32x1xf32>
    %cst_85 = arith.constant 9.99999974E-6 : f32
    %166 = vector.broadcast %cst_85 : f32 to vector<32x1xf32>
    %167 = arith.addf %164, %166 : vector<32x1xf32>
    %168 = math.rsqrt %167 : vector<32x1xf32>
    %169 = arith.mulf %165, %168 : vector<32x1xf32>
    %c0_86 = arith.constant 0 : index
    %c0_87 = arith.constant 0 : index
    %170 = vector.load %arg3[%c0_86, %c0_87] : memref<32x1xf32, #tpu.memory_space<vmem>>, vector<32x1xf32>
    %171 = arith.mulf %160, %169 : vector<32x1xf32>
    %172 = arith.subf %170, %171 : vector<32x1xf32>
    %173 = vector.broadcast %169 : vector<32x1xf32> to vector<32x2xf32>
    %174 = arith.mulf %3, %173 : vector<32x2xf32>
    %175 = vector.broadcast %172 : vector<32x1xf32> to vector<32x2xf32>
    %176 = arith.addf %174, %175 : vector<32x2xf32>
    %cst_88 = arith.constant 0.000000e+00 : f32
    %177 = vector.broadcast %cst_88 : f32 to vector<32x2xf32>
    %178 = arith.cmpf oge, %176, %177 : vector<32x2xf32>
    %cst_89 = arith.constant 2.000000e-01 : f32
    %179 = vector.broadcast %cst_89 : f32 to vector<32x2xf32>
    %180 = arith.mulf %179, %176 : vector<32x2xf32>
    %181 = arith.select %178, %176, %180 : vector<32x2xi1>, vector<32x2xf32>
    %c0_90 = arith.constant 0 : index
    %c0_91 = arith.constant 0 : index
    %c0_92 = arith.constant 0 : index
    %182 = vector.load %arg4[%c0_90, %c0_91, %c0_92] : memref<16x32x2xf32, #tpu.memory_space<vmem>>, vector<1x32x2xf32>
    %183 = vector.shape_cast %182 : vector<1x32x2xf32> to vector<32x2xf32>
    %184 = vector.shape_cast %181 : vector<32x2xf32> to vector<1x32x2xf32>
    tpu.vector_store %arg4[%c0_90, %c0_91, %c0_92], %184 {strides = array<i32>} : memref<16x32x2xf32, #tpu.memory_space<vmem>>, vector<1x32x2xf32>,
    %185 = vector.broadcast %169 : vector<32x1xf32> to vector<32x2xf32>
    %186 = arith.mulf %6, %185 : vector<32x2xf32>
    %187 = vector.broadcast %172 : vector<32x1xf32> to vector<32x2xf32>
    %188 = arith.addf %186, %187 : vector<32x2xf32>
    %cst_93 = arith.constant 0.000000e+00 : f32
    %189 = vector.broadcast %cst_93 : f32 to vector<32x2xf32>
    %190 = arith.cmpf oge, %188, %189 : vector<32x2xf32>
    %cst_94 = arith.constant 2.000000e-01 : f32
    %191 = vector.broadcast %cst_94 : f32 to vector<32x2xf32>
    %192 = arith.mulf %191, %188 : vector<32x2xf32>
    %193 = arith.select %190, %188, %192 : vector<32x2xi1>, vector<32x2xf32>
    %c1_95 = arith.constant 1 : index
    %c0_96 = arith.constant 0 : index
    %c0_97 = arith.constant 0 : index
    %194 = vector.load %arg4[%c1_95, %c0_96, %c0_97] : memref<16x32x2xf32, #tpu.memory_space<vmem>>, vector<1x32x2xf32>
    %195 = vector.shape_cast %194 : vector<1x32x2xf32> to vector<32x2xf32>
    %196 = vector.shape_cast %193 : vector<32x2xf32> to vector<1x32x2xf32>
    tpu.vector_store %arg4[%c1_95, %c0_96, %c0_97], %196 {strides = array<i32>} : memref<16x32x2xf32, #tpu.memory_space<vmem>>, vector<1x32x2xf32>,
    %197 = vector.broadcast %169 : vector<32x1xf32> to vector<32x2xf32>
    %198 = arith.mulf %9, %197 : vector<32x2xf32>
    %199 = vector.broadcast %172 : vector<32x1xf32> to vector<32x2xf32>
    %200 = arith.addf %198, %199 : vector<32x2xf32>
    %cst_98 = arith.constant 0.000000e+00 : f32
    %201 = vector.broadcast %cst_98 : f32 to vector<32x2xf32>
    %202 = arith.cmpf oge, %200, %201 : vector<32x2xf32>
    %cst_99 = arith.constant 2.000000e-01 : f32
    %203 = vector.broadcast %cst_99 : f32 to vector<32x2xf32>
    %204 = arith.mulf %203, %200 : vector<32x2xf32>
    %205 = arith.select %202, %200, %204 : vector<32x2xi1>, vector<32x2xf32>
    %c2_100 = arith.constant 2 : index
    %c0_101 = arith.constant 0 : index
    %c0_102 = arith.constant 0 : index
    %206 = vector.load %arg4[%c2_100, %c0_101, %c0_102] : memref<16x32x2xf32, #tpu.memory_space<vmem>>, vector<1x32x2xf32>
    %207 = vector.shape_cast %206 : vector<1x32x2xf32> to vector<32x2xf32>
    %208 = vector.shape_cast %205 : vector<32x2xf32> to vector<1x32x2xf32>
    tpu.vector_store %arg4[%c2_100, %c0_101, %c0_102], %208 {strides = array<i32>} : memref<16x32x2xf32, #tpu.memory_space<vmem>>, vector<1x32x2xf32>,
    %209 = vector.broadcast %169 : vector<32x1xf32> to vector<32x2xf32>
    %210 = arith.mulf %12, %209 : vector<32x2xf32>
    %211 = vector.broadcast %172 : vector<32x1xf32> to vector<32x2xf32>
    %212 = arith.addf %210, %211 : vector<32x2xf32>
    %cst_103 = arith.constant 0.000000e+00 : f32
    %213 = vector.broadcast %cst_103 : f32 to vector<32x2xf32>
    %214 = arith.cmpf oge, %212, %213 : vector<32x2xf32>
    %cst_104 = arith.constant 2.000000e-01 : f32
    %215 = vector.broadcast %cst_104 : f32 to vector<32x2xf32>
    %216 = arith.mulf %215, %212 : vector<32x2xf32>
    %217 = arith.select %214, %212, %216 : vector<32x2xi1>, vector<32x2xf32>
    %c3_105 = arith.constant 3 : index
    %c0_106 = arith.constant 0 : index
    %c0_107 = arith.constant 0 : index
    %218 = vector.load %arg4[%c3_105, %c0_106, %c0_107] : memref<16x32x2xf32, #tpu.memory_space<vmem>>, vector<1x32x2xf32>
    %219 = vector.shape_cast %218 : vector<1x32x2xf32> to vector<32x2xf32>
    %220 = vector.shape_cast %217 : vector<32x2xf32> to vector<1x32x2xf32>
    tpu.vector_store %arg4[%c3_105, %c0_106, %c0_107], %220 {strides = array<i32>} : memref<16x32x2xf32, #tpu.memory_space<vmem>>, vector<1x32x2xf32>,
    %221 = vector.broadcast %169 : vector<32x1xf32> to vector<32x2xf32>
    %222 = arith.mulf %15, %221 : vector<32x2xf32>
    %223 = vector.broadcast %172 : vector<32x1xf32> to vector<32x2xf32>
    %224 = arith.addf %222, %223 : vector<32x2xf32>
    %cst_108 = arith.constant 0.000000e+00 : f32
    %225 = vector.broadcast %cst_108 : f32 to vector<32x2xf32>
    %226 = arith.cmpf oge, %224, %225 : vector<32x2xf32>
    %cst_109 = arith.constant 2.000000e-01 : f32
    %227 = vector.broadcast %cst_109 : f32 to vector<32x2xf32>
    %228 = arith.mulf %227, %224 : vector<32x2xf32>
    %229 = arith.select %226, %224, %228 : vector<32x2xi1>, vector<32x2xf32>
    %c4_110 = arith.constant 4 : index
    %c0_111 = arith.constant 0 : index
    %c0_112 = arith.constant 0 : index
    %230 = vector.load %arg4[%c4_110, %c0_111, %c0_112] : memref<16x32x2xf32, #tpu.memory_space<vmem>>, vector<1x32x2xf32>
    %231 = vector.shape_cast %230 : vector<1x32x2xf32> to vector<32x2xf32>
    %232 = vector.shape_cast %229 : vector<32x2xf32> to vector<1x32x2xf32>
    tpu.vector_store %arg4[%c4_110, %c0_111, %c0_112], %232 {strides = array<i32>} : memref<16x32x2xf32, #tpu.memory_space<vmem>>, vector<1x32x2xf32>,
    %233 = vector.broadcast %169 : vector<32x1xf32> to vector<32x2xf32>
    %234 = arith.mulf %18, %233 : vector<32x2xf32>
    %235 = vector.broadcast %172 : vector<32x1xf32> to vector<32x2xf32>
    %236 = arith.addf %234, %235 : vector<32x2xf32>
    %cst_113 = arith.constant 0.000000e+00 : f32
    %237 = vector.broadcast %cst_113 : f32 to vector<32x2xf32>
    %238 = arith.cmpf oge, %236, %237 : vector<32x2xf32>
    %cst_114 = arith.constant 2.000000e-01 : f32
    %239 = vector.broadcast %cst_114 : f32 to vector<32x2xf32>
    %240 = arith.mulf %239, %236 : vector<32x2xf32>
    %241 = arith.select %238, %236, %240 : vector<32x2xi1>, vector<32x2xf32>
    %c5_115 = arith.constant 5 : index
    %c0_116 = arith.constant 0 : index
    %c0_117 = arith.constant 0 : index
    %242 = vector.load %arg4[%c5_115, %c0_116, %c0_117] : memref<16x32x2xf32, #tpu.memory_space<vmem>>, vector<1x32x2xf32>
    %243 = vector.shape_cast %242 : vector<1x32x2xf32> to vector<32x2xf32>
    %244 = vector.shape_cast %241 : vector<32x2xf32> to vector<1x32x2xf32>
    tpu.vector_store %arg4[%c5_115, %c0_116, %c0_117], %244 {strides = array<i32>} : memref<16x32x2xf32, #tpu.memory_space<vmem>>, vector<1x32x2xf32>,
    %245 = vector.broadcast %169 : vector<32x1xf32> to vector<32x2xf32>
    %246 = arith.mulf %21, %245 : vector<32x2xf32>
    %247 = vector.broadcast %172 : vector<32x1xf32> to vector<32x2xf32>
    %248 = arith.addf %246, %247 : vector<32x2xf32>
    %cst_118 = arith.constant 0.000000e+00 : f32
    %249 = vector.broadcast %cst_118 : f32 to vector<32x2xf32>
    %250 = arith.cmpf oge, %248, %249 : vector<32x2xf32>
    %cst_119 = arith.constant 2.000000e-01 : f32
    %251 = vector.broadcast %cst_119 : f32 to vector<32x2xf32>
    %252 = arith.mulf %251, %248 : vector<32x2xf32>
    %253 = arith.select %250, %248, %252 : vector<32x2xi1>, vector<32x2xf32>
    %c6_120 = arith.constant 6 : index
    %c0_121 = arith.constant 0 : index
    %c0_122 = arith.constant 0 : index
    %254 = vector.load %arg4[%c6_120, %c0_121, %c0_122] : memref<16x32x2xf32, #tpu.memory_space<vmem>>, vector<1x32x2xf32>
    %255 = vector.shape_cast %254 : vector<1x32x2xf32> to vector<32x2xf32>
    %256 = vector.shape_cast %253 : vector<32x2xf32> to vector<1x32x2xf32>
    tpu.vector_store %arg4[%c6_120, %c0_121, %c0_122], %256 {strides = array<i32>} : memref<16x32x2xf32, #tpu.memory_space<vmem>>, vector<1x32x2xf32>,
    %257 = vector.broadcast %169 : vector<32x1xf32> to vector<32x2xf32>
    %258 = arith.mulf %24, %257 : vector<32x2xf32>
    %259 = vector.broadcast %172 : vector<32x1xf32> to vector<32x2xf32>
    %260 = arith.addf %258, %259 : vector<32x2xf32>
    %cst_123 = arith.constant 0.000000e+00 : f32
    %261 = vector.broadcast %cst_123 : f32 to vector<32x2xf32>
    %262 = arith.cmpf oge, %260, %261 : vector<32x2xf32>
    %cst_124 = arith.constant 2.000000e-01 : f32
    %263 = vector.broadcast %cst_124 : f32 to vector<32x2xf32>
    %264 = arith.mulf %263, %260 : vector<32x2xf32>
    %265 = arith.select %262, %260, %264 : vector<32x2xi1>, vector<32x2xf32>
    %c7_125 = arith.constant 7 : index
    %c0_126 = arith.constant 0 : index
    %c0_127 = arith.constant 0 : index
    %266 = vector.load %arg4[%c7_125, %c0_126, %c0_127] : memref<16x32x2xf32, #tpu.memory_space<vmem>>, vector<1x32x2xf32>
    %267 = vector.shape_cast %266 : vector<1x32x2xf32> to vector<32x2xf32>
    %268 = vector.shape_cast %265 : vector<32x2xf32> to vector<1x32x2xf32>
    tpu.vector_store %arg4[%c7_125, %c0_126, %c0_127], %268 {strides = array<i32>} : memref<16x32x2xf32, #tpu.memory_space<vmem>>, vector<1x32x2xf32>,
    %269 = vector.broadcast %169 : vector<32x1xf32> to vector<32x2xf32>
    %270 = arith.mulf %27, %269 : vector<32x2xf32>
    %271 = vector.broadcast %172 : vector<32x1xf32> to vector<32x2xf32>
    %272 = arith.addf %270, %271 : vector<32x2xf32>
    %cst_128 = arith.constant 0.000000e+00 : f32
    %273 = vector.broadcast %cst_128 : f32 to vector<32x2xf32>
    %274 = arith.cmpf oge, %272, %273 : vector<32x2xf32>
    %cst_129 = arith.constant 2.000000e-01 : f32
    %275 = vector.broadcast %cst_129 : f32 to vector<32x2xf32>
    %276 = arith.mulf %275, %272 : vector<32x2xf32>
    %277 = arith.select %274, %272, %276 : vector<32x2xi1>, vector<32x2xf32>
    %c8_130 = arith.constant 8 : index
    %c0_131 = arith.constant 0 : index
    %c0_132 = arith.constant 0 : index
    %278 = vector.load %arg4[%c8_130, %c0_131, %c0_132] : memref<16x32x2xf32, #tpu.memory_space<vmem>>, vector<1x32x2xf32>
    %279 = vector.shape_cast %278 : vector<1x32x2xf32> to vector<32x2xf32>
    %280 = vector.shape_cast %277 : vector<32x2xf32> to vector<1x32x2xf32>
    tpu.vector_store %arg4[%c8_130, %c0_131, %c0_132], %280 {strides = array<i32>} : memref<16x32x2xf32, #tpu.memory_space<vmem>>, vector<1x32x2xf32>,
    %281 = vector.broadcast %169 : vector<32x1xf32> to vector<32x2xf32>
    %282 = arith.mulf %30, %281 : vector<32x2xf32>
    %283 = vector.broadcast %172 : vector<32x1xf32> to vector<32x2xf32>
    %284 = arith.addf %282, %283 : vector<32x2xf32>
    %cst_133 = arith.constant 0.000000e+00 : f32
    %285 = vector.broadcast %cst_133 : f32 to vector<32x2xf32>
    %286 = arith.cmpf oge, %284, %285 : vector<32x2xf32>
    %cst_134 = arith.constant 2.000000e-01 : f32
    %287 = vector.broadcast %cst_134 : f32 to vector<32x2xf32>
    %288 = arith.mulf %287, %284 : vector<32x2xf32>
    %289 = arith.select %286, %284, %288 : vector<32x2xi1>, vector<32x2xf32>
    %c9_135 = arith.constant 9 : index
    %c0_136 = arith.constant 0 : index
    %c0_137 = arith.constant 0 : index
    %290 = vector.load %arg4[%c9_135, %c0_136, %c0_137] : memref<16x32x2xf32, #tpu.memory_space<vmem>>, vector<1x32x2xf32>
    %291 = vector.shape_cast %290 : vector<1x32x2xf32> to vector<32x2xf32>
    %292 = vector.shape_cast %289 : vector<32x2xf32> to vector<1x32x2xf32>
    tpu.vector_store %arg4[%c9_135, %c0_136, %c0_137], %292 {strides = array<i32>} : memref<16x32x2xf32, #tpu.memory_space<vmem>>, vector<1x32x2xf32>,
    %293 = vector.broadcast %169 : vector<32x1xf32> to vector<32x2xf32>
    %294 = arith.mulf %33, %293 : vector<32x2xf32>
    %295 = vector.broadcast %172 : vector<32x1xf32> to vector<32x2xf32>
    %296 = arith.addf %294, %295 : vector<32x2xf32>
    %cst_138 = arith.constant 0.000000e+00 : f32
    %297 = vector.broadcast %cst_138 : f32 to vector<32x2xf32>
    %298 = arith.cmpf oge, %296, %297 : vector<32x2xf32>
    %cst_139 = arith.constant 2.000000e-01 : f32
    %299 = vector.broadcast %cst_139 : f32 to vector<32x2xf32>
    %300 = arith.mulf %299, %296 : vector<32x2xf32>
    %301 = arith.select %298, %296, %300 : vector<32x2xi1>, vector<32x2xf32>
    %c10_140 = arith.constant 10 : index
    %c0_141 = arith.constant 0 : index
    %c0_142 = arith.constant 0 : index
    %302 = vector.load %arg4[%c10_140, %c0_141, %c0_142] : memref<16x32x2xf32, #tpu.memory_space<vmem>>, vector<1x32x2xf32>
    %303 = vector.shape_cast %302 : vector<1x32x2xf32> to vector<32x2xf32>
    %304 = vector.shape_cast %301 : vector<32x2xf32> to vector<1x32x2xf32>
    tpu.vector_store %arg4[%c10_140, %c0_141, %c0_142], %304 {strides = array<i32>} : memref<16x32x2xf32, #tpu.memory_space<vmem>>, vector<1x32x2xf32>,
    %305 = vector.broadcast %169 : vector<32x1xf32> to vector<32x2xf32>
    %306 = arith.mulf %36, %305 : vector<32x2xf32>
    %307 = vector.broadcast %172 : vector<32x1xf32> to vector<32x2xf32>
    %308 = arith.addf %306, %307 : vector<32x2xf32>
    %cst_143 = arith.constant 0.000000e+00 : f32
    %309 = vector.broadcast %cst_143 : f32 to vector<32x2xf32>
    %310 = arith.cmpf oge, %308, %309 : vector<32x2xf32>
    %cst_144 = arith.constant 2.000000e-01 : f32
    %311 = vector.broadcast %cst_144 : f32 to vector<32x2xf32>
    %312 = arith.mulf %311, %308 : vector<32x2xf32>
    %313 = arith.select %310, %308, %312 : vector<32x2xi1>, vector<32x2xf32>
    %c11_145 = arith.constant 11 : index
    %c0_146 = arith.constant 0 : index
    %c0_147 = arith.constant 0 : index
    %314 = vector.load %arg4[%c11_145, %c0_146, %c0_147] : memref<16x32x2xf32, #tpu.memory_space<vmem>>, vector<1x32x2xf32>
    %315 = vector.shape_cast %314 : vector<1x32x2xf32> to vector<32x2xf32>
    %316 = vector.shape_cast %313 : vector<32x2xf32> to vector<1x32x2xf32>
    tpu.vector_store %arg4[%c11_145, %c0_146, %c0_147], %316 {strides = array<i32>} : memref<16x32x2xf32, #tpu.memory_space<vmem>>, vector<1x32x2xf32>,
    %317 = vector.broadcast %169 : vector<32x1xf32> to vector<32x2xf32>
    %318 = arith.mulf %39, %317 : vector<32x2xf32>
    %319 = vector.broadcast %172 : vector<32x1xf32> to vector<32x2xf32>
    %320 = arith.addf %318, %319 : vector<32x2xf32>
    %cst_148 = arith.constant 0.000000e+00 : f32
    %321 = vector.broadcast %cst_148 : f32 to vector<32x2xf32>
    %322 = arith.cmpf oge, %320, %321 : vector<32x2xf32>
    %cst_149 = arith.constant 2.000000e-01 : f32
    %323 = vector.broadcast %cst_149 : f32 to vector<32x2xf32>
    %324 = arith.mulf %323, %320 : vector<32x2xf32>
    %325 = arith.select %322, %320, %324 : vector<32x2xi1>, vector<32x2xf32>
    %c12_150 = arith.constant 12 : index
    %c0_151 = arith.constant 0 : index
    %c0_152 = arith.constant 0 : index
    %326 = vector.load %arg4[%c12_150, %c0_151, %c0_152] : memref<16x32x2xf32, #tpu.memory_space<vmem>>, vector<1x32x2xf32>
    %327 = vector.shape_cast %326 : vector<1x32x2xf32> to vector<32x2xf32>
    %328 = vector.shape_cast %325 : vector<32x2xf32> to vector<1x32x2xf32>
    tpu.vector_store %arg4[%c12_150, %c0_151, %c0_152], %328 {strides = array<i32>} : memref<16x32x2xf32, #tpu.memory_space<vmem>>, vector<1x32x2xf32>,
    %329 = vector.broadcast %169 : vector<32x1xf32> to vector<32x2xf32>
    %330 = arith.mulf %42, %329 : vector<32x2xf32>
    %331 = vector.broadcast %172 : vector<32x1xf32> to vector<32x2xf32>
    %332 = arith.addf %330, %331 : vector<32x2xf32>
    %cst_153 = arith.constant 0.000000e+00 : f32
    %333 = vector.broadcast %cst_153 : f32 to vector<32x2xf32>
    %334 = arith.cmpf oge, %332, %333 : vector<32x2xf32>
    %cst_154 = arith.constant 2.000000e-01 : f32
    %335 = vector.broadcast %cst_154 : f32 to vector<32x2xf32>
    %336 = arith.mulf %335, %332 : vector<32x2xf32>
    %337 = arith.select %334, %332, %336 : vector<32x2xi1>, vector<32x2xf32>
    %c13_155 = arith.constant 13 : index
    %c0_156 = arith.constant 0 : index
    %c0_157 = arith.constant 0 : index
    %338 = vector.load %arg4[%c13_155, %c0_156, %c0_157] : memref<16x32x2xf32, #tpu.memory_space<vmem>>, vector<1x32x2xf32>
    %339 = vector.shape_cast %338 : vector<1x32x2xf32> to vector<32x2xf32>
    %340 = vector.shape_cast %337 : vector<32x2xf32> to vector<1x32x2xf32>
    tpu.vector_store %arg4[%c13_155, %c0_156, %c0_157], %340 {strides = array<i32>} : memref<16x32x2xf32, #tpu.memory_space<vmem>>, vector<1x32x2xf32>,
    %341 = vector.broadcast %169 : vector<32x1xf32> to vector<32x2xf32>
    %342 = arith.mulf %45, %341 : vector<32x2xf32>
    %343 = vector.broadcast %172 : vector<32x1xf32> to vector<32x2xf32>
    %344 = arith.addf %342, %343 : vector<32x2xf32>
    %cst_158 = arith.constant 0.000000e+00 : f32
    %345 = vector.broadcast %cst_158 : f32 to vector<32x2xf32>
    %346 = arith.cmpf oge, %344, %345 : vector<32x2xf32>
    %cst_159 = arith.constant 2.000000e-01 : f32
    %347 = vector.broadcast %cst_159 : f32 to vector<32x2xf32>
    %348 = arith.mulf %347, %344 : vector<32x2xf32>
    %349 = arith.select %346, %344, %348 : vector<32x2xi1>, vector<32x2xf32>
    %c14_160 = arith.constant 14 : index
    %c0_161 = arith.constant 0 : index
    %c0_162 = arith.constant 0 : index
    %350 = vector.load %arg4[%c14_160, %c0_161, %c0_162] : memref<16x32x2xf32, #tpu.memory_space<vmem>>, vector<1x32x2xf32>
    %351 = vector.shape_cast %350 : vector<1x32x2xf32> to vector<32x2xf32>
    %352 = vector.shape_cast %349 : vector<32x2xf32> to vector<1x32x2xf32>
    tpu.vector_store %arg4[%c14_160, %c0_161, %c0_162], %352 {strides = array<i32>} : memref<16x32x2xf32, #tpu.memory_space<vmem>>, vector<1x32x2xf32>,
    %353 = vector.broadcast %169 : vector<32x1xf32> to vector<32x2xf32>
    %354 = arith.mulf %48, %353 : vector<32x2xf32>
    %355 = vector.broadcast %172 : vector<32x1xf32> to vector<32x2xf32>
    %356 = arith.addf %354, %355 : vector<32x2xf32>
    %cst_163 = arith.constant 0.000000e+00 : f32
    %357 = vector.broadcast %cst_163 : f32 to vector<32x2xf32>
    %358 = arith.cmpf oge, %356, %357 : vector<32x2xf32>
    %cst_164 = arith.constant 2.000000e-01 : f32
    %359 = vector.broadcast %cst_164 : f32 to vector<32x2xf32>
    %360 = arith.mulf %359, %356 : vector<32x2xf32>
    %361 = arith.select %358, %356, %360 : vector<32x2xi1>, vector<32x2xf32>
    %c15_165 = arith.constant 15 : index
    %c0_166 = arith.constant 0 : index
    %c0_167 = arith.constant 0 : index
    %362 = vector.load %arg4[%c15_165, %c0_166, %c0_167] : memref<16x32x2xf32, #tpu.memory_space<vmem>>, vector<1x32x2xf32>
    %363 = vector.shape_cast %362 : vector<1x32x2xf32> to vector<32x2xf32>
    %364 = vector.shape_cast %361 : vector<32x2xf32> to vector<1x32x2xf32>
    tpu.vector_store %arg4[%c15_165, %c0_166, %c0_167], %364 {strides = array<i32>} : memref<16x32x2xf32, #tpu.memory_space<vmem>>, vector<1x32x2xf32>,
    return
  }
}

module attributes {stable_mosaic.version = 11 : i64} {
  func.func @_phase_mm_bn_lrelu_kernel(%arg0: memref<4x16x288xbf16, #tpu.memory_space<vmem>>, %arg1: memref<288x32xbf16, #tpu.memory_space<vmem>>, %arg2: memref<16x1xf32, #tpu.memory_space<vmem>>, %arg3: memref<16x1xf32, #tpu.memory_space<vmem>>, %arg4: memref<4x16x32xf32, #tpu.memory_space<vmem>>) attributes {dimension_semantics = [], scalar_prefetch = 0 : i64, scratch_operands = 0 : i64, tpu.core_type = #tpu.core_type<tc>} {
    %c0 = arith.constant 0 : index
    %c0_0 = arith.constant 0 : index
    %0 = vector.load %arg1[%c0, %c0_0] : memref<288x32xbf16, #tpu.memory_space<vmem>>, vector<288x32xbf16>
    %c0_1 = arith.constant 0 : index
    %c0_2 = arith.constant 0 : index
    %c0_3 = arith.constant 0 : index
    %1 = vector.load %arg0[%c0_1, %c0_2, %c0_3] : memref<4x16x288xbf16, #tpu.memory_space<vmem>>, vector<1x16x288xbf16>
    %2 = vector.shape_cast %1 : vector<1x16x288xbf16> to vector<16x288xbf16>
    %cst = arith.constant dense<0.000000e+00> : vector<16x32xf32>
    %3 = tpu.matmul %2, %0, %cst {dimension_numbers = #tpu.dot_dimension_numbers<[1], [0], [0], [1], [0, 0, 1, 1], [], []>} : vector<16x288xbf16>, vector<288x32xbf16>, vector<16x32xf32> -> vector<16x32xf32>
    %c1 = arith.constant 1 : index
    %c0_4 = arith.constant 0 : index
    %c0_5 = arith.constant 0 : index
    %4 = vector.load %arg0[%c1, %c0_4, %c0_5] : memref<4x16x288xbf16, #tpu.memory_space<vmem>>, vector<1x16x288xbf16>
    %5 = vector.shape_cast %4 : vector<1x16x288xbf16> to vector<16x288xbf16>
    %cst_6 = arith.constant dense<0.000000e+00> : vector<16x32xf32>
    %6 = tpu.matmul %5, %0, %cst_6 {dimension_numbers = #tpu.dot_dimension_numbers<[1], [0], [0], [1], [0, 0, 1, 1], [], []>} : vector<16x288xbf16>, vector<288x32xbf16>, vector<16x32xf32> -> vector<16x32xf32>
    %c2 = arith.constant 2 : index
    %c0_7 = arith.constant 0 : index
    %c0_8 = arith.constant 0 : index
    %7 = vector.load %arg0[%c2, %c0_7, %c0_8] : memref<4x16x288xbf16, #tpu.memory_space<vmem>>, vector<1x16x288xbf16>
    %8 = vector.shape_cast %7 : vector<1x16x288xbf16> to vector<16x288xbf16>
    %cst_9 = arith.constant dense<0.000000e+00> : vector<16x32xf32>
    %9 = tpu.matmul %8, %0, %cst_9 {dimension_numbers = #tpu.dot_dimension_numbers<[1], [0], [0], [1], [0, 0, 1, 1], [], []>} : vector<16x288xbf16>, vector<288x32xbf16>, vector<16x32xf32> -> vector<16x32xf32>
    %c3 = arith.constant 3 : index
    %c0_10 = arith.constant 0 : index
    %c0_11 = arith.constant 0 : index
    %10 = vector.load %arg0[%c3, %c0_10, %c0_11] : memref<4x16x288xbf16, #tpu.memory_space<vmem>>, vector<1x16x288xbf16>
    %11 = vector.shape_cast %10 : vector<1x16x288xbf16> to vector<16x288xbf16>
    %cst_12 = arith.constant dense<0.000000e+00> : vector<16x32xf32>
    %12 = tpu.matmul %11, %0, %cst_12 {dimension_numbers = #tpu.dot_dimension_numbers<[1], [0], [0], [1], [0, 0, 1, 1], [], []>} : vector<16x288xbf16>, vector<288x32xbf16>, vector<16x32xf32> -> vector<16x32xf32>
    %cst_13 = arith.constant dense<0.000000e+00> : vector<16xf32>
    %13 = vector.multi_reduction <add>, %3, %cst_13 [1] : vector<16x32xf32> to vector<16xf32>
    %14 = vector.shape_cast %13 : vector<16xf32> to vector<16x1xf32>
    %15 = arith.mulf %3, %3 : vector<16x32xf32>
    %cst_14 = arith.constant dense<0.000000e+00> : vector<16xf32>
    %16 = vector.multi_reduction <add>, %15, %cst_14 [1] : vector<16x32xf32> to vector<16xf32>
    %17 = vector.shape_cast %16 : vector<16xf32> to vector<16x1xf32>
    %cst_15 = arith.constant dense<0.000000e+00> : vector<16xf32>
    %18 = vector.multi_reduction <add>, %6, %cst_15 [1] : vector<16x32xf32> to vector<16xf32>
    %19 = vector.shape_cast %18 : vector<16xf32> to vector<16x1xf32>
    %20 = arith.addf %14, %19 : vector<16x1xf32>
    %21 = arith.mulf %6, %6 : vector<16x32xf32>
    %cst_16 = arith.constant dense<0.000000e+00> : vector<16xf32>
    %22 = vector.multi_reduction <add>, %21, %cst_16 [1] : vector<16x32xf32> to vector<16xf32>
    %23 = vector.shape_cast %22 : vector<16xf32> to vector<16x1xf32>
    %24 = arith.addf %17, %23 : vector<16x1xf32>
    %cst_17 = arith.constant dense<0.000000e+00> : vector<16xf32>
    %25 = vector.multi_reduction <add>, %9, %cst_17 [1] : vector<16x32xf32> to vector<16xf32>
    %26 = vector.shape_cast %25 : vector<16xf32> to vector<16x1xf32>
    %27 = arith.addf %20, %26 : vector<16x1xf32>
    %28 = arith.mulf %9, %9 : vector<16x32xf32>
    %cst_18 = arith.constant dense<0.000000e+00> : vector<16xf32>
    %29 = vector.multi_reduction <add>, %28, %cst_18 [1] : vector<16x32xf32> to vector<16xf32>
    %30 = vector.shape_cast %29 : vector<16xf32> to vector<16x1xf32>
    %31 = arith.addf %24, %30 : vector<16x1xf32>
    %cst_19 = arith.constant dense<0.000000e+00> : vector<16xf32>
    %32 = vector.multi_reduction <add>, %12, %cst_19 [1] : vector<16x32xf32> to vector<16xf32>
    %33 = vector.shape_cast %32 : vector<16xf32> to vector<16x1xf32>
    %34 = arith.addf %27, %33 : vector<16x1xf32>
    %35 = arith.mulf %12, %12 : vector<16x32xf32>
    %cst_20 = arith.constant dense<0.000000e+00> : vector<16xf32>
    %36 = vector.multi_reduction <add>, %35, %cst_20 [1] : vector<16x32xf32> to vector<16xf32>
    %37 = vector.shape_cast %36 : vector<16xf32> to vector<16x1xf32>
    %38 = arith.addf %31, %37 : vector<16x1xf32>
    %cst_21 = arith.constant 7.812500e-03 : f32
    %39 = vector.broadcast %cst_21 : f32 to vector<16x1xf32>
    %40 = arith.mulf %34, %39 : vector<16x1xf32>
    %cst_22 = arith.constant 7.812500e-03 : f32
    %41 = vector.broadcast %cst_22 : f32 to vector<16x1xf32>
    %42 = arith.mulf %38, %41 : vector<16x1xf32>
    %43 = arith.mulf %40, %40 : vector<16x1xf32>
    %44 = arith.subf %42, %43 : vector<16x1xf32>
    %c0_23 = arith.constant 0 : index
    %c0_24 = arith.constant 0 : index
    %45 = vector.load %arg2[%c0_23, %c0_24] : memref<16x1xf32, #tpu.memory_space<vmem>>, vector<16x1xf32>
    %cst_25 = arith.constant 9.99999974E-6 : f32
    %46 = vector.broadcast %cst_25 : f32 to vector<16x1xf32>
    %47 = arith.addf %44, %46 : vector<16x1xf32>
    %48 = math.rsqrt %47 : vector<16x1xf32>
    %49 = arith.mulf %45, %48 : vector<16x1xf32>
    %c0_26 = arith.constant 0 : index
    %c0_27 = arith.constant 0 : index
    %50 = vector.load %arg3[%c0_26, %c0_27] : memref<16x1xf32, #tpu.memory_space<vmem>>, vector<16x1xf32>
    %51 = arith.mulf %40, %49 : vector<16x1xf32>
    %52 = arith.subf %50, %51 : vector<16x1xf32>
    %53 = vector.broadcast %49 : vector<16x1xf32> to vector<16x32xf32>
    %54 = arith.mulf %3, %53 : vector<16x32xf32>
    %55 = vector.broadcast %52 : vector<16x1xf32> to vector<16x32xf32>
    %56 = arith.addf %54, %55 : vector<16x32xf32>
    %cst_28 = arith.constant 0.000000e+00 : f32
    %57 = vector.broadcast %cst_28 : f32 to vector<16x32xf32>
    %58 = arith.cmpf oge, %56, %57 : vector<16x32xf32>
    %cst_29 = arith.constant 2.000000e-01 : f32
    %59 = vector.broadcast %cst_29 : f32 to vector<16x32xf32>
    %60 = arith.mulf %59, %56 : vector<16x32xf32>
    %61 = arith.select %58, %56, %60 : vector<16x32xi1>, vector<16x32xf32>
    %c0_30 = arith.constant 0 : index
    %c0_31 = arith.constant 0 : index
    %c0_32 = arith.constant 0 : index
    %62 = vector.load %arg4[%c0_30, %c0_31, %c0_32] : memref<4x16x32xf32, #tpu.memory_space<vmem>>, vector<1x16x32xf32>
    %63 = vector.shape_cast %62 : vector<1x16x32xf32> to vector<16x32xf32>
    %64 = vector.shape_cast %61 : vector<16x32xf32> to vector<1x16x32xf32>
    tpu.vector_store %arg4[%c0_30, %c0_31, %c0_32], %64 {strides = array<i32>} : memref<4x16x32xf32, #tpu.memory_space<vmem>>, vector<1x16x32xf32>,
    %65 = vector.broadcast %49 : vector<16x1xf32> to vector<16x32xf32>
    %66 = arith.mulf %6, %65 : vector<16x32xf32>
    %67 = vector.broadcast %52 : vector<16x1xf32> to vector<16x32xf32>
    %68 = arith.addf %66, %67 : vector<16x32xf32>
    %cst_33 = arith.constant 0.000000e+00 : f32
    %69 = vector.broadcast %cst_33 : f32 to vector<16x32xf32>
    %70 = arith.cmpf oge, %68, %69 : vector<16x32xf32>
    %cst_34 = arith.constant 2.000000e-01 : f32
    %71 = vector.broadcast %cst_34 : f32 to vector<16x32xf32>
    %72 = arith.mulf %71, %68 : vector<16x32xf32>
    %73 = arith.select %70, %68, %72 : vector<16x32xi1>, vector<16x32xf32>
    %c1_35 = arith.constant 1 : index
    %c0_36 = arith.constant 0 : index
    %c0_37 = arith.constant 0 : index
    %74 = vector.load %arg4[%c1_35, %c0_36, %c0_37] : memref<4x16x32xf32, #tpu.memory_space<vmem>>, vector<1x16x32xf32>
    %75 = vector.shape_cast %74 : vector<1x16x32xf32> to vector<16x32xf32>
    %76 = vector.shape_cast %73 : vector<16x32xf32> to vector<1x16x32xf32>
    tpu.vector_store %arg4[%c1_35, %c0_36, %c0_37], %76 {strides = array<i32>} : memref<4x16x32xf32, #tpu.memory_space<vmem>>, vector<1x16x32xf32>,
    %77 = vector.broadcast %49 : vector<16x1xf32> to vector<16x32xf32>
    %78 = arith.mulf %9, %77 : vector<16x32xf32>
    %79 = vector.broadcast %52 : vector<16x1xf32> to vector<16x32xf32>
    %80 = arith.addf %78, %79 : vector<16x32xf32>
    %cst_38 = arith.constant 0.000000e+00 : f32
    %81 = vector.broadcast %cst_38 : f32 to vector<16x32xf32>
    %82 = arith.cmpf oge, %80, %81 : vector<16x32xf32>
    %cst_39 = arith.constant 2.000000e-01 : f32
    %83 = vector.broadcast %cst_39 : f32 to vector<16x32xf32>
    %84 = arith.mulf %83, %80 : vector<16x32xf32>
    %85 = arith.select %82, %80, %84 : vector<16x32xi1>, vector<16x32xf32>
    %c2_40 = arith.constant 2 : index
    %c0_41 = arith.constant 0 : index
    %c0_42 = arith.constant 0 : index
    %86 = vector.load %arg4[%c2_40, %c0_41, %c0_42] : memref<4x16x32xf32, #tpu.memory_space<vmem>>, vector<1x16x32xf32>
    %87 = vector.shape_cast %86 : vector<1x16x32xf32> to vector<16x32xf32>
    %88 = vector.shape_cast %85 : vector<16x32xf32> to vector<1x16x32xf32>
    tpu.vector_store %arg4[%c2_40, %c0_41, %c0_42], %88 {strides = array<i32>} : memref<4x16x32xf32, #tpu.memory_space<vmem>>, vector<1x16x32xf32>,
    %89 = vector.broadcast %49 : vector<16x1xf32> to vector<16x32xf32>
    %90 = arith.mulf %12, %89 : vector<16x32xf32>
    %91 = vector.broadcast %52 : vector<16x1xf32> to vector<16x32xf32>
    %92 = arith.addf %90, %91 : vector<16x32xf32>
    %cst_43 = arith.constant 0.000000e+00 : f32
    %93 = vector.broadcast %cst_43 : f32 to vector<16x32xf32>
    %94 = arith.cmpf oge, %92, %93 : vector<16x32xf32>
    %cst_44 = arith.constant 2.000000e-01 : f32
    %95 = vector.broadcast %cst_44 : f32 to vector<16x32xf32>
    %96 = arith.mulf %95, %92 : vector<16x32xf32>
    %97 = arith.select %94, %92, %96 : vector<16x32xi1>, vector<16x32xf32>
    %c3_45 = arith.constant 3 : index
    %c0_46 = arith.constant 0 : index
    %c0_47 = arith.constant 0 : index
    %98 = vector.load %arg4[%c3_45, %c0_46, %c0_47] : memref<4x16x32xf32, #tpu.memory_space<vmem>>, vector<1x16x32xf32>
    %99 = vector.shape_cast %98 : vector<1x16x32xf32> to vector<16x32xf32>
    %100 = vector.shape_cast %97 : vector<16x32xf32> to vector<1x16x32xf32>
    tpu.vector_store %arg4[%c3_45, %c0_46, %c0_47], %100 {strides = array<i32>} : memref<4x16x32xf32, #tpu.memory_space<vmem>>, vector<1x16x32xf32>,
    return
  }
}

module attributes {stable_mosaic.version = 11 : i64} {
  func.func @_phase_mm_bn_lrelu_kernel(%arg0: memref<4x8x144xbf16, #tpu.memory_space<vmem>>, %arg1: memref<144x128xbf16, #tpu.memory_space<vmem>>, %arg2: memref<8x1xf32, #tpu.memory_space<vmem>>, %arg3: memref<8x1xf32, #tpu.memory_space<vmem>>, %arg4: memref<4x8x128xf32, #tpu.memory_space<vmem>>) attributes {dimension_semantics = [], scalar_prefetch = 0 : i64, scratch_operands = 0 : i64, tpu.core_type = #tpu.core_type<tc>} {
    %c0 = arith.constant 0 : index
    %c0_0 = arith.constant 0 : index
    %0 = vector.load %arg1[%c0, %c0_0] : memref<144x128xbf16, #tpu.memory_space<vmem>>, vector<144x128xbf16>
    %c0_1 = arith.constant 0 : index
    %c0_2 = arith.constant 0 : index
    %c0_3 = arith.constant 0 : index
    %1 = vector.load %arg0[%c0_1, %c0_2, %c0_3] : memref<4x8x144xbf16, #tpu.memory_space<vmem>>, vector<1x8x144xbf16>
    %2 = vector.shape_cast %1 : vector<1x8x144xbf16> to vector<8x144xbf16>
    %cst = arith.constant dense<0.000000e+00> : vector<8x128xf32>
    %3 = tpu.matmul %2, %0, %cst {dimension_numbers = #tpu.dot_dimension_numbers<[1], [0], [0], [1], [0, 0, 1, 1], [], []>} : vector<8x144xbf16>, vector<144x128xbf16>, vector<8x128xf32> -> vector<8x128xf32>
    %c1 = arith.constant 1 : index
    %c0_4 = arith.constant 0 : index
    %c0_5 = arith.constant 0 : index
    %4 = vector.load %arg0[%c1, %c0_4, %c0_5] : memref<4x8x144xbf16, #tpu.memory_space<vmem>>, vector<1x8x144xbf16>
    %5 = vector.shape_cast %4 : vector<1x8x144xbf16> to vector<8x144xbf16>
    %cst_6 = arith.constant dense<0.000000e+00> : vector<8x128xf32>
    %6 = tpu.matmul %5, %0, %cst_6 {dimension_numbers = #tpu.dot_dimension_numbers<[1], [0], [0], [1], [0, 0, 1, 1], [], []>} : vector<8x144xbf16>, vector<144x128xbf16>, vector<8x128xf32> -> vector<8x128xf32>
    %c2 = arith.constant 2 : index
    %c0_7 = arith.constant 0 : index
    %c0_8 = arith.constant 0 : index
    %7 = vector.load %arg0[%c2, %c0_7, %c0_8] : memref<4x8x144xbf16, #tpu.memory_space<vmem>>, vector<1x8x144xbf16>
    %8 = vector.shape_cast %7 : vector<1x8x144xbf16> to vector<8x144xbf16>
    %cst_9 = arith.constant dense<0.000000e+00> : vector<8x128xf32>
    %9 = tpu.matmul %8, %0, %cst_9 {dimension_numbers = #tpu.dot_dimension_numbers<[1], [0], [0], [1], [0, 0, 1, 1], [], []>} : vector<8x144xbf16>, vector<144x128xbf16>, vector<8x128xf32> -> vector<8x128xf32>
    %c3 = arith.constant 3 : index
    %c0_10 = arith.constant 0 : index
    %c0_11 = arith.constant 0 : index
    %10 = vector.load %arg0[%c3, %c0_10, %c0_11] : memref<4x8x144xbf16, #tpu.memory_space<vmem>>, vector<1x8x144xbf16>
    %11 = vector.shape_cast %10 : vector<1x8x144xbf16> to vector<8x144xbf16>
    %cst_12 = arith.constant dense<0.000000e+00> : vector<8x128xf32>
    %12 = tpu.matmul %11, %0, %cst_12 {dimension_numbers = #tpu.dot_dimension_numbers<[1], [0], [0], [1], [0, 0, 1, 1], [], []>} : vector<8x144xbf16>, vector<144x128xbf16>, vector<8x128xf32> -> vector<8x128xf32>
    %cst_13 = arith.constant dense<0.000000e+00> : vector<8xf32>
    %13 = vector.multi_reduction <add>, %3, %cst_13 [1] : vector<8x128xf32> to vector<8xf32>
    %14 = vector.shape_cast %13 : vector<8xf32> to vector<8x1xf32>
    %15 = arith.mulf %3, %3 : vector<8x128xf32>
    %cst_14 = arith.constant dense<0.000000e+00> : vector<8xf32>
    %16 = vector.multi_reduction <add>, %15, %cst_14 [1] : vector<8x128xf32> to vector<8xf32>
    %17 = vector.shape_cast %16 : vector<8xf32> to vector<8x1xf32>
    %cst_15 = arith.constant dense<0.000000e+00> : vector<8xf32>
    %18 = vector.multi_reduction <add>, %6, %cst_15 [1] : vector<8x128xf32> to vector<8xf32>
    %19 = vector.shape_cast %18 : vector<8xf32> to vector<8x1xf32>
    %20 = arith.addf %14, %19 : vector<8x1xf32>
    %21 = arith.mulf %6, %6 : vector<8x128xf32>
    %cst_16 = arith.constant dense<0.000000e+00> : vector<8xf32>
    %22 = vector.multi_reduction <add>, %21, %cst_16 [1] : vector<8x128xf32> to vector<8xf32>
    %23 = vector.shape_cast %22 : vector<8xf32> to vector<8x1xf32>
    %24 = arith.addf %17, %23 : vector<8x1xf32>
    %cst_17 = arith.constant dense<0.000000e+00> : vector<8xf32>
    %25 = vector.multi_reduction <add>, %9, %cst_17 [1] : vector<8x128xf32> to vector<8xf32>
    %26 = vector.shape_cast %25 : vector<8xf32> to vector<8x1xf32>
    %27 = arith.addf %20, %26 : vector<8x1xf32>
    %28 = arith.mulf %9, %9 : vector<8x128xf32>
    %cst_18 = arith.constant dense<0.000000e+00> : vector<8xf32>
    %29 = vector.multi_reduction <add>, %28, %cst_18 [1] : vector<8x128xf32> to vector<8xf32>
    %30 = vector.shape_cast %29 : vector<8xf32> to vector<8x1xf32>
    %31 = arith.addf %24, %30 : vector<8x1xf32>
    %cst_19 = arith.constant dense<0.000000e+00> : vector<8xf32>
    %32 = vector.multi_reduction <add>, %12, %cst_19 [1] : vector<8x128xf32> to vector<8xf32>
    %33 = vector.shape_cast %32 : vector<8xf32> to vector<8x1xf32>
    %34 = arith.addf %27, %33 : vector<8x1xf32>
    %35 = arith.mulf %12, %12 : vector<8x128xf32>
    %cst_20 = arith.constant dense<0.000000e+00> : vector<8xf32>
    %36 = vector.multi_reduction <add>, %35, %cst_20 [1] : vector<8x128xf32> to vector<8xf32>
    %37 = vector.shape_cast %36 : vector<8xf32> to vector<8x1xf32>
    %38 = arith.addf %31, %37 : vector<8x1xf32>
    %cst_21 = arith.constant 0.001953125 : f32
    %39 = vector.broadcast %cst_21 : f32 to vector<8x1xf32>
    %40 = arith.mulf %34, %39 : vector<8x1xf32>
    %cst_22 = arith.constant 0.001953125 : f32
    %41 = vector.broadcast %cst_22 : f32 to vector<8x1xf32>
    %42 = arith.mulf %38, %41 : vector<8x1xf32>
    %43 = arith.mulf %40, %40 : vector<8x1xf32>
    %44 = arith.subf %42, %43 : vector<8x1xf32>
    %c0_23 = arith.constant 0 : index
    %c0_24 = arith.constant 0 : index
    %45 = vector.load %arg2[%c0_23, %c0_24] : memref<8x1xf32, #tpu.memory_space<vmem>>, vector<8x1xf32>
    %cst_25 = arith.constant 9.99999974E-6 : f32
    %46 = vector.broadcast %cst_25 : f32 to vector<8x1xf32>
    %47 = arith.addf %44, %46 : vector<8x1xf32>
    %48 = math.rsqrt %47 : vector<8x1xf32>
    %49 = arith.mulf %45, %48 : vector<8x1xf32>
    %c0_26 = arith.constant 0 : index
    %c0_27 = arith.constant 0 : index
    %50 = vector.load %arg3[%c0_26, %c0_27] : memref<8x1xf32, #tpu.memory_space<vmem>>, vector<8x1xf32>
    %51 = arith.mulf %40, %49 : vector<8x1xf32>
    %52 = arith.subf %50, %51 : vector<8x1xf32>
    %53 = vector.broadcast %49 : vector<8x1xf32> to vector<8x128xf32>
    %54 = arith.mulf %3, %53 : vector<8x128xf32>
    %55 = vector.broadcast %52 : vector<8x1xf32> to vector<8x128xf32>
    %56 = arith.addf %54, %55 : vector<8x128xf32>
    %cst_28 = arith.constant 0.000000e+00 : f32
    %57 = vector.broadcast %cst_28 : f32 to vector<8x128xf32>
    %58 = arith.cmpf oge, %56, %57 : vector<8x128xf32>
    %cst_29 = arith.constant 2.000000e-01 : f32
    %59 = vector.broadcast %cst_29 : f32 to vector<8x128xf32>
    %60 = arith.mulf %59, %56 : vector<8x128xf32>
    %61 = arith.select %58, %56, %60 : vector<8x128xi1>, vector<8x128xf32>
    %c0_30 = arith.constant 0 : index
    %c0_31 = arith.constant 0 : index
    %c0_32 = arith.constant 0 : index
    %62 = vector.load %arg4[%c0_30, %c0_31, %c0_32] : memref<4x8x128xf32, #tpu.memory_space<vmem>>, vector<1x8x128xf32>
    %63 = vector.shape_cast %62 : vector<1x8x128xf32> to vector<8x128xf32>
    %64 = vector.shape_cast %61 : vector<8x128xf32> to vector<1x8x128xf32>
    tpu.vector_store %arg4[%c0_30, %c0_31, %c0_32], %64 {strides = array<i32>} : memref<4x8x128xf32, #tpu.memory_space<vmem>>, vector<1x8x128xf32>,
    %65 = vector.broadcast %49 : vector<8x1xf32> to vector<8x128xf32>
    %66 = arith.mulf %6, %65 : vector<8x128xf32>
    %67 = vector.broadcast %52 : vector<8x1xf32> to vector<8x128xf32>
    %68 = arith.addf %66, %67 : vector<8x128xf32>
    %cst_33 = arith.constant 0.000000e+00 : f32
    %69 = vector.broadcast %cst_33 : f32 to vector<8x128xf32>
    %70 = arith.cmpf oge, %68, %69 : vector<8x128xf32>
    %cst_34 = arith.constant 2.000000e-01 : f32
    %71 = vector.broadcast %cst_34 : f32 to vector<8x128xf32>
    %72 = arith.mulf %71, %68 : vector<8x128xf32>
    %73 = arith.select %70, %68, %72 : vector<8x128xi1>, vector<8x128xf32>
    %c1_35 = arith.constant 1 : index
    %c0_36 = arith.constant 0 : index
    %c0_37 = arith.constant 0 : index
    %74 = vector.load %arg4[%c1_35, %c0_36, %c0_37] : memref<4x8x128xf32, #tpu.memory_space<vmem>>, vector<1x8x128xf32>
    %75 = vector.shape_cast %74 : vector<1x8x128xf32> to vector<8x128xf32>
    %76 = vector.shape_cast %73 : vector<8x128xf32> to vector<1x8x128xf32>
    tpu.vector_store %arg4[%c1_35, %c0_36, %c0_37], %76 {strides = array<i32>} : memref<4x8x128xf32, #tpu.memory_space<vmem>>, vector<1x8x128xf32>,
    %77 = vector.broadcast %49 : vector<8x1xf32> to vector<8x128xf32>
    %78 = arith.mulf %9, %77 : vector<8x128xf32>
    %79 = vector.broadcast %52 : vector<8x1xf32> to vector<8x128xf32>
    %80 = arith.addf %78, %79 : vector<8x128xf32>
    %cst_38 = arith.constant 0.000000e+00 : f32
    %81 = vector.broadcast %cst_38 : f32 to vector<8x128xf32>
    %82 = arith.cmpf oge, %80, %81 : vector<8x128xf32>
    %cst_39 = arith.constant 2.000000e-01 : f32
    %83 = vector.broadcast %cst_39 : f32 to vector<8x128xf32>
    %84 = arith.mulf %83, %80 : vector<8x128xf32>
    %85 = arith.select %82, %80, %84 : vector<8x128xi1>, vector<8x128xf32>
    %c2_40 = arith.constant 2 : index
    %c0_41 = arith.constant 0 : index
    %c0_42 = arith.constant 0 : index
    %86 = vector.load %arg4[%c2_40, %c0_41, %c0_42] : memref<4x8x128xf32, #tpu.memory_space<vmem>>, vector<1x8x128xf32>
    %87 = vector.shape_cast %86 : vector<1x8x128xf32> to vector<8x128xf32>
    %88 = vector.shape_cast %85 : vector<8x128xf32> to vector<1x8x128xf32>
    tpu.vector_store %arg4[%c2_40, %c0_41, %c0_42], %88 {strides = array<i32>} : memref<4x8x128xf32, #tpu.memory_space<vmem>>, vector<1x8x128xf32>,
    %89 = vector.broadcast %49 : vector<8x1xf32> to vector<8x128xf32>
    %90 = arith.mulf %12, %89 : vector<8x128xf32>
    %91 = vector.broadcast %52 : vector<8x1xf32> to vector<8x128xf32>
    %92 = arith.addf %90, %91 : vector<8x128xf32>
    %cst_43 = arith.constant 0.000000e+00 : f32
    %93 = vector.broadcast %cst_43 : f32 to vector<8x128xf32>
    %94 = arith.cmpf oge, %92, %93 : vector<8x128xf32>
    %cst_44 = arith.constant 2.000000e-01 : f32
    %95 = vector.broadcast %cst_44 : f32 to vector<8x128xf32>
    %96 = arith.mulf %95, %92 : vector<8x128xf32>
    %97 = arith.select %94, %92, %96 : vector<8x128xi1>, vector<8x128xf32>
    %c3_45 = arith.constant 3 : index
    %c0_46 = arith.constant 0 : index
    %c0_47 = arith.constant 0 : index
    %98 = vector.load %arg4[%c3_45, %c0_46, %c0_47] : memref<4x8x128xf32, #tpu.memory_space<vmem>>, vector<1x8x128xf32>
    %99 = vector.shape_cast %98 : vector<1x8x128xf32> to vector<8x128xf32>
    %100 = vector.shape_cast %97 : vector<8x128xf32> to vector<1x8x128xf32>
    tpu.vector_store %arg4[%c3_45, %c0_46, %c0_47], %100 {strides = array<i32>} : memref<4x8x128xf32, #tpu.memory_space<vmem>>, vector<1x8x128xf32>,
    return
  }
}

module attributes {stable_mosaic.version = 11 : i64} {
  func.func @_phase_mm_bn_lrelu_kernel(%arg0: memref<4x4x72xbf16, #tpu.memory_space<vmem>>, %arg1: memref<72x512xbf16, #tpu.memory_space<vmem>>, %arg2: memref<4x1xf32, #tpu.memory_space<vmem>>, %arg3: memref<4x1xf32, #tpu.memory_space<vmem>>, %arg4: memref<4x4x512xf32, #tpu.memory_space<vmem>>) attributes {dimension_semantics = [], scalar_prefetch = 0 : i64, scratch_operands = 0 : i64, tpu.core_type = #tpu.core_type<tc>} {
    %c0 = arith.constant 0 : index
    %c0_0 = arith.constant 0 : index
    %0 = vector.load %arg1[%c0, %c0_0] : memref<72x512xbf16, #tpu.memory_space<vmem>>, vector<72x512xbf16>
    %c0_1 = arith.constant 0 : index
    %c0_2 = arith.constant 0 : index
    %c0_3 = arith.constant 0 : index
    %1 = vector.load %arg0[%c0_1, %c0_2, %c0_3] : memref<4x4x72xbf16, #tpu.memory_space<vmem>>, vector<1x4x72xbf16>
    %2 = vector.shape_cast %1 : vector<1x4x72xbf16> to vector<4x72xbf16>
    %cst = arith.constant dense<0.000000e+00> : vector<4x512xf32>
    %3 = tpu.matmul %2, %0, %cst {dimension_numbers = #tpu.dot_dimension_numbers<[1], [0], [0], [1], [0, 0, 1, 1], [], []>} : vector<4x72xbf16>, vector<72x512xbf16>, vector<4x512xf32> -> vector<4x512xf32>
    %c1 = arith.constant 1 : index
    %c0_4 = arith.constant 0 : index
    %c0_5 = arith.constant 0 : index
    %4 = vector.load %arg0[%c1, %c0_4, %c0_5] : memref<4x4x72xbf16, #tpu.memory_space<vmem>>, vector<1x4x72xbf16>
    %5 = vector.shape_cast %4 : vector<1x4x72xbf16> to vector<4x72xbf16>
    %cst_6 = arith.constant dense<0.000000e+00> : vector<4x512xf32>
    %6 = tpu.matmul %5, %0, %cst_6 {dimension_numbers = #tpu.dot_dimension_numbers<[1], [0], [0], [1], [0, 0, 1, 1], [], []>} : vector<4x72xbf16>, vector<72x512xbf16>, vector<4x512xf32> -> vector<4x512xf32>
    %c2 = arith.constant 2 : index
    %c0_7 = arith.constant 0 : index
    %c0_8 = arith.constant 0 : index
    %7 = vector.load %arg0[%c2, %c0_7, %c0_8] : memref<4x4x72xbf16, #tpu.memory_space<vmem>>, vector<1x4x72xbf16>
    %8 = vector.shape_cast %7 : vector<1x4x72xbf16> to vector<4x72xbf16>
    %cst_9 = arith.constant dense<0.000000e+00> : vector<4x512xf32>
    %9 = tpu.matmul %8, %0, %cst_9 {dimension_numbers = #tpu.dot_dimension_numbers<[1], [0], [0], [1], [0, 0, 1, 1], [], []>} : vector<4x72xbf16>, vector<72x512xbf16>, vector<4x512xf32> -> vector<4x512xf32>
    %c3 = arith.constant 3 : index
    %c0_10 = arith.constant 0 : index
    %c0_11 = arith.constant 0 : index
    %10 = vector.load %arg0[%c3, %c0_10, %c0_11] : memref<4x4x72xbf16, #tpu.memory_space<vmem>>, vector<1x4x72xbf16>
    %11 = vector.shape_cast %10 : vector<1x4x72xbf16> to vector<4x72xbf16>
    %cst_12 = arith.constant dense<0.000000e+00> : vector<4x512xf32>
    %12 = tpu.matmul %11, %0, %cst_12 {dimension_numbers = #tpu.dot_dimension_numbers<[1], [0], [0], [1], [0, 0, 1, 1], [], []>} : vector<4x72xbf16>, vector<72x512xbf16>, vector<4x512xf32> -> vector<4x512xf32>
    %cst_13 = arith.constant dense<0.000000e+00> : vector<4xf32>
    %13 = vector.multi_reduction <add>, %3, %cst_13 [1] : vector<4x512xf32> to vector<4xf32>
    %14 = vector.shape_cast %13 : vector<4xf32> to vector<4x1xf32>
    %15 = arith.mulf %3, %3 : vector<4x512xf32>
    %cst_14 = arith.constant dense<0.000000e+00> : vector<4xf32>
    %16 = vector.multi_reduction <add>, %15, %cst_14 [1] : vector<4x512xf32> to vector<4xf32>
    %17 = vector.shape_cast %16 : vector<4xf32> to vector<4x1xf32>
    %cst_15 = arith.constant dense<0.000000e+00> : vector<4xf32>
    %18 = vector.multi_reduction <add>, %6, %cst_15 [1] : vector<4x512xf32> to vector<4xf32>
    %19 = vector.shape_cast %18 : vector<4xf32> to vector<4x1xf32>
    %20 = arith.addf %14, %19 : vector<4x1xf32>
    %21 = arith.mulf %6, %6 : vector<4x512xf32>
    %cst_16 = arith.constant dense<0.000000e+00> : vector<4xf32>
    %22 = vector.multi_reduction <add>, %21, %cst_16 [1] : vector<4x512xf32> to vector<4xf32>
    %23 = vector.shape_cast %22 : vector<4xf32> to vector<4x1xf32>
    %24 = arith.addf %17, %23 : vector<4x1xf32>
    %cst_17 = arith.constant dense<0.000000e+00> : vector<4xf32>
    %25 = vector.multi_reduction <add>, %9, %cst_17 [1] : vector<4x512xf32> to vector<4xf32>
    %26 = vector.shape_cast %25 : vector<4xf32> to vector<4x1xf32>
    %27 = arith.addf %20, %26 : vector<4x1xf32>
    %28 = arith.mulf %9, %9 : vector<4x512xf32>
    %cst_18 = arith.constant dense<0.000000e+00> : vector<4xf32>
    %29 = vector.multi_reduction <add>, %28, %cst_18 [1] : vector<4x512xf32> to vector<4xf32>
    %30 = vector.shape_cast %29 : vector<4xf32> to vector<4x1xf32>
    %31 = arith.addf %24, %30 : vector<4x1xf32>
    %cst_19 = arith.constant dense<0.000000e+00> : vector<4xf32>
    %32 = vector.multi_reduction <add>, %12, %cst_19 [1] : vector<4x512xf32> to vector<4xf32>
    %33 = vector.shape_cast %32 : vector<4xf32> to vector<4x1xf32>
    %34 = arith.addf %27, %33 : vector<4x1xf32>
    %35 = arith.mulf %12, %12 : vector<4x512xf32>
    %cst_20 = arith.constant dense<0.000000e+00> : vector<4xf32>
    %36 = vector.multi_reduction <add>, %35, %cst_20 [1] : vector<4x512xf32> to vector<4xf32>
    %37 = vector.shape_cast %36 : vector<4xf32> to vector<4x1xf32>
    %38 = arith.addf %31, %37 : vector<4x1xf32>
    %cst_21 = arith.constant 4.8828125E-4 : f32
    %39 = vector.broadcast %cst_21 : f32 to vector<4x1xf32>
    %40 = arith.mulf %34, %39 : vector<4x1xf32>
    %cst_22 = arith.constant 4.8828125E-4 : f32
    %41 = vector.broadcast %cst_22 : f32 to vector<4x1xf32>
    %42 = arith.mulf %38, %41 : vector<4x1xf32>
    %43 = arith.mulf %40, %40 : vector<4x1xf32>
    %44 = arith.subf %42, %43 : vector<4x1xf32>
    %c0_23 = arith.constant 0 : index
    %c0_24 = arith.constant 0 : index
    %45 = vector.load %arg2[%c0_23, %c0_24] : memref<4x1xf32, #tpu.memory_space<vmem>>, vector<4x1xf32>
    %cst_25 = arith.constant 9.99999974E-6 : f32
    %46 = vector.broadcast %cst_25 : f32 to vector<4x1xf32>
    %47 = arith.addf %44, %46 : vector<4x1xf32>
    %48 = math.rsqrt %47 : vector<4x1xf32>
    %49 = arith.mulf %45, %48 : vector<4x1xf32>
    %c0_26 = arith.constant 0 : index
    %c0_27 = arith.constant 0 : index
    %50 = vector.load %arg3[%c0_26, %c0_27] : memref<4x1xf32, #tpu.memory_space<vmem>>, vector<4x1xf32>
    %51 = arith.mulf %40, %49 : vector<4x1xf32>
    %52 = arith.subf %50, %51 : vector<4x1xf32>
    %53 = vector.broadcast %49 : vector<4x1xf32> to vector<4x512xf32>
    %54 = arith.mulf %3, %53 : vector<4x512xf32>
    %55 = vector.broadcast %52 : vector<4x1xf32> to vector<4x512xf32>
    %56 = arith.addf %54, %55 : vector<4x512xf32>
    %cst_28 = arith.constant 0.000000e+00 : f32
    %57 = vector.broadcast %cst_28 : f32 to vector<4x512xf32>
    %58 = arith.cmpf oge, %56, %57 : vector<4x512xf32>
    %cst_29 = arith.constant 2.000000e-01 : f32
    %59 = vector.broadcast %cst_29 : f32 to vector<4x512xf32>
    %60 = arith.mulf %59, %56 : vector<4x512xf32>
    %61 = arith.select %58, %56, %60 : vector<4x512xi1>, vector<4x512xf32>
    %c0_30 = arith.constant 0 : index
    %c0_31 = arith.constant 0 : index
    %c0_32 = arith.constant 0 : index
    %62 = vector.load %arg4[%c0_30, %c0_31, %c0_32] : memref<4x4x512xf32, #tpu.memory_space<vmem>>, vector<1x4x512xf32>
    %63 = vector.shape_cast %62 : vector<1x4x512xf32> to vector<4x512xf32>
    %64 = vector.shape_cast %61 : vector<4x512xf32> to vector<1x4x512xf32>
    tpu.vector_store %arg4[%c0_30, %c0_31, %c0_32], %64 {strides = array<i32>} : memref<4x4x512xf32, #tpu.memory_space<vmem>>, vector<1x4x512xf32>,
    %65 = vector.broadcast %49 : vector<4x1xf32> to vector<4x512xf32>
    %66 = arith.mulf %6, %65 : vector<4x512xf32>
    %67 = vector.broadcast %52 : vector<4x1xf32> to vector<4x512xf32>
    %68 = arith.addf %66, %67 : vector<4x512xf32>
    %cst_33 = arith.constant 0.000000e+00 : f32
    %69 = vector.broadcast %cst_33 : f32 to vector<4x512xf32>
    %70 = arith.cmpf oge, %68, %69 : vector<4x512xf32>
    %cst_34 = arith.constant 2.000000e-01 : f32
    %71 = vector.broadcast %cst_34 : f32 to vector<4x512xf32>
    %72 = arith.mulf %71, %68 : vector<4x512xf32>
    %73 = arith.select %70, %68, %72 : vector<4x512xi1>, vector<4x512xf32>
    %c1_35 = arith.constant 1 : index
    %c0_36 = arith.constant 0 : index
    %c0_37 = arith.constant 0 : index
    %74 = vector.load %arg4[%c1_35, %c0_36, %c0_37] : memref<4x4x512xf32, #tpu.memory_space<vmem>>, vector<1x4x512xf32>
    %75 = vector.shape_cast %74 : vector<1x4x512xf32> to vector<4x512xf32>
    %76 = vector.shape_cast %73 : vector<4x512xf32> to vector<1x4x512xf32>
    tpu.vector_store %arg4[%c1_35, %c0_36, %c0_37], %76 {strides = array<i32>} : memref<4x4x512xf32, #tpu.memory_space<vmem>>, vector<1x4x512xf32>,
    %77 = vector.broadcast %49 : vector<4x1xf32> to vector<4x512xf32>
    %78 = arith.mulf %9, %77 : vector<4x512xf32>
    %79 = vector.broadcast %52 : vector<4x1xf32> to vector<4x512xf32>
    %80 = arith.addf %78, %79 : vector<4x512xf32>
    %cst_38 = arith.constant 0.000000e+00 : f32
    %81 = vector.broadcast %cst_38 : f32 to vector<4x512xf32>
    %82 = arith.cmpf oge, %80, %81 : vector<4x512xf32>
    %cst_39 = arith.constant 2.000000e-01 : f32
    %83 = vector.broadcast %cst_39 : f32 to vector<4x512xf32>
    %84 = arith.mulf %83, %80 : vector<4x512xf32>
    %85 = arith.select %82, %80, %84 : vector<4x512xi1>, vector<4x512xf32>
    %c2_40 = arith.constant 2 : index
    %c0_41 = arith.constant 0 : index
    %c0_42 = arith.constant 0 : index
    %86 = vector.load %arg4[%c2_40, %c0_41, %c0_42] : memref<4x4x512xf32, #tpu.memory_space<vmem>>, vector<1x4x512xf32>
    %87 = vector.shape_cast %86 : vector<1x4x512xf32> to vector<4x512xf32>
    %88 = vector.shape_cast %85 : vector<4x512xf32> to vector<1x4x512xf32>
    tpu.vector_store %arg4[%c2_40, %c0_41, %c0_42], %88 {strides = array<i32>} : memref<4x4x512xf32, #tpu.memory_space<vmem>>, vector<1x4x512xf32>,
    %89 = vector.broadcast %49 : vector<4x1xf32> to vector<4x512xf32>
    %90 = arith.mulf %12, %89 : vector<4x512xf32>
    %91 = vector.broadcast %52 : vector<4x1xf32> to vector<4x512xf32>
    %92 = arith.addf %90, %91 : vector<4x512xf32>
    %cst_43 = arith.constant 0.000000e+00 : f32
    %93 = vector.broadcast %cst_43 : f32 to vector<4x512xf32>
    %94 = arith.cmpf oge, %92, %93 : vector<4x512xf32>
    %cst_44 = arith.constant 2.000000e-01 : f32
    %95 = vector.broadcast %cst_44 : f32 to vector<4x512xf32>
    %96 = arith.mulf %95, %92 : vector<4x512xf32>
    %97 = arith.select %94, %92, %96 : vector<4x512xi1>, vector<4x512xf32>
    %c3_45 = arith.constant 3 : index
    %c0_46 = arith.constant 0 : index
    %c0_47 = arith.constant 0 : index
    %98 = vector.load %arg4[%c3_45, %c0_46, %c0_47] : memref<4x4x512xf32, #tpu.memory_space<vmem>>, vector<1x4x512xf32>
    %99 = vector.shape_cast %98 : vector<1x4x512xf32> to vector<4x512xf32>
    %100 = vector.shape_cast %97 : vector<4x512xf32> to vector<1x4x512xf32>
    tpu.vector_store %arg4[%c3_45, %c0_46, %c0_47], %100 {strides = array<i32>} : memref<4x4x512xf32, #tpu.memory_space<vmem>>, vector<1x4x512xf32>,
    return
  }
}

module attributes {stable_mosaic.version = 11 : i64} {
  func.func @_phase_mm_bn_lrelu_kernel(%arg0: memref<4x4x36xbf16, #tpu.memory_space<vmem>>, %arg1: memref<36x2048xbf16, #tpu.memory_space<vmem>>, %arg2: memref<4x1xf32, #tpu.memory_space<vmem>>, %arg3: memref<4x1xf32, #tpu.memory_space<vmem>>, %arg4: memref<4x4x2048xf32, #tpu.memory_space<vmem>>) attributes {dimension_semantics = [], scalar_prefetch = 0 : i64, scratch_operands = 0 : i64, tpu.core_type = #tpu.core_type<tc>} {
    %c0 = arith.constant 0 : index
    %c0_0 = arith.constant 0 : index
    %0 = vector.load %arg1[%c0, %c0_0] : memref<36x2048xbf16, #tpu.memory_space<vmem>>, vector<36x2048xbf16>
    %c0_1 = arith.constant 0 : index
    %c0_2 = arith.constant 0 : index
    %c0_3 = arith.constant 0 : index
    %1 = vector.load %arg0[%c0_1, %c0_2, %c0_3] : memref<4x4x36xbf16, #tpu.memory_space<vmem>>, vector<1x4x36xbf16>
    %2 = vector.shape_cast %1 : vector<1x4x36xbf16> to vector<4x36xbf16>
    %cst = arith.constant dense<0.000000e+00> : vector<4x2048xf32>
    %3 = tpu.matmul %2, %0, %cst {dimension_numbers = #tpu.dot_dimension_numbers<[1], [0], [0], [1], [0, 0, 1, 1], [], []>} : vector<4x36xbf16>, vector<36x2048xbf16>, vector<4x2048xf32> -> vector<4x2048xf32>
    %c1 = arith.constant 1 : index
    %c0_4 = arith.constant 0 : index
    %c0_5 = arith.constant 0 : index
    %4 = vector.load %arg0[%c1, %c0_4, %c0_5] : memref<4x4x36xbf16, #tpu.memory_space<vmem>>, vector<1x4x36xbf16>
    %5 = vector.shape_cast %4 : vector<1x4x36xbf16> to vector<4x36xbf16>
    %cst_6 = arith.constant dense<0.000000e+00> : vector<4x2048xf32>
    %6 = tpu.matmul %5, %0, %cst_6 {dimension_numbers = #tpu.dot_dimension_numbers<[1], [0], [0], [1], [0, 0, 1, 1], [], []>} : vector<4x36xbf16>, vector<36x2048xbf16>, vector<4x2048xf32> -> vector<4x2048xf32>
    %c2 = arith.constant 2 : index
    %c0_7 = arith.constant 0 : index
    %c0_8 = arith.constant 0 : index
    %7 = vector.load %arg0[%c2, %c0_7, %c0_8] : memref<4x4x36xbf16, #tpu.memory_space<vmem>>, vector<1x4x36xbf16>
    %8 = vector.shape_cast %7 : vector<1x4x36xbf16> to vector<4x36xbf16>
    %cst_9 = arith.constant dense<0.000000e+00> : vector<4x2048xf32>
    %9 = tpu.matmul %8, %0, %cst_9 {dimension_numbers = #tpu.dot_dimension_numbers<[1], [0], [0], [1], [0, 0, 1, 1], [], []>} : vector<4x36xbf16>, vector<36x2048xbf16>, vector<4x2048xf32> -> vector<4x2048xf32>
    %c3 = arith.constant 3 : index
    %c0_10 = arith.constant 0 : index
    %c0_11 = arith.constant 0 : index
    %10 = vector.load %arg0[%c3, %c0_10, %c0_11] : memref<4x4x36xbf16, #tpu.memory_space<vmem>>, vector<1x4x36xbf16>
    %11 = vector.shape_cast %10 : vector<1x4x36xbf16> to vector<4x36xbf16>
    %cst_12 = arith.constant dense<0.000000e+00> : vector<4x2048xf32>
    %12 = tpu.matmul %11, %0, %cst_12 {dimension_numbers = #tpu.dot_dimension_numbers<[1], [0], [0], [1], [0, 0, 1, 1], [], []>} : vector<4x36xbf16>, vector<36x2048xbf16>, vector<4x2048xf32> -> vector<4x2048xf32>
    %cst_13 = arith.constant dense<0.000000e+00> : vector<4xf32>
    %13 = vector.multi_reduction <add>, %3, %cst_13 [1] : vector<4x2048xf32> to vector<4xf32>
    %14 = vector.shape_cast %13 : vector<4xf32> to vector<4x1xf32>
    %15 = arith.mulf %3, %3 : vector<4x2048xf32>
    %cst_14 = arith.constant dense<0.000000e+00> : vector<4xf32>
    %16 = vector.multi_reduction <add>, %15, %cst_14 [1] : vector<4x2048xf32> to vector<4xf32>
    %17 = vector.shape_cast %16 : vector<4xf32> to vector<4x1xf32>
    %cst_15 = arith.constant dense<0.000000e+00> : vector<4xf32>
    %18 = vector.multi_reduction <add>, %6, %cst_15 [1] : vector<4x2048xf32> to vector<4xf32>
    %19 = vector.shape_cast %18 : vector<4xf32> to vector<4x1xf32>
    %20 = arith.addf %14, %19 : vector<4x1xf32>
    %21 = arith.mulf %6, %6 : vector<4x2048xf32>
    %cst_16 = arith.constant dense<0.000000e+00> : vector<4xf32>
    %22 = vector.multi_reduction <add>, %21, %cst_16 [1] : vector<4x2048xf32> to vector<4xf32>
    %23 = vector.shape_cast %22 : vector<4xf32> to vector<4x1xf32>
    %24 = arith.addf %17, %23 : vector<4x1xf32>
    %cst_17 = arith.constant dense<0.000000e+00> : vector<4xf32>
    %25 = vector.multi_reduction <add>, %9, %cst_17 [1] : vector<4x2048xf32> to vector<4xf32>
    %26 = vector.shape_cast %25 : vector<4xf32> to vector<4x1xf32>
    %27 = arith.addf %20, %26 : vector<4x1xf32>
    %28 = arith.mulf %9, %9 : vector<4x2048xf32>
    %cst_18 = arith.constant dense<0.000000e+00> : vector<4xf32>
    %29 = vector.multi_reduction <add>, %28, %cst_18 [1] : vector<4x2048xf32> to vector<4xf32>
    %30 = vector.shape_cast %29 : vector<4xf32> to vector<4x1xf32>
    %31 = arith.addf %24, %30 : vector<4x1xf32>
    %cst_19 = arith.constant dense<0.000000e+00> : vector<4xf32>
    %32 = vector.multi_reduction <add>, %12, %cst_19 [1] : vector<4x2048xf32> to vector<4xf32>
    %33 = vector.shape_cast %32 : vector<4xf32> to vector<4x1xf32>
    %34 = arith.addf %27, %33 : vector<4x1xf32>
    %35 = arith.mulf %12, %12 : vector<4x2048xf32>
    %cst_20 = arith.constant dense<0.000000e+00> : vector<4xf32>
    %36 = vector.multi_reduction <add>, %35, %cst_20 [1] : vector<4x2048xf32> to vector<4xf32>
    %37 = vector.shape_cast %36 : vector<4xf32> to vector<4x1xf32>
    %38 = arith.addf %31, %37 : vector<4x1xf32>
    %cst_21 = arith.constant 1.22070313E-4 : f32
    %39 = vector.broadcast %cst_21 : f32 to vector<4x1xf32>
    %40 = arith.mulf %34, %39 : vector<4x1xf32>
    %cst_22 = arith.constant 1.22070313E-4 : f32
    %41 = vector.broadcast %cst_22 : f32 to vector<4x1xf32>
    %42 = arith.mulf %38, %41 : vector<4x1xf32>
    %43 = arith.mulf %40, %40 : vector<4x1xf32>
    %44 = arith.subf %42, %43 : vector<4x1xf32>
    %c0_23 = arith.constant 0 : index
    %c0_24 = arith.constant 0 : index
    %45 = vector.load %arg2[%c0_23, %c0_24] : memref<4x1xf32, #tpu.memory_space<vmem>>, vector<4x1xf32>
    %cst_25 = arith.constant 9.99999974E-6 : f32
    %46 = vector.broadcast %cst_25 : f32 to vector<4x1xf32>
    %47 = arith.addf %44, %46 : vector<4x1xf32>
    %48 = math.rsqrt %47 : vector<4x1xf32>
    %49 = arith.mulf %45, %48 : vector<4x1xf32>
    %c0_26 = arith.constant 0 : index
    %c0_27 = arith.constant 0 : index
    %50 = vector.load %arg3[%c0_26, %c0_27] : memref<4x1xf32, #tpu.memory_space<vmem>>, vector<4x1xf32>
    %51 = arith.mulf %40, %49 : vector<4x1xf32>
    %52 = arith.subf %50, %51 : vector<4x1xf32>
    %53 = vector.broadcast %49 : vector<4x1xf32> to vector<4x2048xf32>
    %54 = arith.mulf %3, %53 : vector<4x2048xf32>
    %55 = vector.broadcast %52 : vector<4x1xf32> to vector<4x2048xf32>
    %56 = arith.addf %54, %55 : vector<4x2048xf32>
    %cst_28 = arith.constant 0.000000e+00 : f32
    %57 = vector.broadcast %cst_28 : f32 to vector<4x2048xf32>
    %58 = arith.cmpf oge, %56, %57 : vector<4x2048xf32>
    %cst_29 = arith.constant 2.000000e-01 : f32
    %59 = vector.broadcast %cst_29 : f32 to vector<4x2048xf32>
    %60 = arith.mulf %59, %56 : vector<4x2048xf32>
    %61 = arith.select %58, %56, %60 : vector<4x2048xi1>, vector<4x2048xf32>
    %c0_30 = arith.constant 0 : index
    %c0_31 = arith.constant 0 : index
    %c0_32 = arith.constant 0 : index
    %62 = vector.load %arg4[%c0_30, %c0_31, %c0_32] : memref<4x4x2048xf32, #tpu.memory_space<vmem>>, vector<1x4x2048xf32>
    %63 = vector.shape_cast %62 : vector<1x4x2048xf32> to vector<4x2048xf32>
    %64 = vector.shape_cast %61 : vector<4x2048xf32> to vector<1x4x2048xf32>
    tpu.vector_store %arg4[%c0_30, %c0_31, %c0_32], %64 {strides = array<i32>} : memref<4x4x2048xf32, #tpu.memory_space<vmem>>, vector<1x4x2048xf32>,
    %65 = vector.broadcast %49 : vector<4x1xf32> to vector<4x2048xf32>
    %66 = arith.mulf %6, %65 : vector<4x2048xf32>
    %67 = vector.broadcast %52 : vector<4x1xf32> to vector<4x2048xf32>
    %68 = arith.addf %66, %67 : vector<4x2048xf32>
    %cst_33 = arith.constant 0.000000e+00 : f32
    %69 = vector.broadcast %cst_33 : f32 to vector<4x2048xf32>
    %70 = arith.cmpf oge, %68, %69 : vector<4x2048xf32>
    %cst_34 = arith.constant 2.000000e-01 : f32
    %71 = vector.broadcast %cst_34 : f32 to vector<4x2048xf32>
    %72 = arith.mulf %71, %68 : vector<4x2048xf32>
    %73 = arith.select %70, %68, %72 : vector<4x2048xi1>, vector<4x2048xf32>
    %c1_35 = arith.constant 1 : index
    %c0_36 = arith.constant 0 : index
    %c0_37 = arith.constant 0 : index
    %74 = vector.load %arg4[%c1_35, %c0_36, %c0_37] : memref<4x4x2048xf32, #tpu.memory_space<vmem>>, vector<1x4x2048xf32>
    %75 = vector.shape_cast %74 : vector<1x4x2048xf32> to vector<4x2048xf32>
    %76 = vector.shape_cast %73 : vector<4x2048xf32> to vector<1x4x2048xf32>
    tpu.vector_store %arg4[%c1_35, %c0_36, %c0_37], %76 {strides = array<i32>} : memref<4x4x2048xf32, #tpu.memory_space<vmem>>, vector<1x4x2048xf32>,
    %77 = vector.broadcast %49 : vector<4x1xf32> to vector<4x2048xf32>
    %78 = arith.mulf %9, %77 : vector<4x2048xf32>
    %79 = vector.broadcast %52 : vector<4x1xf32> to vector<4x2048xf32>
    %80 = arith.addf %78, %79 : vector<4x2048xf32>
    %cst_38 = arith.constant 0.000000e+00 : f32
    %81 = vector.broadcast %cst_38 : f32 to vector<4x2048xf32>
    %82 = arith.cmpf oge, %80, %81 : vector<4x2048xf32>
    %cst_39 = arith.constant 2.000000e-01 : f32
    %83 = vector.broadcast %cst_39 : f32 to vector<4x2048xf32>
    %84 = arith.mulf %83, %80 : vector<4x2048xf32>
    %85 = arith.select %82, %80, %84 : vector<4x2048xi1>, vector<4x2048xf32>
    %c2_40 = arith.constant 2 : index
    %c0_41 = arith.constant 0 : index
    %c0_42 = arith.constant 0 : index
    %86 = vector.load %arg4[%c2_40, %c0_41, %c0_42] : memref<4x4x2048xf32, #tpu.memory_space<vmem>>, vector<1x4x2048xf32>
    %87 = vector.shape_cast %86 : vector<1x4x2048xf32> to vector<4x2048xf32>
    %88 = vector.shape_cast %85 : vector<4x2048xf32> to vector<1x4x2048xf32>
    tpu.vector_store %arg4[%c2_40, %c0_41, %c0_42], %88 {strides = array<i32>} : memref<4x4x2048xf32, #tpu.memory_space<vmem>>, vector<1x4x2048xf32>,
    %89 = vector.broadcast %49 : vector<4x1xf32> to vector<4x2048xf32>
    %90 = arith.mulf %12, %89 : vector<4x2048xf32>
    %91 = vector.broadcast %52 : vector<4x1xf32> to vector<4x2048xf32>
    %92 = arith.addf %90, %91 : vector<4x2048xf32>
    %cst_43 = arith.constant 0.000000e+00 : f32
    %93 = vector.broadcast %cst_43 : f32 to vector<4x2048xf32>
    %94 = arith.cmpf oge, %92, %93 : vector<4x2048xf32>
    %cst_44 = arith.constant 2.000000e-01 : f32
    %95 = vector.broadcast %cst_44 : f32 to vector<4x2048xf32>
    %96 = arith.mulf %95, %92 : vector<4x2048xf32>
    %97 = arith.select %94, %92, %96 : vector<4x2048xi1>, vector<4x2048xf32>
    %c3_45 = arith.constant 3 : index
    %c0_46 = arith.constant 0 : index
    %c0_47 = arith.constant 0 : index
    %98 = vector.load %arg4[%c3_45, %c0_46, %c0_47] : memref<4x4x2048xf32, #tpu.memory_space<vmem>>, vector<1x4x2048xf32>
    %99 = vector.shape_cast %98 : vector<1x4x2048xf32> to vector<4x2048xf32>
    %100 = vector.shape_cast %97 : vector<4x2048xf32> to vector<1x4x2048xf32>
    tpu.vector_store %arg4[%c3_45, %c0_46, %c0_47], %100 {strides = array<i32>} : memref<4x4x2048xf32, #tpu.memory_space<vmem>>, vector<1x4x2048xf32>,
    return
  }
}

module attributes {stable_mosaic.version = 11 : i64} {
  func.func @_phase_mm_tanh_kernel(%arg0: i32, %arg1: memref<4x3x36xbf16, #tpu.memory_space<vmem>>, %arg2: memref<36x2048xbf16, #tpu.memory_space<vmem>>, %arg3: memref<4x3x2048xf32, #tpu.memory_space<vmem>>) attributes {dimension_semantics = [#tpu.dimension_semantics<parallel>], iteration_bounds = array<i64: 4>, scalar_prefetch = 0 : i64, scratch_operands = 0 : i64, tpu.core_type = #tpu.core_type<tc>, window_params = [{pipeline_mode = #tpu.pipeline_mode<synchronous>, transform_indices = @transform_0, window_bounds = array<i64: 4, 3, 36>}, {transform_indices = @transform_1, window_bounds = array<i64: 36, 2048>}, {transform_indices = @transform_2, window_bounds = array<i64: 4, 3, 2048>}]} {
    %c0 = arith.constant 0 : index
    %c0_0 = arith.constant 0 : index
    %0 = vector.load %arg2[%c0, %c0_0] : memref<36x2048xbf16, #tpu.memory_space<vmem>>, vector<36x2048xbf16>
    %c0_1 = arith.constant 0 : index
    %c0_2 = arith.constant 0 : index
    %c0_3 = arith.constant 0 : index
    %1 = vector.load %arg1[%c0_1, %c0_2, %c0_3] : memref<4x3x36xbf16, #tpu.memory_space<vmem>>, vector<1x3x36xbf16>
    %2 = vector.shape_cast %1 : vector<1x3x36xbf16> to vector<3x36xbf16>
    %cst = arith.constant dense<0.000000e+00> : vector<3x2048xf32>
    %3 = tpu.matmul %2, %0, %cst {dimension_numbers = #tpu.dot_dimension_numbers<[1], [0], [0], [1], [0, 0, 1, 1], [], []>} : vector<3x36xbf16>, vector<36x2048xbf16>, vector<3x2048xf32> -> vector<3x2048xf32>
    %4 = math.tanh %3 : vector<3x2048xf32>
    %c0_4 = arith.constant 0 : index
    %c0_5 = arith.constant 0 : index
    %c0_6 = arith.constant 0 : index
    %5 = vector.load %arg3[%c0_4, %c0_5, %c0_6] : memref<4x3x2048xf32, #tpu.memory_space<vmem>>, vector<1x3x2048xf32>
    %6 = vector.shape_cast %5 : vector<1x3x2048xf32> to vector<3x2048xf32>
    %7 = vector.shape_cast %4 : vector<3x2048xf32> to vector<1x3x2048xf32>
    tpu.vector_store %arg3[%c0_4, %c0_5, %c0_6], %7 {strides = array<i32>} : memref<4x3x2048xf32, #tpu.memory_space<vmem>>, vector<1x3x2048xf32>,
    %c1 = arith.constant 1 : index
    %c0_7 = arith.constant 0 : index
    %c0_8 = arith.constant 0 : index
    %8 = vector.load %arg1[%c1, %c0_7, %c0_8] : memref<4x3x36xbf16, #tpu.memory_space<vmem>>, vector<1x3x36xbf16>
    %9 = vector.shape_cast %8 : vector<1x3x36xbf16> to vector<3x36xbf16>
    %cst_9 = arith.constant dense<0.000000e+00> : vector<3x2048xf32>
    %10 = tpu.matmul %9, %0, %cst_9 {dimension_numbers = #tpu.dot_dimension_numbers<[1], [0], [0], [1], [0, 0, 1, 1], [], []>} : vector<3x36xbf16>, vector<36x2048xbf16>, vector<3x2048xf32> -> vector<3x2048xf32>
    %11 = math.tanh %10 : vector<3x2048xf32>
    %c1_10 = arith.constant 1 : index
    %c0_11 = arith.constant 0 : index
    %c0_12 = arith.constant 0 : index
    %12 = vector.load %arg3[%c1_10, %c0_11, %c0_12] : memref<4x3x2048xf32, #tpu.memory_space<vmem>>, vector<1x3x2048xf32>
    %13 = vector.shape_cast %12 : vector<1x3x2048xf32> to vector<3x2048xf32>
    %14 = vector.shape_cast %11 : vector<3x2048xf32> to vector<1x3x2048xf32>
    tpu.vector_store %arg3[%c1_10, %c0_11, %c0_12], %14 {strides = array<i32>} : memref<4x3x2048xf32, #tpu.memory_space<vmem>>, vector<1x3x2048xf32>,
    %c2 = arith.constant 2 : index
    %c0_13 = arith.constant 0 : index
    %c0_14 = arith.constant 0 : index
    %15 = vector.load %arg1[%c2, %c0_13, %c0_14] : memref<4x3x36xbf16, #tpu.memory_space<vmem>>, vector<1x3x36xbf16>
    %16 = vector.shape_cast %15 : vector<1x3x36xbf16> to vector<3x36xbf16>
    %cst_15 = arith.constant dense<0.000000e+00> : vector<3x2048xf32>
    %17 = tpu.matmul %16, %0, %cst_15 {dimension_numbers = #tpu.dot_dimension_numbers<[1], [0], [0], [1], [0, 0, 1, 1], [], []>} : vector<3x36xbf16>, vector<36x2048xbf16>, vector<3x2048xf32> -> vector<3x2048xf32>
    %18 = math.tanh %17 : vector<3x2048xf32>
    %c2_16 = arith.constant 2 : index
    %c0_17 = arith.constant 0 : index
    %c0_18 = arith.constant 0 : index
    %19 = vector.load %arg3[%c2_16, %c0_17, %c0_18] : memref<4x3x2048xf32, #tpu.memory_space<vmem>>, vector<1x3x2048xf32>
    %20 = vector.shape_cast %19 : vector<1x3x2048xf32> to vector<3x2048xf32>
    %21 = vector.shape_cast %18 : vector<3x2048xf32> to vector<1x3x2048xf32>
    tpu.vector_store %arg3[%c2_16, %c0_17, %c0_18], %21 {strides = array<i32>} : memref<4x3x2048xf32, #tpu.memory_space<vmem>>, vector<1x3x2048xf32>,
    %c3 = arith.constant 3 : index
    %c0_19 = arith.constant 0 : index
    %c0_20 = arith.constant 0 : index
    %22 = vector.load %arg1[%c3, %c0_19, %c0_20] : memref<4x3x36xbf16, #tpu.memory_space<vmem>>, vector<1x3x36xbf16>
    %23 = vector.shape_cast %22 : vector<1x3x36xbf16> to vector<3x36xbf16>
    %cst_21 = arith.constant dense<0.000000e+00> : vector<3x2048xf32>
    %24 = tpu.matmul %23, %0, %cst_21 {dimension_numbers = #tpu.dot_dimension_numbers<[1], [0], [0], [1], [0, 0, 1, 1], [], []>} : vector<3x36xbf16>, vector<36x2048xbf16>, vector<3x2048xf32> -> vector<3x2048xf32>
    %25 = math.tanh %24 : vector<3x2048xf32>
    %c3_22 = arith.constant 3 : index
    %c0_23 = arith.constant 0 : index
    %c0_24 = arith.constant 0 : index
    %26 = vector.load %arg3[%c3_22, %c0_23, %c0_24] : memref<4x3x2048xf32, #tpu.memory_space<vmem>>, vector<1x3x2048xf32>
    %27 = vector.shape_cast %26 : vector<1x3x2048xf32> to vector<3x2048xf32>
    %28 = vector.shape_cast %25 : vector<3x2048xf32> to vector<1x3x2048xf32>
    tpu.vector_store %arg3[%c3_22, %c0_23, %c0_24], %28 {strides = array<i32>} : memref<4x3x2048xf32, #tpu.memory_space<vmem>>, vector<1x3x2048xf32>,
    return
  }
  func.func @transform_0(%arg0: i32) -> (i32, i32, i32) {
    %c0_i32 = arith.constant 0 : i32
    %c0_i32_0 = arith.constant 0 : i32
    %c0_i32_1 = arith.constant 0 : i32
    %c0_i32_2 = arith.constant 0 : i32
    return %c0_i32, %c0_i32_0, %c0_i32_1 : i32, i32, i32
  }
  func.func @transform_1(%arg0: i32) -> (i32, i32) {
    %c0_i32 = arith.constant 0 : i32
    %c0_i32_0 = arith.constant 0 : i32
    return %c0_i32, %arg0 : i32, i32
  }
  func.func @transform_2(%arg0: i32) -> (i32, i32, i32) {
    %c0_i32 = arith.constant 0 : i32
    %c0_i32_0 = arith.constant 0 : i32
    %c0_i32_1 = arith.constant 0 : i32
    return %c0_i32, %c0_i32_0, %arg0 : i32, i32, i32
  }
}

</mosaic_0001>

<bundles_post_ra>
// kernel: generator_dc_forward.7
= control target key start
LH: loop header
LB: loop body
LE: loop exit
PB: predicated region body
PF: predicated region fallthrough
CT: control target
= control target key end

     0   :  { %v974_v0 = vmov 0.0   ;;  %vm975_vm0 = vmmov 0   ;;  %vm181_vm1 = vcmask 261120   ;;  %s1328_s1 = inlined_call_operand.vmem [shape: bf16[288,32], index: 1, kind: input, shape index: {}]   ;;  %s1329_s0 = inlined_call_operand.vmem [shape: bf16[4,16,288], index: 0, kind: input, shape index: {}]   ;;  %s1330_s2 = inlined_call_operand.vmem [shape: f32[16,1], index: 2, kind: input, shape index: {}]   ;;  %s1331_s3 = inlined_call_operand.vmem [shape: f32[16,1], index: 3, kind: input, shape index: {}]   ;;  %s1332_s4 = inlined_call_operand.vmem [shape: f32[4,16,32], index: 4, kind: output, shape index: {}]  }
   0x1   :  { %899 = vmatprep.subr.bf16.mxu1 %v974_v0  ;;  %v1006_v1 = vld [vmem:[%s1328_s1 + $0x40] sm:$0xff]   ;;  %903 = vmatprep.mubr.msk.bf16.mxu1 %vm975_vm0, %v974_v0  ;;  %v1025_v4 = vld [vmem:[%s1328_s1 + $0x48] sm:$0xff]   ;;  %v1047_v8 = vld [vmem:[%s1328_s1 + $0x50] sm:$0xff]  }
   0x2   :  { %v1013_v2 = vld [vmem:[%s1328_s1 + $0x80] sm:$0xff]   ;;  %799 = vmatprep.subr.bf16.mxu0 %v1006_v1  ;;  %v1032_v5 = vld [vmem:[%s1328_s1 + $0x88] sm:$0xff]   ;;  %v1054_v9 = vld [vmem:[%s1328_s1 + $0x10] sm:$0xff]  }
   0x3   :  { %v1019_v3 = vld [vmem:[%s1328_s1] sm:$0xff]   ;;  %900 = vmatpush3.bf16.msra.mxu1 %v1013_v2  ;;  %v1038_v6 = vld [vmem:[%s1328_s1 + $0x8] sm:$0xff]   ;;  %v1060_v10 = vld [vmem:[%s1328_s1 + $0x58] sm:$0xff]  }
   0x4   :  { %800 = vmatpush3.bf16.msra.mxu0 %v1019_v3  ;;  %901 = vmatprep.subr.bf16.mxu1 %v974_v0  ;;  %v942_v7 = vld [vmem:[%s1329_s0 + $0x8] ss:$12 sps:$4 sm:$0xff]   ;;  %v1069_v11 = vld [vmem:[%s1328_s1 + $0x18] sm:$0xff]   ;;  %v1075_v12 = vld [vmem:[%s1328_s1 + $0x60] sm:$0xff]  }
   0x5   :  { %801 = vmatprep.subr.bf16.mxu0 %v1025_v4  ;;  %v1083_v13 = vld [vmem:[%s1328_s1 + $0x20] sm:$0xff]   ;;  %v1089_v14 = vld [vmem:[%s1328_s1 + $0x68] sm:$0xff]   ;;  %v1106_v17 = vld [vmem:[%s1328_s1 + $0x70] sm:$0xff]  }
   0x6   :  { %v1095_v15 = vld [vmem:[%s1328_s1 + $0x28] sm:$0xff]   ;;  %v957_v16 = vld [vmem:[%s1329_s0 + $0x4] ss:$12 sps:$4 sm:$0xff]   ;;  %v1123_v20 = vld [vmem:[%s1328_s1 + $0x78] sm:$0xff]  }
   0x7   :  { %902 = vmatpush3.bf16.msra.mxu1 %v1032_v5  ;;  %v960_v18 = vld [vmem:[%s1329_s0 + $0x1c] ss:$12 sps:$4 sm:$0xff]   ;;  %217 = vmatprep.mubr.bf16.mxu0 %v957_v16  ;;  %v1117_v19 = vld [vmem:[%s1328_s1 + $0x30] sm:$0xff]   ;;  %v955_v22 = vld [vmem:[%s1329_s0] ss:$12 sps:$4 sm:$0xff]  }
   0x8   :  { %802 = vmatpush3.bf16.msra.mxu0 %v1038_v6  ;;  %824 = vmatprep.subr.bf16.mxu1 %v1006_v1  ;;  %v1131_v21 = vld [vmem:[%s1328_s1 + $0x38] sm:$0xff]   ;;  %v961_v24 = vld [vmem:[%s1329_s0 + $0x20] ss:$12 sps:$4 sm:$0xff]   ;;  %v966_v29 = vld [vmem:[%s1329_s0 + $0x48] ss:$12 sps:$4 sm:$0xff]  }
   0x9   :  { %803 = vmatprep.subr.bf16.mxu0 %v1047_v8  ;;  %v958_v23 = vld [vmem:[%s1329_s0 + $0x18] ss:$12 sps:$4 sm:$0xff]   ;;  %v965_v25 = vld [vmem:[%s1329_s0 + $0x34] ss:$12 sps:$4 sm:$0xff]   ;;  %v963_v28 = vld [vmem:[%s1329_s0 + $0x30] ss:$12 sps:$4 sm:$0xff]  }
   0xa   :  { %904 = vmatmul.mubr.msk.bf16.vlgmr.msra.gmra.mrb[0].mxu1 %vm181_vm1, %v942_v7  ;;  %v962_v26 = vld [vmem:[%s1329_s0 + $0x38] ss:$12 sps:$4 sm:$0xff]   ;;  %v969_v30 = vld [vmem:[%s1329_s0 + $0x50] ss:$12 sps:$4 sm:$0xff]  }
   0xb   :  { %825 = vmatpush3.bf16.msra.mxu1 %v1019_v3  ;;  %322 = vmatprep.mubr.bf16.mxu1 %v960_v18  ;;  %v968_v27 = vld [vmem:[%s1329_s0 + $0x4c] ss:$12 sps:$4 sm:$0xff]  }
   0xc   :  { %804 = vmatpush3.bf16.msra.mxu0 %v1054_v9  ;;  %826 = vmatprep.subr.bf16.mxu1 %v1025_v4 }
   0xd   :  { %805 = vmatprep.subr.bf16.mxu0 %v1060_v10 }
   0xf   :  { %827 = vmatpush3.bf16.msra.mxu1 %v1038_v6 }
  0x10   :  { %806 = vmatpush3.bf16.msra.mxu0 %v1069_v11  ;;  %828 = vmatprep.subr.bf16.mxu1 %v1047_v8 }
  0x11   :  { %807 = vmatprep.subr.bf16.mxu0 %v1075_v12 }
  0x13   :  { %829 = vmatpush3.bf16.msra.mxu1 %v1054_v9 }
  0x14   :  { %808 = vmatpush3.bf16.msra.mxu0 %v1083_v13  ;;  %830 = vmatprep.subr.bf16.mxu1 %v1060_v10 }
  0x15   :  { %809 = vmatprep.subr.bf16.mxu0 %v1089_v14 }
  0x17   :  { %831 = vmatpush3.bf16.msra.mxu1 %v1069_v11 }
  0x18   :  { %810 = vmatpush3.bf16.msra.mxu0 %v1095_v15  ;;  %832 = vmatprep.subr.bf16.mxu1 %v1075_v12 }
  0x19   :  { %811 = vmatprep.subr.bf16.mxu0 %v1106_v17 }
  0x1b   :  { %833 = vmatpush3.bf16.msra.mxu1 %v1083_v13 }
  0x1c   :  { %812 = vmatpush3.bf16.msra.mxu0 %v1117_v19  ;;  %834 = vmatprep.subr.bf16.mxu1 %v1089_v14 }
  0x1d   :  { %813 = vmatprep.subr.bf16.mxu0 %v1123_v20 }
  0x1f   :  { %835 = vmatpush3.bf16.msra.mxu1 %v1095_v15 }
  0x20   :  { %814 = vmatpush3.bf16.msra.mxu0 %v1131_v21  ;;  %836 = vmatprep.subr.bf16.mxu1 %v1106_v17 }
  0x21   :  { %907 = vmatprep.subr.bf16.mxu0 %v974_v0 }
  0x23   :  { %218 = vmatmul.mubr.bf16.vlgmr.msra.gmra.mrb[0].mxu0 %v955_v22  ;;  %837 = vmatpush3.bf16.msra.mxu1 %v1117_v19 }
  0x24   :  { %908 = vmatpush3.bf16.msra.mxu0 %v1013_v2  ;;  %838 = vmatprep.subr.bf16.mxu1 %v1123_v20 }
  0x25   :  { %909 = vmatprep.subr.bf16.mxu0 %v974_v0  ;;  %911 = vmatprep.mubr.msk.bf16.mxu0 %vm975_vm0, %v974_v0 }
  0x27   :  { %839 = vmatpush3.bf16.msra.mxu1 %v1131_v21 }
  0x28   :  { %910 = vmatpush3.bf16.msra.mxu0 %v1032_v5  ;;  %915 = vmatprep.subr.bf16.mxu1 %v974_v0 }
  0x29   :  { %849 = vmatprep.subr.bf16.mxu0 %v1006_v1 }
  0x2a   :  { %323 = vmatmul.mubr.bf16.vlgmr.msra.gmra.mrb[4].mxu1 %v958_v23 }
  0x2b   :  { %912 = vmatmul.mubr.msk.bf16.vlgmr.msra.gmra.mrb[4].mxu0 %vm181_vm1, %v961_v24  ;;  %916 = vmatpush3.bf16.msra.mxu1 %v1013_v2 }
  0x2c   :  { %850 = vmatpush3.bf16.msra.mxu0 %v1019_v3  ;;  %917 = vmatprep.subr.bf16.mxu1 %v974_v0 }
  0x2d   :  { %851 = vmatprep.subr.bf16.mxu0 %v1025_v4  ;;  %919 = vmatprep.mubr.msk.bf16.mxu1 %vm975_vm0, %v974_v0 }
  0x2e   :  { %427 = vmatprep.mubr.bf16.mxu0 %v965_v25 }
  0x2f   :  { %918 = vmatpush3.bf16.msra.mxu1 %v1032_v5 }
  0x30   :  { %852 = vmatpush3.bf16.msra.mxu0 %v1038_v6  ;;  %874 = vmatprep.subr.bf16.mxu1 %v1006_v1 }
  0x31   :  { %853 = vmatprep.subr.bf16.mxu0 %v1047_v8 }
  0x32   :  { %920 = vmatmul.mubr.msk.bf16.vlgmr.msra.gmra.mrb[8].mxu1 %vm181_vm1, %v962_v26 }
  0x33   :  { %875 = vmatpush3.bf16.msra.mxu1 %v1019_v3  ;;  %532 = vmatprep.mubr.bf16.mxu1 %v968_v27 }
  0x34   :  { %854 = vmatpush3.bf16.msra.mxu0 %v1054_v9  ;;  %876 = vmatprep.subr.bf16.mxu1 %v1025_v4 }
  0x35   :  { %855 = vmatprep.subr.bf16.mxu0 %v1060_v10 }
  0x37   :  { %877 = vmatpush3.bf16.msra.mxu1 %v1038_v6 }
  0x38   :  { %856 = vmatpush3.bf16.msra.mxu0 %v1069_v11  ;;  %878 = vmatprep.subr.bf16.mxu1 %v1047_v8 }
  0x39   :  { %857 = vmatprep.subr.bf16.mxu0 %v1075_v12 }
  0x3b   :  { %879 = vmatpush3.bf16.msra.mxu1 %v1054_v9 }
  0x3c   :  { %858 = vmatpush3.bf16.msra.mxu0 %v1083_v13  ;;  %880 = vmatprep.subr.bf16.mxu1 %v1060_v10 }
  0x3d   :  { %859 = vmatprep.subr.bf16.mxu0 %v1089_v14 }
  0x3f   :  { %881 = vmatpush3.bf16.msra.mxu1 %v1069_v11 }
  0x40   :  { %860 = vmatpush3.bf16.msra.mxu0 %v1095_v15  ;;  %882 = vmatprep.subr.bf16.mxu1 %v1075_v12 }
  0x41   :  { %861 = vmatprep.subr.bf16.mxu0 %v1106_v17 }
  0x43   :  { %883 = vmatpush3.bf16.msra.mxu1 %v1083_v13 }
  0x44   :  { %862 = vmatpush3.bf16.msra.mxu0 %v1117_v19  ;;  %884 = vmatprep.subr.bf16.mxu1 %v1089_v14 }
  0x45   :  { %863 = vmatprep.subr.bf16.mxu0 %v1123_v20 }
  0x47   :  { %885 = vmatpush3.bf16.msra.mxu1 %v1095_v15 }
  0x48   :  { %864 = vmatpush3.bf16.msra.mxu0 %v1131_v21  ;;  %886 = vmatprep.subr.bf16.mxu1 %v1106_v17 }
  0x49   :  { %923 = vmatprep.subr.bf16.mxu0 %v974_v0 }
  0x4b   :  { %428 = vmatmul.mubr.bf16.vlgmr.msra.gmra.mrb[8].mxu0 %v963_v28  ;;  %887 = vmatpush3.bf16.msra.mxu1 %v1117_v19 }
  0x4c   :  { %924 = vmatpush3.bf16.msra.mxu0 %v1013_v2  ;;  %888 = vmatprep.subr.bf16.mxu1 %v1123_v20 }
  0x4d   :  { %925 = vmatprep.subr.bf16.mxu0 %v974_v0  ;;  %927 = vmatprep.mubr.msk.bf16.mxu0 %vm975_vm0, %v974_v0 }
  0x4f   :  { %889 = vmatpush3.bf16.msra.mxu1 %v1131_v21 }
  0x50   :  { %926 = vmatpush3.bf16.msra.mxu0 %v1032_v5 }
  0x52   :  { %533 = vmatmul.mubr.bf16.vlgmr.msra.gmra.mrb[12].mxu1 %v966_v29 }
  0x53   :  { %928 = vmatmul.mubr.msk.bf16.vlgmr.msra.gmra.mrb[12].mxu0 %vm181_vm1, %v969_v30 }
  0xdd   :  { %v260_v31 = vpop.f32.mrb[0].mxu1 }
  0xde   :  { %v905_v32 = vpop.f32.mrb[1].mxu1 }
  0xdf   :  { %v263_v33 = vpop.f32.mrb[2].mxu1 }
  0xe0   :  { %v906_v34 = vpop.f32.mrb[3].mxu1 }
  0xf6   :  { %v815_v35 = vpop.f32.mrb[0].mxu0 }
  0xf7   :  { %v816_v36 = vpop.f32.mrb[1].mxu0 }
  0xf8   :  { %v817_v37 = vadd.f32 %v816_v36, %v815_v35  ;;  %v818_v38 = vpop.f32.mrb[2].mxu0 }
  0xf9   :  { %v819_v39 = vpop.f32.mrb[3].mxu0 }
  0xfa   :  { %v1220_v40 = vadd.f32 %v817_v37, %v260_v31  ;;  %v820_v41 = vadd.f32 %v819_v39, %v818_v38  ;;  %v976_v39 = vmov 0  }
  0xfb   :  { %934 = vset.pattern.permute.xlu0 %v976_v39  ;;  %935 = vset.pattern.permute.xlu1 %v976_v39 }
  0xfc   :  { %v1222_v42 = vadd.f32 %v820_v41, %v263_v33  ;;  %v582_v43 = vsel %vm181_vm1, %v1220_v40, 0.0  ;;  %v588_v55 = vmul.f32 %v1220_v40, %v1220_v40 }
  0xfd   :  { %v840_v44 = vpop.f32.mrb[4].mxu1  ;;  %583 = vadd.xlane.f32.xlu0 %v582_v43 }
  0xfe   :  { %v841_v45 = vpop.f32.mrb[5].mxu1  ;;  %v365_v46 = vpop.f32.mrb[4].mxu0  ;;  %v589_v47 = vmul.f32 %v1222_v42, %v1222_v42  ;;  %v585_v54 = vsel %vm181_vm1, %v1222_v42, 0.0  ;;  %v590_v61 = vsel %vm181_vm1, %v588_v55, 0.0 }
  0xff   :  { %v842_v48 = vadd.f32 %v841_v45, %v840_v44  ;;  %v843_v49 = vpop.f32.mrb[6].mxu1  ;;  %v913_v50 = vpop.f32.mrb[5].mxu0 }
 0x100   :  { %v844_v51 = vpop.f32.mrb[7].mxu1  ;;  %v368_v52 = vpop.f32.mrb[6].mxu0  ;;  %v593_v53 = vsel %vm181_vm1, %v589_v47, 0.0 }
 0x101   :  { %v1233_v56 = vadd.f32 %v842_v48, %v365_v46  ;;  %v845_v57 = vadd.f32 %v844_v51, %v843_v49  ;;  %v914_v58 = vpop.f32.mrb[7].mxu0  ;;  %594 = vadd.xlane.f32.xlu1 %v593_v53  ;;  %586 = vadd.xlane.f32.xlu0 %v585_v54 }
 0x103   :  { %v1235_v59 = vadd.f32 %v845_v57, %v368_v52  ;;  %v596_v60 = vsel %vm181_vm1, %v1233_v56, 0.0  ;;  %v604_v62 = vmul.f32 %v1233_v56, %v1233_v56 }
 0x105   :  { %v470_v63 = vpop.f32.mrb[8].mxu1  ;;  %597 = vadd.xlane.f32.xlu1 %v596_v60  ;;  %591 = vadd.xlane.f32.xlu0 %v590_v61  ;;  %v599_v3 = vsel %vm181_vm1, %v1235_v59, 0.0  ;;  %v606_v4 = vsel %vm181_vm1, %v604_v62, 0.0  ;;  %v605_v5 = vmul.f32 %v1235_v59, %v1235_v59 }
 0x106   :  { %v921_v0 = vpop.f32.mrb[9].mxu1 }
 0x107   :  { %v473_v1 = vpop.f32.mrb[10].mxu1  ;;  %v609_v6 = vsel %vm181_vm1, %v605_v5, 0.0 }
 0x108   :  { %v922_v2 = vpop.f32.mrb[11].mxu1 }
 0x109   :  { %600 = vadd.xlane.f32.xlu1 %v599_v3  ;;  %607 = vadd.xlane.f32.xlu0 %v606_v4 }
 0x10d   :  { %610 = vadd.xlane.f32.xlu1 %v609_v6 }
 0x11e   :  { %v865_v7 = vpop.f32.mrb[8].mxu0 }
 0x11f   :  { %v866_v8 = vpop.f32.mrb[9].mxu0 }
 0x120   :  { %v867_v9 = vadd.f32 %v866_v8, %v865_v7  ;;  %v868_v10 = vpop.f32.mrb[10].mxu0 }
 0x121   :  { %v869_v11 = vpop.f32.mrb[11].mxu0 }
 0x122   :  { %v1248_v12 = vadd.f32 %v867_v9, %v470_v63  ;;  %v870_v13 = vadd.f32 %v869_v11, %v868_v10 }
 0x124   :  { %v1250_v14 = vadd.f32 %v870_v13, %v473_v1  ;;  %v614_v15 = vsel %vm181_vm1, %v1248_v12, 0.0  ;;  %v622_v16 = vmul.f32 %v1248_v12, %v1248_v12 }
 0x125   :  { %v890_v17 = vpop.f32.mrb[12].mxu1  ;;  %615 = vadd.xlane.f32.xlu0 %v614_v15 }
 0x126   :  { %v891_v18 = vpop.f32.mrb[13].mxu1  ;;  %v575_v19 = vpop.f32.mrb[12].mxu0  ;;  %v617_v20 = vsel %vm181_vm1, %v1250_v14, 0.0  ;;  %v623_v21 = vmul.f32 %v1250_v14, %v1250_v14  ;;  %v624_v27 = vsel %vm181_vm1, %v622_v16, 0.0 }
 0x127   :  { %v892_v22 = vadd.f32 %v891_v18, %v890_v17  ;;  %v893_v23 = vpop.f32.mrb[14].mxu1  ;;  %v929_v24 = vpop.f32.mrb[13].mxu0  ;;  %618 = vadd.xlane.f32.xlu1 %v617_v20  ;;  %v658_v20 = vld [vmem:[%s1330_s2] sm:$0xff] }
 0x128   :  { %v894_v25 = vpop.f32.mrb[15].mxu1  ;;  %v578_v26 = vpop.f32.mrb[14].mxu0  ;;  %v627_v31 = vsel %vm181_vm1, %v623_v21, 0.0 }
 0x129   :  { %v1261_v28 = vadd.f32 %v892_v22, %v575_v19  ;;  %v895_v29 = vadd.f32 %v894_v25, %v893_v23  ;;  %v930_v30 = vpop.f32.mrb[15].mxu0  ;;  %625 = vadd.xlane.f32.xlu0 %v624_v27  ;;  %v659_v22 = vld [vmem:[%s1330_s2 + $0x8] sm:$0xff]  ;;  %v666_v27 = vld [vmem:[%s1331_s3] sm:$0xff] }
 0x12b   :  { %v1264_v32 = vadd.f32 %v895_v29, %v578_v26  ;;  %628 = vadd.xlane.f32.xlu1 %v627_v31  ;;  %v632_v33 = vsel %vm181_vm1, %v1261_v28, 0.0  ;;  %v640_v34 = vmul.f32 %v1261_v28, %v1261_v28  ;;  %v667_v31 = vld [vmem:[%s1331_s3 + $0x8] sm:$0xff] }
 0x12d   :  { %633 = vadd.xlane.f32.xlu0 %v632_v33  ;;  %v635_v35 = vsel %vm181_vm1, %v1264_v32, 0.0  ;;  %v641_v36 = vmul.f32 %v1264_v32, %v1264_v32  ;;  %v642_v37 = vsel %vm181_vm1, %v640_v34, 0.0 }
 0x12f   :  { %636 = vadd.xlane.f32.xlu1 %v635_v35  ;;  %v645_v38 = vsel %vm181_vm1, %v641_v36, 0.0 }
 0x131   :  { %643 = vadd.xlane.f32.xlu0 %v642_v37 }
 0x133   :  { %646 = vadd.xlane.f32.xlu1 %v645_v38 }
 0x18a   :  { %v584_v41 = vpop.xlane.xlu0 %583 }
 0x18e   :  { %v595_v43 = vpop.xlane.xlu1 %594  ;;  %v587_v44 = vpop.xlane.xlu0 %586 }
 0x192   :  { %v598_v45 = vpop.xlane.xlu1 %597  ;;  %v592_v46 = vpop.xlane.xlu0 %591 }
 0x193   :  { %v602_v53 = vadd.f32 %v598_v45, %v584_v41 }
 0x196   :  { %v601_v47 = vpop.xlane.xlu1 %600  ;;  %v608_v48 = vpop.xlane.xlu0 %607 }
 0x197   :  { %v603_v55 = vadd.f32 %v601_v47, %v587_v44  ;;  %v612_v60 = vadd.f32 %v608_v48, %v592_v46 }
 0x19a   :  { %v611_v49 = vpop.xlane.xlu1 %610 }
 0x19b   :  { %v613_v0 = vadd.f32 %v611_v49, %v595_v43 }
 0x1b2   :  { %v616_v50 = vpop.xlane.xlu0 %615 }
 0x1b3   :  { %v620_v57 = vadd.f32 %v616_v50, %v602_v53 }
 0x1b4   :  { %v619_v51 = vpop.xlane.xlu1 %618 }
 0x1b5   :  { %v621_v61 = vadd.f32 %v619_v51, %v603_v55 }
 0x1b6   :  { %v626_v52 = vpop.xlane.xlu0 %625 }
 0x1b7   :  { %v630_v1 = vadd.f32 %v626_v52, %v612_v60 }
 0x1b8   :  { %v629_v54 = vpop.xlane.xlu1 %628 }
 0x1b9   :  { %v631_v5 = vadd.f32 %v629_v54, %v613_v0 }
 0x1ba   :  { %v634_v58 = vpop.xlane.xlu0 %633 }
 0x1bb   :  { %v638_v62 = vadd.f32 %v634_v58, %v620_v57 }
 0x1bc   :  { %v637_v63 = vpop.xlane.xlu1 %636 }
 0x1bd   :  { %v650_v2 = vmul.f32 0.0078125, %v638_v62  ;;  %v639_v3 = vadd.f32 %v637_v63, %v621_v61 }
 0x1be   :  { %v644_v4 = vpop.xlane.xlu0 %643 }
 0x1bf   :  { %v651_v6 = vmul.f32 0.0078125, %v639_v3  ;;  %v648_v7 = vadd.f32 %v644_v4, %v630_v1  ;;  %v654_v9 = vmul.f32 %v650_v2, %v650_v2 }
 0x1c0   :  { %v647_v8 = vpop.xlane.xlu1 %646 }
 0x1c1   :  { %v652_v10 = vmul.f32 0.0078125, %v648_v7  ;;  %v649_v11 = vadd.f32 %v647_v8, %v631_v5  ;;  %v655_v13 = vmul.f32 %v651_v6, %v651_v6 }
 0x1c3   :  { %v656_v15 = vsub.f32 %v652_v10, %v654_v9  ;;  %v653_v16 = vmul.f32 0.0078125, %v649_v11 }
 0x1c5   :  { %v660_v17 = vadd.f32 1e-05, %v656_v15  ;;  %v657_v18 = vsub.f32 %v653_v16, %v655_v13 }
 0x1c7   :  { %970 = vrsqrt.f32 %v660_v17  ;;  %v661_v19 = vadd.f32 1e-05, %v657_v18 }
 0x1c9   :  { %972 = vrsqrt.f32 %v661_v19 }
 0x1d1   :  { %v971_v21 = vpop.eup %970 }
 0x1d2   :  { %v664_v23 = vmul.f32 %v971_v21, %v658_v20 }
 0x1d3   :  { %v973_v24 = vpop.eup %972 }
 0x1d4   :  { %674 = vperm.xlu0 %934, %v664_v23   ;;  %v665_v25 = vmul.f32 %v973_v24, %v659_v22  ;;  %v668_v26 = vmul.f32 %v664_v23, %v650_v2 }
 0x1d6   :  { %679 = vperm.xlu1 %935, %v665_v25   ;;  %v670_v29 = vsub.f32 %v666_v27, %v668_v26  ;;  %v669_v30 = vmul.f32 %v665_v25, %v651_v6 }
 0x1d8   :  { %v671_v33 = vsub.f32 %v667_v31, %v669_v30 }
 0x1da   :  { %686 = vperm.xlu1 %935, %v670_v29  }
 0x1de   :  { %691 = vperm.xlu1 %935, %v671_v33  }
 0x253   :  { %v675_v34 = vpop.permute.xlu0 %674 }
 0x254   :  { %v682_v36 = vmul.f32 %v675_v34, %v1220_v40  ;;  %v704_v37 = vmul.f32 %v675_v34, %v1233_v56  ;;  %v717_v38 = vmul.f32 %v675_v34, %v1248_v12  ;;  %v730_v39 = vmul.f32 %v675_v34, %v1261_v28 }
 0x255   :  { %v680_v35 = vpop.permute.xlu1 %679 }
 0x256   :  { %v683_v47 = vmul.f32 %v680_v35, %v1222_v42  ;;  %v705_v48 = vmul.f32 %v680_v35, %v1235_v59  ;;  %v718_v49 = vmul.f32 %v680_v35, %v1250_v14  ;;  %v731_v50 = vmul.f32 %v680_v35, %v1264_v32 }
 0x259   :  { %v687_v41 = vpop.permute.xlu1 %686 }
 0x25a   :  { %v694_v43 = vadd.f32 %v687_v41, %v682_v36  ;;  %v706_v44 = vadd.f32 %v704_v37, %v687_v41  ;;  %v719_v45 = vadd.f32 %v717_v38, %v687_v41  ;;  %v732_v46 = vadd.f32 %v730_v39, %v687_v41 }
 0x25c   :  { %vm696_vm2 = vcmp.ge.f32.partialorder %v694_v43, 0.0  ;;  %v698_v40 = vmul.f32 0.2, %v694_v43  ;;  %vm708_vm3 = vcmp.ge.f32.partialorder %v706_v44, 0.0  ;;  %v710_v56 = vmul.f32 0.2, %v706_v44 }
 0x25d   :  { %vm721_vm4 = vcmp.ge.f32.partialorder %v719_v45, 0.0  ;;  %v723_v12 = vmul.f32 0.2, %v719_v45  ;;  %vm734_vm5 = vcmp.ge.f32.partialorder %v732_v46, 0.0  ;;  %v736_v28 = vmul.f32 0.2, %v732_v46  ;;  %v692_v51 = vpop.permute.xlu1 %691 }
 0x25e   :  { %v700_v52 = vsel %vm696_vm2, %v694_v43, %v698_v40  ;;  %v712_v53 = vsel %vm708_vm3, %v706_v44, %v710_v56  ;;  %v695_v54 = vadd.f32 %v692_v51, %v683_v47  ;;  %v707_v55 = vadd.f32 %v705_v48, %v692_v51 }
 0x25f   :  { %702 = vst.msk [vmem:[%s1332_s4] sm:$0xff] %vm181_vm1, %v700_v52  ;;  %793 = vst.msk [vmem:[%s1332_s4 + $0x10] sm:$0xff] %vm181_vm1, %v712_v53  ;;  %v725_v42 = vsel %vm721_vm4, %v719_v45, %v723_v12  ;;  %v738_v59 = vsel %vm734_vm5, %v732_v46, %v736_v28  ;;  %v720_v14 = vadd.f32 %v718_v49, %v692_v51 }
 0x260   :  { %v733_v32 = vadd.f32 %v731_v50, %v692_v51  ;;  %795 = vst.msk [vmem:[%s1332_s4 + $0x20] sm:$0xff] %vm181_vm1, %v725_v42  ;;  %797 = vst.msk [vmem:[%s1332_s4 + $0x30] sm:$0xff] %vm181_vm1, %v738_v59  ;;  %vm697_vm6 = vcmp.ge.f32.partialorder %v695_v54, 0.0  ;;  %v699_v57 = vmul.f32 0.2, %v695_v54  ;;  %vm709_vm7 = vcmp.ge.f32.partialorder %v707_v55, 0.0 }
 0x261   :  { %v711_v58 = vmul.f32 0.2, %v707_v55  ;;  %vm722_vm8 = vcmp.ge.f32.partialorder %v720_v14, 0.0  ;;  %v724_v60 = vmul.f32 0.2, %v720_v14 }
 0x262   :  { %vm735_vm9 = vcmp.ge.f32.partialorder %v733_v32, 0.0  ;;  %v737_v61 = vmul.f32 0.2, %v733_v32  ;;  %v701_v62 = vsel %vm697_vm6, %v695_v54, %v699_v57 }
 0x263   :  { %v713_v63 = vsel %vm709_vm7, %v707_v55, %v711_v58  ;;  %703 = vst.msk [vmem:[%s1332_s4 + $0x8] sm:$0xff] %vm181_vm1, %v701_v62  ;;  %v726_v0 = vsel %vm722_vm8, %v720_v14, %v724_v60 }
 0x264   :  { %794 = vst.msk [vmem:[%s1332_s4 + $0x18] sm:$0xff] %vm181_vm1, %v713_v63  ;;  %v739_v1 = vsel %vm735_vm9, %v733_v32, %v737_v61  ;;  %796 = vst.msk [vmem:[%s1332_s4 + $0x28] sm:$0xff] %vm181_vm1, %v726_v0 }
 0x265   :  { %798 = vst.msk [vmem:[%s1332_s4 + $0x38] sm:$0xff] %vm181_vm1, %v739_v1 }

// kernel: generator_dc_forward.6
= control target key start
LH: loop header
LB: loop body
LE: loop exit
PB: predicated region body
PF: predicated region fallthrough
CT: control target
= control target key end

     0   :  { %vm40_vm0 = vcmask 1043456   ;;  %vm33_vm1 = vcmask 64512   ;;  %vm1143_vm2 = vcmask 15360   ;;  %s3871_s1 = inlined_call_operand.vmem [shape: bf16[8,2], index: 1, kind: input, shape index: {}]   ;;  %s3872_s0 = inlined_call_operand.vmem [shape: bf16[16,32,8], index: 0, kind: input, shape index: {}]   ;;  %s3873_s2 = inlined_call_operand.vmem [shape: f32[32,1], index: 2, kind: input, shape index: {}]   ;;  %s3874_s3 = inlined_call_operand.vmem [shape: f32[32,1], index: 3, kind: input, shape index: {}]   ;;  %s3875_s4 = inlined_call_operand.vmem [shape: f32[16,32,2], index: 4, kind: output, shape index: {}]  }
   0x1   :  { %v2615_v0 = vld [vmem:[%s3871_s1] sm:$0xf]  ;;  %v2547_v3 = vld [vmem:[%s3872_s0 + $0x10] sm:$0xff]   ;;  %v2548_v4 = vld [vmem:[%s3872_s0 + $0x8] sm:$0xff]  }
   0x2   :  { %2527 = vmatprep.subr.msk.bf16.mxu0 %vm40_vm0, %v2615_v0  ;;  %2528 = vmatprep.subr.msk.bf16.mxu1 %vm40_vm0, %v2615_v0  ;;  %v2623_v1 = vsel %vm40_vm0, %v2615_v0, 0  ;;  %v2546_v2 = vld [vmem:[%s3872_s0] sm:$0xff]   ;;  %v2549_v5 = vld [vmem:[%s3872_s0 + $0x18] sm:$0xff]   ;;  %v2552_v7 = vld [vmem:[%s3872_s0 + $0x30] sm:$0xff]  }
   0x3   :  { %2432 = vmatpush3.bf16.msra.mxu0 %v2623_v1  ;;  %2438 = vmatpush3.bf16.msra.mxu1 %v2623_v1  ;;  %v2550_v6 = vld [vmem:[%s3872_s0 + $0x20] sm:$0xff]   ;;  %v2551_v8 = vld [vmem:[%s3872_s0 + $0x28] sm:$0xff]   ;;  %v2553_v9 = vld [vmem:[%s3872_s0 + $0x38] sm:$0xff]  }
   0x4   :  { %2433 = vmatprep.mubr.msk.bf16.mxu0 %vm33_vm1, %v2546_v2  ;;  %2529 = vmatprep.subr.msk.bf16.mxu0 %vm40_vm0, %v2615_v0  ;;  %v2554_v10 = vld [vmem:[%s3872_s0 + $0x40] sm:$0xff]   ;;  %v2556_v11 = vld [vmem:[%s3872_s0 + $0x50] sm:$0xff]   ;;  %v2555_v12 = vld [vmem:[%s3872_s0 + $0x48] sm:$0xff]  }
   0x5   :  { %2439 = vmatprep.mubr.msk.bf16.mxu1 %vm33_vm1, %v2547_v3  ;;  %2530 = vmatprep.subr.msk.bf16.mxu1 %vm40_vm0, %v2615_v0  ;;  %v2557_v13 = vld [vmem:[%s3872_s0 + $0x58] sm:$0xff]   ;;  %v2558_v14 = vld [vmem:[%s3872_s0 + $0x60] sm:$0xff]   ;;  %v2560_v15 = vld [vmem:[%s3872_s0 + $0x70] sm:$0xff]  }
   0x6   :  { %2434 = vmatmul.mubr.msk.bf16.vlgmr.msra.gmra.mrb[0].mxu0 %vm33_vm1, %v2548_v4  ;;  %2440 = vmatmul.mubr.msk.bf16.vlgmr.msra.gmra.mrb[0].mxu1 %vm33_vm1, %v2549_v5  ;;  %v2559_v16 = vld [vmem:[%s3872_s0 + $0x68] sm:$0xff]   ;;  %v2561_v17 = vld [vmem:[%s3872_s0 + $0x78] sm:$0xff]   ;;  %v2562_v18 = vld [vmem:[%s3872_s0 + $0x80] sm:$0xff]  }
   0x7   :  { %2444 = vmatpush3.bf16.msra.mxu0 %v2623_v1  ;;  %2445 = vmatprep.mubr.msk.bf16.mxu0 %vm33_vm1, %v2550_v6  ;;  %v2564_v19 = vld [vmem:[%s3872_s0 + $0x90] sm:$0xff]   ;;  %v2563_v20 = vld [vmem:[%s3872_s0 + $0x88] sm:$0xff]   ;;  %v2565_v21 = vld [vmem:[%s3872_s0 + $0x98] sm:$0xff]  }
   0x8   :  { %2450 = vmatpush3.bf16.msra.mxu1 %v2623_v1  ;;  %2531 = vmatprep.subr.msk.bf16.mxu0 %vm40_vm0, %v2615_v0  ;;  %v2566_v22 = vld [vmem:[%s3872_s0 + $0xa0] sm:$0xff]   ;;  %v2568_v23 = vld [vmem:[%s3872_s0 + $0xb0] sm:$0xff]   ;;  %v2567_v24 = vld [vmem:[%s3872_s0 + $0xa8] sm:$0xff]  }
   0x9   :  { %2532 = vmatprep.subr.msk.bf16.mxu1 %vm40_vm0, %v2615_v0  ;;  %2451 = vmatprep.mubr.msk.bf16.mxu1 %vm33_vm1, %v2552_v7  ;;  %v2569_v25 = vld [vmem:[%s3872_s0 + $0xb8] sm:$0xff]   ;;  %v2570_v26 = vld [vmem:[%s3872_s0 + $0xc0] sm:$0xff]   ;;  %v2572_v27 = vld [vmem:[%s3872_s0 + $0xd0] sm:$0xff]  }
   0xa   :  { %v2571_v28 = vld [vmem:[%s3872_s0 + $0xc8] sm:$0xff]   ;;  %v2573_v29 = vld [vmem:[%s3872_s0 + $0xd8] sm:$0xff]   ;;  %v2574_v30 = vld [vmem:[%s3872_s0 + $0xe0] sm:$0xff]  }
   0xb   :  { %v2575_v31 = vld [vmem:[%s3872_s0 + $0xe8] sm:$0xff]   ;;  %v2576_v32 = vld [vmem:[%s3872_s0 + $0xf0] sm:$0xff]   ;;  %v2577_v33 = vld [vmem:[%s3872_s0 + $0xf8] sm:$0xff]  }
   0xe   :  { %2446 = vmatmul.mubr.msk.bf16.vlgmr.msra.gmra.mrb[4].mxu0 %vm33_vm1, %v2551_v8  ;;  %2452 = vmatmul.mubr.msk.bf16.vlgmr.msra.gmra.mrb[4].mxu1 %vm33_vm1, %v2553_v9 }
   0xf   :  { %2456 = vmatpush3.bf16.msra.mxu0 %v2623_v1  ;;  %2457 = vmatprep.mubr.msk.bf16.mxu0 %vm33_vm1, %v2554_v10 }
  0x10   :  { %2462 = vmatpush3.bf16.msra.mxu1 %v2623_v1  ;;  %2463 = vmatprep.mubr.msk.bf16.mxu1 %vm33_vm1, %v2556_v11 }
  0x11   :  { %2533 = vmatprep.subr.msk.bf16.mxu0 %vm40_vm0, %v2615_v0  ;;  %2534 = vmatprep.subr.msk.bf16.mxu1 %vm40_vm0, %v2615_v0 }
  0x16   :  { %2458 = vmatmul.mubr.msk.bf16.vlgmr.msra.gmra.mrb[8].mxu0 %vm33_vm1, %v2555_v12  ;;  %2464 = vmatmul.mubr.msk.bf16.vlgmr.msra.gmra.mrb[8].mxu1 %vm33_vm1, %v2557_v13 }
  0x17   :  { %2468 = vmatpush3.bf16.msra.mxu0 %v2623_v1  ;;  %2469 = vmatprep.mubr.msk.bf16.mxu0 %vm33_vm1, %v2558_v14 }
  0x18   :  { %2474 = vmatpush3.bf16.msra.mxu1 %v2623_v1  ;;  %2475 = vmatprep.mubr.msk.bf16.mxu1 %vm33_vm1, %v2560_v15 }
  0x19   :  { %2535 = vmatprep.subr.msk.bf16.mxu0 %vm40_vm0, %v2615_v0  ;;  %2536 = vmatprep.subr.msk.bf16.mxu1 %vm40_vm0, %v2615_v0 }
  0x1e   :  { %2470 = vmatmul.mubr.msk.bf16.vlgmr.msra.gmra.mrb[12].mxu0 %vm33_vm1, %v2559_v16  ;;  %2476 = vmatmul.mubr.msk.bf16.vlgmr.msra.gmra.mrb[12].mxu1 %vm33_vm1, %v2561_v17 }
  0x1f   :  { %2480 = vmatpush3.bf16.msra.mxu0 %v2623_v1  ;;  %2481 = vmatprep.mubr.msk.bf16.mxu0 %vm33_vm1, %v2562_v18 }
  0x20   :  { %2486 = vmatpush3.bf16.msra.mxu1 %v2623_v1  ;;  %2487 = vmatprep.mubr.msk.bf16.mxu1 %vm33_vm1, %v2564_v19 }
  0x21   :  { %2537 = vmatprep.subr.msk.bf16.mxu0 %vm40_vm0, %v2615_v0  ;;  %2538 = vmatprep.subr.msk.bf16.mxu1 %vm40_vm0, %v2615_v0 }
  0x26   :  { %2482 = vmatmul.mubr.msk.bf16.vlgmr.msra.gmra.mrb[16].mxu0 %vm33_vm1, %v2563_v20  ;;  %2488 = vmatmul.mubr.msk.bf16.vlgmr.msra.gmra.mrb[16].mxu1 %vm33_vm1, %v2565_v21 }
  0x27   :  { %2492 = vmatpush3.bf16.msra.mxu0 %v2623_v1  ;;  %2493 = vmatprep.mubr.msk.bf16.mxu0 %vm33_vm1, %v2566_v22 }
  0x28   :  { %2498 = vmatpush3.bf16.msra.mxu1 %v2623_v1  ;;  %2499 = vmatprep.mubr.msk.bf16.mxu1 %vm33_vm1, %v2568_v23 }
  0x29   :  { %2539 = vmatprep.subr.msk.bf16.mxu0 %vm40_vm0, %v2615_v0  ;;  %2540 = vmatprep.subr.msk.bf16.mxu1 %vm40_vm0, %v2615_v0 }
  0x2e   :  { %2494 = vmatmul.mubr.msk.bf16.vlgmr.msra.gmra.mrb[20].mxu0 %vm33_vm1, %v2567_v24  ;;  %2500 = vmatmul.mubr.msk.bf16.vlgmr.msra.gmra.mrb[20].mxu1 %vm33_vm1, %v2569_v25 }
  0x2f   :  { %2504 = vmatpush3.bf16.msra.mxu0 %v2623_v1  ;;  %2505 = vmatprep.mubr.msk.bf16.mxu0 %vm33_vm1, %v2570_v26 }
  0x30   :  { %2510 = vmatpush3.bf16.msra.mxu1 %v2623_v1  ;;  %2511 = vmatprep.mubr.msk.bf16.mxu1 %vm33_vm1, %v2572_v27 }
  0x31   :  { %2541 = vmatprep.subr.msk.bf16.mxu0 %vm40_vm0, %v2615_v0  ;;  %2542 = vmatprep.subr.msk.bf16.mxu1 %vm40_vm0, %v2615_v0 }
  0x36   :  { %2506 = vmatmul.mubr.msk.bf16.vlgmr.msra.gmra.mrb[24].mxu0 %vm33_vm1, %v2571_v28  ;;  %2512 = vmatmul.mubr.msk.bf16.vlgmr.msra.gmra.mrb[24].mxu1 %vm33_vm1, %v2573_v29 }
  0x37   :  { %2516 = vmatpush3.bf16.msra.mxu0 %v2623_v1  ;;  %2522 = vmatpush3.bf16.msra.mxu1 %v2623_v1 }
  0x38   :  { %2517 = vmatprep.mubr.msk.bf16.mxu0 %vm33_vm1, %v2574_v30  ;;  %2523 = vmatprep.mubr.msk.bf16.mxu1 %vm33_vm1, %v2576_v32 }
  0x3e   :  { %2518 = vmatmul.mubr.msk.bf16.vlgmr.msra.gmra.mrb[28].mxu0 %vm33_vm1, %v2575_v31  ;;  %2524 = vmatmul.mubr.msk.bf16.vlgmr.msra.gmra.mrb[28].mxu1 %vm33_vm1, %v2577_v33 }
  0xd9   :  { %v2797_v34 = vpop.f32.mrb[0].mxu0  ;;  %v2799_v35 = vpop.f32.mrb[0].mxu1 }
  0xda   :  { %3931 = vst [vmem:[#allocation2_spill] sm:$0xff] %v2797_v34  ;;  %3932 = vst [vmem:[#allocation3_spill] sm:$0xff] %v2799_v35  ;;  %v2801_v36 = vpop.f32.mrb[1].mxu0  ;;  %v1150_v37 = vsel %vm1143_vm2, %v2797_v34, 0.0  ;;  %v2805_v38 = vpop.f32.mrb[1].mxu1  ;;  %v1178_v39 = vsel %vm1143_vm2, %v2799_v35, 0.0  ;;  %v1158_v51 = vmul.f32 %v2797_v34, %v2797_v34  ;;  %v1190_v60 = vmul.f32 %v2799_v35, %v2799_v35 }
  0xdb   :  { %1151 = vadd.xlane.f32.xlu1 %v1150_v37  ;;  %v2809_v40 = vpop.f32.mrb[2].mxu0  ;;  %1179 = vadd.xlane.f32.xlu0 %v1178_v39  ;;  %v2811_v41 = vpop.f32.mrb[2].mxu1  ;;  %v1144_v45 = vsel %vm1143_vm2, %v2801_v36, 0.0  ;;  %v1172_v50 = vsel %vm1143_vm2, %v2805_v38, 0.0  ;;  %v1156_v11 = vmul.f32 %v2801_v36, %v2801_v36  ;;  %v1188_v18 = vmul.f32 %v2805_v38, %v2805_v38 }
  0xdc   :  { %3933 = vst [vmem:[#allocation4_spill] sm:$0xff] %v2809_v40  ;;  %3934 = vst [vmem:[#allocation5_spill] sm:$0xff] %v2811_v41  ;;  %v2813_v42 = vpop.f32.mrb[3].mxu0  ;;  %v1153_v43 = vsel %vm1143_vm2, %v2809_v40, 0.0  ;;  %v2817_v44 = vpop.f32.mrb[3].mxu1  ;;  %v1181_v47 = vsel %vm1143_vm2, %v2811_v41, 0.0  ;;  %v1159_v58 = vmul.f32 %v2809_v40, %v2809_v40  ;;  %v1191_v63 = vmul.f32 %v2811_v41, %v2811_v41 }
  0xdd   :  { %3935 = vst [vmem:[#allocation6_spill] sm:$0xff] %v2813_v42  ;;  %3936 = vst [vmem:[#allocation7_spill] sm:$0xff] %v2817_v44  ;;  %v1175_v57 = vsel %vm1143_vm2, %v2817_v44, 0.0  ;;  %v1166_v59 = vsel %vm1143_vm2, %v1158_v51, 0.0  ;;  %v1198_v2 = vsel %vm1143_vm2, %v1190_v60, 0.0  ;;  %v1157_v9 = vmul.f32 %v2813_v42, %v2813_v42 }
  0xde   :  { %v1169_v62 = vsel %vm1143_vm2, %v1159_v58, 0.0  ;;  %v1201_v8 = vsel %vm1143_vm2, %v1191_v63, 0.0  ;;  %v1147_v10 = vsel %vm1143_vm2, %v2813_v42, 0.0  ;;  %v1189_v14 = vmul.f32 %v2817_v44, %v2817_v44 }
  0xdf   :  { %1154 = vadd.xlane.f32.xlu1 %v1153_v43  ;;  %1145 = vadd.xlane.f32.xlu0 %v1144_v45  ;;  %v1163_v13 = vsel %vm1143_vm2, %v1157_v9, 0.0  ;;  %v1160_v17 = vsel %vm1143_vm2, %v1156_v11, 0.0  ;;  %v1192_v25 = vsel %vm1143_vm2, %v1188_v18, 0.0 }
  0xe0   :  { %v1195_v24 = vsel %vm1143_vm2, %v1189_v14, 0.0 }
  0xe1   :  { %v2821_v46 = vpop.f32.mrb[4].mxu0  ;;  %v2827_v49 = vpop.f32.mrb[4].mxu1 }
  0xe2   :  { %3937 = vst [vmem:[#allocation8_spill] sm:$0xff] %v2821_v46  ;;  %v2825_v48 = vpop.f32.mrb[5].mxu0  ;;  %3938 = vst [vmem:[#allocation9_spill] sm:$0xff] %v2827_v49  ;;  %v2835_v53 = vpop.f32.mrb[5].mxu1  ;;  %v1214_v27 = vsel %vm1143_vm2, %v2821_v46, 0.0  ;;  %v1250_v43 = vsel %vm1143_vm2, %v2827_v49, 0.0  ;;  %v1226_v11 = vmul.f32 %v2821_v46, %v2821_v46  ;;  %v1262_v18 = vmul.f32 %v2827_v49, %v2827_v49 }
  0xe3   :  { %1182 = vadd.xlane.f32.xlu1 %v1181_v47  ;;  %v2833_v52 = vpop.f32.mrb[6].mxu0  ;;  %1173 = vadd.xlane.f32.xlu0 %v1172_v50  ;;  %v2839_v55 = vpop.f32.mrb[6].mxu1  ;;  %v1208_v58 = vsel %vm1143_vm2, %v2825_v48, 0.0 }
  0xe4   :  { %3939 = vst [vmem:[#allocation10_spill] sm:$0xff] %v2833_v52  ;;  %v2837_v54 = vpop.f32.mrb[7].mxu0  ;;  %3941 = vst [vmem:[#allocation12_spill] sm:$0xff] %v2839_v55  ;;  %v2841_v56 = vpop.f32.mrb[7].mxu1  ;;  %v1217_v26 = vsel %vm1143_vm2, %v2833_v52, 0.0  ;;  %v1253_v33 = vsel %vm1143_vm2, %v2839_v55, 0.0  ;;  %v1227_v9 = vmul.f32 %v2833_v52, %v2833_v52  ;;  %v1263_v14 = vmul.f32 %v2839_v55, %v2839_v55 }
  0xe5   :  { %3940 = vst [vmem:[#allocation11_spill] sm:$0xff] %v2837_v54  ;;  %3942 = vst [vmem:[#allocation13_spill] sm:$0xff] %v2841_v56  ;;  %v1211_v50 = vsel %vm1143_vm2, %v2837_v54, 0.0 }
  0xe7   :  { %1176 = vadd.xlane.f32.xlu1 %v1175_v57  ;;  %1167 = vadd.xlane.f32.xlu0 %v1166_v59 }
  0xe9   :  { %v2850_v61 = vpop.f32.mrb[8].mxu0  ;;  %v2857_v1 = vpop.f32.mrb[8].mxu1 }
  0xea   :  { %3943 = vst [vmem:[#allocation14_spill] sm:$0xff] %v2850_v61  ;;  %v2855_v0 = vpop.f32.mrb[9].mxu0  ;;  %3944 = vst [vmem:[#allocation15_spill] sm:$0xff] %v2857_v1  ;;  %v2862_v4 = vpop.f32.mrb[9].mxu1 }
  0xeb   :  { %1170 = vadd.xlane.f32.xlu1 %v1169_v62  ;;  %v2860_v3 = vpop.f32.mrb[10].mxu0  ;;  %1199 = vadd.xlane.f32.xlu0 %v1198_v2  ;;  %v2866_v6 = vpop.f32.mrb[10].mxu1 }
  0xec   :  { %3945 = vst [vmem:[#allocation16_spill] sm:$0xff] %v2860_v3  ;;  %v2864_v5 = vpop.f32.mrb[11].mxu0  ;;  %3947 = vst [vmem:[#allocation18_spill] sm:$0xff] %v2866_v6  ;;  %v2868_v7 = vpop.f32.mrb[11].mxu1 }
  0xed   :  { %3946 = vst [vmem:[#allocation17_spill] sm:$0xff] %v2864_v5  ;;  %3948 = vst [vmem:[#allocation19_spill] sm:$0xff] %v2868_v7 }
  0xef   :  { %1202 = vadd.xlane.f32.xlu1 %v1201_v8  ;;  %1148 = vadd.xlane.f32.xlu0 %v1147_v10  ;;  %v1247_v8 = vsel %vm1143_vm2, %v2841_v56, 0.0  ;;  %v1244_v10 = vsel %vm1143_vm2, %v2835_v53, 0.0 }
  0xf1   :  { %v2877_v12 = vpop.f32.mrb[12].mxu0  ;;  %v2884_v16 = vpop.f32.mrb[12].mxu1 }
  0xf2   :  { %3949 = vst [vmem:[#allocation20_spill] sm:$0xff] %v2877_v12  ;;  %v2882_v15 = vpop.f32.mrb[13].mxu0  ;;  %3950 = vst [vmem:[#allocation21_spill] sm:$0xff] %v2884_v16  ;;  %v2891_v20 = vpop.f32.mrb[13].mxu1 }
  0xf3   :  { %1164 = vadd.xlane.f32.xlu1 %v1163_v13  ;;  %v2889_v19 = vpop.f32.mrb[14].mxu0  ;;  %1161 = vadd.xlane.f32.xlu0 %v1160_v17  ;;  %v2895_v22 = vpop.f32.mrb[14].mxu1  ;;  %v1237_v13 = vsel %vm1143_vm2, %v1227_v9, 0.0  ;;  %v1234_v17 = vsel %vm1143_vm2, %v1226_v11, 0.0  ;;  %v1289_v11 = vsel %vm1143_vm2, %v2860_v3, 0.0  ;;  %v1352_v44 = vsel %vm1143_vm2, %v2882_v15, 0.0 }
  0xf4   :  { %3951 = vst [vmem:[#allocation22_spill] sm:$0xff] %v2889_v19  ;;  %v2893_v21 = vpop.f32.mrb[15].mxu0  ;;  %3953 = vst [vmem:[#allocation24_spill] sm:$0xff] %v2895_v22  ;;  %v2897_v23 = vpop.f32.mrb[15].mxu1  ;;  %v1371_v42 = vmul.f32 %v2889_v19, %v2889_v19 }
  0xf5   :  { %3952 = vst [vmem:[#allocation23_spill] sm:$0xff] %v2893_v21  ;;  %3954 = vst [vmem:[#allocation25_spill] sm:$0xff] %v2897_v23 }
  0xf7   :  { %1196 = vadd.xlane.f32.xlu1 %v1195_v24  ;;  %1193 = vadd.xlane.f32.xlu0 %v1192_v25  ;;  %v1273_v24 = vsel %vm1143_vm2, %v1263_v14, 0.0  ;;  %v1225_v25 = vmul.f32 %v2837_v54, %v2837_v54  ;;  %v1286_v14 = vsel %vm1143_vm2, %v2850_v61, 0.0 }
  0xf9   :  { %v2905_v28 = vpop.f32.mrb[16].mxu0  ;;  %v2909_v30 = vpop.f32.mrb[16].mxu1 }
  0xfa   :  { %3955 = vst [vmem:[#allocation26_spill] sm:$0xff] %v2905_v28  ;;  %v2907_v29 = vpop.f32.mrb[17].mxu0  ;;  %3956 = vst [vmem:[#allocation27_spill] sm:$0xff] %v2909_v30  ;;  %v2913_v32 = vpop.f32.mrb[17].mxu1 }
  0xfb   :  { %1218 = vadd.xlane.f32.xlu1 %v1217_v26  ;;  %v2911_v31 = vpop.f32.mrb[18].mxu0  ;;  %3958 = vst [vmem:[#allocation29_spill] sm:$0xff] %v2913_v32  ;;  %1215 = vadd.xlane.f32.xlu0 %v1214_v27  ;;  %v2919_v39 = vpop.f32.mrb[18].mxu1  ;;  %v1270_v26 = vsel %vm1143_vm2, %v1262_v18, 0.0  ;;  %v1224_v27 = vmul.f32 %v2825_v48, %v2825_v48 }
  0xfc   :  { %3957 = vst [vmem:[#allocation28_spill] sm:$0xff] %v2911_v31  ;;  %v2917_v37 = vpop.f32.mrb[19].mxu0  ;;  %3960 = vst [vmem:[#allocation31_spill] sm:$0xff] %v2919_v39  ;;  %v2923_v45 = vpop.f32.mrb[19].mxu1 }
  0xfd   :  { %3959 = vst [vmem:[#allocation30_spill] sm:$0xff] %v2917_v37  ;;  %3961 = vst [vmem:[#allocation32_spill] sm:$0xff] %v2923_v45 }
  0xff   :  { %1254 = vadd.xlane.f32.xlu1 %v1253_v33  ;;  %1251 = vadd.xlane.f32.xlu0 %v1250_v43  ;;  %v1231_v33 = vsel %vm1143_vm2, %v1225_v25, 0.0  ;;  %v1261_v43 = vmul.f32 %v2841_v56, %v2841_v56 }
 0x101   :  { %v2925_v47 = vpop.f32.mrb[20].mxu0  ;;  %v2931_v57 = vpop.f32.mrb[20].mxu1 }
 0x102   :  { %3962 = vst [vmem:[#allocation33_spill] sm:$0xff] %v2925_v47  ;;  %v2929_v51 = vpop.f32.mrb[21].mxu0  ;;  %3964 = vst [vmem:[#allocation35_spill] sm:$0xff] %v2931_v57  ;;  %v2937_v60 = vpop.f32.mrb[21].mxu1 }
 0x103   :  { %3963 = vst [vmem:[#allocation34_spill] sm:$0xff] %v2929_v51  ;;  %1212 = vadd.xlane.f32.xlu1 %v1211_v50  ;;  %v2935_v59 = vpop.f32.mrb[22].mxu0  ;;  %3966 = vst [vmem:[#allocation37_spill] sm:$0xff] %v2937_v60  ;;  %1209 = vadd.xlane.f32.xlu0 %v1208_v58  ;;  %v2941_v63 = vpop.f32.mrb[22].mxu1  ;;  %v1228_v50 = vsel %vm1143_vm2, %v1224_v27, 0.0  ;;  %v1260_v58 = vmul.f32 %v2835_v53, %v2835_v53 }
 0x104   :  { %3965 = vst [vmem:[#allocation36_spill] sm:$0xff] %v2935_v59  ;;  %v2939_v62 = vpop.f32.mrb[23].mxu0  ;;  %3968 = vst [vmem:[#allocation39_spill] sm:$0xff] %v2941_v63  ;;  %v2943_v2 = vpop.f32.mrb[23].mxu1 }
 0x105   :  { %3967 = vst [vmem:[#allocation38_spill] sm:$0xff] %v2939_v62  ;;  %3969 = vst [vmem:[#allocation40_spill] sm:$0xff] %v2943_v2 }
 0x107   :  { %1248 = vadd.xlane.f32.xlu1 %v1247_v8  ;;  %1245 = vadd.xlane.f32.xlu0 %v1244_v10  ;;  %v1267_v8 = vsel %vm1143_vm2, %v1261_v43, 0.0  ;;  %v1264_v10 = vsel %vm1143_vm2, %v1260_v58, 0.0  ;;  %v1280_v58 = vsel %vm1143_vm2, %v2855_v0, 0.0 }
 0x109   :  { %v2972_v9 = vpop.f32.mrb[24].mxu0  ;;  %v2983_v18 = vpop.f32.mrb[24].mxu1 }
 0x10a   :  { %3970 = vst [vmem:[#allocation41_spill] sm:$0xff] %v2972_v9  ;;  %3973 = vst [vmem:[#allocation44_spill] sm:$0xff] %v2983_v18  ;;  %v2987_v25 = vpop.f32.mrb[25].mxu1 }
 0x10b   :  { %1238 = vadd.xlane.f32.xlu1 %v1237_v13  ;;  %1235 = vadd.xlane.f32.xlu0 %v1234_v17  ;;  %v2977_v13 = vpop.f32.mrb[25].mxu0  ;;  %3975 = vst [vmem:[#allocation46_spill] sm:$0xff] %v2987_v25  ;;  %v2991_v27 = vpop.f32.mrb[26].mxu1 }
 0x10c   :  { %3971 = vst [vmem:[#allocation42_spill] sm:$0xff] %v2977_v13  ;;  %v2981_v17 = vpop.f32.mrb[26].mxu0  ;;  %3976 = vst [vmem:[#allocation47_spill] sm:$0xff] %v2991_v27  ;;  %v2995_v43 = vpop.f32.mrb[27].mxu1 }
 0x10d   :  { %3972 = vst [vmem:[#allocation43_spill] sm:$0xff] %v2981_v17  ;;  %3977 = vst [vmem:[#allocation48_spill] sm:$0xff] %v2995_v43 }
 0x10f   :  { %1274 = vadd.xlane.f32.xlu1 %v1273_v24  ;;  %1271 = vadd.xlane.f32.xlu0 %v1270_v26  ;;  %v2985_v24 = vpop.f32.mrb[27].mxu0  ;;  %v1325_v26 = vsel %vm1143_vm2, %v2866_v6, 0.0 }
 0x110   :  { %3974 = vst [vmem:[#allocation45_spill] sm:$0xff] %v2985_v24 }
 0x113   :  { %1232 = vadd.xlane.f32.xlu1 %v1231_v33  ;;  %1229 = vadd.xlane.f32.xlu0 %v1228_v50  ;;  %v1322_v33 = vsel %vm1143_vm2, %v2857_v1, 0.0  ;;  %v1283_v50 = vsel %vm1143_vm2, %v2864_v5, 0.0 }
 0x117   :  { %1268 = vadd.xlane.f32.xlu1 %v1267_v8  ;;  %1265 = vadd.xlane.f32.xlu0 %v1264_v10  ;;  %v1319_v8 = vsel %vm1143_vm2, %v2868_v7, 0.0  ;;  %v1299_v10 = vmul.f32 %v2860_v3, %v2860_v3  ;;  %v1406_v3 = vmul.f32 %v2884_v16, %v2884_v16 }
 0x119   :  { %v1414_v55 = vsel %vm1143_vm2, %v1406_v3, 0.0 }
 0x11b   :  { %1290 = vadd.xlane.f32.xlu1 %v1289_v11  ;;  %1287 = vadd.xlane.f32.xlu0 %v1286_v14  ;;  %v1316_v11 = vsel %vm1143_vm2, %v2862_v4, 0.0  ;;  %v1298_v14 = vmul.f32 %v2850_v61, %v2850_v61 }
 0x11f   :  { %1326 = vadd.xlane.f32.xlu1 %v1325_v26  ;;  %1323 = vadd.xlane.f32.xlu0 %v1322_v33  ;;  %v1309_v26 = vsel %vm1143_vm2, %v1299_v10, 0.0  ;;  %v1335_v33 = vmul.f32 %v2866_v6, %v2866_v6  ;;  %v1296_v10 = vmul.f32 %v2855_v0, %v2855_v0  ;;  %v1388_v6 = vsel %vm1143_vm2, %v2891_v20, 0.0 }
 0x121   :  { %v1345_v56 = vsel %vm1143_vm2, %v1335_v33, 0.0  ;;  %v1332_v33 = vmul.f32 %v2862_v4, %v2862_v4 }
 0x123   :  { %1284 = vadd.xlane.f32.xlu1 %v1283_v50  ;;  %1281 = vadd.xlane.f32.xlu0 %v1280_v58  ;;  %v1306_v50 = vsel %vm1143_vm2, %v1298_v14, 0.0  ;;  %v1334_v58 = vmul.f32 %v2857_v1, %v2857_v1  ;;  %v1333_v14 = vmul.f32 %v2868_v7, %v2868_v7  ;;  %v3039_v7 = vpop.f32.mrb[28].mxu1 }
 0x124   :  { %3981 = vst [vmem:[#allocation52_spill] sm:$0xff] %v3039_v7 }
 0x125   :  { %v1342_v54 = vsel %vm1143_vm2, %v1334_v58, 0.0  ;;  %v3028_v58 = vpop.f32.mrb[28].mxu0 }
 0x126   :  { %3978 = vst [vmem:[#allocation49_spill] sm:$0xff] %v3028_v58 }
 0x127   :  { %1320 = vadd.xlane.f32.xlu1 %v1319_v8  ;;  %1317 = vadd.xlane.f32.xlu0 %v1316_v11  ;;  %v1297_v8 = vmul.f32 %v2864_v5, %v2864_v5 }
 0x129   :  { %v1303_v11 = vsel %vm1143_vm2, %v1297_v8, 0.0  ;;  %v3033_v8 = vpop.f32.mrb[29].mxu0 }
 0x12a   :  { %3979 = vst [vmem:[#allocation50_spill] sm:$0xff] %v3033_v8 }
 0x12b   :  { %1310 = vadd.xlane.f32.xlu1 %v1309_v26  ;;  %1307 = vadd.xlane.f32.xlu0 %v1306_v50  ;;  %v1300_v26 = vsel %vm1143_vm2, %v1296_v10, 0.0  ;;  %v1339_v50 = vsel %vm1143_vm2, %v1333_v14, 0.0  ;;  %v1358_v10 = vsel %vm1143_vm2, %v2877_v12, 0.0 }
 0x12f   :  { %1346 = vadd.xlane.f32.xlu1 %v1345_v56  ;;  %1343 = vadd.xlane.f32.xlu0 %v1342_v54  ;;  %v1336_v56 = vsel %vm1143_vm2, %v1332_v33, 0.0  ;;  %v1361_v54 = vsel %vm1143_vm2, %v2889_v19, 0.0  ;;  %v1397_v33 = vsel %vm1143_vm2, %v2895_v22, 0.0 }
 0x133   :  { %1304 = vadd.xlane.f32.xlu1 %v1303_v11  ;;  %1301 = vadd.xlane.f32.xlu0 %v1300_v26  ;;  %v3037_v11 = vpop.f32.mrb[30].mxu0  ;;  %v3043_v26 = vpop.f32.mrb[29].mxu1 }
 0x134   :  { %3980 = vst [vmem:[#allocation51_spill] sm:$0xff] %v3037_v11  ;;  %v3041_v14 = vpop.f32.mrb[31].mxu0  ;;  %3983 = vst [vmem:[#allocation54_spill] sm:$0xff] %v3043_v26 }
 0x135   :  { %3982 = vst [vmem:[#allocation53_spill] sm:$0xff] %v3041_v14 }
 0x137   :  { %1340 = vadd.xlane.f32.xlu1 %v1339_v50  ;;  %1337 = vadd.xlane.f32.xlu0 %v1336_v56  ;;  %v3047_v50 = vpop.f32.mrb[30].mxu1  ;;  %v1394_v56 = vsel %vm1143_vm2, %v2884_v16, 0.0 }
 0x138   :  { %3984 = vst [vmem:[#allocation55_spill] sm:$0xff] %v3047_v50  ;;  %v3051_v5 = vpop.f32.mrb[31].mxu1 }
 0x139   :  { %3985 = vst [vmem:[#allocation56_spill] sm:$0xff] %v3051_v5 }
 0x13b   :  { %1362 = vadd.xlane.f32.xlu1 %v1361_v54  ;;  %1359 = vadd.xlane.f32.xlu0 %v1358_v10  ;;  %v1355_v54 = vsel %vm1143_vm2, %v2893_v21, 0.0  ;;  %v1391_v10 = vsel %vm1143_vm2, %v2897_v23, 0.0 }
 0x13f   :  { %1398 = vadd.xlane.f32.xlu1 %v1397_v33  ;;  %1395 = vadd.xlane.f32.xlu0 %v1394_v56  ;;  %v1370_v33 = vmul.f32 %v2877_v12, %v2877_v12  ;;  %v1381_v56 = vsel %vm1143_vm2, %v1371_v42, 0.0  ;;  %v1368_v42 = vmul.f32 %v2882_v15, %v2882_v15 }
 0x143   :  { %1356 = vadd.xlane.f32.xlu1 %v1355_v54  ;;  %1353 = vadd.xlane.f32.xlu0 %v1352_v44  ;;  %v1407_v54 = vmul.f32 %v2895_v22, %v2895_v22  ;;  %v1378_v44 = vsel %vm1143_vm2, %v1370_v33, 0.0  ;;  %v1405_v33 = vmul.f32 %v2897_v23, %v2897_v23  ;;  %v1478_v23 = vmul.f32 %v2909_v30, %v2909_v30 }
 0x145   :  { %v1417_v19 = vsel %vm1143_vm2, %v1407_v54, 0.0  ;;  %v1404_v54 = vmul.f32 %v2891_v20, %v2891_v20 }
 0x147   :  { %1392 = vadd.xlane.f32.xlu1 %v1391_v10  ;;  %1389 = vadd.xlane.f32.xlu0 %v1388_v6  ;;  %v1369_v10 = vmul.f32 %v2893_v21, %v2893_v21  ;;  %v1408_v3 = vsel %vm1143_vm2, %v1404_v54, 0.0  ;;  %v1443_v54 = vmul.f32 %v2911_v31, %v2911_v31 }
 0x149   :  { %v1375_v6 = vsel %vm1143_vm2, %v1369_v10, 0.0  ;;  %v1469_v10 = vsel %vm1143_vm2, %v2919_v39, 0.0 }
 0x14b   :  { %1382 = vadd.xlane.f32.xlu1 %v1381_v56  ;;  %1379 = vadd.xlane.f32.xlu0 %v1378_v44  ;;  %v1372_v56 = vsel %vm1143_vm2, %v1368_v42, 0.0  ;;  %v1411_v44 = vsel %vm1143_vm2, %v1405_v33, 0.0  ;;  %v1466_v42 = vsel %vm1143_vm2, %v2909_v30, 0.0  ;;  %v1424_v33 = vsel %vm1143_vm2, %v2907_v29, 0.0 }
 0x14f   :  { %1418 = vadd.xlane.f32.xlu1 %v1417_v19  ;;  %1415 = vadd.xlane.f32.xlu0 %v1414_v55  ;;  %v1433_v55 = vsel %vm1143_vm2, %v2911_v31, 0.0  ;;  %v1430_v19 = vsel %vm1143_vm2, %v2905_v28, 0.0 }
 0x153   :  { %1376 = vadd.xlane.f32.xlu1 %v1375_v6  ;;  %1373 = vadd.xlane.f32.xlu0 %v1372_v56  ;;  %v1427_v6 = vsel %vm1143_vm2, %v2917_v37, 0.0  ;;  %v1463_v56 = vsel %vm1143_vm2, %v2923_v45, 0.0 }
 0x157   :  { %1412 = vadd.xlane.f32.xlu1 %v1411_v44  ;;  %1409 = vadd.xlane.f32.xlu0 %v1408_v3  ;;  %v1460_v44 = vsel %vm1143_vm2, %v2913_v32, 0.0  ;;  %v1442_v3 = vmul.f32 %v2905_v28, %v2905_v28 }
 0x15b   :  { %1434 = vadd.xlane.f32.xlu1 %v1433_v55  ;;  %1431 = vadd.xlane.f32.xlu0 %v1430_v19 }
 0x15f   :  { %1470 = vadd.xlane.f32.xlu1 %v1469_v10  ;;  %1467 = vadd.xlane.f32.xlu0 %v1466_v42  ;;  %v1453_v42 = vsel %vm1143_vm2, %v1443_v54, 0.0  ;;  %v1440_v54 = vmul.f32 %v2907_v29, %v2907_v29 }
 0x161   :  { %v1444_v22 = vsel %vm1143_vm2, %v1440_v54, 0.0  ;;  %v1502_v54 = vsel %vm1143_vm2, %v2925_v47, 0.0 }
 0x163   :  { %1428 = vadd.xlane.f32.xlu1 %v1427_v6  ;;  %1425 = vadd.xlane.f32.xlu0 %v1424_v33  ;;  %v1479_v6 = vmul.f32 %v2919_v39, %v2919_v39  ;;  %v1450_v33 = vsel %vm1143_vm2, %v1442_v3, 0.0 }
 0x167   :  { %1464 = vadd.xlane.f32.xlu1 %v1463_v56  ;;  %1461 = vadd.xlane.f32.xlu0 %v1460_v44  ;;  %v1489_v44 = vsel %vm1143_vm2, %v1479_v6, 0.0  ;;  %v1477_v6 = vmul.f32 %v2923_v45, %v2923_v45 }
 0x168   :  { %v1152_v55 = vpop.xlane.xlu1 %1151  ;;  %v1180_v19 = vpop.xlane.xlu0 %1179 }
 0x169   :  { %v3105_v10 = vadd.f32 %v1180_v19, %v1152_v55  ;;  %v1441_v55 = vmul.f32 %v2917_v37, %v2917_v37  ;;  %v1486_v19 = vsel %vm1143_vm2, %v1478_v23, 0.0  ;;  %v1476_v23 = vmul.f32 %v2913_v32, %v2913_v32 }
 0x16b   :  { %1454 = vadd.xlane.f32.xlu1 %v1453_v42  ;;  %1451 = vadd.xlane.f32.xlu0 %v1450_v33  ;;  %v1447_v33 = vsel %vm1143_vm2, %v1441_v55, 0.0  ;;  %v1505_v55 = vsel %vm1143_vm2, %v2935_v59, 0.0 }
 0x16c   :  { %v1155_v56 = vpop.xlane.xlu1 %1154  ;;  %v1146_v21 = vpop.xlane.xlu0 %1145 }
 0x16f   :  { %1490 = vadd.xlane.f32.xlu1 %v1489_v44  ;;  %1487 = vadd.xlane.f32.xlu0 %v1486_v19  ;;  %v1483_v19 = vsel %vm1143_vm2, %v1477_v6, 0.0 }
 0x170   :  { %v1183_v3 = vpop.xlane.xlu1 %1182  ;;  %v1174_v42 = vpop.xlane.xlu0 %1173 }
 0x171   :  { %v1187_v39 = vadd.f32 %v1183_v3, %v1155_v56  ;;  %v3119_v31 = vadd.f32 %v1174_v42, %v1146_v21  ;;  %v1480_v56 = vsel %vm1143_vm2, %v1476_v23, 0.0 }
 0x173   :  { %1448 = vadd.xlane.f32.xlu1 %v1447_v33  ;;  %1445 = vadd.xlane.f32.xlu0 %v1444_v22  ;;  %v1541_v33 = vsel %vm1143_vm2, %v2941_v63, 0.0 }
 0x174   :  { %v1177_v44 = vpop.xlane.xlu1 %1176  ;;  %v1168_v37 = vpop.xlane.xlu0 %1167 }
 0x177   :  { %1484 = vadd.xlane.f32.xlu1 %v1483_v19  ;;  %1481 = vadd.xlane.f32.xlu0 %v1480_v56  ;;  %v1538_v19 = vsel %vm1143_vm2, %v2931_v57, 0.0 }
 0x178   :  { %v1171_v21 = vpop.xlane.xlu1 %1170  ;;  %v1200_v3 = vpop.xlane.xlu0 %1199 }
 0x179   :  { %v3133_v42 = vadd.f32 %v1200_v3, %v1168_v37  ;;  %v1499_v37 = vsel %vm1143_vm2, %v2939_v62, 0.0 }
 0x17b   :  { %1506 = vadd.xlane.f32.xlu1 %v1505_v55  ;;  %1503 = vadd.xlane.f32.xlu0 %v1502_v54  ;;  %v1496_v55 = vsel %vm1143_vm2, %v2929_v51, 0.0 }
 0x17c   :  { %v1203_v22 = vpop.xlane.xlu1 %1202  ;;  %v1149_v23 = vpop.xlane.xlu0 %1148 }
 0x17d   :  { %v3137_v6 = vadd.f32 %v1203_v22, %v1171_v21  ;;  %v1185_v56 = vadd.f32 %v1177_v44, %v1149_v23  ;;  %v1535_v44 = vsel %vm1143_vm2, %v2943_v2, 0.0  ;;  %v1532_v23 = vsel %vm1143_vm2, %v2937_v60, 0.0 }
 0x17f   :  { %1542 = vadd.xlane.f32.xlu1 %v1541_v33  ;;  %1539 = vadd.xlane.f32.xlu0 %v1538_v19  ;;  %v1515_v33 = vmul.f32 %v2935_v59, %v2935_v59  ;;  %v1514_v19 = vmul.f32 %v2925_v47, %v2925_v47 }
 0x180   :  { %v1165_v45 = vpop.xlane.xlu1 %1164  ;;  %v1162_v52 = vpop.xlane.xlu0 %1161 }
 0x181   :  { %v1522_v59 = vsel %vm1143_vm2, %v1514_v19, 0.0  ;;  %v1512_v19 = vmul.f32 %v2929_v51, %v2929_v51 }
 0x183   :  { %1500 = vadd.xlane.f32.xlu1 %v1499_v37  ;;  %1497 = vadd.xlane.f32.xlu0 %v1496_v55 }
 0x184   :  { %v1197_v3 = vpop.xlane.xlu1 %1196  ;;  %v1194_v54 = vpop.xlane.xlu0 %1193 }
 0x185   :  { %v3145_v21 = vadd.f32 %v1197_v3, %v1165_v45  ;;  %v3147_v22 = vadd.f32 %v1194_v54, %v1162_v52  ;;  %v1525_v3 = vsel %vm1143_vm2, %v1515_v33, 0.0  ;;  %v1551_v54 = vmul.f32 %v2941_v63, %v2941_v63 }
 0x187   :  { %1536 = vadd.xlane.f32.xlu1 %v1535_v44  ;;  %1533 = vadd.xlane.f32.xlu0 %v1532_v23  ;;  %v1550_v44 = vmul.f32 %v2931_v57, %v2931_v57 }
 0x188   :  { %v1219_v37 = vpop.xlane.xlu1 %1218  ;;  %v1216_v45 = vpop.xlane.xlu0 %1215 }
 0x189   :  { %v1223_v55 = vadd.f32 %v1219_v37, %v1187_v39  ;;  %v1222_v52 = vadd.f32 %v1216_v45, %v3105_v10  ;;  %v1561_v39 = vsel %vm1143_vm2, %v1551_v54, 0.0  ;;  %v1513_v10 = vmul.f32 %v2939_v62, %v2939_v62 }
 0x18a   :  { %v1558_v33 = vsel %vm1143_vm2, %v1550_v44, 0.0 }
 0x18b   :  { %1526 = vadd.xlane.f32.xlu1 %v1525_v3  ;;  %1523 = vadd.xlane.f32.xlu0 %v1522_v59 }
 0x18c   :  { %v1255_v41 = vpop.xlane.xlu1 %1254  ;;  %v1252_v40 = vpop.xlane.xlu0 %1251 }
 0x18d   :  { %v3164_v23 = vadd.f32 %v1255_v41, %v1223_v55  ;;  %v1258_v47 = vadd.f32 %v1252_v40, %v1222_v52  ;;  %v1519_v41 = vsel %vm1143_vm2, %v1513_v10, 0.0  ;;  %v1549_v40 = vmul.f32 %v2943_v2, %v2943_v2 }
 0x18e   :  { %v1516_v55 = vsel %vm1143_vm2, %v1512_v19, 0.0  ;;  %v1548_v52 = vmul.f32 %v2937_v60, %v2937_v60  ;;  %v1577_v19 = vsel %vm1143_vm2, %v2981_v17, 0.0 }
 0x18f   :  { %1562 = vadd.xlane.f32.xlu1 %v1561_v39  ;;  %1559 = vadd.xlane.f32.xlu0 %v1558_v33 }
 0x190   :  { %v1213_v37 = vpop.xlane.xlu1 %1212  ;;  %v1210_v45 = vpop.xlane.xlu0 %1209 }
 0x191   :  { %v1221_v59 = vadd.f32 %v1213_v37, %v1185_v56  ;;  %v1220_v3 = vadd.f32 %v1210_v45, %v3119_v31  ;;  %v1555_v56 = vsel %vm1143_vm2, %v1549_v40, 0.0  ;;  %v1552_v31 = vsel %vm1143_vm2, %v1548_v52, 0.0 }
 0x192   :  { %v1613_v40 = vsel %vm1143_vm2, %v2991_v27, 0.0 }
 0x193   :  { %1520 = vadd.xlane.f32.xlu1 %v1519_v41  ;;  %1517 = vadd.xlane.f32.xlu0 %v1516_v55  ;;  %v1574_v41 = vsel %vm1143_vm2, %v2972_v9, 0.0 }
 0x194   :  { %v1249_v54 = vpop.xlane.xlu1 %1248  ;;  %v1246_v44 = vpop.xlane.xlu0 %1245 }
 0x195   :  { %v3179_v39 = vadd.f32 %v1249_v54, %v1221_v59  ;;  %v1256_v33 = vadd.f32 %v1246_v44, %v1220_v3  ;;  %v1610_v54 = vsel %vm1143_vm2, %v2983_v18, 0.0 }
 0x197   :  { %1556 = vadd.xlane.f32.xlu1 %v1555_v56  ;;  %1553 = vadd.xlane.f32.xlu0 %v1552_v31 }
 0x198   :  { %v1239_v10 = vpop.xlane.xlu1 %1238  ;;  %v1236_v37 = vpop.xlane.xlu0 %1235 }
 0x199   :  { %v1243_v45 = vadd.f32 %v1239_v10, %v3137_v6  ;;  %v1242_v59 = vadd.f32 %v1236_v37, %v3133_v42  ;;  %v1571_v10 = vsel %vm1143_vm2, %v2985_v24, 0.0 }
 0x19b   :  { %1578 = vadd.xlane.f32.xlu1 %v1577_v19  ;;  %1575 = vadd.xlane.f32.xlu0 %v1574_v41  ;;  %v1568_v19 = vsel %vm1143_vm2, %v2977_v13, 0.0  ;;  %v1587_v41 = vmul.f32 %v2981_v17, %v2981_v17 }
 0x19c   :  { %v1275_v3 = vpop.xlane.xlu1 %1274  ;;  %v1272_v55 = vpop.xlane.xlu0 %1271 }
 0x19d   :  { %v3191_v52 = vadd.f32 %v1275_v3, %v1243_v45  ;;  %v1278_v44 = vadd.f32 %v1272_v55, %v1242_v59  ;;  %v1607_v59 = vsel %vm1143_vm2, %v2995_v43, 0.0  ;;  %v1623_v55 = vmul.f32 %v2991_v27, %v2991_v27 }
 0x19f   :  { %1614 = vadd.xlane.f32.xlu1 %v1613_v40  ;;  %1611 = vadd.xlane.f32.xlu0 %v1610_v54  ;;  %v1633_v62 = vsel %vm1143_vm2, %v1623_v55, 0.0 }
 0x1a0   :  { %v1233_v6 = vpop.xlane.xlu1 %1232  ;;  %v1230_v56 = vpop.xlane.xlu0 %1229 }
 0x1a1   :  { %v1241_v31 = vadd.f32 %v1233_v6, %v3145_v21  ;;  %v1240_v42 = vadd.f32 %v1230_v56, %v3147_v22  ;;  %v1586_v21 = vmul.f32 %v2972_v9, %v2972_v9  ;;  %v1604_v22 = vsel %vm1143_vm2, %v2987_v25, 0.0 }
 0x1a2   :  { %v1597_v6 = vsel %vm1143_vm2, %v1587_v41, 0.0  ;;  %v1622_v56 = vmul.f32 %v2983_v18, %v2983_v18 }
 0x1a3   :  { %1572 = vadd.xlane.f32.xlu1 %v1571_v10  ;;  %1569 = vadd.xlane.f32.xlu0 %v1568_v19  ;;  %v1594_v10 = vsel %vm1143_vm2, %v1586_v21, 0.0 }
 0x1a4   :  { %v1269_v37 = vpop.xlane.xlu1 %1268  ;;  %v1266_v45 = vpop.xlane.xlu0 %1265  ;;  %v1630_v41 = vsel %vm1143_vm2, %v1622_v56, 0.0 }
 0x1a7   :  { %1608 = vadd.xlane.f32.xlu1 %v1607_v59  ;;  %1605 = vadd.xlane.f32.xlu0 %v1604_v22  ;;  %v1585_v59 = vmul.f32 %v2985_v24, %v2985_v24 }
 0x1a8   :  { %v1291_v3 = vpop.xlane.xlu1 %1290  ;;  %v1288_v40 = vpop.xlane.xlu0 %1287 }
 0x1a9   :  { %v1294_v54 = vadd.f32 %v1288_v40, %v1258_v47  ;;  %v1584_v47 = vmul.f32 %v2977_v13, %v2977_v13  ;;  %v1591_v27 = vsel %vm1143_vm2, %v1585_v59, 0.0  ;;  %v1649_v59 = vsel %vm1143_vm2, %v3037_v11, 0.0 }
 0x1ab   :  { %1598 = vadd.xlane.f32.xlu1 %v1597_v6  ;;  %1595 = vadd.xlane.f32.xlu0 %v1594_v10  ;;  %v1621_v6 = vmul.f32 %v2995_v43, %v2995_v43  ;;  %v1588_v55 = vsel %vm1143_vm2, %v1584_v47, 0.0 }
 0x1ac   :  { %v1327_v19 = vpop.xlane.xlu1 %1326  ;;  %v1324_v2 = vpop.xlane.xlu0 %1323 }
 0x1ad   :  { %v1330_v22 = vadd.f32 %v1324_v2, %v1294_v54  ;;  %v1620_v2 = vmul.f32 %v2987_v25, %v2987_v25 }
 0x1af   :  { %1634 = vadd.xlane.f32.xlu1 %v1633_v62  ;;  %1631 = vadd.xlane.f32.xlu0 %v1630_v41  ;;  %v1627_v41 = vsel %vm1143_vm2, %v1621_v6, 0.0  ;;  %v1624_v24 = vsel %vm1143_vm2, %v1620_v2, 0.0  ;;  %v1685_v6 = vsel %vm1143_vm2, %v3047_v50, 0.0 }
 0x1b0   :  { %v3221_v40 = vpop.xlane.xlu1 %1284  ;;  %v1282_v21 = vpop.xlane.xlu0 %1281 }
 0x1b1   :  { %v1292_v10 = vadd.f32 %v1282_v21, %v1256_v33 }
 0x1b3   :  { %1592 = vadd.xlane.f32.xlu1 %v1591_v27  ;;  %1589 = vadd.xlane.f32.xlu0 %v1588_v55  ;;  %v1646_v27 = vsel %vm1143_vm2, %v3028_v58, 0.0 }
 0x1b4   :  { %v1321_v54 = vpop.xlane.xlu1 %1320  ;;  %v1318_v56 = vpop.xlane.xlu0 %1317 }
 0x1b5   :  { %v3229_v62 = vadd.f32 %v1318_v56, %v1292_v10  ;;  %v1277_v56 = vadd.f32 %v1269_v37, %v1241_v31 }
 0x1b7   :  { %1628 = vadd.xlane.f32.xlu1 %v1627_v41  ;;  %1625 = vadd.xlane.f32.xlu0 %v1624_v24  ;;  %v1682_v24 = vsel %vm1143_vm2, %v3039_v7, 0.0  ;;  %v1276_v41 = vadd.f32 %v1266_v45, %v1240_v42  ;;  %v1659_v42 = vmul.f32 %v3037_v11, %v3037_v11  ;;  %v1658_v45 = vmul.f32 %v3028_v58, %v3028_v58 }
 0x1b8   :  { %v3233_v33 = vpop.xlane.xlu1 %1310  ;;  %v1308_v21 = vpop.xlane.xlu0 %1307 }
 0x1b9   :  { %v1314_v47 = vadd.f32 %v1308_v21, %v1278_v44  ;;  %v1643_v21 = vsel %vm1143_vm2, %v3041_v14, 0.0 }
 0x1bb   :  { %1650 = vadd.xlane.f32.xlu1 %v1649_v59  ;;  %1647 = vadd.xlane.f32.xlu0 %v1646_v27  ;;  %v1640_v27 = vsel %vm1143_vm2, %v3033_v8, 0.0 }
 0x1bc   :  { %v3239_v10 = vpop.xlane.xlu1 %1346  ;;  %v1344_v2 = vpop.xlane.xlu0 %1343 }
 0x1bd   :  { %v3245_v55 = vadd.f32 %v1344_v2, %v1314_v47  ;;  %v1295_v47 = vadd.f32 %v1291_v3, %v3164_v23 }
 0x1bf   :  { %1686 = vadd.xlane.f32.xlu1 %v1685_v6  ;;  %1683 = vadd.xlane.f32.xlu0 %v1682_v24  ;;  %v1676_v6 = vsel %vm1143_vm2, %v3043_v26, 0.0 }
 0x1c0   :  { %v1305_v43 = vpop.xlane.xlu1 %1304  ;;  %v1302_v17 = vpop.xlane.xlu0 %1301 }
 0x1c1   :  { %v1313_v44 = vadd.f32 %v1305_v43, %v1277_v56  ;;  %v1312_v59 = vadd.f32 %v1302_v17, %v1276_v41  ;;  %v1679_v17 = vsel %vm1143_vm2, %v3051_v5, 0.0  ;;  %v1331_v43 = vadd.f32 %v1327_v19, %v1295_v47 }
 0x1c2   :  { %v1669_v41 = vsel %vm1143_vm2, %v1659_v42, 0.0  ;;  %v1656_v19 = vmul.f32 %v3033_v8, %v3033_v8 }
 0x1c3   :  { %1644 = vadd.xlane.f32.xlu1 %v1643_v21  ;;  %1641 = vadd.xlane.f32.xlu0 %v1640_v27  ;;  %v1293_v21 = vadd.f32 %v3221_v40, %v3179_v39  ;;  %v1695_v39 = vmul.f32 %v3047_v50, %v3047_v50 }
 0x1c4   :  { %v1341_v63 = vpop.xlane.xlu1 %1340  ;;  %v1338_v2 = vpop.xlane.xlu0 %1337 }
 0x1c5   :  { %v1349_v31 = vadd.f32 %v1341_v63, %v1313_v44  ;;  %v1348_v37 = vadd.f32 %v1338_v2, %v1312_v59  ;;  %v1657_v63 = vmul.f32 %v3041_v14, %v3041_v14  ;;  %v1666_v44 = vsel %vm1143_vm2, %v1658_v45, 0.0 }
 0x1c6   :  { %v1693_v2 = vmul.f32 %v3051_v5, %v3051_v5  ;;  %v1329_v42 = vadd.f32 %v1321_v54, %v1293_v21  ;;  %v1660_v45 = vsel %vm1143_vm2, %v1656_v19, 0.0  ;;  %v1694_v54 = vmul.f32 %v3039_v7, %v3039_v7 }
 0x1c7   :  { %1680 = vadd.xlane.f32.xlu1 %v1679_v17  ;;  %1677 = vadd.xlane.f32.xlu0 %v1676_v6  ;;  %v1705_v21 = vsel %vm1143_vm2, %v1695_v39, 0.0 }
 0x1c8   :  { %v1363_v24 = vpop.xlane.xlu1 %1362  ;;  %v1360_v23 = vpop.xlane.xlu0 %1359 }
 0x1c9   :  { %v1367_v3 = vadd.f32 %v1363_v24, %v1331_v43  ;;  %v1366_v56 = vadd.f32 %v1360_v23, %v1330_v22  ;;  %v1663_v22 = vsel %vm1143_vm2, %v1657_v63, 0.0  ;;  %v1692_v43 = vmul.f32 %v3043_v26, %v3043_v26 }
 0x1cb   :  { %1670 = vadd.xlane.f32.xlu1 %v1669_v41  ;;  %1667 = vadd.xlane.f32.xlu0 %v1666_v44  ;;  %v1696_v63 = vsel %vm1143_vm2, %v1692_v43, 0.0  ;;  %v1315_v41 = vadd.f32 %v3233_v33, %v3191_v52 }
 0x1cc   :  { %v1399_v59 = vpop.xlane.xlu1 %1398  ;;  %v1396_v27 = vpop.xlane.xlu0 %1395 }
 0x1cd   :  { %v1403_v47 = vadd.f32 %v1399_v59, %v1367_v3  ;;  %v1402_v17 = vadd.f32 %v1396_v27, %v1366_v56  ;;  %v1699_v3 = vsel %vm1143_vm2, %v1693_v2, 0.0  ;;  %v1702_v27 = vsel %vm1143_vm2, %v1694_v54, 0.0 }
 0x1cf   :  { %1664 = vadd.xlane.f32.xlu1 %v1663_v22  ;;  %1661 = vadd.xlane.f32.xlu0 %v1660_v45 }
 0x1d0   :  { %v1357_v6 = vpop.xlane.xlu1 %1356  ;;  %v1354_v24 = vpop.xlane.xlu0 %1353 }
 0x1d1   :  { %v1365_v23 = vadd.f32 %v1357_v6, %v1329_v42  ;;  %v1364_v40 = vadd.f32 %v1354_v24, %v3229_v62  ;;  %v1351_v62 = vadd.f32 %v3239_v10, %v1315_v41 }
 0x1d3   :  { %1700 = vadd.xlane.f32.xlu1 %v1699_v3  ;;  %1697 = vadd.xlane.f32.xlu0 %v1696_v63 }
 0x1d4   :  { %v1393_v56 = vpop.xlane.xlu1 %1392  ;;  %v1390_v19 = vpop.xlane.xlu0 %1389 }
 0x1d5   :  { %v1401_v44 = vadd.f32 %v1393_v56, %v1365_v23  ;;  %v1400_v59 = vadd.f32 %v1390_v19, %v1364_v40 }
 0x1d7   :  { %1706 = vadd.xlane.f32.xlu1 %v1705_v21  ;;  %1703 = vadd.xlane.f32.xlu0 %v1702_v27 }
 0x1d8   :  { %v1383_v2 = vpop.xlane.xlu1 %1382  ;;  %v1380_v22 = vpop.xlane.xlu0 %1379 }
 0x1d9   :  { %v1387_v42 = vadd.f32 %v1383_v2, %v1351_v62  ;;  %v1386_v43 = vadd.f32 %v1380_v22, %v3245_v55  ;;  %v2586_v22 = vmov 0  }
 0x1da   :  { %2544 = vset.pattern.permute.xlu0 %v2586_v22  ;;  %2545 = vset.pattern.permute.xlu1 %v2586_v22 }
 0x1dc   :  { %v1419_v45 = vpop.xlane.xlu1 %1418  ;;  %v1416_v6 = vpop.xlane.xlu0 %1415 }
 0x1dd   :  { %v1423_v24 = vadd.f32 %v1419_v45, %v1387_v42  ;;  %v1422_v52 = vadd.f32 %v1416_v6, %v1386_v43 }
 0x1e0   :  { %v1377_v33 = vpop.xlane.xlu1 %1376  ;;  %v1374_v23 = vpop.xlane.xlu0 %1373 }
 0x1e1   :  { %v1385_v40 = vadd.f32 %v1377_v33, %v1349_v31  ;;  %v1384_v3 = vadd.f32 %v1374_v23, %v1348_v37 }
 0x1e4   :  { %v1413_v39 = vpop.xlane.xlu1 %1412  ;;  %v1410_v63 = vpop.xlane.xlu0 %1409 }
 0x1e5   :  { %v1421_v10 = vadd.f32 %v1413_v39, %v1385_v40  ;;  %v1420_v56 = vadd.f32 %v1410_v63, %v1384_v3 }
 0x1e8   :  { %v1435_v54 = vpop.xlane.xlu1 %1434  ;;  %v1432_v41 = vpop.xlane.xlu0 %1431 }
 0x1e9   :  { %v1439_v19 = vadd.f32 %v1435_v54, %v1403_v47  ;;  %v1438_v21 = vadd.f32 %v1432_v41, %v1402_v17 }
 0x1ec   :  { %v1471_v27 = vpop.xlane.xlu1 %1470  ;;  %v1468_v62 = vpop.xlane.xlu0 %1467 }
 0x1ed   :  { %v1475_v2 = vadd.f32 %v1471_v27, %v1439_v19  ;;  %v1474_v55 = vadd.f32 %v1468_v62, %v1438_v21 }
 0x1f0   :  { %v1429_v42 = vpop.xlane.xlu1 %1428  ;;  %v1426_v43 = vpop.xlane.xlu0 %1425 }
 0x1f1   :  { %v1437_v45 = vadd.f32 %v1429_v42, %v1401_v44  ;;  %v1436_v31 = vadd.f32 %v1426_v43, %v1400_v59 }
 0x1f4   :  { %v1465_v37 = vpop.xlane.xlu1 %1464  ;;  %v1462_v6 = vpop.xlane.xlu0 %1461 }
 0x1f5   :  { %v1473_v33 = vadd.f32 %v1465_v37, %v1437_v45  ;;  %v1472_v23 = vadd.f32 %v1462_v6, %v1436_v31 }
 0x1f8   :  { %v1455_v40 = vpop.xlane.xlu1 %1454  ;;  %v1452_v3 = vpop.xlane.xlu0 %1451 }
 0x1f9   :  { %v1459_v39 = vadd.f32 %v1455_v40, %v1423_v24  ;;  %v1458_v47 = vadd.f32 %v1452_v3, %v1422_v52 }
 0x1fc   :  { %v1491_v17 = vpop.xlane.xlu1 %1490  ;;  %v1488_v63 = vpop.xlane.xlu0 %1487 }
 0x1fd   :  { %v1495_v54 = vadd.f32 %v1491_v17, %v1459_v39  ;;  %v1494_v41 = vadd.f32 %v1488_v63, %v1458_v47 }
 0x200   :  { %v1449_v19 = vpop.xlane.xlu1 %1448  ;;  %v1446_v21 = vpop.xlane.xlu0 %1445 }
 0x201   :  { %v1457_v27 = vadd.f32 %v1449_v19, %v1421_v10  ;;  %v1456_v62 = vadd.f32 %v1446_v21, %v1420_v56 }
 0x204   :  { %v1485_v22 = vpop.xlane.xlu1 %1484  ;;  %v1482_v5 = vpop.xlane.xlu0 %1481 }
 0x205   :  { %v1493_v44 = vadd.f32 %v1485_v22, %v1457_v27  ;;  %v1492_v59 = vadd.f32 %v1482_v5, %v1456_v62 }
 0x208   :  { %v1507_v42 = vpop.xlane.xlu1 %1506  ;;  %v1504_v43 = vpop.xlane.xlu0 %1503 }
 0x209   :  { %v1511_v45 = vadd.f32 %v1507_v42, %v1475_v2  ;;  %v1510_v31 = vadd.f32 %v1504_v43, %v1474_v55 }
 0x20c   :  { %v1543_v37 = vpop.xlane.xlu1 %1542  ;;  %v1540_v6 = vpop.xlane.xlu0 %1539 }
 0x20d   :  { %v1547_v24 = vadd.f32 %v1543_v37, %v1511_v45  ;;  %v1546_v52 = vadd.f32 %v1540_v6, %v1510_v31 }
 0x210   :  { %v1501_v40 = vpop.xlane.xlu1 %1500  ;;  %v1498_v3 = vpop.xlane.xlu0 %1497 }
 0x211   :  { %v1509_v39 = vadd.f32 %v1501_v40, %v1473_v33  ;;  %v1508_v47 = vadd.f32 %v1498_v3, %v1472_v23 }
 0x214   :  { %v1537_v17 = vpop.xlane.xlu1 %1536  ;;  %v1534_v63 = vpop.xlane.xlu0 %1533 }
 0x215   :  { %v1545_v10 = vadd.f32 %v1537_v17, %v1509_v39  ;;  %v1544_v56 = vadd.f32 %v1534_v63, %v1508_v47 }
 0x218   :  { %v1527_v19 = vpop.xlane.xlu1 %1526  ;;  %v1524_v21 = vpop.xlane.xlu0 %1523 }
 0x219   :  { %v1531_v27 = vadd.f32 %v1527_v19, %v1495_v54  ;;  %v1530_v5 = vadd.f32 %v1524_v21, %v1494_v41 }
 0x21c   :  { %v1563_v62 = vpop.xlane.xlu1 %1562  ;;  %v1560_v22 = vpop.xlane.xlu0 %1559 }
 0x21d   :  { %v1567_v2 = vadd.f32 %v1563_v62, %v1531_v27  ;;  %v1566_v55 = vadd.f32 %v1560_v22, %v1530_v5 }
 0x220   :  { %v1521_v42 = vpop.xlane.xlu1 %1520  ;;  %v1518_v43 = vpop.xlane.xlu0 %1517 }
 0x221   :  { %v1529_v30 = vadd.f32 %v1521_v42, %v1493_v44  ;;  %v1528_v16 = vadd.f32 %v1518_v43, %v1492_v59 }
 0x224   :  { %v1557_v45 = vpop.xlane.xlu1 %1556  ;;  %v1554_v31 = vpop.xlane.xlu0 %1553 }
 0x225   :  { %v1565_v61 = vadd.f32 %v1557_v45, %v1529_v30  ;;  %v1564_v34 = vadd.f32 %v1554_v31, %v1528_v16 }
 0x228   :  { %v1579_v37 = vpop.xlane.xlu1 %1578  ;;  %v1576_v6 = vpop.xlane.xlu0 %1575 }
 0x229   :  { %v1583_v49 = vadd.f32 %v1579_v37, %v1547_v24  ;;  %v1582_v26 = vadd.f32 %v1576_v6, %v1546_v52 }
 0x22c   :  { %v1615_v33 = vpop.xlane.xlu1 %1614  ;;  %v1612_v23 = vpop.xlane.xlu0 %1611 }
 0x22d   :  { %v1619_v25 = vadd.f32 %v1615_v33, %v1583_v49  ;;  %v1618_v51 = vadd.f32 %v1612_v23, %v1582_v26 }
 0x230   :  { %v1573_v40 = vpop.xlane.xlu1 %1572  ;;  %v1570_v3 = vpop.xlane.xlu0 %1569 }
 0x231   :  { %v1581_v18 = vadd.f32 %v1573_v40, %v1545_v10  ;;  %v1580_v57 = vadd.f32 %v1570_v3, %v1544_v56 }
 0x234   :  { %v1609_v39 = vpop.xlane.xlu1 %1608  ;;  %v1606_v47 = vpop.xlane.xlu0 %1605 }
 0x235   :  { %v1617_v28 = vadd.f32 %v1609_v39, %v1581_v18  ;;  %v1616_v12 = vadd.f32 %v1606_v47, %v1580_v57 }
 0x238   :  { %v1599_v17 = vpop.xlane.xlu1 %1598  ;;  %v1596_v63 = vpop.xlane.xlu0 %1595 }
 0x239   :  { %v1603_v42 = vadd.f32 %v1599_v17, %v1567_v2 }
 0x23c   :  { %v1635_v54 = vpop.xlane.xlu1 %1634  ;;  %v1632_v41 = vpop.xlane.xlu0 %1631 }
 0x240   :  { %v1593_v19 = vpop.xlane.xlu1 %1592  ;;  %v1590_v21 = vpop.xlane.xlu0 %1589 }
 0x241   :  { %v1601_v13 = vadd.f32 %v1593_v19, %v1565_v61  ;;  %v1600_v32 = vadd.f32 %v1590_v21, %v1564_v34  ;;  %v1639_v61 = vadd.f32 %v1635_v54, %v1603_v42 }
 0x244   :  { %v1629_v27 = vpop.xlane.xlu1 %1628  ;;  %v1626_v5 = vpop.xlane.xlu0 %1625 }
 0x245   :  { %v1637_v56 = vadd.f32 %v1629_v27, %v1601_v13  ;;  %v1636_v59 = vadd.f32 %v1626_v5, %v1600_v32  ;;  %v1731_v27 = vld [vmem:[%s3873_s2 + $0x18] sm:$0xff]  ;;  %v1730_v5 = vld [vmem:[%s3873_s2 + $0x10] sm:$0xff] }
 0x248   :  { %v1651_v62 = vpop.xlane.xlu1 %1650  ;;  %v1648_v22 = vpop.xlane.xlu0 %1647 }
 0x249   :  { %v1655_v44 = vadd.f32 %v1651_v62, %v1619_v25  ;;  %v1654_v57 = vadd.f32 %v1648_v22, %v1618_v51 }
 0x24c   :  { %v1687_v14 = vpop.xlane.xlu1 %1686  ;;  %v1684_v50 = vpop.xlane.xlu0 %1683 }
 0x24d   :  { %v1691_v30 = vadd.f32 %v1687_v14, %v1655_v44  ;;  %v1690_v16 = vadd.f32 %v1684_v50, %v1654_v57  ;;  %v1746_v57 = vld [vmem:[%s3874_s3 + $0x10] sm:$0xff] }
 0x24f   :  { %v1714_v32 = vmul.f32 0.03125, %v1690_v16  ;;  %v1747_v16 = vld [vmem:[%s3874_s3 + $0x18] sm:$0xff] }
 0x250   :  { %v1645_v11 = vpop.xlane.xlu1 %1644  ;;  %v1642_v7 = vpop.xlane.xlu0 %1641 }
 0x251   :  { %v1653_v46 = vadd.f32 %v1645_v11, %v1617_v28  ;;  %v1652_v8 = vadd.f32 %v1642_v7, %v1616_v12  ;;  %v1602_v11 = vadd.f32 %v1596_v63, %v1566_v55  ;;  %v1722_v33 = vmul.f32 %v1714_v32, %v1714_v32  ;;  %v1728_v63 = vld [vmem:[%s3873_s2] sm:$0xff] }
 0x253   :  { %v1638_v34 = vadd.f32 %v1632_v41, %v1602_v11 }
 0x254   :  { %v1681_v58 = vpop.xlane.xlu1 %1680  ;;  %v1678_v9 = vpop.xlane.xlu0 %1677 }
 0x255   :  { %v1689_v60 = vadd.f32 %v1681_v58, %v1653_v46  ;;  %v1688_v10 = vadd.f32 %v1678_v9, %v1652_v8  ;;  %v1715_v58 = vmul.f32 0.03125, %v1691_v30  ;;  %v1744_v30 = vld [vmem:[%s3874_s3] sm:$0xff] }
 0x257   :  { %v1713_v24 = vmul.f32 0.03125, %v1689_v60  ;;  %v1712_v52 = vmul.f32 0.03125, %v1688_v10  ;;  %v1723_v31 = vmul.f32 %v1715_v58, %v1715_v58 }
 0x258   :  { %v1671_v1 = vpop.xlane.xlu1 %1670  ;;  %v1668_v35 = vpop.xlane.xlu0 %1667 }
 0x259   :  { %v1721_v13 = vmul.f32 %v1713_v24, %v1713_v24  ;;  %v1675_v25 = vadd.f32 %v1671_v1, %v1639_v61  ;;  %v1720_v51 = vmul.f32 %v1712_v52, %v1712_v52  ;;  %v1674_v26 = vadd.f32 %v1668_v35, %v1638_v34  ;;  %v1729_v35 = vld [vmem:[%s3873_s2 + $0x8] sm:$0xff] }
 0x25c   :  { %v1665_v40 = vpop.xlane.xlu1 %1664  ;;  %v1662_v18 = vpop.xlane.xlu0 %1661 }
 0x25d   :  { %v1673_v28 = vadd.f32 %v1665_v40, %v1637_v56  ;;  %v1672_v7 = vadd.f32 %v1662_v18, %v1636_v59 }
 0x260   :  { %v1701_v49 = vpop.xlane.xlu1 %1700  ;;  %v1698_v46 = vpop.xlane.xlu0 %1697 }
 0x261   :  { %v1709_v12 = vadd.f32 %v1701_v49, %v1673_v28  ;;  %v1708_v9 = vadd.f32 %v1698_v46, %v1672_v7  ;;  %v1745_v28 = vld [vmem:[%s3874_s3 + $0x8] sm:$0xff] }
 0x263   :  { %v1717_v8 = vmul.f32 0.03125, %v1709_v12  ;;  %v1716_v14 = vmul.f32 0.03125, %v1708_v9 }
 0x264   :  { %v1707_v60 = vpop.xlane.xlu1 %1706  ;;  %v1704_v55 = vpop.xlane.xlu0 %1703 }
 0x265   :  { %v1725_v2 = vsub.f32 %v1717_v8, %v1721_v13  ;;  %v1711_v50 = vadd.f32 %v1707_v60, %v1675_v25  ;;  %v1724_v43 = vsub.f32 %v1716_v14, %v1720_v51  ;;  %v1710_v45 = vadd.f32 %v1704_v55, %v1674_v26 }
 0x267   :  { %v1733_v37 = vadd.f32 1e-05, %v1725_v2  ;;  %v1719_v6 = vmul.f32 0.03125, %v1711_v50  ;;  %v1732_v23 = vadd.f32 1e-05, %v1724_v43  ;;  %v1718_v3 = vmul.f32 0.03125, %v1710_v45 }
 0x268   :  { %v3993_v2 = vld [vmem:[#allocation2_spill] sm:$0xff]  ;;  %v3994_v50 = vld [vmem:[#allocation3_spill] sm:$0xff]  ;;  %v3995_v45 = vld [vmem:[#allocation8_spill] sm:$0xff] }
 0x269   :  { %2578 = vrsqrt.f32 %v1733_v37  ;;  %v1727_v39 = vsub.f32 %v1719_v6, %v1723_v31  ;;  %v1726_v1 = vsub.f32 %v1718_v3, %v1722_v33  ;;  %v3996_v37 = vld [vmem:[#allocation9_spill] sm:$0xff]  ;;  %v3997_v33 = vld [vmem:[#allocation14_spill] sm:$0xff]  ;;  %v3998_v3 = vld [vmem:[#allocation15_spill] sm:$0xff] }
 0x26a   :  { %2580 = vrsqrt.f32 %v1732_v23 }
 0x26b   :  { %v1735_v47 = vadd.f32 1e-05, %v1727_v39  ;;  %v1734_v17 = vadd.f32 1e-05, %v1726_v1  ;;  %v3999_v1 = vld [vmem:[#allocation20_spill] sm:$0xff] }
 0x26d   :  { %2582 = vrsqrt.f32 %v1735_v47 }
 0x26e   :  { %2584 = vrsqrt.f32 %v1734_v17  ;;  %v4000_v17 = vld [vmem:[#allocation21_spill] sm:$0xff] }
 0x273   :  { %v2579_v54 = vpop.eup %2578 }
 0x274   :  { %v2581_v41 = vpop.eup %2580  ;;  %v1741_v19 = vmul.f32 %v2579_v54, %v1729_v35 }
 0x275   :  { %v1740_v21 = vmul.f32 %v2581_v41, %v1728_v63  ;;  %v4001_v63 = vld [vmem:[#allocation26_spill] sm:$0xff]  ;;  %v4002_v41 = vld [vmem:[#allocation27_spill] sm:$0xff] }
 0x276   :  { %v1749_v62 = vmul.f32 %v1741_v19, %v1713_v24 }
 0x277   :  { %v2583_v22 = vpop.eup %2582  ;;  %1758 = vperm.xlu0 %2544, %v1740_v21   ;;  %v1748_v10 = vmul.f32 %v1740_v21, %v1712_v52  ;;  %v4003_v21 = vld [vmem:[#allocation33_spill] sm:$0xff] }
 0x278   :  { %v2585_v40 = vpop.eup %2584  ;;  %v1743_v56 = vmul.f32 %v2583_v22, %v1731_v27  ;;  %v1753_v11 = vsub.f32 %v1745_v28, %v1749_v62  ;;  %v4005_v22 = vld [vmem:[#allocation41_spill] sm:$0xff] }
 0x279   :  { %v1742_v44 = vmul.f32 %v2585_v40, %v1730_v5  ;;  %v1752_v24 = vsub.f32 %v1744_v30, %v1748_v10  ;;  %v4004_v5 = vld [vmem:[#allocation35_spill] sm:$0xff]  ;;  %v4006_v40 = vld [vmem:[#allocation44_spill] sm:$0xff]  ;;  %v4010_v28 = vld [vmem:[#allocation5_spill] sm:$0xff] }
 0x27a   :  { %v1751_v18 = vmul.f32 %v1743_v56, %v1715_v58  ;;  %v4009_v30 = vld [vmem:[#allocation4_spill] sm:$0xff] }
 0x27b   :  { %1768 = vperm.xlu1 %2545, %v1742_v44   ;;  %v1750_v59 = vmul.f32 %v1742_v44, %v1714_v32  ;;  %v4007_v44 = vld [vmem:[#allocation49_spill] sm:$0xff] }
 0x27c   :  { %v1755_v52 = vsub.f32 %v1747_v16, %v1751_v18  ;;  %v4011_v16 = vld [vmem:[#allocation10_spill] sm:$0xff] }
 0x27d   :  { %v1754_v42 = vsub.f32 %v1746_v57, %v1750_v59  ;;  %v4008_v59 = vld [vmem:[#allocation52_spill] sm:$0xff] }
 0x27f   :  { %1773 = vperm.xlu1 %2545, %v1743_v56  }
 0x283   :  { %1763 = vperm.xlu1 %2545, %v1741_v19  }
 0x287   :  { %1792 = vperm.xlu1 %2545, %v1754_v42  }
 0x28b   :  { %1782 = vperm.xlu1 %2545, %v1752_v24  }
 0x28f   :  { %1787 = vperm.xlu1 %2545, %v1753_v11  }
 0x293   :  { %1797 = vperm.xlu1 %2545, %v1755_v52  }
 0x2f6   :  { %v1759_v7 = vpop.permute.xlu0 %1758 }
 0x2f7   :  { %v3312_v49 = vmul.f32 %v1759_v7, %v2801_v36  ;;  %v3315_v61 = vmul.f32 %v1759_v7, %v2805_v38  ;;  %v3318_v46 = vmul.f32 %v1759_v7, %v2825_v48  ;;  %v3321_v12 = vmul.f32 %v1759_v7, %v2835_v53  ;;  %v3986_v48 = vld [vmem:[#allocation29_spill] sm:$0xff]  ;;  %v3987_v53 = vld [vmem:[#allocation34_spill] sm:$0xff] }
 0x2f8   :  { %v3324_v34 = vmul.f32 %v1759_v7, %v2855_v0  ;;  %v3327_v9 = vmul.f32 %v1759_v7, %v2862_v4  ;;  %v3330_v58 = vmul.f32 %v1759_v7, %v2882_v15  ;;  %v3333_v36 = vmul.f32 %v1759_v7, %v2891_v20  ;;  %v3988_v0 = vld [vmem:[#allocation37_spill] sm:$0xff]  ;;  %v3989_v4 = vld [vmem:[#allocation42_spill] sm:$0xff] }
 0x2f9   :  { %v3336_v38 = vmul.f32 %v1759_v7, %v2907_v29  ;;  %v3339_v13 = vmul.f32 %v1759_v7, %v3986_v48  ;;  %v3342_v25 = vmul.f32 %v1759_v7, %v3987_v53  ;;  %v3345_v8 = vmul.f32 %v1759_v7, %v3988_v0  ;;  %v3990_v15 = vld [vmem:[#allocation46_spill] sm:$0xff]  ;;  %v4013_v53 = vld [vmem:[#allocation16_spill] sm:$0xff] }
 0x2fa   :  { %v3348_v32 = vmul.f32 %v1759_v7, %v3989_v4  ;;  %v3351_v51 = vmul.f32 %v1759_v7, %v3990_v15  ;;  %v3991_v20 = vld [vmem:[#allocation50_spill] sm:$0xff]  ;;  %v1769_v60 = vpop.permute.xlu1 %1768 }
 0x2fb   :  { %v3354_v26 = vmul.f32 %v1759_v7, %v3991_v20  ;;  %v3992_v29 = vld [vmem:[#allocation54_spill] sm:$0xff]  ;;  %v1778_v55 = vmul.f32 %v3993_v2, %v1769_v60  ;;  %v1822_v43 = vmul.f32 %v3994_v50, %v1769_v60  ;;  %v1847_v31 = vmul.f32 %v3995_v45, %v1769_v60  ;;  %v4021_v50 = vld [vmem:[#allocation28_spill] sm:$0xff] }
 0x2fc   :  { %v3357_v14 = vmul.f32 %v1759_v7, %v3992_v29  ;;  %v1872_v6 = vmul.f32 %v3996_v37, %v1769_v60  ;;  %v1897_v23 = vmul.f32 %v3997_v33, %v1769_v60  ;;  %v1922_v39 = vmul.f32 %v3998_v3, %v1769_v60  ;;  %v4012_v7 = vld [vmem:[#allocation12_spill] sm:$0xff]  ;;  %v4015_v4 = vld [vmem:[#allocation18_spill] sm:$0xff]  ;;  %v4023_v37 = vld [vmem:[#allocation31_spill] sm:$0xff] }
 0x2fd   :  { %v1947_v47 = vmul.f32 %v3999_v1, %v1769_v60  ;;  %v1972_v35 = vmul.f32 %v4000_v17, %v1769_v60  ;;  %v3368_v54 = vmul.f32 %v4001_v63, %v1769_v60  ;;  %v3371_v19 = vmul.f32 %v4002_v41, %v1769_v60  ;;  %v4017_v20 = vld [vmem:[#allocation22_spill] sm:$0xff]  ;;  %v4025_v3 = vld [vmem:[#allocation36_spill] sm:$0xff]  ;;  %v4027_v17 = vld [vmem:[#allocation39_spill] sm:$0xff] }
 0x2fe   :  { %v3374_v27 = vmul.f32 %v4003_v21, %v1769_v60  ;;  %v3377_v62 = vmul.f32 %v4004_v5, %v1769_v60  ;;  %v3380_v10 = vmul.f32 %v4005_v22, %v1769_v60  ;;  %v3383_v56 = vmul.f32 %v4006_v40, %v1769_v60  ;;  %v1774_v42 = vpop.permute.xlu1 %1773  ;;  %v4029_v21 = vld [vmem:[#allocation43_spill] sm:$0xff] }
 0x2ff   :  { %v3386_v18 = vmul.f32 %v4007_v44, %v1769_v60  ;;  %v3389_v57 = vmul.f32 %v4008_v59, %v1769_v60  ;;  %v3392_v24 = vmul.f32 %v4009_v30, %v1774_v42  ;;  %v3395_v11 = vmul.f32 %v4010_v28, %v1774_v42  ;;  %v4019_v60 = vld [vmem:[#allocation24_spill] sm:$0xff]  ;;  %v4031_v22 = vld [vmem:[#allocation47_spill] sm:$0xff] }
 0x300   :  { %v3398_v52 = vmul.f32 %v4011_v16, %v1774_v42  ;;  %v3401_v48 = vmul.f32 %v4012_v7, %v1774_v42  ;;  %v3404_v0 = vmul.f32 %v4013_v53, %v1774_v42  ;;  %v3407_v15 = vmul.f32 %v4015_v4, %v1774_v42  ;;  %v4033_v44 = vld [vmem:[#allocation51_spill] sm:$0xff]  ;;  %v4037_v16 = vld [vmem:[#allocation6_spill] sm:$0xff] }
 0x301   :  { %v3410_v29 = vmul.f32 %v4017_v20, %v1774_v42  ;;  %v3413_v2 = vmul.f32 %v4019_v60, %v1774_v42  ;;  %v3416_v45 = vmul.f32 %v4021_v50, %v1774_v42  ;;  %v3419_v33 = vmul.f32 %v4023_v37, %v1774_v42  ;;  %v4035_v30 = vld [vmem:[#allocation55_spill] sm:$0xff]  ;;  %v4040_v50 = vld [vmem:[#allocation13_spill] sm:$0xff] }
 0x302   :  { %4014 = vst [vmem:[#allocation29_spill] sm:$0xff] %v3404_v0  ;;  %4016 = vst [vmem:[#allocation34_spill] sm:$0xff] %v3407_v15  ;;  %v3422_v1 = vmul.f32 %v4025_v3, %v1774_v42  ;;  %v3425_v63 = vmul.f32 %v4027_v17, %v1774_v42  ;;  %v1764_v41 = vpop.permute.xlu1 %1763  ;;  %v3428_v5 = vmul.f32 %v4029_v21, %v1774_v42  ;;  %v4038_v53 = vld [vmem:[#allocation7_spill] sm:$0xff]  ;;  %v4041_v3 = vld [vmem:[#allocation17_spill] sm:$0xff] }
 0x303   :  { %4018 = vst [vmem:[#allocation37_spill] sm:$0xff] %v3410_v29  ;;  %4020 = vst [vmem:[#allocation42_spill] sm:$0xff] %v3413_v2  ;;  %v3431_v40 = vmul.f32 %v4031_v22, %v1774_v42  ;;  %v3434_v59 = vmul.f32 %v4033_v44, %v1774_v42  ;;  %v3437_v28 = vmul.f32 %v4035_v30, %v1774_v42  ;;  %v4039_v20 = vld [vmem:[#allocation11_spill] sm:$0xff]  ;;  %v4044_v30 = vld [vmem:[#allocation25_spill] sm:$0xff] }
 0x304   :  { %4022 = vst [vmem:[#allocation46_spill] sm:$0xff] %v3416_v45  ;;  %4024 = vst [vmem:[#allocation50_spill] sm:$0xff] %v3419_v33  ;;  %v3440_v7 = vmul.f32 %v1764_v41, %v4037_v16  ;;  %v3443_v4 = vmul.f32 %v1764_v41, %v4038_v53  ;;  %v3446_v60 = vmul.f32 %v1764_v41, %v4039_v20  ;;  %v4042_v21 = vld [vmem:[#allocation19_spill] sm:$0xff]  ;;  %v4045_v53 = vld [vmem:[#allocation30_spill] sm:$0xff] }
 0x305   :  { %4026 = vst [vmem:[#allocation54_spill] sm:$0xff] %v3422_v1  ;;  %4028 = vst [vmem:[#allocation2_spill] sm:$0xff] %v3425_v63  ;;  %v3449_v37 = vmul.f32 %v1764_v41, %v4040_v50  ;;  %v3452_v17 = vmul.f32 %v1764_v41, %v4041_v3  ;;  %v3455_v22 = vmul.f32 %v1764_v41, %v4042_v21  ;;  %v4043_v42 = vld [vmem:[#allocation23_spill] sm:$0xff]  ;;  %v4046_v20 = vld [vmem:[#allocation32_spill] sm:$0xff] }
 0x306   :  { %4030 = vst [vmem:[#allocation3_spill] sm:$0xff] %v3428_v5  ;;  %4032 = vst [vmem:[#allocation8_spill] sm:$0xff] %v3431_v40  ;;  %v3458_v44 = vmul.f32 %v1764_v41, %v4043_v42  ;;  %v3461_v16 = vmul.f32 %v1764_v41, %v4044_v30  ;;  %v4047_v50 = vld [vmem:[#allocation38_spill] sm:$0xff]  ;;  %v4048_v3 = vld [vmem:[#allocation40_spill] sm:$0xff] }
 0x307   :  { %4034 = vst [vmem:[#allocation9_spill] sm:$0xff] %v3434_v59  ;;  %4036 = vst [vmem:[#allocation14_spill] sm:$0xff] %v3437_v28  ;;  %v3464_v28 = vmul.f32 %v1764_v41, %v4045_v53  ;;  %v3467_v59 = vmul.f32 %v1764_v41, %v4046_v20  ;;  %v3470_v40 = vmul.f32 %v1764_v41, %v4047_v50  ;;  %v4049_v21 = vld [vmem:[#allocation45_spill] sm:$0xff]  ;;  %v4050_v42 = vld [vmem:[#allocation48_spill] sm:$0xff]  ;;  %v3487_v20 = vpop.permute.xlu1 %1792 }
 0x308   :  { %v3473_v5 = vmul.f32 %v1764_v41, %v4048_v3  ;;  %v3476_v63 = vmul.f32 %v1764_v41, %v4049_v21  ;;  %v3479_v1 = vmul.f32 %v1764_v41, %v4050_v42  ;;  %v4051_v30 = vld [vmem:[#allocation53_spill] sm:$0xff]  ;;  %v4052_v53 = vld [vmem:[#allocation56_spill] sm:$0xff]  ;;  %v1802_v50 = vadd.f32 %v3487_v20, %v1778_v55 }
 0x309   :  { %v3482_v33 = vmul.f32 %v1764_v41, %v4051_v30  ;;  %v3485_v45 = vmul.f32 %v1764_v41, %v4052_v53  ;;  %v1826_v2 = vadd.f32 %v1822_v43, %v3487_v20  ;;  %v1851_v3 = vadd.f32 %v1847_v31, %v3487_v20 }
 0x30a   :  { %v1876_v21 = vadd.f32 %v1872_v6, %v3487_v20  ;;  %v1901_v29 = vadd.f32 %v1897_v23, %v3487_v20  ;;  %v1926_v42 = vadd.f32 %v1922_v39, %v3487_v20  ;;  %v1951_v30 = vadd.f32 %v1947_v47, %v3487_v20 }
 0x30b   :  { %v1976_v15 = vadd.f32 %v1972_v35, %v3487_v20  ;;  %vm1806_vm3 = vcmp.ge.f32.partialorder %v1802_v50, 0.0  ;;  %v1810_v41 = vmul.f32 0.2, %v1802_v50  ;;  %vm1830_vm4 = vcmp.ge.f32.partialorder %v1826_v2, 0.0 }
 0x30c   :  { %v1834_v53 = vmul.f32 0.2, %v1826_v2  ;;  %vm1855_vm5 = vcmp.ge.f32.partialorder %v1851_v3, 0.0  ;;  %v1859_v55 = vmul.f32 0.2, %v1851_v3  ;;  %vm1880_vm6 = vcmp.ge.f32.partialorder %v1876_v21, 0.0 }
 0x30d   :  { %v1884_v43 = vmul.f32 0.2, %v1876_v21  ;;  %v1814_v0 = vsel %vm1806_vm3, %v1802_v50, %v1810_v41  ;;  %vm1905_vm7 = vcmp.ge.f32.partialorder %v1901_v29, 0.0  ;;  %v1909_v6 = vmul.f32 0.2, %v1901_v29 }
 0x30e   :  { %v1838_v31 = vsel %vm1830_vm4, %v1826_v2, %v1834_v53  ;;  %1818 = vst.msk [vmem:[%s3875_s4 + $0x10] sm:$0xff] %vm1143_vm2, %v1814_v0  ;;  %v1863_v23 = vsel %vm1855_vm5, %v1851_v3, %v1859_v55  ;;  %vm1930_vm8 = vcmp.ge.f32.partialorder %v1926_v42, 0.0  ;;  %v1934_v47 = vmul.f32 0.2, %v1926_v42 }
 0x30f   :  { %2325 = vst.msk [vmem:[%s3875_s4 + $0x30] sm:$0xff] %vm1143_vm2, %v1838_v31  ;;  %v1888_v39 = vsel %vm1880_vm6, %v1876_v21, %v1884_v43  ;;  %2329 = vst.msk [vmem:[%s3875_s4 + $0x50] sm:$0xff] %vm1143_vm2, %v1863_v23  ;;  %v1913_v35 = vsel %vm1905_vm7, %v1901_v29, %v1909_v6  ;;  %vm1955_vm9 = vcmp.ge.f32.partialorder %v1951_v30, 0.0  ;;  %v1959_v0 = vmul.f32 0.2, %v1951_v30 }
 0x310   :  { %2333 = vst.msk [vmem:[%s3875_s4 + $0x70] sm:$0xff] %vm1143_vm2, %v1888_v39  ;;  %vm1980_vm10 = vcmp.ge.f32.partialorder %v1976_v15, 0.0  ;;  %2337 = vst.msk [vmem:[%s3875_s4 + $0x90] sm:$0xff] %vm1143_vm2, %v1913_v35  ;;  %v1938_v2 = vsel %vm1930_vm8, %v1926_v42, %v1934_v47  ;;  %v1984_v50 = vmul.f32 0.2, %v1976_v15  ;;  %v2001_v3 = vadd.f32 %v3368_v54, %v3487_v20 }
 0x311   :  { %v2026_v21 = vadd.f32 %v3371_v19, %v3487_v20  ;;  %2341 = vst.msk [vmem:[%s3875_s4 + $0xb0] sm:$0xff] %vm1143_vm2, %v1938_v2  ;;  %v1963_v29 = vsel %vm1955_vm9, %v1951_v30, %v1959_v0  ;;  %v2051_v41 = vadd.f32 %v3374_v27, %v3487_v20  ;;  %v2076_v53 = vadd.f32 %v3377_v62, %v3487_v20  ;;  %v3539_v30 = vpop.permute.xlu1 %1782 }
 0x312   :  { %v2101_v42 = vadd.f32 %v3380_v10, %v3487_v20  ;;  %2345 = vst.msk [vmem:[%s3875_s4 + $0xd0] sm:$0xff] %vm1143_vm2, %v1963_v29  ;;  %v1988_v54 = vsel %vm1980_vm10, %v1976_v15, %v1984_v50  ;;  %vm2005_vm11 = vcmp.ge.f32.partialorder %v2001_v3, 0.0  ;;  %v2009_v19 = vmul.f32 0.2, %v2001_v3 }
 0x313   :  { %vm2030_vm12 = vcmp.ge.f32.partialorder %v2026_v21, 0.0  ;;  %2349 = vst.msk [vmem:[%s3875_s4 + $0xf0] sm:$0xff] %vm1143_vm2, %v1988_v54  ;;  %v2034_v27 = vmul.f32 0.2, %v2026_v21  ;;  %vm2055_vm13 = vcmp.ge.f32.partialorder %v2051_v41, 0.0  ;;  %vm2080_vm14 = vcmp.ge.f32.partialorder %v2076_v53, 0.0 }
 0x314   :  { %v2059_v62 = vmul.f32 0.2, %v2051_v41  ;;  %v2013_v10 = vsel %vm2005_vm11, %v2001_v3, %v2009_v19  ;;  %v2084_v55 = vmul.f32 0.2, %v2076_v53  ;;  %vm2105_vm15 = vcmp.ge.f32.partialorder %v2101_v42, 0.0 }
 0x315   :  { %v2109_v43 = vmul.f32 0.2, %v2101_v42  ;;  %2353 = vst.msk [vmem:[%s3875_s4 + $0x110] sm:$0xff] %vm1143_vm2, %v2013_v10  ;;  %v2038_v15 = vsel %vm2030_vm12, %v2026_v21, %v2034_v27  ;;  %v2126_v6 = vadd.f32 %v3383_v56, %v3487_v20  ;;  %v2151_v23 = vadd.f32 %v3386_v18, %v3487_v20 }
 0x316   :  { %v2063_v31 = vsel %vm2055_vm13, %v2051_v41, %v2059_v62  ;;  %2357 = vst.msk [vmem:[%s3875_s4 + $0x130] sm:$0xff] %vm1143_vm2, %v2038_v15  ;;  %v2088_v39 = vsel %vm2080_vm14, %v2076_v53, %v2084_v55  ;;  %v2176_v35 = vadd.f32 %v3389_v57, %v3487_v20  ;;  %v1800_v56 = vadd.f32 %v3539_v30, %v3312_v49 }
 0x317   :  { %2361 = vst.msk [vmem:[%s3875_s4 + $0x150] sm:$0xff] %vm1143_vm2, %v2063_v31  ;;  %v2113_v47 = vsel %vm2105_vm15, %v2101_v42, %v2109_v43  ;;  %2365 = vst.msk [vmem:[%s3875_s4 + $0x170] sm:$0xff] %vm1143_vm2, %v2088_v39  ;;  %vm2130_vm0 = vcmp.ge.f32.partialorder %v2126_v6, 0.0  ;;  %v2134_v18 = vmul.f32 0.2, %v2126_v6  ;;  %vm2155_vm1 = vcmp.ge.f32.partialorder %v2151_v23, 0.0 }
 0x318   :  { %2369 = vst.msk [vmem:[%s3875_s4 + $0x190] sm:$0xff] %vm1143_vm2, %v2113_v47  ;;  %v2159_v0 = vmul.f32 0.2, %v2151_v23  ;;  %vm2180_vm3 = vcmp.ge.f32.partialorder %v2176_v35, 0.0  ;;  %v2184_v2 = vmul.f32 0.2, %v2176_v35  ;;  %v1824_v50 = vadd.f32 %v3315_v61, %v3539_v30 }
 0x319   :  { %vm1804_vm4 = vcmp.ge.f32.partialorder %v1800_v56, 0.0  ;;  %v1808_v57 = vmul.f32 0.2, %v1800_v56  ;;  %v2138_v20 = vsel %vm2130_vm0, %v2126_v6, %v2134_v18  ;;  %v1849_v3 = vadd.f32 %v3318_v46, %v3539_v30  ;;  %v3641_v18 = vpop.permute.xlu1 %1787 }
 0x31a   :  { %v2163_v49 = vsel %vm2155_vm1, %v2151_v23, %v2159_v0  ;;  %2373 = vst.msk [vmem:[%s3875_s4 + $0x1b0] sm:$0xff] %vm1143_vm2, %v2138_v20  ;;  %v2188_v21 = vsel %vm2180_vm3, %v2176_v35, %v2184_v2  ;;  %v1874_v41 = vadd.f32 %v3321_v12, %v3539_v30  ;;  %v1899_v61 = vadd.f32 %v3324_v34, %v3539_v30 }
 0x31b   :  { %2377 = vst.msk [vmem:[%s3875_s4 + $0x1d0] sm:$0xff] %vm1143_vm2, %v2163_v49  ;;  %v1812_v29 = vsel %vm1804_vm4, %v1800_v56, %v1808_v57  ;;  %2381 = vst.msk [vmem:[%s3875_s4 + $0x1f0] sm:$0xff] %vm1143_vm2, %v2188_v21  ;;  %vm1828_vm5 = vcmp.ge.f32.partialorder %v1824_v50, 0.0  ;;  %v1832_v46 = vmul.f32 0.2, %v1824_v50  ;;  %vm1853_vm6 = vcmp.ge.f32.partialorder %v1849_v3, 0.0 }
 0x31c   :  { %1816 = vst.msk [vmem:[%s3875_s4] sm:$0xff] %vm1143_vm2, %v1812_v29  ;;  %v1857_v53 = vmul.f32 0.2, %v1849_v3  ;;  %vm1878_vm7 = vcmp.ge.f32.partialorder %v1874_v41, 0.0  ;;  %v1882_v42 = vmul.f32 0.2, %v1874_v41  ;;  %v1924_v19 = vadd.f32 %v3327_v9, %v3539_v30 }
 0x31d   :  { %vm1903_vm8 = vcmp.ge.f32.partialorder %v1899_v61, 0.0  ;;  %v1907_v12 = vmul.f32 0.2, %v1899_v61  ;;  %v1836_v54 = vsel %vm1828_vm5, %v1824_v50, %v1832_v46  ;;  %v1949_v27 = vadd.f32 %v3330_v58, %v3539_v30 }
 0x31e   :  { %v1861_v34 = vsel %vm1853_vm6, %v1849_v3, %v1857_v53  ;;  %2323 = vst.msk [vmem:[%s3875_s4 + $0x20] sm:$0xff] %vm1143_vm2, %v1836_v54  ;;  %v1886_v62 = vsel %vm1878_vm7, %v1874_v41, %v1882_v42  ;;  %v1974_v55 = vadd.f32 %v3333_v36, %v3539_v30  ;;  %v1999_v9 = vadd.f32 %v3336_v38, %v3539_v30 }
 0x31f   :  { %2327 = vst.msk [vmem:[%s3875_s4 + $0x40] sm:$0xff] %vm1143_vm2, %v1861_v34  ;;  %v1911_v10 = vsel %vm1903_vm8, %v1899_v61, %v1907_v12  ;;  %2331 = vst.msk [vmem:[%s3875_s4 + $0x60] sm:$0xff] %vm1143_vm2, %v1886_v62  ;;  %vm1928_vm9 = vcmp.ge.f32.partialorder %v1924_v19, 0.0  ;;  %v1932_v58 = vmul.f32 0.2, %v1924_v19  ;;  %vm1953_vm10 = vcmp.ge.f32.partialorder %v1949_v27, 0.0 }
 0x320   :  { %2335 = vst.msk [vmem:[%s3875_s4 + $0x80] sm:$0xff] %vm1143_vm2, %v1911_v10  ;;  %v1957_v43 = vmul.f32 0.2, %v1949_v27  ;;  %vm1978_vm11 = vcmp.ge.f32.partialorder %v1974_v55, 0.0  ;;  %v1982_v15 = vmul.f32 0.2, %v1974_v55  ;;  %v2024_v6 = vadd.f32 %v3339_v13, %v3539_v30 }
 0x321   :  { %vm2003_vm12 = vcmp.ge.f32.partialorder %v1999_v9, 0.0  ;;  %v2007_v36 = vmul.f32 0.2, %v1999_v9  ;;  %v1936_v31 = vsel %vm1928_vm9, %v1924_v19, %v1932_v58  ;;  %v2049_v23 = vadd.f32 %v3342_v25, %v3539_v30 }
 0x322   :  { %v1961_v38 = vsel %vm1953_vm10, %v1949_v27, %v1957_v43  ;;  %2339 = vst.msk [vmem:[%s3875_s4 + $0xa0] sm:$0xff] %vm1143_vm2, %v1936_v31  ;;  %v1986_v39 = vsel %vm1978_vm11, %v1974_v55, %v1982_v15  ;;  %v2074_v35 = vadd.f32 %v3345_v8, %v3539_v30  ;;  %v2099_v13 = vadd.f32 %v3348_v32, %v3539_v30 }
 0x323   :  { %2343 = vst.msk [vmem:[%s3875_s4 + $0xc0] sm:$0xff] %vm1143_vm2, %v1961_v38  ;;  %v2011_v47 = vsel %vm2003_vm12, %v1999_v9, %v2007_v36  ;;  %2347 = vst.msk [vmem:[%s3875_s4 + $0xe0] sm:$0xff] %vm1143_vm2, %v1986_v39  ;;  %vm2028_vm13 = vcmp.ge.f32.partialorder %v2024_v6, 0.0  ;;  %v2032_v25 = vmul.f32 0.2, %v2024_v6  ;;  %vm2053_vm14 = vcmp.ge.f32.partialorder %v2049_v23, 0.0  ;;  %v3739_v39 = vpop.permute.xlu1 %1797 }
 0x324   :  { %2351 = vst.msk [vmem:[%s3875_s4 + $0x100] sm:$0xff] %vm1143_vm2, %v2011_v47  ;;  %v2057_v56 = vmul.f32 0.2, %v2049_v23  ;;  %vm2078_vm15 = vcmp.ge.f32.partialorder %v2074_v35, 0.0  ;;  %v2082_v8 = vmul.f32 0.2, %v2074_v35  ;;  %v2124_v57 = vadd.f32 %v3351_v51, %v3539_v30 }
 0x325   :  { %vm2103_vm0 = vcmp.ge.f32.partialorder %v2099_v13, 0.0  ;;  %v2107_v32 = vmul.f32 0.2, %v2099_v13  ;;  %v2036_v0 = vsel %vm2028_vm13, %v2024_v6, %v2032_v25  ;;  %v2149_v20 = vadd.f32 %v3354_v26, %v3539_v30 }
 0x326   :  { %v2061_v2 = vsel %vm2053_vm14, %v2049_v23, %v2057_v56  ;;  %2355 = vst.msk [vmem:[%s3875_s4 + $0x120] sm:$0xff] %vm1143_vm2, %v2036_v0  ;;  %v2086_v49 = vsel %vm2078_vm15, %v2074_v35, %v2082_v8  ;;  %v2174_v3 = vadd.f32 %v3357_v14, %v3539_v30  ;;  %v1801_v51 = vadd.f32 %v3641_v18, %v3440_v7 }
 0x327   :  { %2359 = vst.msk [vmem:[%s3875_s4 + $0x140] sm:$0xff] %vm1143_vm2, %v2061_v2  ;;  %v2111_v50 = vsel %vm2103_vm0, %v2099_v13, %v2107_v32  ;;  %2363 = vst.msk [vmem:[%s3875_s4 + $0x160] sm:$0xff] %vm1143_vm2, %v2086_v49  ;;  %vm2128_vm1 = vcmp.ge.f32.partialorder %v2124_v57, 0.0  ;;  %v2132_v26 = vmul.f32 0.2, %v2124_v57  ;;  %vm2153_vm3 = vcmp.ge.f32.partialorder %v2149_v20, 0.0 }
 0x328   :  { %2367 = vst.msk [vmem:[%s3875_s4 + $0x180] sm:$0xff] %vm1143_vm2, %v2111_v50  ;;  %v2157_v21 = vmul.f32 0.2, %v2149_v20  ;;  %vm2178_vm4 = vcmp.ge.f32.partialorder %v2174_v3, 0.0  ;;  %v2182_v29 = vmul.f32 0.2, %v2174_v3  ;;  %v1825_v41 = vadd.f32 %v3443_v4, %v3641_v18 }
 0x329   :  { %vm1805_vm5 = vcmp.ge.f32.partialorder %v1801_v51, 0.0  ;;  %v1809_v14 = vmul.f32 0.2, %v1801_v51  ;;  %v2136_v30 = vsel %vm2128_vm1, %v2124_v57, %v2132_v26  ;;  %v1850_v61 = vadd.f32 %v3446_v60, %v3641_v18 }
 0x32a   :  { %v2161_v7 = vsel %vm2153_vm3, %v2149_v20, %v2157_v21  ;;  %2371 = vst.msk [vmem:[%s3875_s4 + $0x1a0] sm:$0xff] %vm1143_vm2, %v2136_v30  ;;  %v2186_v46 = vsel %vm2178_vm4, %v2174_v3, %v2182_v29  ;;  %v1875_v42 = vadd.f32 %v3449_v37, %v3641_v18  ;;  %v1900_v4 = vadd.f32 %v3452_v17, %v3641_v18  ;;  %v4054_v30 = vld [vmem:[#allocation34_spill] sm:$0xff] }
 0x32b   :  { %2375 = vst.msk [vmem:[%s3875_s4 + $0x1c0] sm:$0xff] %vm1143_vm2, %v2161_v7  ;;  %v1813_v53 = vsel %vm1805_vm5, %v1801_v51, %v1809_v14  ;;  %2379 = vst.msk [vmem:[%s3875_s4 + $0x1e0] sm:$0xff] %vm1143_vm2, %v2186_v46  ;;  %vm1829_vm6 = vcmp.ge.f32.partialorder %v1825_v41, 0.0  ;;  %v1833_v60 = vmul.f32 0.2, %v1825_v41  ;;  %vm1854_vm7 = vcmp.ge.f32.partialorder %v1850_v61, 0.0 }
 0x32c   :  { %1817 = vst.msk [vmem:[%s3875_s4 + $0x8] sm:$0xff] %vm1143_vm2, %v1813_v53  ;;  %v1858_v12 = vmul.f32 0.2, %v1850_v61  ;;  %vm1879_vm8 = vcmp.ge.f32.partialorder %v1875_v42, 0.0  ;;  %v1883_v54 = vmul.f32 0.2, %v1875_v42  ;;  %v1925_v19 = vadd.f32 %v3455_v22, %v3641_v18 }
 0x32d   :  { %vm1904_vm9 = vcmp.ge.f32.partialorder %v1900_v4, 0.0  ;;  %v1908_v37 = vmul.f32 0.2, %v1900_v4  ;;  %v1837_v34 = vsel %vm1829_vm6, %v1825_v41, %v1833_v60  ;;  %v1950_v27 = vadd.f32 %v3458_v44, %v3641_v18  ;;  %v4055_v41 = vld [vmem:[#allocation37_spill] sm:$0xff]  ;;  %v4057_v60 = vld [vmem:[#allocation46_spill] sm:$0xff] }
 0x32e   :  { %v1862_v17 = vsel %vm1854_vm7, %v1850_v61, %v1858_v12  ;;  %2324 = vst.msk [vmem:[%s3875_s4 + $0x28] sm:$0xff] %vm1143_vm2, %v1837_v34  ;;  %v1887_v62 = vsel %vm1879_vm8, %v1875_v42, %v1883_v54  ;;  %v1975_v55 = vadd.f32 %v3461_v16, %v3641_v18  ;;  %v2000_v22 = vadd.f32 %v3464_v28, %v3641_v18  ;;  %v4056_v42 = vld [vmem:[#allocation42_spill] sm:$0xff] }
 0x32f   :  { %2328 = vst.msk [vmem:[%s3875_s4 + $0x48] sm:$0xff] %vm1143_vm2, %v1862_v17  ;;  %v1912_v10 = vsel %vm1904_vm9, %v1900_v4, %v1908_v37  ;;  %2332 = vst.msk [vmem:[%s3875_s4 + $0x68] sm:$0xff] %vm1143_vm2, %v1887_v62  ;;  %vm1929_vm10 = vcmp.ge.f32.partialorder %v1925_v19, 0.0  ;;  %v1933_v44 = vmul.f32 0.2, %v1925_v19  ;;  %vm1954_vm11 = vcmp.ge.f32.partialorder %v1950_v27, 0.0 }
 0x330   :  { %2336 = vst.msk [vmem:[%s3875_s4 + $0x88] sm:$0xff] %vm1143_vm2, %v1912_v10  ;;  %v1958_v9 = vmul.f32 0.2, %v1950_v27  ;;  %vm1979_vm12 = vcmp.ge.f32.partialorder %v1975_v55, 0.0  ;;  %v1983_v58 = vmul.f32 0.2, %v1975_v55  ;;  %v2025_v15 = vadd.f32 %v3467_v59, %v3641_v18 }
 0x331   :  { %vm2004_vm13 = vcmp.ge.f32.partialorder %v2000_v22, 0.0  ;;  %v2008_v16 = vmul.f32 0.2, %v2000_v22  ;;  %v1937_v43 = vsel %vm1929_vm10, %v1925_v19, %v1933_v44  ;;  %v2050_v36 = vadd.f32 %v3470_v40, %v3641_v18  ;;  %v4058_v62 = vld [vmem:[#allocation50_spill] sm:$0xff] }
 0x332   :  { %v1962_v28 = vsel %vm1954_vm11, %v1950_v27, %v1958_v9  ;;  %2340 = vst.msk [vmem:[%s3875_s4 + $0xa8] sm:$0xff] %vm1143_vm2, %v1937_v43  ;;  %v1987_v31 = vsel %vm1979_vm12, %v1975_v55, %v1983_v58  ;;  %v2075_v6 = vadd.f32 %v3473_v5, %v3641_v18  ;;  %v2100_v59 = vadd.f32 %v3476_v63, %v3641_v18  ;;  %v4059_v55 = vld [vmem:[#allocation54_spill] sm:$0xff]  ;;  %v4061_v43 = vld [vmem:[#allocation3_spill] sm:$0xff] }
 0x333   :  { %2344 = vst.msk [vmem:[%s3875_s4 + $0xc8] sm:$0xff] %vm1143_vm2, %v1962_v28  ;;  %v2012_v38 = vsel %vm2004_vm13, %v2000_v22, %v2008_v16  ;;  %2348 = vst.msk [vmem:[%s3875_s4 + $0xe8] sm:$0xff] %vm1143_vm2, %v1987_v31  ;;  %vm2029_vm14 = vcmp.ge.f32.partialorder %v2025_v15, 0.0  ;;  %v2033_v40 = vmul.f32 0.2, %v2025_v15  ;;  %vm2054_vm15 = vcmp.ge.f32.partialorder %v2050_v36, 0.0 }
 0x334   :  { %2352 = vst.msk [vmem:[%s3875_s4 + $0x108] sm:$0xff] %vm1143_vm2, %v2012_v38  ;;  %v2058_v23 = vmul.f32 0.2, %v2050_v36  ;;  %vm2079_vm0 = vcmp.ge.f32.partialorder %v2075_v6, 0.0  ;;  %v2083_v5 = vmul.f32 0.2, %v2075_v6  ;;  %v2125_v13 = vadd.f32 %v3479_v1, %v3641_v18 }
 0x335   :  { %vm2104_vm1 = vcmp.ge.f32.partialorder %v2100_v59, 0.0  ;;  %v2108_v63 = vmul.f32 0.2, %v2100_v59  ;;  %v2037_v47 = vsel %vm2029_vm14, %v2025_v15, %v2033_v40  ;;  %v2150_v25 = vadd.f32 %v3482_v33, %v3641_v18  ;;  %v4060_v58 = vld [vmem:[#allocation2_spill] sm:$0xff]  ;;  %v4062_v40 = vld [vmem:[#allocation8_spill] sm:$0xff] }
 0x336   :  { %v2062_v35 = vsel %vm2054_vm15, %v2050_v36, %v2058_v23  ;;  %2356 = vst.msk [vmem:[%s3875_s4 + $0x128] sm:$0xff] %vm1143_vm2, %v2037_v47  ;;  %v2087_v56 = vsel %vm2079_vm0, %v2075_v6, %v2083_v5  ;;  %v2175_v32 = vadd.f32 %v3485_v45, %v3641_v18  ;;  %v1803_v1 = vadd.f32 %v3739_v39, %v3392_v24  ;;  %v4063_v5 = vld [vmem:[#allocation9_spill] sm:$0xff] }
 0x337   :  { %2360 = vst.msk [vmem:[%s3875_s4 + $0x148] sm:$0xff] %vm1143_vm2, %v2062_v35  ;;  %v2112_v8 = vsel %vm2104_vm1, %v2100_v59, %v2108_v63  ;;  %2364 = vst.msk [vmem:[%s3875_s4 + $0x168] sm:$0xff] %vm1143_vm2, %v2087_v56  ;;  %vm2129_vm3 = vcmp.ge.f32.partialorder %v2125_v13, 0.0  ;;  %v2133_v33 = vmul.f32 0.2, %v2125_v13  ;;  %vm2154_vm4 = vcmp.ge.f32.partialorder %v2150_v25, 0.0 }
 0x338   :  { %2368 = vst.msk [vmem:[%s3875_s4 + $0x188] sm:$0xff] %vm1143_vm2, %v2112_v8  ;;  %v2158_v0 = vmul.f32 0.2, %v2150_v25  ;;  %vm2179_vm5 = vcmp.ge.f32.partialorder %v2175_v32, 0.0  ;;  %v2183_v2 = vmul.f32 0.2, %v2175_v32  ;;  %v1827_v57 = vadd.f32 %v3395_v11, %v3739_v39 }
 0x339   :  { %vm1807_vm6 = vcmp.ge.f32.partialorder %v1803_v1, 0.0  ;;  %v1811_v45 = vmul.f32 0.2, %v1803_v1  ;;  %v2137_v18 = vsel %vm2129_vm3, %v2125_v13, %v2133_v33  ;;  %v1852_v20 = vadd.f32 %v3398_v52, %v3739_v39  ;;  %v4053_v11 = vld [vmem:[#allocation29_spill] sm:$0xff]  ;;  %v4064_v13 = vld [vmem:[#allocation14_spill] sm:$0xff] }
 0x33a   :  { %v2162_v24 = vsel %vm2154_vm4, %v2150_v25, %v2158_v0  ;;  %2372 = vst.msk [vmem:[%s3875_s4 + $0x1a8] sm:$0xff] %vm1143_vm2, %v2137_v18  ;;  %v2187_v49 = vsel %vm2179_vm5, %v2175_v32, %v2183_v2  ;;  %v1877_v3 = vadd.f32 %v3401_v48, %v3739_v39  ;;  %v1902_v51 = vadd.f32 %v4053_v11, %v3739_v39 }
 0x33b   :  { %2376 = vst.msk [vmem:[%s3875_s4 + $0x1c8] sm:$0xff] %vm1143_vm2, %v2162_v24  ;;  %v1815_v50 = vsel %vm1807_vm6, %v1803_v1, %v1811_v45  ;;  %2380 = vst.msk [vmem:[%s3875_s4 + $0x1e8] sm:$0xff] %vm1143_vm2, %v2187_v49  ;;  %vm1831_vm7 = vcmp.ge.f32.partialorder %v1827_v57, 0.0  ;;  %v1835_v52 = vmul.f32 0.2, %v1827_v57  ;;  %vm1856_vm8 = vcmp.ge.f32.partialorder %v1852_v20, 0.0 }
 0x33c   :  { %1819 = vst.msk [vmem:[%s3875_s4 + $0x18] sm:$0xff] %vm1143_vm2, %v1815_v50  ;;  %v1860_v26 = vmul.f32 0.2, %v1852_v20  ;;  %vm1881_vm9 = vcmp.ge.f32.partialorder %v1877_v3, 0.0  ;;  %v1885_v21 = vmul.f32 0.2, %v1877_v3  ;;  %v1927_v7 = vadd.f32 %v4054_v30, %v3739_v39 }
 0x33d   :  { %vm1906_vm10 = vcmp.ge.f32.partialorder %v1902_v51, 0.0  ;;  %v1910_v48 = vmul.f32 0.2, %v1902_v51  ;;  %v1839_v29 = vsel %vm1831_vm7, %v1827_v57, %v1835_v52  ;;  %v1952_v61 = vadd.f32 %v4055_v41, %v3739_v39 }
 0x33e   :  { %v1864_v14 = vsel %vm1856_vm8, %v1852_v20, %v1860_v26  ;;  %2326 = vst.msk [vmem:[%s3875_s4 + $0x38] sm:$0xff] %vm1143_vm2, %v1839_v29  ;;  %v1889_v46 = vsel %vm1881_vm9, %v1877_v3, %v1885_v21  ;;  %v1977_v4 = vadd.f32 %v4056_v42, %v3739_v39  ;;  %v2002_v12 = vadd.f32 %v4057_v60, %v3739_v39 }
 0x33f   :  { %2330 = vst.msk [vmem:[%s3875_s4 + $0x58] sm:$0xff] %vm1143_vm2, %v1864_v14  ;;  %v1914_v53 = vsel %vm1906_vm10, %v1902_v51, %v1910_v48  ;;  %2334 = vst.msk [vmem:[%s3875_s4 + $0x78] sm:$0xff] %vm1143_vm2, %v1889_v46  ;;  %vm1931_vm11 = vcmp.ge.f32.partialorder %v1927_v7, 0.0  ;;  %v1935_v54 = vmul.f32 0.2, %v1927_v7  ;;  %vm1956_vm12 = vcmp.ge.f32.partialorder %v1952_v61, 0.0 }
 0x340   :  { %2338 = vst.msk [vmem:[%s3875_s4 + $0x98] sm:$0xff] %vm1143_vm2, %v1914_v53  ;;  %v1960_v37 = vmul.f32 0.2, %v1952_v61  ;;  %vm1981_vm13 = vcmp.ge.f32.partialorder %v1977_v4, 0.0  ;;  %v1985_v34 = vmul.f32 0.2, %v1977_v4  ;;  %v2027_v10 = vadd.f32 %v4058_v62, %v3739_v39 }
 0x341   :  { %vm2006_vm14 = vcmp.ge.f32.partialorder %v2002_v12, 0.0  ;;  %v2010_v17 = vmul.f32 0.2, %v2002_v12  ;;  %v1939_v19 = vsel %vm1931_vm11, %v1927_v7, %v1935_v54  ;;  %v2052_v22 = vadd.f32 %v4059_v55, %v3739_v39 }
 0x342   :  { %v1964_v27 = vsel %vm1956_vm12, %v1952_v61, %v1960_v37  ;;  %2342 = vst.msk [vmem:[%s3875_s4 + $0xb8] sm:$0xff] %vm1143_vm2, %v1939_v19  ;;  %v1989_v44 = vsel %vm1981_vm13, %v1977_v4, %v1985_v34  ;;  %v2077_v16 = vadd.f32 %v4060_v58, %v3739_v39  ;;  %v2102_v28 = vadd.f32 %v4061_v43, %v3739_v39 }
 0x343   :  { %2346 = vst.msk [vmem:[%s3875_s4 + $0xd8] sm:$0xff] %vm1143_vm2, %v1964_v27  ;;  %v2014_v9 = vsel %vm2006_vm14, %v2002_v12, %v2010_v17  ;;  %2350 = vst.msk [vmem:[%s3875_s4 + $0xf8] sm:$0xff] %vm1143_vm2, %v1989_v44  ;;  %vm2031_vm15 = vcmp.ge.f32.partialorder %v2027_v10, 0.0  ;;  %v2035_v15 = vmul.f32 0.2, %v2027_v10  ;;  %vm2056_vm0 = vcmp.ge.f32.partialorder %v2052_v22, 0.0 }
 0x344   :  { %2354 = vst.msk [vmem:[%s3875_s4 + $0x118] sm:$0xff] %vm1143_vm2, %v2014_v9  ;;  %v2060_v36 = vmul.f32 0.2, %v2052_v22  ;;  %vm2081_vm1 = vcmp.ge.f32.partialorder %v2077_v16, 0.0  ;;  %v2085_v31 = vmul.f32 0.2, %v2077_v16  ;;  %v2127_v23 = vadd.f32 %v4062_v40, %v3739_v39 }
 0x345   :  { %vm2106_vm3 = vcmp.ge.f32.partialorder %v2102_v28, 0.0  ;;  %v2110_v38 = vmul.f32 0.2, %v2102_v28  ;;  %v2039_v6 = vsel %vm2031_vm15, %v2027_v10, %v2035_v15  ;;  %v2152_v63 = vadd.f32 %v4063_v5, %v3739_v39 }
 0x346   :  { %v2064_v59 = vsel %vm2056_vm0, %v2052_v22, %v2060_v36  ;;  %2358 = vst.msk [vmem:[%s3875_s4 + $0x138] sm:$0xff] %vm1143_vm2, %v2039_v6  ;;  %v2089_v47 = vsel %vm2081_vm1, %v2077_v16, %v2085_v31  ;;  %v2177_v25 = vadd.f32 %v4064_v13, %v3739_v39  ;;  %vm2131_vm4 = vcmp.ge.f32.partialorder %v2127_v23, 0.0 }
 0x347   :  { %2362 = vst.msk [vmem:[%s3875_s4 + $0x158] sm:$0xff] %vm1143_vm2, %v2064_v59  ;;  %v2114_v35 = vsel %vm2106_vm3, %v2102_v28, %v2110_v38  ;;  %2366 = vst.msk [vmem:[%s3875_s4 + $0x178] sm:$0xff] %vm1143_vm2, %v2089_v47  ;;  %v2135_v56 = vmul.f32 0.2, %v2127_v23  ;;  %vm2156_vm5 = vcmp.ge.f32.partialorder %v2152_v63, 0.0 }
 0x348   :  { %2370 = vst.msk [vmem:[%s3875_s4 + $0x198] sm:$0xff] %vm1143_vm2, %v2114_v35  ;;  %v2160_v8 = vmul.f32 0.2, %v2152_v63  ;;  %vm2181_vm6 = vcmp.ge.f32.partialorder %v2177_v25, 0.0  ;;  %v2185_v32 = vmul.f32 0.2, %v2177_v25 }
 0x349   :  { %v2139_v1 = vsel %vm2131_vm4, %v2127_v23, %v2135_v56 }
 0x34a   :  { %v2164_v33 = vsel %vm2156_vm5, %v2152_v63, %v2160_v8  ;;  %2374 = vst.msk [vmem:[%s3875_s4 + $0x1b8] sm:$0xff] %vm1143_vm2, %v2139_v1  ;;  %v2189_v39 = vsel %vm2181_vm6, %v2177_v25, %v2185_v32 }
 0x34b   :  { %2378 = vst.msk [vmem:[%s3875_s4 + $0x1d8] sm:$0xff] %vm1143_vm2, %v2164_v33  ;;  %2382 = vst.msk [vmem:[%s3875_s4 + $0x1f8] sm:$0xff] %vm1143_vm2, %v2189_v39 }

// kernel: generator_dc_forward.8
= control target key start
LH: loop header
LB: loop body
LE: loop exit
PB: predicated region body
PF: predicated region fallthrough
CT: control target
= control target key end

     0   :  { %v421_v0 = vmov 0   ;;  %vm97_vm0 = vcmask 130048   ;;  %s564_s1 = inlined_call_operand.vmem [shape: bf16[144,128], index: 1, kind: input, shape index: {}]   ;;  %s565_s0 = inlined_call_operand.vmem [shape: bf16[4,8,144], index: 0, kind: input, shape index: {}]   ;;  %s566_s2 = inlined_call_operand.vmem [shape: f32[8,1], index: 2, kind: input, shape index: {}]   ;;  %s567_s3 = inlined_call_operand.vmem [shape: f32[8,1], index: 3, kind: input, shape index: {}]   ;;  %s568_s4 = inlined_call_operand.vmem [shape: f32[4,8,128], index: 4, kind: output, shape index: {}]  }
   0x1   :  { %101 = vmatprep.subr.bf16.mxu0 %v421_v0  ;;  %v451_v1 = vld [vmem:[%s564_s1] sm:$0xff]   ;;  %152 = vmatprep.subr.bf16.mxu1 %v421_v0  ;;  %v461_v2 = vld [vmem:[%s564_s1 + $0x8] sm:$0xff]   ;;  %v470_v3 = vld [vmem:[%s564_s1 + $0x10] sm:$0xff]  }
   0x2   :  { %400 = vset.pattern.permute.xlu0 %v421_v0  ;;  %401 = vset.pattern.permute.xlu1 %v421_v0  ;;  %v36_v4 = vld [vmem:[%s565_s0] sm:$0xff]  ;;  %v384_v5 = vld [vmem:[%s565_s0 + $0x8] sm:$0xff]  ;;  %v405_v6 = vld [vmem:[%s564_s1 + $0x18] sm:$0xff]  }
   0x3   :  { %102 = vmatpush1.bf16.msra.mxu0 %v451_v1  ;;  %153 = vmatpush1.bf16.msra.mxu1 %v451_v1  ;;  %v373_v7 = vcombine.high %v36_v4, %v36_v4  ;;  %v386_v8 = vcombine.high %v384_v5, %v384_v5  ;;  %v406_v9 = vld [vmem:[%s564_s1 + $0x20] sm:$0xff]   ;;  %v407_v10 = vld [vmem:[%s564_s1 + $0x28] sm:$0xff]   ;;  %v408_v11 = vld [vmem:[%s564_s1 + $0x30] sm:$0xff]   ;;  %v372_v14 = vcombine.low %v36_v4, %v36_v4 }
   0x4   :  { %103 = vmatprep.subr.bf16.mxu0 %v421_v0  ;;  %154 = vmatprep.subr.bf16.mxu1 %v421_v0  ;;  %v409_v12 = vld [vmem:[%s564_s1 + $0x38] sm:$0xff]   ;;  %v410_v13 = vld [vmem:[%s564_s1 + $0x40] sm:$0xff]   ;;  %v385_v15 = vcombine.low %v384_v5, %v384_v5  ;;  %v388_v16 = vld [vmem:[%s565_s0 + $0x10] sm:$0xff] }
   0x5   :  { %383 = vmatprep.mubr.msk.bf16.mxu0 %vm97_vm0, %v373_v7  ;;  %387 = vmatprep.mubr.msk.bf16.mxu1 %vm97_vm0, %v386_v8  ;;  %v392_v17 = vld [vmem:[%s565_s0 + $0x18] sm:$0xff]  ;;  %v390_v18 = vcombine.high %v388_v16, %v388_v16  ;;  %v389_v20 = vcombine.low %v388_v16, %v388_v16  ;;  %v324_v61 = vld [vmem:[%s566_s2] sm:$0xff] }
   0x6   :  { %v394_v19 = vcombine.high %v392_v17, %v392_v17  ;;  %v393_v21 = vcombine.low %v392_v17, %v392_v17 }
   0x7   :  { %104 = vmatpush1.bf16.msra.mxu0 %v461_v2  ;;  %155 = vmatpush1.bf16.msra.mxu1 %v461_v2 }
   0x8   :  { %105 = vmatprep.subr.bf16.mxu0 %v421_v0  ;;  %156 = vmatprep.subr.bf16.mxu1 %v421_v0 }
   0xb   :  { %106 = vmatpush1.bf16.msra.mxu0 %v470_v3  ;;  %157 = vmatpush1.bf16.msra.mxu1 %v470_v3 }
   0xc   :  { %107 = vmatprep.subr.bf16.mxu0 %v421_v0  ;;  %158 = vmatprep.subr.bf16.mxu1 %v421_v0 }
   0xf   :  { %108 = vmatpush1.bf16.msra.mxu0 %v405_v6  ;;  %159 = vmatpush1.bf16.msra.mxu1 %v405_v6 }
  0x10   :  { %109 = vmatprep.subr.bf16.mxu0 %v421_v0  ;;  %160 = vmatprep.subr.bf16.mxu1 %v421_v0 }
  0x13   :  { %110 = vmatpush1.bf16.msra.mxu0 %v406_v9  ;;  %161 = vmatpush1.bf16.msra.mxu1 %v406_v9 }
  0x14   :  { %111 = vmatprep.subr.bf16.mxu0 %v421_v0  ;;  %162 = vmatprep.subr.bf16.mxu1 %v421_v0 }
  0x17   :  { %112 = vmatpush1.bf16.msra.mxu0 %v407_v10  ;;  %163 = vmatpush1.bf16.msra.mxu1 %v407_v10 }
  0x18   :  { %113 = vmatprep.subr.bf16.mxu0 %v421_v0  ;;  %164 = vmatprep.subr.bf16.mxu1 %v421_v0 }
  0x1b   :  { %114 = vmatpush1.bf16.msra.mxu0 %v408_v11  ;;  %165 = vmatpush1.bf16.msra.mxu1 %v408_v11 }
  0x1c   :  { %115 = vmatprep.subr.bf16.mxu0 %v421_v0  ;;  %166 = vmatprep.subr.bf16.mxu1 %v421_v0 }
  0x1f   :  { %116 = vmatpush1.bf16.msra.mxu0 %v409_v12  ;;  %167 = vmatpush1.bf16.msra.mxu1 %v409_v12 }
  0x20   :  { %117 = vmatprep.subr.bf16.mxu0 %v421_v0  ;;  %168 = vmatprep.subr.bf16.mxu1 %v421_v0 }
  0x23   :  { %118 = vmatpush1.bf16.msra.mxu0 %v410_v13  ;;  %169 = vmatpush1.bf16.msra.mxu1 %v410_v13 }
  0x24   :  { %203 = vmatprep.subr.bf16.mxu0 %v421_v0  ;;  %254 = vmatprep.subr.bf16.mxu1 %v421_v0 }
  0x26   :  { %134 = vmatmul.mubr.bf16.vlgmr.msra.gmra.mrb[0].mxu0 %v372_v14  ;;  %185 = vmatmul.mubr.bf16.vlgmr.msra.gmra.mrb[0].mxu1 %v385_v15 }
  0x27   :  { %204 = vmatpush1.bf16.msra.mxu0 %v451_v1  ;;  %255 = vmatpush1.bf16.msra.mxu1 %v451_v1 }
  0x28   :  { %205 = vmatprep.subr.bf16.mxu0 %v421_v0  ;;  %256 = vmatprep.subr.bf16.mxu1 %v421_v0 }
  0x29   :  { %391 = vmatprep.mubr.msk.bf16.mxu0 %vm97_vm0, %v390_v18  ;;  %395 = vmatprep.mubr.msk.bf16.mxu1 %vm97_vm0, %v394_v19 }
  0x2b   :  { %206 = vmatpush1.bf16.msra.mxu0 %v461_v2  ;;  %257 = vmatpush1.bf16.msra.mxu1 %v461_v2 }
  0x2c   :  { %207 = vmatprep.subr.bf16.mxu0 %v421_v0  ;;  %258 = vmatprep.subr.bf16.mxu1 %v421_v0 }
  0x2f   :  { %208 = vmatpush1.bf16.msra.mxu0 %v470_v3  ;;  %259 = vmatpush1.bf16.msra.mxu1 %v470_v3 }
  0x30   :  { %209 = vmatprep.subr.bf16.mxu0 %v421_v0  ;;  %260 = vmatprep.subr.bf16.mxu1 %v421_v0 }
  0x33   :  { %210 = vmatpush1.bf16.msra.mxu0 %v405_v6  ;;  %261 = vmatpush1.bf16.msra.mxu1 %v405_v6 }
  0x34   :  { %211 = vmatprep.subr.bf16.mxu0 %v421_v0  ;;  %262 = vmatprep.subr.bf16.mxu1 %v421_v0 }
  0x37   :  { %212 = vmatpush1.bf16.msra.mxu0 %v406_v9  ;;  %263 = vmatpush1.bf16.msra.mxu1 %v406_v9 }
  0x38   :  { %213 = vmatprep.subr.bf16.mxu0 %v421_v0  ;;  %264 = vmatprep.subr.bf16.mxu1 %v421_v0 }
  0x3b   :  { %214 = vmatpush1.bf16.msra.mxu0 %v407_v10  ;;  %265 = vmatpush1.bf16.msra.mxu1 %v407_v10 }
  0x3c   :  { %215 = vmatprep.subr.bf16.mxu0 %v421_v0  ;;  %266 = vmatprep.subr.bf16.mxu1 %v421_v0 }
  0x3f   :  { %216 = vmatpush1.bf16.msra.mxu0 %v408_v11  ;;  %267 = vmatpush1.bf16.msra.mxu1 %v408_v11 }
  0x40   :  { %217 = vmatprep.subr.bf16.mxu0 %v421_v0  ;;  %268 = vmatprep.subr.bf16.mxu1 %v421_v0 }
  0x43   :  { %218 = vmatpush1.bf16.msra.mxu0 %v409_v12  ;;  %269 = vmatpush1.bf16.msra.mxu1 %v409_v12 }
  0x44   :  { %219 = vmatprep.subr.bf16.mxu0 %v421_v0  ;;  %270 = vmatprep.subr.bf16.mxu1 %v421_v0  ;;  %v328_v0 = vld [vmem:[%s567_s3] sm:$0xff] }
  0x47   :  { %220 = vmatpush1.bf16.msra.mxu0 %v410_v13  ;;  %271 = vmatpush1.bf16.msra.mxu1 %v410_v13 }
  0x4a   :  { %236 = vmatmul.mubr.bf16.vlgmr.msra.gmra.mrb[4].mxu0 %v389_v20  ;;  %287 = vmatmul.mubr.bf16.vlgmr.msra.gmra.mrb[4].mxu1 %v393_v21 }
  0xf9   :  { %v135_v22 = vpop.f32.mrb[0].mxu0  ;;  %v186_v23 = vpop.f32.mrb[0].mxu1 }
  0xfa   :  { %294 = vadd.xlane.f32.xlu0 %v135_v22  ;;  %v137_v24 = vpop.f32.mrb[1].mxu0  ;;  %v188_v25 = vpop.f32.mrb[1].mxu1  ;;  %v296_v26 = vmul.f32 %v135_v22, %v135_v22  ;;  %v302_v31 = vmul.f32 %v186_v23, %v186_v23 }
  0xfb   :  { %v138_v27 = vpop.f32.mrb[2].mxu0  ;;  %v189_v28 = vpop.f32.mrb[2].mxu1 }
  0xfc   :  { %297 = vadd.xlane.f32.xlu1 %v296_v26  ;;  %v139_v29 = vpop.f32.mrb[3].mxu0  ;;  %v190_v30 = vpop.f32.mrb[3].mxu1 }
  0xfe   :  { %299 = vadd.xlane.f32.xlu0 %v186_v23 }
 0x100   :  { %303 = vadd.xlane.f32.xlu1 %v302_v31 }
 0x11d   :  { %v237_v32 = vpop.f32.mrb[4].mxu0  ;;  %v288_v33 = vpop.f32.mrb[4].mxu1 }
 0x11e   :  { %306 = vadd.xlane.f32.xlu0 %v237_v32  ;;  %v239_v34 = vpop.f32.mrb[5].mxu0  ;;  %v290_v35 = vpop.f32.mrb[5].mxu1  ;;  %v309_v36 = vmul.f32 %v237_v32, %v237_v32  ;;  %v316_v41 = vmul.f32 %v288_v33, %v288_v33 }
 0x11f   :  { %v240_v37 = vpop.f32.mrb[6].mxu0  ;;  %v291_v38 = vpop.f32.mrb[6].mxu1 }
 0x120   :  { %310 = vadd.xlane.f32.xlu1 %v309_v36  ;;  %v241_v39 = vpop.f32.mrb[7].mxu0  ;;  %v292_v40 = vpop.f32.mrb[7].mxu1 }
 0x122   :  { %313 = vadd.xlane.f32.xlu0 %v288_v33 }
 0x124   :  { %317 = vadd.xlane.f32.xlu1 %v316_v41 }
 0x187   :  { %v295_v42 = vpop.xlane.xlu0 %294 }
 0x189   :  { %v298_v43 = vpop.xlane.xlu1 %297 }
 0x18b   :  { %v300_v44 = vpop.xlane.xlu0 %299 }
 0x18c   :  { %v301_v47 = vadd.f32 %v300_v44, %v295_v42 }
 0x18d   :  { %v304_v45 = vpop.xlane.xlu1 %303 }
 0x18e   :  { %v305_v49 = vadd.f32 %v304_v45, %v298_v43 }
 0x1ab   :  { %v307_v46 = vpop.xlane.xlu0 %306 }
 0x1ac   :  { %v308_v50 = vadd.f32 %v307_v46, %v301_v47 }
 0x1ad   :  { %v311_v48 = vpop.xlane.xlu1 %310 }
 0x1ae   :  { %v312_v52 = vadd.f32 %v311_v48, %v305_v49 }
 0x1af   :  { %v314_v51 = vpop.xlane.xlu0 %313 }
 0x1b0   :  { %v315_v53 = vadd.f32 %v314_v51, %v308_v50 }
 0x1b1   :  { %v318_v54 = vpop.xlane.xlu1 %317 }
 0x1b2   :  { %v320_v55 = vmul.f32 0.001953125, %v315_v53  ;;  %v319_v56 = vadd.f32 %v318_v54, %v312_v52 }
 0x1b4   :  { %v322_v57 = vmul.f32 %v320_v55, %v320_v55  ;;  %v321_v58 = vmul.f32 0.001953125, %v319_v56 }
 0x1b6   :  { %v323_v59 = vsub.f32 %v321_v58, %v322_v57 }
 0x1b8   :  { %v325_v60 = vadd.f32 1e-05, %v323_v59 }
 0x1ba   :  { %419 = vrsqrt.f32 %v325_v60 }
 0x1c4   :  { %v420_v62 = vpop.eup %419 }
 0x1c5   :  { %v327_v63 = vmul.f32 %v420_v62, %v324_v61 }
 0x1c7   :  { %333 = vperm.xlu0 %400, %v327_v63   ;;  %v329_v1 = vmul.f32 %v327_v63, %v320_v55 }
 0x1c9   :  { %v330_v2 = vsub.f32 %v328_v0, %v329_v1 }
 0x1cb   :  { %339 = vperm.xlu1 %401, %v330_v2  }
 0x246   :  { %v334_v3 = vpop.permute.xlu0 %333 }
 0x247   :  { %v336_v4 = vmul.f32 %v334_v3, %v135_v22  ;;  %v347_v5 = vmul.f32 %v334_v3, %v186_v23  ;;  %v354_v6 = vmul.f32 %v334_v3, %v237_v32  ;;  %v361_v7 = vmul.f32 %v334_v3, %v288_v33 }
 0x24a   :  { %v340_v8 = vpop.permute.xlu1 %339 }
 0x24b   :  { %v342_v9 = vadd.f32 %v340_v8, %v336_v4  ;;  %v348_v10 = vadd.f32 %v347_v5, %v340_v8  ;;  %v355_v11 = vadd.f32 %v354_v6, %v340_v8  ;;  %v362_v12 = vadd.f32 %v361_v7, %v340_v8 }
 0x24d   :  { %vm343_vm1 = vcmp.ge.f32.partialorder %v342_v9, 0.0  ;;  %v344_v13 = vmul.f32 0.2, %v342_v9  ;;  %vm349_vm2 = vcmp.ge.f32.partialorder %v348_v10, 0.0  ;;  %v350_v14 = vmul.f32 0.2, %v348_v10 }
 0x24e   :  { %vm356_vm3 = vcmp.ge.f32.partialorder %v355_v11, 0.0  ;;  %v357_v15 = vmul.f32 0.2, %v355_v11  ;;  %vm363_vm4 = vcmp.ge.f32.partialorder %v362_v12, 0.0  ;;  %v364_v16 = vmul.f32 0.2, %v362_v12 }
 0x24f   :  { %v345_v17 = vsel %vm343_vm1, %v342_v9, %v344_v13  ;;  %v351_v18 = vsel %vm349_vm2, %v348_v10, %v350_v14 }
 0x250   :  { %346 = vst [vmem:[%s568_s4] sm:$0xff] %v345_v17  ;;  %396 = vst [vmem:[%s568_s4 + $0x8] sm:$0xff] %v351_v18  ;;  %v358_v19 = vsel %vm356_vm3, %v355_v11, %v357_v15  ;;  %v365_v20 = vsel %vm363_vm4, %v362_v12, %v364_v16 }
 0x251   :  { %397 = vst [vmem:[%s568_s4 + $0x10] sm:$0xff] %v358_v19  ;;  %398 = vst [vmem:[%s568_s4 + $0x18] sm:$0xff] %v365_v20 }

// kernel: generator_dc_forward.9
= control target key start
LH: loop header
LB: loop body
LE: loop exit
PB: predicated region body
PF: predicated region fallthrough
CT: control target
= control target key end

     0   :  { %v807_v1 = vmov 0   ;;  %vm131_vm0 = vcmask 1043456   ;;  %vm127_vm1 = vcmask 588800   ;;  %s1209_s1 = inlined_call_operand.vmem [shape: bf16[72,512], index: 1, kind: input, shape index: {}]   ;;  %s1210_s0 = inlined_call_operand.vmem [shape: bf16[4,4,72], index: 0, kind: input, shape index: {}]   ;;  %s1211_s2 = inlined_call_operand.vmem [shape: f32[4,1], index: 2, kind: input, shape index: {}]   ;;  %s1212_s3 = inlined_call_operand.vmem [shape: f32[4,1], index: 3, kind: input, shape index: {}]   ;;  %s1213_s4 = inlined_call_operand.vmem [shape: f32[4,4,512], index: 4, kind: output, shape index: {}]  }
   0x1   :  { %v836_v0 = vld [vmem:[%s1209_s1 + $0x4] ss:$16 sps:$4 sm:$0xff]   ;;  %176 = vmatprep.mubr.bf16.mxu0 %v807_v1  ;;  %217 = vmatprep.mubr.bf16.mxu1 %v807_v1  ;;  %v843_v2 = vld [vmem:[%s1209_s1 + $0xc] ss:$16 sps:$4 sm:$0xff]   ;;  %v851_v3 = vld [vmem:[%s1209_s1] ss:$16 sps:$4 sm:$0xff]  }
   0x2   :  { %775 = vset.pattern.permute.xlu0 %v807_v1  ;;  %776 = vset.pattern.permute.xlu1 %v807_v1  ;;  %v856_v4 = vld [vmem:[%s1209_s1 + $0x8] ss:$16 sps:$4 sm:$0xff]   ;;  %v862_v5 = vld [vmem:[%s1209_s1 + $0x24] ss:$16 sps:$4 sm:$0xff]   ;;  %v869_v6 = vld [vmem:[%s1209_s1 + $0x2c] ss:$16 sps:$4 sm:$0xff]  }
   0x3   :  { %144 = vmatprep.subr.bf16.mxu0 %v836_v0  ;;  %185 = vmatprep.subr.bf16.mxu1 %v843_v2  ;;  %v874_v7 = vld [vmem:[%s1209_s1 + $0x20] ss:$16 sps:$4 sm:$0xff]   ;;  %v880_v8 = vld [vmem:[%s1209_s1 + $0x28] ss:$16 sps:$4 sm:$0xff]   ;;  %v886_v9 = vld [vmem:[%s1209_s1 + $0x44] ss:$16 sps:$4 sm:$0xff]  }
   0x4   :  { %145 = vmatpush1.bf16.msra.mxu0 %v851_v3  ;;  %186 = vmatpush1.bf16.msra.mxu1 %v856_v4  ;;  %v891_v10 = vld [vmem:[%s1209_s1 + $0x4c] ss:$16 sps:$4 sm:$0xff]   ;;  %v896_v11 = vld [vmem:[%s1209_s1 + $0x40] ss:$16 sps:$4 sm:$0xff]   ;;  %v901_v12 = vld [vmem:[%s1209_s1 + $0x48] ss:$16 sps:$4 sm:$0xff]  }
   0x5   :  { %146 = vmatprep.subr.bf16.mxu0 %v862_v5  ;;  %187 = vmatprep.subr.bf16.mxu1 %v869_v6  ;;  %v908_v13 = vld [vmem:[%s1209_s1 + $0x64] ss:$16 sps:$4 sm:$0xff]   ;;  %v915_v14 = vld [vmem:[%s1209_s1 + $0x6c] ss:$16 sps:$4 sm:$0xff]   ;;  %v928_v17 = vld [vmem:[%s1209_s1 + $0x60] ss:$16 sps:$4 sm:$0xff]  }
   0x6   :  { %v34_v15 = vld [vmem:[%s1209_s1 + $0x80] sm:$0xff]  ;;  %v35_v16 = vld [vmem:[%s1209_s1 + $0x88] sm:$0xff] }
   0x7   :  { %v933_v18 = vld [vmem:[%s1209_s1 + $0x68] ss:$16 sps:$4 sm:$0xff]   ;;  %v935_v19 = vcombine.high %v34_v15, %v34_v15  ;;  %v939_v20 = vcombine.high %v35_v16, %v35_v16  ;;  %v745_v21 = vcombine.low %v34_v15, %v34_v15  ;;  %v747_v22 = vcombine.low %v35_v16, %v35_v16  ;;  %v36_v25 = vld [vmem:[%s1210_s0] sm:$0x3]  ;;  %v753_v26 = vld [vmem:[%s1210_s0 + $0x2] sm:$0x3] }
   0x8   :  { %147 = vmatpush1.bf16.msra.mxu0 %v874_v7  ;;  %188 = vmatpush1.bf16.msra.mxu1 %v880_v8  ;;  %v758_v27 = vld [vmem:[%s1210_s0 + $0x4] sm:$0x3]  ;;  %v763_v28 = vld [vmem:[%s1210_s0 + $0x6] sm:$0x3] }
   0x9   :  { %148 = vmatprep.subr.bf16.mxu0 %v886_v9  ;;  %189 = vmatprep.subr.bf16.mxu1 %v891_v10  ;;  %v948_v23 = vsel %vm131_vm0, %v745_v21, 0  ;;  %v951_v24 = vsel %vm131_vm0, %v747_v22, 0 }
   0xc   :  { %149 = vmatpush1.bf16.msra.mxu0 %v896_v11  ;;  %190 = vmatpush1.bf16.msra.mxu1 %v901_v12 }
   0xd   :  { %150 = vmatprep.subr.bf16.mxu0 %v908_v13  ;;  %191 = vmatprep.subr.bf16.mxu1 %v915_v14 }
  0x10   :  { %151 = vmatpush1.bf16.msra.mxu0 %v928_v17  ;;  %192 = vmatpush1.bf16.msra.mxu1 %v933_v18 }
  0x11   :  { %749 = vmatprep.subr.msk.bf16.mxu0 %vm131_vm0, %v935_v19  ;;  %751 = vmatprep.subr.msk.bf16.mxu1 %vm131_vm0, %v939_v20 }
  0x14   :  { %153 = vmatpush1.bf16.msra.mxu0 %v948_v23  ;;  %194 = vmatpush1.bf16.msra.mxu1 %v951_v24 }
  0x15   :  { %231 = vmatprep.subr.bf16.mxu0 %v836_v0  ;;  %272 = vmatprep.subr.bf16.mxu1 %v843_v2 }
  0x17   :  { %750 = vmatmul.mubr.msk.bf16.vlgmr.msra.gmra.mrb[0].mxu0 %vm127_vm1, %v36_v25  ;;  %752 = vmatmul.mubr.msk.bf16.vlgmr.msra.gmra.mrb[0].mxu1 %vm127_vm1, %v36_v25 }
  0x18   :  { %232 = vmatpush1.bf16.msra.mxu0 %v851_v3  ;;  %273 = vmatpush1.bf16.msra.mxu1 %v856_v4 }
  0x19   :  { %233 = vmatprep.subr.bf16.mxu0 %v862_v5  ;;  %274 = vmatprep.subr.bf16.mxu1 %v869_v6 }
  0x1a   :  { %263 = vmatprep.mubr.bf16.mxu0 %v807_v1  ;;  %304 = vmatprep.mubr.bf16.mxu1 %v807_v1 }
  0x1c   :  { %234 = vmatpush1.bf16.msra.mxu0 %v874_v7  ;;  %275 = vmatpush1.bf16.msra.mxu1 %v880_v8 }
  0x1d   :  { %235 = vmatprep.subr.bf16.mxu0 %v886_v9  ;;  %276 = vmatprep.subr.bf16.mxu1 %v891_v10 }
  0x20   :  { %236 = vmatpush1.bf16.msra.mxu0 %v896_v11  ;;  %277 = vmatpush1.bf16.msra.mxu1 %v901_v12 }
  0x21   :  { %237 = vmatprep.subr.bf16.mxu0 %v908_v13  ;;  %278 = vmatprep.subr.bf16.mxu1 %v915_v14 }
  0x24   :  { %238 = vmatpush1.bf16.msra.mxu0 %v928_v17  ;;  %279 = vmatpush1.bf16.msra.mxu1 %v933_v18 }
  0x25   :  { %754 = vmatprep.subr.msk.bf16.mxu0 %vm131_vm0, %v935_v19  ;;  %756 = vmatprep.subr.msk.bf16.mxu1 %vm131_vm0, %v939_v20 }
  0x28   :  { %240 = vmatpush1.bf16.msra.mxu0 %v948_v23  ;;  %281 = vmatpush1.bf16.msra.mxu1 %v951_v24 }
  0x29   :  { %318 = vmatprep.subr.bf16.mxu0 %v836_v0  ;;  %359 = vmatprep.subr.bf16.mxu1 %v843_v2 }
  0x2b   :  { %755 = vmatmul.mubr.msk.bf16.vlgmr.msra.gmra.mrb[4].mxu0 %vm127_vm1, %v753_v26  ;;  %757 = vmatmul.mubr.msk.bf16.vlgmr.msra.gmra.mrb[4].mxu1 %vm127_vm1, %v753_v26 }
  0x2c   :  { %319 = vmatpush1.bf16.msra.mxu0 %v851_v3  ;;  %360 = vmatpush1.bf16.msra.mxu1 %v856_v4 }
  0x2d   :  { %320 = vmatprep.subr.bf16.mxu0 %v862_v5  ;;  %361 = vmatprep.subr.bf16.mxu1 %v869_v6 }
  0x2e   :  { %350 = vmatprep.mubr.bf16.mxu0 %v807_v1  ;;  %391 = vmatprep.mubr.bf16.mxu1 %v807_v1 }
  0x30   :  { %321 = vmatpush1.bf16.msra.mxu0 %v874_v7  ;;  %362 = vmatpush1.bf16.msra.mxu1 %v880_v8 }
  0x31   :  { %322 = vmatprep.subr.bf16.mxu0 %v886_v9  ;;  %363 = vmatprep.subr.bf16.mxu1 %v891_v10 }
  0x34   :  { %323 = vmatpush1.bf16.msra.mxu0 %v896_v11  ;;  %364 = vmatpush1.bf16.msra.mxu1 %v901_v12 }
  0x35   :  { %324 = vmatprep.subr.bf16.mxu0 %v908_v13  ;;  %365 = vmatprep.subr.bf16.mxu1 %v915_v14 }
  0x38   :  { %325 = vmatpush1.bf16.msra.mxu0 %v928_v17  ;;  %366 = vmatpush1.bf16.msra.mxu1 %v933_v18 }
  0x39   :  { %759 = vmatprep.subr.msk.bf16.mxu0 %vm131_vm0, %v935_v19  ;;  %761 = vmatprep.subr.msk.bf16.mxu1 %vm131_vm0, %v939_v20 }
  0x3c   :  { %327 = vmatpush1.bf16.msra.mxu0 %v948_v23  ;;  %368 = vmatpush1.bf16.msra.mxu1 %v951_v24 }
  0x3d   :  { %405 = vmatprep.subr.bf16.mxu0 %v836_v0  ;;  %446 = vmatprep.subr.bf16.mxu1 %v843_v2 }
  0x3f   :  { %760 = vmatmul.mubr.msk.bf16.vlgmr.msra.gmra.mrb[8].mxu0 %vm127_vm1, %v758_v27  ;;  %762 = vmatmul.mubr.msk.bf16.vlgmr.msra.gmra.mrb[8].mxu1 %vm127_vm1, %v758_v27 }
  0x40   :  { %406 = vmatpush1.bf16.msra.mxu0 %v851_v3  ;;  %447 = vmatpush1.bf16.msra.mxu1 %v856_v4 }
  0x41   :  { %407 = vmatprep.subr.bf16.mxu0 %v862_v5  ;;  %448 = vmatprep.subr.bf16.mxu1 %v869_v6 }
  0x42   :  { %437 = vmatprep.mubr.bf16.mxu0 %v807_v1  ;;  %478 = vmatprep.mubr.bf16.mxu1 %v807_v1 }
  0x44   :  { %408 = vmatpush1.bf16.msra.mxu0 %v874_v7  ;;  %449 = vmatpush1.bf16.msra.mxu1 %v880_v8 }
  0x45   :  { %409 = vmatprep.subr.bf16.mxu0 %v886_v9  ;;  %450 = vmatprep.subr.bf16.mxu1 %v891_v10 }
  0x48   :  { %410 = vmatpush1.bf16.msra.mxu0 %v896_v11  ;;  %451 = vmatpush1.bf16.msra.mxu1 %v901_v12 }
  0x49   :  { %411 = vmatprep.subr.bf16.mxu0 %v908_v13  ;;  %452 = vmatprep.subr.bf16.mxu1 %v915_v14 }
  0x4c   :  { %412 = vmatpush1.bf16.msra.mxu0 %v928_v17  ;;  %453 = vmatpush1.bf16.msra.mxu1 %v933_v18 }
  0x4d   :  { %764 = vmatprep.subr.msk.bf16.mxu0 %vm131_vm0, %v935_v19  ;;  %766 = vmatprep.subr.msk.bf16.mxu1 %vm131_vm0, %v939_v20 }
  0x50   :  { %414 = vmatpush1.bf16.msra.mxu0 %v948_v23  ;;  %455 = vmatpush1.bf16.msra.mxu1 %v951_v24 }
  0x53   :  { %765 = vmatmul.mubr.msk.bf16.vlgmr.msra.gmra.mrb[12].mxu0 %vm127_vm1, %v763_v28  ;;  %767 = vmatmul.mubr.msk.bf16.vlgmr.msra.gmra.mrb[12].mxu1 %vm127_vm1, %v763_v28 }
  0xea   :  { %v1047_v29 = vpop.f32.mrb[0].mxu0  ;;  %v1049_v30 = vpop.f32.mrb[0].mxu1 }
  0xeb   :  { %v487_v31 = vsel %vm131_vm0, %v1047_v29, 0.0  ;;  %v496_v32 = vmul.f32 %v1047_v29, %v1047_v29  ;;  %v1055_v33 = vpop.f32.mrb[1].mxu0  ;;  %v498_v34 = vmul.f32 %v1049_v30, %v1049_v30  ;;  %v1059_v35 = vpop.f32.mrb[1].mxu1  ;;  %v490_v40 = vsel %vm131_vm0, %v1049_v30, 0.0 }
  0xec   :  { %v488_v36 = vsel %vm131_vm0, %v1055_v33, 0.0  ;;  %v497_v37 = vmul.f32 %v1055_v33, %v1055_v33  ;;  %v182_v38 = vpop.f32.mrb[2].mxu0  ;;  %v223_v39 = vpop.f32.mrb[2].mxu1  ;;  %v499_v41 = vmul.f32 %v1059_v35, %v1059_v35  ;;  %v492_v46 = vsel %vm131_vm0, %v1059_v35, 0.0 }
  0xed   :  { %v183_v42 = vpop.f32.mrb[3].mxu0  ;;  %v224_v43 = vpop.f32.mrb[3].mxu1  ;;  %v489_v44 = vadd.f32 %v488_v36, %v487_v31  ;;  %v500_v45 = vsel %vm131_vm0, %v496_v32, 0.0  ;;  %v503_v48 = vsel %vm131_vm0, %v498_v34, 0.0 }
  0xee   :  { %v501_v47 = vsel %vm131_vm0, %v497_v37, 0.0  ;;  %v505_v51 = vsel %vm131_vm0, %v499_v41, 0.0 }
  0xef   :  { %v491_v49 = vadd.f32 %v490_v40, %v489_v44  ;;  %v502_v50 = vadd.f32 %v501_v47, %v500_v45 }
  0xf1   :  { %v493_v52 = vadd.f32 %v492_v46, %v491_v49  ;;  %v504_v53 = vadd.f32 %v503_v48, %v502_v50 }
  0xf3   :  { %494 = vadd.xlane.f32.xlu0 %v493_v52  ;;  %v506_v54 = vadd.f32 %v505_v51, %v504_v53 }
  0xf5   :  { %507 = vadd.xlane.f32.xlu1 %v506_v54 }
  0xfe   :  { %v1075_v55 = vpop.f32.mrb[4].mxu0  ;;  %v1077_v56 = vpop.f32.mrb[4].mxu1 }
  0xff   :  { %v509_v57 = vsel %vm131_vm0, %v1075_v55, 0.0  ;;  %v519_v58 = vmul.f32 %v1075_v55, %v1075_v55  ;;  %v1083_v59 = vpop.f32.mrb[5].mxu0  ;;  %v521_v60 = vmul.f32 %v1077_v56, %v1077_v56  ;;  %v1087_v61 = vpop.f32.mrb[5].mxu1  ;;  %v512_v0 = vsel %vm131_vm0, %v1077_v56, 0.0 }
 0x100   :  { %v510_v62 = vsel %vm131_vm0, %v1083_v59, 0.0  ;;  %v520_v63 = vmul.f32 %v1083_v59, %v1083_v59  ;;  %v269_v1 = vpop.f32.mrb[6].mxu0  ;;  %v522_v2 = vmul.f32 %v1087_v61, %v1087_v61  ;;  %v310_v3 = vpop.f32.mrb[6].mxu1  ;;  %v514_v9 = vsel %vm131_vm0, %v1087_v61, 0.0 }
 0x101   :  { %v523_v4 = vsel %vm131_vm0, %v519_v58, 0.0  ;;  %v511_v5 = vadd.f32 %v510_v62, %v509_v57  ;;  %v270_v6 = vpop.f32.mrb[7].mxu0  ;;  %v311_v7 = vpop.f32.mrb[7].mxu1  ;;  %v526_v10 = vsel %vm131_vm0, %v521_v60, 0.0 }
 0x102   :  { %v524_v8 = vsel %vm131_vm0, %v520_v63, 0.0  ;;  %v528_v13 = vsel %vm131_vm0, %v522_v2, 0.0 }
 0x103   :  { %v513_v11 = vadd.f32 %v512_v0, %v511_v5  ;;  %v525_v12 = vadd.f32 %v524_v8, %v523_v4 }
 0x105   :  { %v515_v14 = vadd.f32 %v514_v9, %v513_v11  ;;  %v527_v15 = vadd.f32 %v526_v10, %v525_v12 }
 0x107   :  { %516 = vadd.xlane.f32.xlu0 %v515_v14  ;;  %v529_v16 = vadd.f32 %v528_v13, %v527_v15 }
 0x109   :  { %530 = vadd.xlane.f32.xlu1 %v529_v16 }
 0x112   :  { %v1103_v17 = vpop.f32.mrb[8].mxu0  ;;  %v1105_v18 = vpop.f32.mrb[8].mxu1 }
 0x113   :  { %v533_v19 = vsel %vm131_vm0, %v1103_v17, 0.0  ;;  %v543_v20 = vmul.f32 %v1103_v17, %v1103_v17  ;;  %v1111_v21 = vpop.f32.mrb[9].mxu0  ;;  %v545_v22 = vmul.f32 %v1105_v18, %v1105_v18  ;;  %v1115_v23 = vpop.f32.mrb[9].mxu1  ;;  %v536_v26 = vsel %vm131_vm0, %v1105_v18, 0.0 }
 0x114   :  { %v534_v24 = vsel %vm131_vm0, %v1111_v21, 0.0  ;;  %v544_v25 = vmul.f32 %v1111_v21, %v1111_v21  ;;  %v356_v27 = vpop.f32.mrb[10].mxu0  ;;  %v546_v28 = vmul.f32 %v1115_v23, %v1115_v23  ;;  %v397_v31 = vpop.f32.mrb[10].mxu1  ;;  %v538_v39 = vsel %vm131_vm0, %v1115_v23, 0.0 }
 0x115   :  { %v547_v32 = vsel %vm131_vm0, %v543_v20, 0.0  ;;  %v535_v34 = vadd.f32 %v534_v24, %v533_v19  ;;  %v357_v36 = vpop.f32.mrb[11].mxu0  ;;  %v398_v37 = vpop.f32.mrb[11].mxu1  ;;  %v550_v40 = vsel %vm131_vm0, %v545_v22, 0.0 }
 0x116   :  { %v548_v38 = vsel %vm131_vm0, %v544_v25, 0.0  ;;  %v552_v43 = vsel %vm131_vm0, %v546_v28, 0.0 }
 0x117   :  { %v537_v41 = vadd.f32 %v536_v26, %v535_v34  ;;  %v549_v42 = vadd.f32 %v548_v38, %v547_v32 }
 0x119   :  { %v539_v44 = vadd.f32 %v538_v39, %v537_v41  ;;  %v551_v45 = vadd.f32 %v550_v40, %v549_v42  ;;  %v585_v40 = vld [vmem:[%s1211_s2] sm:$0xf] }
 0x11b   :  { %540 = vadd.xlane.f32.xlu0 %v539_v44  ;;  %v553_v46 = vadd.f32 %v552_v43, %v551_v45  ;;  %v589_v43 = vld [vmem:[%s1212_s3] sm:$0xf] }
 0x11d   :  { %554 = vadd.xlane.f32.xlu1 %v553_v46 }
 0x126   :  { %v1131_v47 = vpop.f32.mrb[12].mxu0  ;;  %v1133_v48 = vpop.f32.mrb[12].mxu1 }
 0x127   :  { %v557_v49 = vsel %vm131_vm0, %v1131_v47, 0.0  ;;  %v567_v50 = vmul.f32 %v1131_v47, %v1131_v47  ;;  %v569_v51 = vmul.f32 %v1133_v48, %v1133_v48  ;;  %v1141_v52 = vpop.f32.mrb[13].mxu0  ;;  %v1143_v53 = vpop.f32.mrb[13].mxu1  ;;  %v560_v54 = vsel %vm131_vm0, %v1133_v48, 0.0 }
 0x128   :  { %v558_v57 = vsel %vm131_vm0, %v1141_v52, 0.0  ;;  %v568_v58 = vmul.f32 %v1141_v52, %v1141_v52  ;;  %v443_v60 = vpop.f32.mrb[14].mxu0  ;;  %v484_v62 = vpop.f32.mrb[14].mxu1  ;;  %v570_v4 = vmul.f32 %v1143_v53, %v1143_v53  ;;  %v562_v8 = vsel %vm131_vm0, %v1143_v53, 0.0 }
 0x129   :  { %v571_v63 = vsel %vm131_vm0, %v567_v50, 0.0  ;;  %v559_v0 = vadd.f32 %v558_v57, %v557_v49  ;;  %v444_v1 = vpop.f32.mrb[15].mxu0  ;;  %v485_v2 = vpop.f32.mrb[15].mxu1  ;;  %v574_v5 = vsel %vm131_vm0, %v569_v51, 0.0 }
 0x12a   :  { %v572_v3 = vsel %vm131_vm0, %v568_v58, 0.0  ;;  %v576_v11 = vsel %vm131_vm0, %v570_v4, 0.0 }
 0x12b   :  { %v561_v6 = vadd.f32 %v560_v54, %v559_v0  ;;  %v573_v7 = vadd.f32 %v572_v3, %v571_v63 }
 0x12d   :  { %v563_v9 = vadd.f32 %v562_v8, %v561_v6  ;;  %v575_v10 = vadd.f32 %v574_v5, %v573_v7 }
 0x12f   :  { %564 = vadd.xlane.f32.xlu0 %v563_v9  ;;  %v577_v12 = vadd.f32 %v576_v11, %v575_v10 }
 0x131   :  { %578 = vadd.xlane.f32.xlu1 %v577_v12 }
 0x180   :  { %v495_v13 = vpop.xlane.xlu0 %494 }
 0x182   :  { %v508_v14 = vpop.xlane.xlu1 %507 }
 0x194   :  { %v517_v15 = vpop.xlane.xlu0 %516 }
 0x195   :  { %v518_v20 = vadd.f32 %v517_v15, %v495_v13 }
 0x196   :  { %v531_v16 = vpop.xlane.xlu1 %530 }
 0x197   :  { %v532_v24 = vadd.f32 %v531_v16, %v508_v14 }
 0x1a8   :  { %v541_v19 = vpop.xlane.xlu0 %540 }
 0x1a9   :  { %v542_v25 = vadd.f32 %v541_v19, %v518_v20 }
 0x1aa   :  { %v555_v22 = vpop.xlane.xlu1 %554 }
 0x1ab   :  { %v556_v27 = vadd.f32 %v555_v22, %v532_v24 }
 0x1bc   :  { %v565_v26 = vpop.xlane.xlu0 %564 }
 0x1bd   :  { %v566_v28 = vadd.f32 %v565_v26, %v542_v25 }
 0x1be   :  { %v579_v31 = vpop.xlane.xlu1 %578 }
 0x1bf   :  { %v581_v32 = vmul.f32 0.00048828125, %v566_v28  ;;  %v580_v34 = vadd.f32 %v579_v31, %v556_v27 }
 0x1c1   :  { %v583_v36 = vmul.f32 %v581_v32, %v581_v32  ;;  %v582_v37 = vmul.f32 0.00048828125, %v580_v34 }
 0x1c3   :  { %v584_v38 = vsub.f32 %v582_v37, %v583_v36 }
 0x1c5   :  { %v586_v39 = vadd.f32 1e-05, %v584_v38 }
 0x1c7   :  { %805 = vrsqrt.f32 %v586_v39 }
 0x1d1   :  { %v806_v41 = vpop.eup %805 }
 0x1d2   :  { %v588_v42 = vmul.f32 %v806_v41, %v585_v40 }
 0x1d4   :  { %594 = vperm.xlu0 %775, %v588_v42   ;;  %v590_v44 = vmul.f32 %v588_v42, %v581_v32 }
 0x1d6   :  { %v591_v45 = vsub.f32 %v589_v43, %v590_v44 }
 0x1d8   :  { %603 = vperm.xlu1 %776, %v591_v45  }
 0x253   :  { %v595_v46 = vpop.permute.xlu0 %594 }
 0x254   :  { %v597_v49 = vmul.f32 %v595_v46, %v1047_v29  ;;  %v598_v50 = vmul.f32 %v595_v46, %v1055_v33  ;;  %v599_v51 = vmul.f32 %v595_v46, %v1049_v30  ;;  %v600_v54 = vmul.f32 %v595_v46, %v1059_v35 }
 0x255   :  { %v632_v57 = vmul.f32 %v595_v46, %v1075_v55  ;;  %v633_v58 = vmul.f32 %v595_v46, %v1083_v59  ;;  %v634_v60 = vmul.f32 %v595_v46, %v1077_v56  ;;  %v635_v62 = vmul.f32 %v595_v46, %v1087_v61 }
 0x256   :  { %v663_v63 = vmul.f32 %v595_v46, %v1103_v17  ;;  %v664_v0 = vmul.f32 %v595_v46, %v1111_v21  ;;  %v665_v29 = vmul.f32 %v595_v46, %v1105_v18  ;;  %v666_v33 = vmul.f32 %v595_v46, %v1115_v23 }
 0x257   :  { %v694_v30 = vmul.f32 %v595_v46, %v1131_v47  ;;  %v695_v35 = vmul.f32 %v595_v46, %v1141_v52  ;;  %v696_v55 = vmul.f32 %v595_v46, %v1133_v48  ;;  %v697_v59 = vmul.f32 %v595_v46, %v1143_v53  ;;  %v604_v1 = vpop.permute.xlu1 %603 }
 0x258   :  { %v606_v56 = vadd.f32 %v604_v1, %v597_v49  ;;  %v607_v2 = vadd.f32 %v604_v1, %v598_v50  ;;  %v608_v61 = vadd.f32 %v604_v1, %v599_v51  ;;  %v609_v3 = vadd.f32 %v604_v1, %v600_v54 }
 0x259   :  { %v636_v17 = vadd.f32 %v632_v57, %v604_v1  ;;  %v637_v4 = vadd.f32 %v633_v58, %v604_v1  ;;  %v638_v21 = vadd.f32 %v634_v60, %v604_v1  ;;  %v639_v5 = vadd.f32 %v635_v62, %v604_v1 }
 0x25a   :  { %vm610_vm2 = vcmp.ge.f32.partialorder %v606_v56, 0.0  ;;  %vm611_vm3 = vcmp.ge.f32.partialorder %v607_v2, 0.0  ;;  %vm612_vm4 = vcmp.ge.f32.partialorder %v608_v61, 0.0  ;;  %vm613_vm5 = vcmp.ge.f32.partialorder %v609_v3, 0.0 }
 0x25b   :  { %v614_v18 = vmul.f32 0.2, %v606_v56  ;;  %v615_v23 = vmul.f32 0.2, %v607_v2  ;;  %v616_v47 = vmul.f32 0.2, %v608_v61  ;;  %v667_v52 = vadd.f32 %v663_v63, %v604_v1 }
 0x25c   :  { %v617_v48 = vmul.f32 0.2, %v609_v3  ;;  %vm640_vm6 = vcmp.ge.f32.partialorder %v636_v17, 0.0  ;;  %vm641_vm7 = vcmp.ge.f32.partialorder %v637_v4, 0.0  ;;  %vm642_vm8 = vcmp.ge.f32.partialorder %v638_v21, 0.0 }
 0x25d   :  { %v618_v53 = vsel %vm610_vm2, %v606_v56, %v614_v18  ;;  %v619_v6 = vsel %vm611_vm3, %v607_v2, %v615_v23  ;;  %v620_v7 = vsel %vm612_vm4, %v608_v61, %v616_v47  ;;  %vm643_vm9 = vcmp.ge.f32.partialorder %v639_v5, 0.0 }
 0x25e   :  { %v621_v8 = vsel %vm613_vm5, %v609_v3, %v617_v48  ;;  %v626_v9 = vcombine.low %v618_v53, %v619_v6  ;;  %v644_v10 = vmul.f32 0.2, %v636_v17  ;;  %v645_v11 = vmul.f32 0.2, %v637_v4 }
 0x25f   :  { %v627_v12 = vcombine.low %v620_v7, %v621_v8  ;;  %v646_v13 = vmul.f32 0.2, %v638_v21  ;;  %v647_v14 = vmul.f32 0.2, %v639_v5  ;;  %v668_v15 = vadd.f32 %v664_v0, %v604_v1 }
 0x260   :  { %630 = vst [vmem:[%s1213_s4] sm:$0xff] %v626_v9  ;;  %v648_v16 = vsel %vm640_vm6, %v636_v17, %v644_v10  ;;  %v649_v19 = vsel %vm641_vm7, %v637_v4, %v645_v11  ;;  %v669_v20 = vadd.f32 %v665_v29, %v604_v1  ;;  %v670_v22 = vadd.f32 %v666_v33, %v604_v1 }
 0x261   :  { %631 = vst [vmem:[%s1213_s4 + $0x8] sm:$0xff] %v627_v12  ;;  %v650_v24 = vsel %vm642_vm8, %v638_v21, %v646_v13  ;;  %v651_v25 = vsel %vm643_vm9, %v639_v5, %v647_v14  ;;  %v656_v26 = vcombine.low %v648_v16, %v649_v19  ;;  %vm671_vm10 = vcmp.ge.f32.partialorder %v667_v52, 0.0 }
 0x262   :  { %v657_v27 = vcombine.low %v650_v24, %v651_v25  ;;  %vm672_vm11 = vcmp.ge.f32.partialorder %v668_v15, 0.0  ;;  %vm673_vm12 = vcmp.ge.f32.partialorder %v669_v20, 0.0  ;;  %vm674_vm13 = vcmp.ge.f32.partialorder %v670_v22, 0.0 }
 0x263   :  { %768 = vst [vmem:[%s1213_s4 + $0x10] sm:$0xff] %v656_v26  ;;  %v675_v28 = vmul.f32 0.2, %v667_v52  ;;  %v676_v31 = vmul.f32 0.2, %v668_v15  ;;  %v698_v34 = vadd.f32 %v694_v30, %v604_v1  ;;  %v699_v37 = vadd.f32 %v695_v35, %v604_v1 }
 0x264   :  { %v677_v32 = vmul.f32 0.2, %v669_v20  ;;  %769 = vst [vmem:[%s1213_s4 + $0x18] sm:$0xff] %v657_v27  ;;  %v678_v36 = vmul.f32 0.2, %v670_v22  ;;  %v700_v38 = vadd.f32 %v696_v55, %v604_v1  ;;  %v701_v39 = vadd.f32 %v697_v59, %v604_v1 }
 0x265   :  { %v679_v40 = vsel %vm671_vm10, %v667_v52, %v675_v28  ;;  %v680_v41 = vsel %vm672_vm11, %v668_v15, %v676_v31  ;;  %vm702_vm14 = vcmp.ge.f32.partialorder %v698_v34, 0.0  ;;  %vm703_vm15 = vcmp.ge.f32.partialorder %v699_v37, 0.0 }
 0x266   :  { %v681_v42 = vsel %vm673_vm12, %v669_v20, %v677_v32  ;;  %v682_v43 = vsel %vm674_vm13, %v670_v22, %v678_v36  ;;  %v687_v44 = vcombine.low %v679_v40, %v680_v41  ;;  %vm704_vm0 = vcmp.ge.f32.partialorder %v700_v38, 0.0 }
 0x267   :  { %v688_v45 = vcombine.low %v681_v42, %v682_v43  ;;  %vm705_vm1 = vcmp.ge.f32.partialorder %v701_v39, 0.0  ;;  %v706_v46 = vmul.f32 0.2, %v698_v34  ;;  %v707_v49 = vmul.f32 0.2, %v699_v37 }
 0x268   :  { %770 = vst [vmem:[%s1213_s4 + $0x20] sm:$0xff] %v687_v44  ;;  %v708_v50 = vmul.f32 0.2, %v700_v38  ;;  %v709_v51 = vmul.f32 0.2, %v701_v39 }
 0x269   :  { %771 = vst [vmem:[%s1213_s4 + $0x28] sm:$0xff] %v688_v45  ;;  %v710_v54 = vsel %vm702_vm14, %v698_v34, %v706_v46  ;;  %v711_v57 = vsel %vm703_vm15, %v699_v37, %v707_v49 }
 0x26a   :  { %v712_v58 = vsel %vm704_vm0, %v700_v38, %v708_v50  ;;  %v713_v60 = vsel %vm705_vm1, %v701_v39, %v709_v51  ;;  %v718_v62 = vcombine.low %v710_v54, %v711_v57 }
 0x26b   :  { %v719_v63 = vcombine.low %v712_v58, %v713_v60 }
 0x26c   :  { %772 = vst [vmem:[%s1213_s4 + $0x30] sm:$0xff] %v718_v62 }
 0x26d   :  { %773 = vst [vmem:[%s1213_s4 + $0x38] sm:$0xff] %v719_v63 }

// kernel: generator_dc_forward.10
= control target key start
LH: loop header
LB: loop body
LE: loop exit
PB: predicated region body
PF: predicated region fallthrough
CT: control target
= control target key end

     0   :  { %v2642_v3 = vmov 0   ;;  %vm263_vm0 = vcmask 1041408   ;;  %vm259_vm1 = vcmask 293888   ;;  %vm1639_vm2 = vcmask 1043456   ;;  %s4242_s1 = inlined_call_operand.vmem [shape: bf16[36,2048], index: 1, kind: input, shape index: {}]   ;;  %s4243_s0 = inlined_call_operand.vmem [shape: bf16[4,4,36], index: 0, kind: input, shape index: {}]   ;;  %s4244_s2 = inlined_call_operand.vmem [shape: f32[4,1], index: 2, kind: input, shape index: {}]   ;;  %s4245_s3 = inlined_call_operand.vmem [shape: f32[4,1], index: 3, kind: input, shape index: {}]   ;;  %s4246_s4 = inlined_call_operand.vmem [shape: f32[4,4,2048], index: 4, kind: output, shape index: {}]  }
   0x1   :  { %v18_v0 = vld [vmem:[%s4242_s1] sm:$0xff]  ;;  %v19_v2 = vld [vmem:[%s4242_s1 + $0x8] sm:$0xff]  ;;  %344 = vmatprep.mubr.bf16.mxu0 %v2642_v3  ;;  %385 = vmatprep.mubr.bf16.mxu1 %v2642_v3  ;;  %v20_v23 = vld [vmem:[%s4242_s1 + $0x10] sm:$0xff] }
   0x2   :  { %v26_v1 = vld [vmem:[%s4242_s1 + $0x40] sm:$0xff]  ;;  %v27_v6 = vld [vmem:[%s4242_s1 + $0x48] sm:$0xff]  ;;  %2622 = vset.pattern.permute.xlu0 %v2642_v3  ;;  %2623 = vset.pattern.permute.xlu1 %v2642_v3  ;;  %v28_v24 = vld [vmem:[%s4242_s1 + $0x50] sm:$0xff] }
   0x3   :  { %v2679_v4 = vcombine.high %v18_v0, %v26_v1  ;;  %v2681_v5 = vcombine.low %v18_v0, %v26_v1  ;;  %v34_v7 = vld [vmem:[%s4242_s1 + $0x80] sm:$0xff]  ;;  %v2694_v9 = vcombine.high %v19_v2, %v27_v6  ;;  %v2696_v10 = vcombine.low %v19_v2, %v27_v6  ;;  %v35_v12 = vld [vmem:[%s4242_s1 + $0x88] sm:$0xff]  ;;  %v21_v25 = vld [vmem:[%s4242_s1 + $0x18] sm:$0xff] }
   0x4   :  { %v42_v8 = vld [vmem:[%s4242_s1 + $0xc0] sm:$0xff]  ;;  %v43_v13 = vld [vmem:[%s4242_s1 + $0xc8] sm:$0xff]  ;;  %v29_v26 = vld [vmem:[%s4242_s1 + $0x58] sm:$0xff]  ;;  %v2747_v28 = vcombine.high %v20_v23, %v28_v24  ;;  %v2774_v36 = vcombine.low %v20_v23, %v28_v24 }
   0x5   :  { %v2698_v11 = vcombine.high %v34_v7, %v42_v8  ;;  %v50_v14 = vld [vmem:[%s4242_s1 + $0x100] sm:$0x33]  ;;  %312 = vmatprep.subr.bf16.mxu0 %v2679_v4  ;;  %v2710_v15 = vcombine.high %v35_v12, %v43_v13  ;;  %v51_v16 = vld [vmem:[%s4242_s1 + $0x108] sm:$0x33]  ;;  %353 = vmatprep.subr.bf16.mxu1 %v2694_v9  ;;  %v2717_v17 = vcombine.low %v34_v7, %v42_v8  ;;  %v36_v31 = vld [vmem:[%s4242_s1 + $0x90] sm:$0xff] }
   0x6   :  { %313 = vmatpush1.bf16.msra.mxu0 %v2681_v5  ;;  %354 = vmatpush1.bf16.msra.mxu1 %v2696_v10  ;;  %v2721_v18 = vcombine.low %v35_v12, %v43_v13  ;;  %v2723_v19 = vcombine.high %v50_v14, %v50_v14  ;;  %v2514_v20 = vcombine.low %v50_v14, %v50_v14  ;;  %v44_v32 = vld [vmem:[%s4242_s1 + $0xd0] sm:$0xff]  ;;  %v37_v33 = vld [vmem:[%s4242_s1 + $0x98] sm:$0xff]  ;;  %v2772_v35 = vld [vmem:[%s4243_s0] sm:$0x3] }
   0x7   :  { %314 = vmatprep.subr.bf16.mxu0 %v2698_v11  ;;  %355 = vmatprep.subr.bf16.mxu1 %v2710_v15  ;;  %v2726_v21 = vcombine.high %v51_v16, %v51_v16  ;;  %v2516_v22 = vcombine.low %v51_v16, %v51_v16  ;;  %v2754_v30 = vcombine.high %v21_v25, %v29_v26  ;;  %v45_v34 = vld [vmem:[%s4242_s1 + $0xd8] sm:$0xff]  ;;  %v52_v40 = vld [vmem:[%s4242_s1 + $0x110] sm:$0x33]  ;;  %v22_v48 = vld [vmem:[%s4242_s1 + $0x20] sm:$0xff] }
   0x8   :  { %v2745_v27 = vsel %vm263_vm0, %v2514_v20, 0  ;;  %v2778_v37 = vcombine.low %v21_v25, %v29_v26  ;;  %v2780_v38 = vcombine.high %v36_v31, %v44_v32  ;;  %v2783_v39 = vcombine.high %v37_v33, %v45_v34  ;;  %v53_v41 = vld [vmem:[%s4242_s1 + $0x118] sm:$0x33]  ;;  %v30_v49 = vld [vmem:[%s4242_s1 + $0x60] sm:$0xff]  ;;  %v23_v50 = vld [vmem:[%s4242_s1 + $0x28] sm:$0xff] }
   0x9   :  { %v2752_v29 = vsel %vm263_vm0, %v2516_v22, 0  ;;  %v2796_v42 = vcombine.low %v36_v31, %v44_v32  ;;  %v2800_v43 = vcombine.low %v37_v33, %v45_v34  ;;  %v2802_v44 = vcombine.high %v52_v40, %v52_v40  ;;  %v31_v51 = vld [vmem:[%s4242_s1 + $0x68] sm:$0xff]  ;;  %v38_v56 = vld [vmem:[%s4242_s1 + $0xa0] sm:$0xff]  ;;  %v24_v14 = vld [vmem:[%s4242_s1 + $0x30] sm:$0xff] }
   0xa   :  { %315 = vmatpush1.bf16.msra.mxu0 %v2717_v17  ;;  %356 = vmatpush1.bf16.msra.mxu1 %v2721_v18  ;;  %v2518_v45 = vcombine.low %v52_v40, %v52_v40  ;;  %v2805_v46 = vcombine.high %v53_v41, %v53_v41  ;;  %v2520_v47 = vcombine.low %v53_v41, %v53_v41  ;;  %v46_v57 = vld [vmem:[%s4242_s1 + $0xe0] sm:$0xff]  ;;  %v39_v58 = vld [vmem:[%s4242_s1 + $0xa8] sm:$0xff]  ;;  %v32_v16 = vld [vmem:[%s4242_s1 + $0x70] sm:$0xff] }
   0xb   :  { %2530 = vmatprep.subr.msk.bf16.mxu0 %vm263_vm0, %v2723_v19  ;;  %2532 = vmatprep.subr.msk.bf16.mxu1 %vm263_vm0, %v2726_v21  ;;  %v2828_v53 = vcombine.high %v22_v48, %v30_v49  ;;  %v2835_v55 = vcombine.high %v23_v50, %v31_v51  ;;  %v47_v59 = vld [vmem:[%s4242_s1 + $0xe8] sm:$0xff]  ;;  %v2850_v60 = vcombine.low %v22_v48, %v30_v49  ;;  %v54_v0 = vld [vmem:[%s4242_s1 + $0x120] sm:$0x33]  ;;  %v25_v20 = vld [vmem:[%s4242_s1 + $0x38] sm:$0xff] }
   0xc   :  { %v2826_v52 = vsel %vm263_vm0, %v2518_v45, 0  ;;  %v2833_v54 = vsel %vm263_vm0, %v2520_v47, 0  ;;  %v2854_v61 = vcombine.low %v23_v50, %v31_v51  ;;  %v2856_v62 = vcombine.high %v38_v56, %v46_v57  ;;  %v55_v1 = vld [vmem:[%s4242_s1 + $0x128] sm:$0x33]  ;;  %v33_v22 = vld [vmem:[%s4242_s1 + $0x78] sm:$0xff]  ;;  %v40_v31 = vld [vmem:[%s4242_s1 + $0xb0] sm:$0xff] }
   0xd   :  { %v2859_v63 = vcombine.high %v39_v58, %v47_v59  ;;  %v2872_v2 = vcombine.low %v38_v56, %v46_v57  ;;  %v2876_v6 = vcombine.low %v39_v58, %v47_v59  ;;  %v2878_v7 = vcombine.high %v54_v0, %v54_v0  ;;  %v48_v32 = vld [vmem:[%s4242_s1 + $0xf0] sm:$0xff]  ;;  %v41_v33 = vld [vmem:[%s4242_s1 + $0xb8] sm:$0xff] }
   0xe   :  { %317 = vmatpush1.bf16.msra.mxu0 %v2745_v27  ;;  %358 = vmatpush1.bf16.msra.mxu1 %v2752_v29  ;;  %v2522_v8 = vcombine.low %v54_v0, %v54_v0  ;;  %v2881_v12 = vcombine.high %v55_v1, %v55_v1  ;;  %v2524_v13 = vcombine.low %v55_v1, %v55_v1  ;;  %v49_v34 = vld [vmem:[%s4242_s1 + $0xf8] sm:$0xff]  ;;  %v56_v48 = vld [vmem:[%s4242_s1 + $0x130] sm:$0x33] }
   0xf   :  { %394 = vmatprep.subr.bf16.mxu0 %v2747_v28  ;;  %435 = vmatprep.subr.bf16.mxu1 %v2754_v30  ;;  %v2904_v24 = vcombine.high %v24_v14, %v32_v16  ;;  %v2911_v26 = vcombine.high %v25_v20, %v33_v22  ;;  %v2926_v40 = vcombine.low %v24_v14, %v32_v16  ;;  %v57_v49 = vld [vmem:[%s4242_s1 + $0x138] sm:$0x33] }
  0x10   :  { %v2902_v23 = vsel %vm263_vm0, %v2522_v8, 0  ;;  %v2909_v25 = vsel %vm263_vm0, %v2524_v13, 0  ;;  %v2930_v41 = vcombine.low %v25_v20, %v33_v22  ;;  %v2932_v45 = vcombine.high %v40_v31, %v48_v32  ;;  %v2563_v8 = vld [vmem:[%s4243_s0 + $0x4] sm:$0x3] }
  0x11   :  { %2531 = vmatmul.mubr.msk.bf16.vlgmr.msra.gmra.mrb[0].mxu0 %vm259_vm1, %v2772_v35  ;;  %2533 = vmatmul.mubr.msk.bf16.vlgmr.msra.gmra.mrb[0].mxu1 %vm259_vm1, %v2772_v35  ;;  %v2935_v47 = vcombine.high %v41_v33, %v49_v34  ;;  %v2948_v50 = vcombine.low %v40_v31, %v48_v32  ;;  %v2952_v51 = vcombine.low %v41_v33, %v49_v34 }
  0x12   :  { %395 = vmatpush1.bf16.msra.mxu0 %v2774_v36  ;;  %436 = vmatpush1.bf16.msra.mxu1 %v2778_v37  ;;  %v2954_v56 = vcombine.high %v56_v48, %v56_v48  ;;  %v2526_v57 = vcombine.low %v56_v48, %v56_v48  ;;  %v2957_v58 = vcombine.high %v57_v49, %v57_v49 }
  0x13   :  { %396 = vmatprep.subr.bf16.mxu0 %v2780_v38  ;;  %437 = vmatprep.subr.bf16.mxu1 %v2783_v39  ;;  %v2528_v59 = vcombine.low %v57_v49, %v57_v49 }
  0x14   :  { %426 = vmatprep.mubr.bf16.mxu0 %v2642_v3  ;;  %467 = vmatprep.mubr.bf16.mxu1 %v2642_v3  ;;  %v2966_v0 = vsel %vm263_vm0, %v2526_v57, 0 }
  0x15   :  { %v2971_v1 = vsel %vm263_vm0, %v2528_v59, 0 }
  0x16   :  { %397 = vmatpush1.bf16.msra.mxu0 %v2796_v42  ;;  %438 = vmatpush1.bf16.msra.mxu1 %v2800_v43 }
  0x17   :  { %2534 = vmatprep.subr.msk.bf16.mxu0 %vm263_vm0, %v2802_v44  ;;  %2536 = vmatprep.subr.msk.bf16.mxu1 %vm263_vm0, %v2805_v46 }
  0x1a   :  { %399 = vmatpush1.bf16.msra.mxu0 %v2826_v52  ;;  %440 = vmatpush1.bf16.msra.mxu1 %v2833_v54 }
  0x1b   :  { %476 = vmatprep.subr.bf16.mxu0 %v2828_v53  ;;  %517 = vmatprep.subr.bf16.mxu1 %v2835_v55 }
  0x1d   :  { %2535 = vmatmul.mubr.msk.bf16.vlgmr.msra.gmra.mrb[4].mxu0 %vm259_vm1, %v2772_v35  ;;  %2537 = vmatmul.mubr.msk.bf16.vlgmr.msra.gmra.mrb[4].mxu1 %vm259_vm1, %v2772_v35 }
  0x1e   :  { %477 = vmatpush1.bf16.msra.mxu0 %v2850_v60  ;;  %518 = vmatpush1.bf16.msra.mxu1 %v2854_v61 }
  0x1f   :  { %478 = vmatprep.subr.bf16.mxu0 %v2856_v62  ;;  %519 = vmatprep.subr.bf16.mxu1 %v2859_v63 }
  0x20   :  { %508 = vmatprep.mubr.bf16.mxu0 %v2642_v3  ;;  %549 = vmatprep.mubr.bf16.mxu1 %v2642_v3 }
  0x22   :  { %479 = vmatpush1.bf16.msra.mxu0 %v2872_v2  ;;  %520 = vmatpush1.bf16.msra.mxu1 %v2876_v6 }
  0x23   :  { %2538 = vmatprep.subr.msk.bf16.mxu0 %vm263_vm0, %v2878_v7  ;;  %2540 = vmatprep.subr.msk.bf16.mxu1 %vm263_vm0, %v2881_v12 }
  0x26   :  { %481 = vmatpush1.bf16.msra.mxu0 %v2902_v23  ;;  %522 = vmatpush1.bf16.msra.mxu1 %v2909_v25 }
  0x27   :  { %558 = vmatprep.subr.bf16.mxu0 %v2904_v24  ;;  %599 = vmatprep.subr.bf16.mxu1 %v2911_v26 }
  0x29   :  { %2539 = vmatmul.mubr.msk.bf16.vlgmr.msra.gmra.mrb[8].mxu0 %vm259_vm1, %v2772_v35  ;;  %2541 = vmatmul.mubr.msk.bf16.vlgmr.msra.gmra.mrb[8].mxu1 %vm259_vm1, %v2772_v35 }
  0x2a   :  { %559 = vmatpush1.bf16.msra.mxu0 %v2926_v40  ;;  %600 = vmatpush1.bf16.msra.mxu1 %v2930_v41 }
  0x2b   :  { %560 = vmatprep.subr.bf16.mxu0 %v2932_v45  ;;  %601 = vmatprep.subr.bf16.mxu1 %v2935_v47 }
  0x2c   :  { %590 = vmatprep.mubr.bf16.mxu0 %v2642_v3  ;;  %631 = vmatprep.mubr.bf16.mxu1 %v2642_v3 }
  0x2e   :  { %561 = vmatpush1.bf16.msra.mxu0 %v2948_v50  ;;  %602 = vmatpush1.bf16.msra.mxu1 %v2952_v51 }
  0x2f   :  { %2542 = vmatprep.subr.msk.bf16.mxu0 %vm263_vm0, %v2954_v56  ;;  %2544 = vmatprep.subr.msk.bf16.mxu1 %vm263_vm0, %v2957_v58 }
  0x32   :  { %563 = vmatpush1.bf16.msra.mxu0 %v2966_v0  ;;  %604 = vmatpush1.bf16.msra.mxu1 %v2971_v1 }
  0x33   :  { %645 = vmatprep.subr.bf16.mxu0 %v2679_v4  ;;  %686 = vmatprep.subr.bf16.mxu1 %v2694_v9 }
  0x35   :  { %2543 = vmatmul.mubr.msk.bf16.vlgmr.msra.gmra.mrb[12].mxu0 %vm259_vm1, %v2772_v35  ;;  %2545 = vmatmul.mubr.msk.bf16.vlgmr.msra.gmra.mrb[12].mxu1 %vm259_vm1, %v2772_v35  ;;  %v2546_v35 = vld [vmem:[%s4243_s0 + $0x2] sm:$0x3] }
  0x36   :  { %646 = vmatpush1.bf16.msra.mxu0 %v2681_v5  ;;  %687 = vmatpush1.bf16.msra.mxu1 %v2696_v10 }
  0x37   :  { %647 = vmatprep.subr.bf16.mxu0 %v2698_v11  ;;  %688 = vmatprep.subr.bf16.mxu1 %v2710_v15 }
  0x38   :  { %677 = vmatprep.mubr.bf16.mxu0 %v2642_v3  ;;  %718 = vmatprep.mubr.bf16.mxu1 %v2642_v3 }
  0x3a   :  { %648 = vmatpush1.bf16.msra.mxu0 %v2717_v17  ;;  %689 = vmatpush1.bf16.msra.mxu1 %v2721_v18 }
  0x3b   :  { %2547 = vmatprep.subr.msk.bf16.mxu0 %vm263_vm0, %v2723_v19  ;;  %2549 = vmatprep.subr.msk.bf16.mxu1 %vm263_vm0, %v2726_v21 }
  0x3e   :  { %650 = vmatpush1.bf16.msra.mxu0 %v2745_v27  ;;  %691 = vmatpush1.bf16.msra.mxu1 %v2752_v29 }
  0x3f   :  { %727 = vmatprep.subr.bf16.mxu0 %v2747_v28  ;;  %768 = vmatprep.subr.bf16.mxu1 %v2754_v30 }
  0x41   :  { %2548 = vmatmul.mubr.msk.bf16.vlgmr.msra.gmra.mrb[16].mxu0 %vm259_vm1, %v2546_v35  ;;  %2550 = vmatmul.mubr.msk.bf16.vlgmr.msra.gmra.mrb[16].mxu1 %vm259_vm1, %v2546_v35 }
  0x42   :  { %728 = vmatpush1.bf16.msra.mxu0 %v2774_v36  ;;  %769 = vmatpush1.bf16.msra.mxu1 %v2778_v37 }
  0x43   :  { %729 = vmatprep.subr.bf16.mxu0 %v2780_v38  ;;  %770 = vmatprep.subr.bf16.mxu1 %v2783_v39 }
  0x44   :  { %759 = vmatprep.mubr.bf16.mxu0 %v2642_v3  ;;  %800 = vmatprep.mubr.bf16.mxu1 %v2642_v3 }
  0x46   :  { %730 = vmatpush1.bf16.msra.mxu0 %v2796_v42  ;;  %771 = vmatpush1.bf16.msra.mxu1 %v2800_v43 }
  0x47   :  { %2551 = vmatprep.subr.msk.bf16.mxu0 %vm263_vm0, %v2802_v44  ;;  %2553 = vmatprep.subr.msk.bf16.mxu1 %vm263_vm0, %v2805_v46 }
  0x4a   :  { %732 = vmatpush1.bf16.msra.mxu0 %v2826_v52  ;;  %773 = vmatpush1.bf16.msra.mxu1 %v2833_v54 }
  0x4b   :  { %809 = vmatprep.subr.bf16.mxu0 %v2828_v53  ;;  %850 = vmatprep.subr.bf16.mxu1 %v2835_v55 }
  0x4d   :  { %2552 = vmatmul.mubr.msk.bf16.vlgmr.msra.gmra.mrb[20].mxu0 %vm259_vm1, %v2546_v35  ;;  %2554 = vmatmul.mubr.msk.bf16.vlgmr.msra.gmra.mrb[20].mxu1 %vm259_vm1, %v2546_v35 }
  0x4e   :  { %810 = vmatpush1.bf16.msra.mxu0 %v2850_v60  ;;  %851 = vmatpush1.bf16.msra.mxu1 %v2854_v61 }
  0x4f   :  { %811 = vmatprep.subr.bf16.mxu0 %v2856_v62  ;;  %852 = vmatprep.subr.bf16.mxu1 %v2859_v63 }
  0x50   :  { %841 = vmatprep.mubr.bf16.mxu0 %v2642_v3  ;;  %882 = vmatprep.mubr.bf16.mxu1 %v2642_v3 }
  0x52   :  { %812 = vmatpush1.bf16.msra.mxu0 %v2872_v2  ;;  %853 = vmatpush1.bf16.msra.mxu1 %v2876_v6 }
  0x53   :  { %2555 = vmatprep.subr.msk.bf16.mxu0 %vm263_vm0, %v2878_v7  ;;  %2557 = vmatprep.subr.msk.bf16.mxu1 %vm263_vm0, %v2881_v12 }
  0x56   :  { %814 = vmatpush1.bf16.msra.mxu0 %v2902_v23  ;;  %855 = vmatpush1.bf16.msra.mxu1 %v2909_v25 }
  0x57   :  { %891 = vmatprep.subr.bf16.mxu0 %v2904_v24  ;;  %932 = vmatprep.subr.bf16.mxu1 %v2911_v26 }
  0x59   :  { %2556 = vmatmul.mubr.msk.bf16.vlgmr.msra.gmra.mrb[24].mxu0 %vm259_vm1, %v2546_v35  ;;  %2558 = vmatmul.mubr.msk.bf16.vlgmr.msra.gmra.mrb[24].mxu1 %vm259_vm1, %v2546_v35 }
  0x5a   :  { %892 = vmatpush1.bf16.msra.mxu0 %v2926_v40  ;;  %933 = vmatpush1.bf16.msra.mxu1 %v2930_v41 }
  0x5b   :  { %893 = vmatprep.subr.bf16.mxu0 %v2932_v45  ;;  %934 = vmatprep.subr.bf16.mxu1 %v2935_v47 }
  0x5c   :  { %923 = vmatprep.mubr.bf16.mxu0 %v2642_v3  ;;  %964 = vmatprep.mubr.bf16.mxu1 %v2642_v3 }
  0x5e   :  { %894 = vmatpush1.bf16.msra.mxu0 %v2948_v50  ;;  %935 = vmatpush1.bf16.msra.mxu1 %v2952_v51 }
  0x5f   :  { %2559 = vmatprep.subr.msk.bf16.mxu0 %vm263_vm0, %v2954_v56  ;;  %2561 = vmatprep.subr.msk.bf16.mxu1 %vm263_vm0, %v2957_v58 }
  0x62   :  { %896 = vmatpush1.bf16.msra.mxu0 %v2966_v0  ;;  %937 = vmatpush1.bf16.msra.mxu1 %v2971_v1 }
  0x63   :  { %978 = vmatprep.subr.bf16.mxu0 %v2679_v4  ;;  %1019 = vmatprep.subr.bf16.mxu1 %v2694_v9 }
  0x65   :  { %2560 = vmatmul.mubr.msk.bf16.vlgmr.msra.gmra.mrb[28].mxu0 %vm259_vm1, %v2546_v35  ;;  %2562 = vmatmul.mubr.msk.bf16.vlgmr.msra.gmra.mrb[28].mxu1 %vm259_vm1, %v2546_v35 }
  0x66   :  { %979 = vmatpush1.bf16.msra.mxu0 %v2681_v5  ;;  %1020 = vmatpush1.bf16.msra.mxu1 %v2696_v10 }
  0x67   :  { %980 = vmatprep.subr.bf16.mxu0 %v2698_v11  ;;  %1021 = vmatprep.subr.bf16.mxu1 %v2710_v15 }
  0x68   :  { %1010 = vmatprep.mubr.bf16.mxu0 %v2642_v3  ;;  %1051 = vmatprep.mubr.bf16.mxu1 %v2642_v3 }
  0x6a   :  { %981 = vmatpush1.bf16.msra.mxu0 %v2717_v17  ;;  %1022 = vmatpush1.bf16.msra.mxu1 %v2721_v18 }
  0x6b   :  { %2564 = vmatprep.subr.msk.bf16.mxu0 %vm263_vm0, %v2723_v19  ;;  %2566 = vmatprep.subr.msk.bf16.mxu1 %vm263_vm0, %v2726_v21 }
  0x6e   :  { %983 = vmatpush1.bf16.msra.mxu0 %v2745_v27  ;;  %1024 = vmatpush1.bf16.msra.mxu1 %v2752_v29 }
  0x6f   :  { %1060 = vmatprep.subr.bf16.mxu0 %v2747_v28  ;;  %1101 = vmatprep.subr.bf16.mxu1 %v2754_v30 }
  0x71   :  { %2565 = vmatmul.mubr.msk.bf16.vlgmr.msra.gmra.mrb[32].mxu0 %vm259_vm1, %v2563_v8  ;;  %2567 = vmatmul.mubr.msk.bf16.vlgmr.msra.gmra.mrb[32].mxu1 %vm259_vm1, %v2563_v8 }
  0x72   :  { %1061 = vmatpush1.bf16.msra.mxu0 %v2774_v36  ;;  %1102 = vmatpush1.bf16.msra.mxu1 %v2778_v37 }
  0x73   :  { %1062 = vmatprep.subr.bf16.mxu0 %v2780_v38  ;;  %1103 = vmatprep.subr.bf16.mxu1 %v2783_v39 }
  0x74   :  { %1092 = vmatprep.mubr.bf16.mxu0 %v2642_v3  ;;  %1133 = vmatprep.mubr.bf16.mxu1 %v2642_v3 }
  0x76   :  { %1063 = vmatpush1.bf16.msra.mxu0 %v2796_v42  ;;  %1104 = vmatpush1.bf16.msra.mxu1 %v2800_v43 }
  0x77   :  { %2568 = vmatprep.subr.msk.bf16.mxu0 %vm263_vm0, %v2802_v44  ;;  %2570 = vmatprep.subr.msk.bf16.mxu1 %vm263_vm0, %v2805_v46 }
  0x7a   :  { %1065 = vmatpush1.bf16.msra.mxu0 %v2826_v52  ;;  %1106 = vmatpush1.bf16.msra.mxu1 %v2833_v54 }
  0x7b   :  { %1142 = vmatprep.subr.bf16.mxu0 %v2828_v53  ;;  %1183 = vmatprep.subr.bf16.mxu1 %v2835_v55 }
  0x7d   :  { %2569 = vmatmul.mubr.msk.bf16.vlgmr.msra.gmra.mrb[36].mxu0 %vm259_vm1, %v2563_v8  ;;  %2571 = vmatmul.mubr.msk.bf16.vlgmr.msra.gmra.mrb[36].mxu1 %vm259_vm1, %v2563_v8 }
  0x7e   :  { %1143 = vmatpush1.bf16.msra.mxu0 %v2850_v60  ;;  %1184 = vmatpush1.bf16.msra.mxu1 %v2854_v61 }
  0x7f   :  { %1144 = vmatprep.subr.bf16.mxu0 %v2856_v62  ;;  %1185 = vmatprep.subr.bf16.mxu1 %v2859_v63 }
  0x80   :  { %1174 = vmatprep.mubr.bf16.mxu0 %v2642_v3  ;;  %1215 = vmatprep.mubr.bf16.mxu1 %v2642_v3 }
  0x82   :  { %1145 = vmatpush1.bf16.msra.mxu0 %v2872_v2  ;;  %1186 = vmatpush1.bf16.msra.mxu1 %v2876_v6 }
  0x83   :  { %2572 = vmatprep.subr.msk.bf16.mxu0 %vm263_vm0, %v2878_v7  ;;  %2574 = vmatprep.subr.msk.bf16.mxu1 %vm263_vm0, %v2881_v12 }
  0x86   :  { %1147 = vmatpush1.bf16.msra.mxu0 %v2902_v23  ;;  %1188 = vmatpush1.bf16.msra.mxu1 %v2909_v25 }
  0x87   :  { %1224 = vmatprep.subr.bf16.mxu0 %v2904_v24  ;;  %1265 = vmatprep.subr.bf16.mxu1 %v2911_v26 }
  0x89   :  { %2573 = vmatmul.mubr.msk.bf16.vlgmr.msra.gmra.mrb[40].mxu0 %vm259_vm1, %v2563_v8  ;;  %2575 = vmatmul.mubr.msk.bf16.vlgmr.msra.gmra.mrb[40].mxu1 %vm259_vm1, %v2563_v8 }
  0x8a   :  { %1225 = vmatpush1.bf16.msra.mxu0 %v2926_v40  ;;  %1266 = vmatpush1.bf16.msra.mxu1 %v2930_v41 }
  0x8b   :  { %1226 = vmatprep.subr.bf16.mxu0 %v2932_v45  ;;  %1267 = vmatprep.subr.bf16.mxu1 %v2935_v47 }
  0x8c   :  { %1256 = vmatprep.mubr.bf16.mxu0 %v2642_v3  ;;  %1297 = vmatprep.mubr.bf16.mxu1 %v2642_v3 }
  0x8e   :  { %1227 = vmatpush1.bf16.msra.mxu0 %v2948_v50  ;;  %1268 = vmatpush1.bf16.msra.mxu1 %v2952_v51 }
  0x8f   :  { %2576 = vmatprep.subr.msk.bf16.mxu0 %vm263_vm0, %v2954_v56  ;;  %2578 = vmatprep.subr.msk.bf16.mxu1 %vm263_vm0, %v2957_v58 }
  0x92   :  { %1229 = vmatpush1.bf16.msra.mxu0 %v2966_v0  ;;  %1270 = vmatpush1.bf16.msra.mxu1 %v2971_v1 }
  0x93   :  { %1311 = vmatprep.subr.bf16.mxu0 %v2679_v4  ;;  %1352 = vmatprep.subr.bf16.mxu1 %v2694_v9  ;;  %v2580_v4 = vld [vmem:[%s4243_s0 + $0x6] sm:$0x3] }
  0x95   :  { %2577 = vmatmul.mubr.msk.bf16.vlgmr.msra.gmra.mrb[44].mxu0 %vm259_vm1, %v2563_v8  ;;  %2579 = vmatmul.mubr.msk.bf16.vlgmr.msra.gmra.mrb[44].mxu1 %vm259_vm1, %v2563_v8 }
  0x96   :  { %1312 = vmatpush1.bf16.msra.mxu0 %v2681_v5  ;;  %1353 = vmatpush1.bf16.msra.mxu1 %v2696_v10 }
  0x97   :  { %1313 = vmatprep.subr.bf16.mxu0 %v2698_v11  ;;  %1354 = vmatprep.subr.bf16.mxu1 %v2710_v15 }
  0x98   :  { %1343 = vmatprep.mubr.bf16.mxu0 %v2642_v3  ;;  %1384 = vmatprep.mubr.bf16.mxu1 %v2642_v3 }
  0x9a   :  { %1314 = vmatpush1.bf16.msra.mxu0 %v2717_v17  ;;  %1355 = vmatpush1.bf16.msra.mxu1 %v2721_v18 }
  0x9b   :  { %2581 = vmatprep.subr.msk.bf16.mxu0 %vm263_vm0, %v2723_v19  ;;  %2583 = vmatprep.subr.msk.bf16.mxu1 %vm263_vm0, %v2726_v21 }
  0x9e   :  { %1316 = vmatpush1.bf16.msra.mxu0 %v2745_v27  ;;  %1357 = vmatpush1.bf16.msra.mxu1 %v2752_v29 }
  0x9f   :  { %1393 = vmatprep.subr.bf16.mxu0 %v2747_v28  ;;  %1434 = vmatprep.subr.bf16.mxu1 %v2754_v30 }
  0xa1   :  { %2582 = vmatmul.mubr.msk.bf16.vlgmr.msra.gmra.mrb[48].mxu0 %vm259_vm1, %v2580_v4  ;;  %2584 = vmatmul.mubr.msk.bf16.vlgmr.msra.gmra.mrb[48].mxu1 %vm259_vm1, %v2580_v4 }
  0xa2   :  { %1394 = vmatpush1.bf16.msra.mxu0 %v2774_v36  ;;  %1435 = vmatpush1.bf16.msra.mxu1 %v2778_v37 }
  0xa3   :  { %1395 = vmatprep.subr.bf16.mxu0 %v2780_v38  ;;  %1436 = vmatprep.subr.bf16.mxu1 %v2783_v39 }
  0xa4   :  { %1425 = vmatprep.mubr.bf16.mxu0 %v2642_v3  ;;  %1466 = vmatprep.mubr.bf16.mxu1 %v2642_v3 }
  0xa6   :  { %1396 = vmatpush1.bf16.msra.mxu0 %v2796_v42  ;;  %1437 = vmatpush1.bf16.msra.mxu1 %v2800_v43 }
  0xa7   :  { %2585 = vmatprep.subr.msk.bf16.mxu0 %vm263_vm0, %v2802_v44  ;;  %2587 = vmatprep.subr.msk.bf16.mxu1 %vm263_vm0, %v2805_v46 }
  0xaa   :  { %1398 = vmatpush1.bf16.msra.mxu0 %v2826_v52  ;;  %1439 = vmatpush1.bf16.msra.mxu1 %v2833_v54 }
  0xab   :  { %1475 = vmatprep.subr.bf16.mxu0 %v2828_v53  ;;  %1516 = vmatprep.subr.bf16.mxu1 %v2835_v55 }
  0xad   :  { %2586 = vmatmul.mubr.msk.bf16.vlgmr.msra.gmra.mrb[52].mxu0 %vm259_vm1, %v2580_v4  ;;  %2588 = vmatmul.mubr.msk.bf16.vlgmr.msra.gmra.mrb[52].mxu1 %vm259_vm1, %v2580_v4 }
  0xae   :  { %1476 = vmatpush1.bf16.msra.mxu0 %v2850_v60  ;;  %1517 = vmatpush1.bf16.msra.mxu1 %v2854_v61 }
  0xaf   :  { %1477 = vmatprep.subr.bf16.mxu0 %v2856_v62  ;;  %1518 = vmatprep.subr.bf16.mxu1 %v2859_v63 }
  0xb0   :  { %1507 = vmatprep.mubr.bf16.mxu0 %v2642_v3  ;;  %1548 = vmatprep.mubr.bf16.mxu1 %v2642_v3 }
  0xb2   :  { %1478 = vmatpush1.bf16.msra.mxu0 %v2872_v2  ;;  %1519 = vmatpush1.bf16.msra.mxu1 %v2876_v6 }
  0xb3   :  { %2589 = vmatprep.subr.msk.bf16.mxu0 %vm263_vm0, %v2878_v7  ;;  %2591 = vmatprep.subr.msk.bf16.mxu1 %vm263_vm0, %v2881_v12 }
  0xb6   :  { %1480 = vmatpush1.bf16.msra.mxu0 %v2902_v23  ;;  %1521 = vmatpush1.bf16.msra.mxu1 %v2909_v25 }
  0xb7   :  { %1557 = vmatprep.subr.bf16.mxu0 %v2904_v24  ;;  %1598 = vmatprep.subr.bf16.mxu1 %v2911_v26 }
  0xb9   :  { %2590 = vmatmul.mubr.msk.bf16.vlgmr.msra.gmra.mrb[56].mxu0 %vm259_vm1, %v2580_v4  ;;  %2592 = vmatmul.mubr.msk.bf16.vlgmr.msra.gmra.mrb[56].mxu1 %vm259_vm1, %v2580_v4 }
  0xba   :  { %1558 = vmatpush1.bf16.msra.mxu0 %v2926_v40  ;;  %1599 = vmatpush1.bf16.msra.mxu1 %v2930_v41 }
  0xbb   :  { %1559 = vmatprep.subr.bf16.mxu0 %v2932_v45  ;;  %1600 = vmatprep.subr.bf16.mxu1 %v2935_v47 }
  0xbc   :  { %1589 = vmatprep.mubr.bf16.mxu0 %v2642_v3  ;;  %1630 = vmatprep.mubr.bf16.mxu1 %v2642_v3 }
  0xbe   :  { %1560 = vmatpush1.bf16.msra.mxu0 %v2948_v50  ;;  %1601 = vmatpush1.bf16.msra.mxu1 %v2952_v51 }
  0xbf   :  { %2593 = vmatprep.subr.msk.bf16.mxu0 %vm263_vm0, %v2954_v56  ;;  %2595 = vmatprep.subr.msk.bf16.mxu1 %vm263_vm0, %v2957_v58 }
  0xc2   :  { %1562 = vmatpush1.bf16.msra.mxu0 %v2966_v0  ;;  %1603 = vmatpush1.bf16.msra.mxu1 %v2971_v1 }
  0xc5   :  { %2594 = vmatmul.mubr.msk.bf16.vlgmr.msra.gmra.mrb[60].mxu0 %vm259_vm1, %v2580_v4  ;;  %2596 = vmatmul.mubr.msk.bf16.vlgmr.msra.gmra.mrb[60].mxu1 %vm259_vm1, %v2580_v4 }
  0xe4   :  { %v3204_v3 = vpop.f32.mrb[0].mxu0  ;;  %v3212_v11 = vpop.f32.mrb[0].mxu1 }
  0xe5   :  { %v1640_v5 = vsel %vm1639_vm2, %v3204_v3, 0.0  ;;  %v1673_v9 = vmul.f32 %v3204_v3, %v3204_v3  ;;  %v3210_v10 = vpop.f32.mrb[1].mxu0  ;;  %v1643_v19 = vsel %vm1639_vm2, %v3212_v11, 0.0  ;;  %v1675_v21 = vmul.f32 %v3212_v11, %v3212_v11  ;;  %v3222_v27 = vpop.f32.mrb[1].mxu1 }
  0xe6   :  { %v1641_v15 = vsel %vm1639_vm2, %v3210_v10, 0.0  ;;  %v1674_v17 = vmul.f32 %v3210_v10, %v3210_v10  ;;  %v350_v18 = vpop.f32.mrb[2].mxu0  ;;  %v1676_v36 = vmul.f32 %v3222_v27, %v3222_v27  ;;  %v391_v37 = vpop.f32.mrb[2].mxu1  ;;  %v1645_v42 = vsel %vm1639_vm2, %v3222_v27, 0.0 }
  0xe7   :  { %v1689_v28 = vsel %vm1639_vm2, %v1673_v9, 0.0  ;;  %v1642_v29 = vadd.f32 %v1641_v15, %v1640_v5  ;;  %v351_v30 = vpop.f32.mrb[3].mxu0  ;;  %v1692_v39 = vsel %vm1639_vm2, %v1675_v21, 0.0  ;;  %v392_v43 = vpop.f32.mrb[3].mxu1 }
  0xe8   :  { %v1690_v38 = vsel %vm1639_vm2, %v1674_v17, 0.0  ;;  %v1694_v52 = vsel %vm1639_vm2, %v1676_v36, 0.0 }
  0xe9   :  { %v1691_v44 = vadd.f32 %v1690_v38, %v1689_v28  ;;  %v1644_v46 = vadd.f32 %v1643_v19, %v1642_v29 }
  0xeb   :  { %v1693_v53 = vadd.f32 %v1692_v39, %v1691_v44  ;;  %v1646_v54 = vadd.f32 %v1645_v42, %v1644_v46 }
  0xed   :  { %v1695_v55 = vadd.f32 %v1694_v52, %v1693_v53 }
  0xf0   :  { %v3232_v60 = vpop.f32.mrb[4].mxu0  ;;  %v3240_v2 = vpop.f32.mrb[4].mxu1 }
  0xf1   :  { %v1647_v61 = vsel %vm1639_vm2, %v3232_v60, 0.0  ;;  %v1677_v62 = vmul.f32 %v3232_v60, %v3232_v60  ;;  %v3238_v63 = vpop.f32.mrb[5].mxu0  ;;  %v3246_v14 = vpop.f32.mrb[5].mxu1  ;;  %v1651_v20 = vsel %vm1639_vm2, %v3240_v2, 0.0  ;;  %v1679_v22 = vmul.f32 %v3240_v2, %v3240_v2 }
  0xf2   :  { %v1648_v6 = vadd.f32 %v1647_v61, %v1646_v54  ;;  %v1649_v7 = vsel %vm1639_vm2, %v3238_v63, 0.0  ;;  %v1678_v12 = vmul.f32 %v3238_v63, %v3238_v63  ;;  %v432_v13 = vpop.f32.mrb[6].mxu0  ;;  %v1680_v24 = vmul.f32 %v3246_v14, %v3246_v14  ;;  %v473_v25 = vpop.f32.mrb[6].mxu1 }
  0xf3   :  { %v1696_v16 = vsel %vm1639_vm2, %v1677_v62, 0.0  ;;  %v433_v23 = vpop.f32.mrb[7].mxu0  ;;  %v474_v33 = vpop.f32.mrb[7].mxu1  ;;  %v1700_v34 = vsel %vm1639_vm2, %v1679_v22, 0.0  ;;  %v1653_v40 = vsel %vm1639_vm2, %v3246_v14, 0.0 }
  0xf4   :  { %v1697_v26 = vadd.f32 %v1696_v16, %v1695_v55  ;;  %v1650_v31 = vadd.f32 %v1649_v7, %v1648_v6  ;;  %v1698_v32 = vsel %vm1639_vm2, %v1678_v12, 0.0  ;;  %v1702_v47 = vsel %vm1639_vm2, %v1680_v24, 0.0 }
  0xf6   :  { %v1699_v41 = vadd.f32 %v1698_v32, %v1697_v26  ;;  %v1652_v45 = vadd.f32 %v1651_v20, %v1650_v31 }
  0xf8   :  { %v1701_v48 = vadd.f32 %v1700_v34, %v1699_v41  ;;  %v1654_v49 = vadd.f32 %v1653_v40, %v1652_v45 }
  0xfa   :  { %v1703_v50 = vadd.f32 %v1702_v47, %v1701_v48 }
  0xfc   :  { %v3260_v51 = vpop.f32.mrb[8].mxu0  ;;  %v3268_v59 = vpop.f32.mrb[8].mxu1 }
  0xfd   :  { %v1655_v56 = vsel %vm1639_vm2, %v3260_v51, 0.0  ;;  %v1681_v57 = vmul.f32 %v3260_v51, %v3260_v51  ;;  %v3266_v58 = vpop.f32.mrb[9].mxu0  ;;  %v3274_v4 = vpop.f32.mrb[9].mxu1  ;;  %v1659_v9 = vsel %vm1639_vm2, %v3268_v59, 0.0  ;;  %v1683_v15 = vmul.f32 %v3268_v59, %v3268_v59 }
  0xfe   :  { %v1656_v0 = vadd.f32 %v1655_v56, %v1654_v49  ;;  %v1657_v1 = vsel %vm1639_vm2, %v3266_v58, 0.0  ;;  %v1682_v35 = vmul.f32 %v3266_v58, %v3266_v58  ;;  %v514_v8 = vpop.f32.mrb[10].mxu0  ;;  %v1684_v18 = vmul.f32 %v3274_v4, %v3274_v4  ;;  %v555_v19 = vpop.f32.mrb[10].mxu1 }
  0xff   :  { %v1704_v5 = vsel %vm1639_vm2, %v1681_v57, 0.0  ;;  %v515_v17 = vpop.f32.mrb[11].mxu0  ;;  %v556_v30 = vpop.f32.mrb[11].mxu1  ;;  %v1708_v36 = vsel %vm1639_vm2, %v1683_v15, 0.0  ;;  %v1661_v37 = vsel %vm1639_vm2, %v3274_v4, 0.0 }
 0x100   :  { %v1705_v21 = vadd.f32 %v1704_v5, %v1703_v50  ;;  %v1658_v28 = vadd.f32 %v1657_v1, %v1656_v0  ;;  %v1706_v29 = vsel %vm1639_vm2, %v1682_v35, 0.0  ;;  %v1710_v42 = vsel %vm1639_vm2, %v1684_v18, 0.0 }
 0x102   :  { %v1707_v38 = vadd.f32 %v1706_v29, %v1705_v21  ;;  %v1660_v39 = vadd.f32 %v1659_v9, %v1658_v28 }
 0x104   :  { %v1709_v43 = vadd.f32 %v1708_v36, %v1707_v38  ;;  %v1662_v44 = vadd.f32 %v1661_v37, %v1660_v39 }
 0x106   :  { %v1711_v46 = vadd.f32 %v1710_v42, %v1709_v43 }
 0x108   :  { %v3288_v52 = vpop.f32.mrb[12].mxu0  ;;  %v3296_v61 = vpop.f32.mrb[12].mxu1 }
 0x109   :  { %v1663_v53 = vsel %vm1639_vm2, %v3288_v52, 0.0  ;;  %v1685_v54 = vmul.f32 %v3288_v52, %v3288_v52  ;;  %v3294_v55 = vpop.f32.mrb[13].mxu0  ;;  %v1687_v13 = vmul.f32 %v3296_v61, %v3296_v61  ;;  %v3304_v16 = vpop.f32.mrb[13].mxu1  ;;  %v1667_v24 = vsel %vm1639_vm2, %v3296_v61, 0.0 }
 0x10a   :  { %v1664_v62 = vadd.f32 %v1663_v53, %v1662_v44  ;;  %v1665_v6 = vsel %vm1639_vm2, %v3294_v55, 0.0  ;;  %v1686_v7 = vmul.f32 %v3294_v55, %v3294_v55  ;;  %v596_v12 = vpop.f32.mrb[14].mxu0  ;;  %v637_v23 = vpop.f32.mrb[14].mxu1  ;;  %v1688_v25 = vmul.f32 %v3304_v16, %v3304_v16 }
 0x10b   :  { %v1712_v20 = vsel %vm1639_vm2, %v1685_v54, 0.0  ;;  %v597_v22 = vpop.f32.mrb[15].mxu0  ;;  %v638_v26 = vpop.f32.mrb[15].mxu1  ;;  %v1669_v34 = vsel %vm1639_vm2, %v3304_v16, 0.0  ;;  %v1716_v40 = vsel %vm1639_vm2, %v1687_v13, 0.0 }
 0x10c   :  { %v1666_v31 = vadd.f32 %v1665_v6, %v1664_v62  ;;  %v1713_v32 = vadd.f32 %v1712_v20, %v1711_v46  ;;  %v1714_v33 = vsel %vm1639_vm2, %v1686_v7, 0.0  ;;  %v1718_v47 = vsel %vm1639_vm2, %v1688_v25, 0.0 }
 0x10e   :  { %v1668_v41 = vadd.f32 %v1667_v24, %v1666_v31  ;;  %v1715_v45 = vadd.f32 %v1714_v33, %v1713_v32 }
 0x110   :  { %v1670_v48 = vadd.f32 %v1669_v34, %v1668_v41  ;;  %v1717_v49 = vadd.f32 %v1716_v40, %v1715_v45 }
 0x112   :  { %1671 = vadd.xlane.f32.xlu0 %v1670_v48  ;;  %v1719_v50 = vadd.f32 %v1718_v47, %v1717_v49 }
 0x114   :  { %1720 = vadd.xlane.f32.xlu1 %v1719_v50  ;;  %v3316_v56 = vpop.f32.mrb[16].mxu0  ;;  %v3324_v35 = vpop.f32.mrb[16].mxu1 }
 0x115   :  { %v1722_v57 = vsel %vm1639_vm2, %v3316_v56, 0.0  ;;  %v1756_v0 = vmul.f32 %v3316_v56, %v3316_v56  ;;  %v3322_v1 = vpop.f32.mrb[17].mxu0  ;;  %v1725_v15 = vsel %vm1639_vm2, %v3324_v35, 0.0  ;;  %v1758_v17 = vmul.f32 %v3324_v35, %v3324_v35  ;;  %v3334_v18 = vpop.f32.mrb[17].mxu1 }
 0x116   :  { %v1723_v8 = vsel %vm1639_vm2, %v3322_v1, 0.0  ;;  %v1757_v5 = vmul.f32 %v3322_v1, %v3322_v1  ;;  %v683_v9 = vpop.f32.mrb[18].mxu0  ;;  %v1759_v29 = vmul.f32 %v3334_v18, %v3334_v18  ;;  %v724_v30 = vpop.f32.mrb[18].mxu1  ;;  %v1727_v38 = vsel %vm1639_vm2, %v3334_v18, 0.0 }
 0x117   :  { %v1772_v19 = vsel %vm1639_vm2, %v1756_v0, 0.0  ;;  %v1724_v21 = vadd.f32 %v1723_v8, %v1722_v57  ;;  %v684_v28 = vpop.f32.mrb[19].mxu0  ;;  %v1775_v37 = vsel %vm1639_vm2, %v1758_v17, 0.0  ;;  %v725_v39 = vpop.f32.mrb[19].mxu1 }
 0x118   :  { %v1773_v36 = vsel %vm1639_vm2, %v1757_v5, 0.0  ;;  %v1777_v44 = vsel %vm1639_vm2, %v1759_v29, 0.0 }
 0x119   :  { %v1774_v42 = vadd.f32 %v1773_v36, %v1772_v19  ;;  %v1726_v43 = vadd.f32 %v1725_v15, %v1724_v21 }
 0x11b   :  { %v1776_v46 = vadd.f32 %v1775_v37, %v1774_v42  ;;  %v1728_v53 = vadd.f32 %v1727_v38, %v1726_v43 }
 0x11d   :  { %v1778_v54 = vadd.f32 %v1777_v44, %v1776_v46 }
 0x120   :  { %v3344_v62 = vpop.f32.mrb[20].mxu0  ;;  %v3352_v13 = vpop.f32.mrb[20].mxu1 }
 0x121   :  { %v1729_v6 = vsel %vm1639_vm2, %v3344_v62, 0.0  ;;  %v1760_v7 = vmul.f32 %v3344_v62, %v3344_v62  ;;  %v3350_v12 = vpop.f32.mrb[21].mxu0  ;;  %v3358_v25 = vpop.f32.mrb[21].mxu1  ;;  %v1733_v31 = vsel %vm1639_vm2, %v3352_v13, 0.0  ;;  %v1762_v32 = vmul.f32 %v3352_v13, %v3352_v13 }
 0x122   :  { %v1730_v20 = vadd.f32 %v1729_v6, %v1728_v53  ;;  %v1731_v22 = vsel %vm1639_vm2, %v3350_v12, 0.0  ;;  %v1761_v23 = vmul.f32 %v3350_v12, %v3350_v12  ;;  %v765_v24 = vpop.f32.mrb[22].mxu0  ;;  %v1763_v34 = vmul.f32 %v3358_v25, %v3358_v25  ;;  %v806_v40 = vpop.f32.mrb[22].mxu1 }
 0x123   :  { %v1779_v26 = vsel %vm1639_vm2, %v1760_v7, 0.0  ;;  %v766_v33 = vpop.f32.mrb[23].mxu0  ;;  %v807_v48 = vpop.f32.mrb[23].mxu1  ;;  %v1783_v49 = vsel %vm1639_vm2, %v1762_v32, 0.0  ;;  %v1735_v50 = vsel %vm1639_vm2, %v3358_v25, 0.0 }
 0x124   :  { %v1780_v41 = vadd.f32 %v1779_v26, %v1778_v54  ;;  %v1732_v45 = vadd.f32 %v1731_v22, %v1730_v20  ;;  %v1781_v47 = vsel %vm1639_vm2, %v1761_v23, 0.0  ;;  %v1785_v8 = vsel %vm1639_vm2, %v1763_v34, 0.0 }
 0x126   :  { %v1782_v57 = vadd.f32 %v1781_v47, %v1780_v41  ;;  %v1734_v0 = vadd.f32 %v1733_v31, %v1732_v45 }
 0x128   :  { %v1784_v5 = vadd.f32 %v1783_v49, %v1782_v57  ;;  %v1736_v9 = vadd.f32 %v1735_v50, %v1734_v0 }
 0x12a   :  { %v1786_v15 = vadd.f32 %v1785_v8, %v1784_v5 }
 0x12c   :  { %v3372_v17 = vpop.f32.mrb[24].mxu0  ;;  %v3380_v29 = vpop.f32.mrb[24].mxu1 }
 0x12d   :  { %v1737_v19 = vsel %vm1639_vm2, %v3372_v17, 0.0  ;;  %v1764_v21 = vmul.f32 %v3372_v17, %v3372_v17  ;;  %v3378_v28 = vpop.f32.mrb[25].mxu0  ;;  %v3386_v39 = vpop.f32.mrb[25].mxu1  ;;  %v1741_v43 = vsel %vm1639_vm2, %v3380_v29, 0.0  ;;  %v1766_v44 = vmul.f32 %v3380_v29, %v3380_v29 }
 0x12e   :  { %v1738_v30 = vadd.f32 %v1737_v19, %v1736_v9  ;;  %v1739_v36 = vsel %vm1639_vm2, %v3378_v28, 0.0  ;;  %v1765_v37 = vmul.f32 %v3378_v28, %v3378_v28  ;;  %v847_v38 = vpop.f32.mrb[26].mxu0  ;;  %v1767_v53 = vmul.f32 %v3386_v39, %v3386_v39  ;;  %v888_v54 = vpop.f32.mrb[26].mxu1 }
 0x12f   :  { %v1787_v42 = vsel %vm1639_vm2, %v1764_v21, 0.0  ;;  %v848_v46 = vpop.f32.mrb[27].mxu0  ;;  %v889_v22 = vpop.f32.mrb[27].mxu1  ;;  %v1791_v23 = vsel %vm1639_vm2, %v1766_v44, 0.0  ;;  %v1743_v24 = vsel %vm1639_vm2, %v3386_v39, 0.0 }
 0x130   :  { %v1788_v6 = vadd.f32 %v1787_v42, %v1786_v15  ;;  %v1740_v7 = vadd.f32 %v1739_v36, %v1738_v30  ;;  %v1789_v20 = vsel %vm1639_vm2, %v1765_v37, 0.0  ;;  %v1793_v32 = vsel %vm1639_vm2, %v1767_v53, 0.0 }
 0x132   :  { %v1790_v26 = vadd.f32 %v1789_v20, %v1788_v6  ;;  %v1742_v31 = vadd.f32 %v1741_v43, %v1740_v7 }
 0x134   :  { %v1792_v33 = vadd.f32 %v1791_v23, %v1790_v26  ;;  %v1744_v34 = vadd.f32 %v1743_v24, %v1742_v31 }
 0x136   :  { %v1794_v40 = vadd.f32 %v1793_v32, %v1792_v33 }
 0x138   :  { %v3400_v41 = vpop.f32.mrb[28].mxu0  ;;  %v3408_v49 = vpop.f32.mrb[28].mxu1 }
 0x139   :  { %v1745_v45 = vsel %vm1639_vm2, %v3400_v41, 0.0  ;;  %v1768_v47 = vmul.f32 %v3400_v41, %v3400_v41  ;;  %v3406_v48 = vpop.f32.mrb[29].mxu0  ;;  %v3414_v5 = vpop.f32.mrb[29].mxu1  ;;  %v1749_v15 = vsel %vm1639_vm2, %v3408_v49, 0.0  ;;  %v1770_v19 = vmul.f32 %v3408_v49, %v3408_v49 }
 0x13a   :  { %v1746_v50 = vadd.f32 %v1745_v45, %v1744_v34  ;;  %v1747_v57 = vsel %vm1639_vm2, %v3406_v48, 0.0  ;;  %v1769_v0 = vmul.f32 %v3406_v48, %v3406_v48  ;;  %v929_v8 = vpop.f32.mrb[30].mxu0  ;;  %v1771_v30 = vmul.f32 %v3414_v5, %v3414_v5  ;;  %v970_v36 = vpop.f32.mrb[30].mxu1 }
 0x13b   :  { %v1795_v9 = vsel %vm1639_vm2, %v1768_v47, 0.0  ;;  %v930_v21 = vpop.f32.mrb[31].mxu0  ;;  %v971_v43 = vpop.f32.mrb[31].mxu1  ;;  %v1751_v44 = vsel %vm1639_vm2, %v3414_v5, 0.0  ;;  %v1799_v46 = vsel %vm1639_vm2, %v1770_v19, 0.0 }
 0x13c   :  { %v1796_v37 = vadd.f32 %v1795_v9, %v1794_v40  ;;  %v1748_v38 = vadd.f32 %v1747_v57, %v1746_v50  ;;  %v1797_v42 = vsel %vm1639_vm2, %v1769_v0, 0.0  ;;  %v1801_v6 = vsel %vm1639_vm2, %v1771_v30, 0.0 }
 0x13e   :  { %v1750_v53 = vadd.f32 %v1749_v15, %v1748_v38  ;;  %v1798_v54 = vadd.f32 %v1797_v42, %v1796_v37 }
 0x140   :  { %v1752_v7 = vadd.f32 %v1751_v44, %v1750_v53  ;;  %v1800_v20 = vadd.f32 %v1799_v46, %v1798_v54 }
 0x142   :  { %1753 = vadd.xlane.f32.xlu0 %v1752_v7  ;;  %v1802_v22 = vadd.f32 %v1801_v6, %v1800_v20 }
 0x144   :  { %1803 = vadd.xlane.f32.xlu1 %v1802_v22  ;;  %v3428_v23 = vpop.f32.mrb[32].mxu0  ;;  %v3436_v32 = vpop.f32.mrb[32].mxu1 }
 0x145   :  { %v1806_v24 = vsel %vm1639_vm2, %v3428_v23, 0.0  ;;  %v1840_v26 = vmul.f32 %v3428_v23, %v3428_v23  ;;  %v3434_v31 = vpop.f32.mrb[33].mxu0  ;;  %v1809_v45 = vsel %vm1639_vm2, %v3436_v32, 0.0  ;;  %v1842_v47 = vmul.f32 %v3436_v32, %v3436_v32  ;;  %v3446_v50 = vpop.f32.mrb[33].mxu1 }
 0x146   :  { %v1807_v33 = vsel %vm1639_vm2, %v3434_v31, 0.0  ;;  %v1841_v34 = vmul.f32 %v3434_v31, %v3434_v31  ;;  %v1016_v40 = vpop.f32.mrb[34].mxu0  ;;  %v1843_v9 = vmul.f32 %v3446_v50, %v3446_v50  ;;  %v1057_v15 = vpop.f32.mrb[34].mxu1  ;;  %v1811_v30 = vsel %vm1639_vm2, %v3446_v50, 0.0 }
 0x147   :  { %v1856_v57 = vsel %vm1639_vm2, %v1840_v26, 0.0  ;;  %v1808_v0 = vadd.f32 %v1807_v33, %v1806_v24  ;;  %v1017_v8 = vpop.f32.mrb[35].mxu0  ;;  %v1859_v21 = vsel %vm1639_vm2, %v1842_v47, 0.0  ;;  %v1058_v36 = vpop.f32.mrb[35].mxu1 }
 0x148   :  { %v1857_v19 = vsel %vm1639_vm2, %v1841_v34, 0.0  ;;  %v1861_v42 = vsel %vm1639_vm2, %v1843_v9, 0.0 }
 0x149   :  { %v1858_v37 = vadd.f32 %v1857_v19, %v1856_v57  ;;  %v1810_v38 = vadd.f32 %v1809_v45, %v1808_v0 }
 0x14b   :  { %v1860_v43 = vadd.f32 %v1859_v21, %v1858_v37  ;;  %v1812_v44 = vadd.f32 %v1811_v30, %v1810_v38 }
 0x14d   :  { %v1862_v46 = vadd.f32 %v1861_v42, %v1860_v43 }
 0x150   :  { %v3456_v53 = vpop.f32.mrb[36].mxu0  ;;  %v3464_v20 = vpop.f32.mrb[36].mxu1 }
 0x151   :  { %v1813_v54 = vsel %vm1639_vm2, %v3456_v53, 0.0  ;;  %v1844_v6 = vmul.f32 %v3456_v53, %v3456_v53  ;;  %v3462_v7 = vpop.f32.mrb[37].mxu0  ;;  %v3470_v34 = vpop.f32.mrb[37].mxu1  ;;  %v1817_v45 = vsel %vm1639_vm2, %v3464_v20, 0.0  ;;  %v1846_v47 = vmul.f32 %v3464_v20, %v3464_v20 }
 0x152   :  { %v1814_v22 = vadd.f32 %v1813_v54, %v1812_v44  ;;  %v1815_v24 = vsel %vm1639_vm2, %v3462_v7, 0.0  ;;  %v1845_v26 = vmul.f32 %v3462_v7, %v3462_v7  ;;  %v1098_v33 = vpop.f32.mrb[38].mxu0  ;;  %v1847_v0 = vmul.f32 %v3470_v34, %v3470_v34  ;;  %v1139_v8 = vpop.f32.mrb[38].mxu1 }
 0x153   :  { %v1863_v40 = vsel %vm1639_vm2, %v1844_v6, 0.0  ;;  %v1099_v57 = vpop.f32.mrb[39].mxu0  ;;  %v1140_v21 = vpop.f32.mrb[39].mxu1  ;;  %v1867_v30 = vsel %vm1639_vm2, %v1846_v47, 0.0  ;;  %v1819_v36 = vsel %vm1639_vm2, %v3470_v34, 0.0 }
 0x154   :  { %v1864_v9 = vadd.f32 %v1863_v40, %v1862_v46  ;;  %v1816_v15 = vadd.f32 %v1815_v24, %v1814_v22  ;;  %v1865_v19 = vsel %vm1639_vm2, %v1845_v26, 0.0  ;;  %v1869_v42 = vsel %vm1639_vm2, %v1847_v0, 0.0 }
 0x156   :  { %v1866_v37 = vadd.f32 %v1865_v19, %v1864_v9  ;;  %v1818_v38 = vadd.f32 %v1817_v45, %v1816_v15 }
 0x158   :  { %v1868_v43 = vadd.f32 %v1867_v30, %v1866_v37  ;;  %v1820_v44 = vadd.f32 %v1819_v36, %v1818_v38 }
 0x15a   :  { %v1870_v54 = vadd.f32 %v1869_v42, %v1868_v43 }
 0x15c   :  { %v3484_v6 = vpop.f32.mrb[40].mxu0  ;;  %v3492_v26 = vpop.f32.mrb[40].mxu1 }
 0x15d   :  { %v1821_v46 = vsel %vm1639_vm2, %v3484_v6, 0.0  ;;  %v1848_v22 = vmul.f32 %v3484_v6, %v3484_v6  ;;  %v3490_v24 = vpop.f32.mrb[41].mxu0  ;;  %4270 = vst [vmem:[#allocation3_spill] sm:$0xff] %v3492_v26  ;;  %v3498_v57 = vpop.f32.mrb[41].mxu1  ;;  %v1825_v8 = vsel %vm1639_vm2, %v3492_v26, 0.0  ;;  %v1850_v9 = vmul.f32 %v3492_v26, %v3492_v26 }
 0x15e   :  { %4269 = vst [vmem:[#allocation2_spill] sm:$0xff] %v3490_v24  ;;  %v1822_v33 = vadd.f32 %v1821_v46, %v1820_v44  ;;  %v1823_v40 = vsel %vm1639_vm2, %v3490_v24, 0.0  ;;  %v1849_v45 = vmul.f32 %v3490_v24, %v3490_v24  ;;  %v1180_v47 = vpop.f32.mrb[42].mxu0  ;;  %4271 = vst [vmem:[#allocation4_spill] sm:$0xff] %v3498_v57  ;;  %v1851_v19 = vmul.f32 %v3498_v57, %v3498_v57  ;;  %v1221_v21 = vpop.f32.mrb[42].mxu1 }
 0x15f   :  { %v1871_v0 = vsel %vm1639_vm2, %v1848_v22, 0.0  ;;  %v1181_v15 = vpop.f32.mrb[43].mxu0  ;;  %v1222_v38 = vpop.f32.mrb[43].mxu1  ;;  %v1875_v42 = vsel %vm1639_vm2, %v1850_v9, 0.0  ;;  %v1827_v43 = vsel %vm1639_vm2, %v3498_v57, 0.0 }
 0x160   :  { %v1872_v30 = vadd.f32 %v1871_v0, %v1870_v54  ;;  %v1824_v36 = vadd.f32 %v1823_v40, %v1822_v33  ;;  %v1873_v37 = vsel %vm1639_vm2, %v1849_v45, 0.0  ;;  %v1877_v22 = vsel %vm1639_vm2, %v1851_v19, 0.0 }
 0x162   :  { %v1874_v44 = vadd.f32 %v1873_v37, %v1872_v30  ;;  %v1826_v46 = vadd.f32 %v1825_v8, %v1824_v36 }
 0x164   :  { %v1876_v47 = vadd.f32 %v1875_v42, %v1874_v44  ;;  %v1828_v15 = vadd.f32 %v1827_v43, %v1826_v46 }
 0x166   :  { %v1878_v26 = vadd.f32 %v1877_v22, %v1876_v47 }
 0x168   :  { %v3512_v24 = vpop.f32.mrb[44].mxu0  ;;  %v3520_v45 = vpop.f32.mrb[44].mxu1 }
 0x169   :  { %4272 = vst [vmem:[#allocation5_spill] sm:$0xff] %v3512_v24  ;;  %v1829_v54 = vsel %vm1639_vm2, %v3512_v24, 0.0  ;;  %v1852_v33 = vmul.f32 %v3512_v24, %v3512_v24  ;;  %v3518_v40 = vpop.f32.mrb[45].mxu0  ;;  %4274 = vst [vmem:[#allocation7_spill] sm:$0xff] %v3520_v45  ;;  %v3526_v21 = vpop.f32.mrb[45].mxu1  ;;  %v1833_v36 = vsel %vm1639_vm2, %v3520_v45, 0.0  ;;  %v1854_v37 = vmul.f32 %v3520_v45, %v3520_v45 }
 0x16a   :  { %4273 = vst [vmem:[#allocation6_spill] sm:$0xff] %v3518_v40  ;;  %v1830_v0 = vadd.f32 %v1829_v54, %v1828_v15  ;;  %v1831_v8 = vsel %vm1639_vm2, %v3518_v40, 0.0  ;;  %v1853_v9 = vmul.f32 %v3518_v40, %v3518_v40  ;;  %v1262_v19 = vpop.f32.mrb[46].mxu0  ;;  %4275 = vst [vmem:[#allocation8_spill] sm:$0xff] %v3526_v21  ;;  %v1855_v42 = vmul.f32 %v3526_v21, %v3526_v21  ;;  %v1303_v43 = vpop.f32.mrb[46].mxu1 }
 0x16b   :  { %v1879_v30 = vsel %vm1639_vm2, %v1852_v33, 0.0  ;;  %v1263_v38 = vpop.f32.mrb[47].mxu0  ;;  %v1304_v47 = vpop.f32.mrb[47].mxu1  ;;  %v1835_v15 = vsel %vm1639_vm2, %v3526_v21, 0.0  ;;  %v1883_v54 = vsel %vm1639_vm2, %v1854_v37, 0.0 }
 0x16c   :  { %v1880_v44 = vadd.f32 %v1879_v30, %v1878_v26  ;;  %v1832_v46 = vadd.f32 %v1831_v8, %v1830_v0  ;;  %v1881_v22 = vsel %vm1639_vm2, %v1853_v9, 0.0  ;;  %v1885_v40 = vsel %vm1639_vm2, %v1855_v42, 0.0 }
 0x16e   :  { %v1834_v33 = vadd.f32 %v1833_v36, %v1832_v46  ;;  %v1882_v19 = vadd.f32 %v1881_v22, %v1880_v44 }
 0x170   :  { %v1836_v45 = vadd.f32 %v1835_v15, %v1834_v33  ;;  %v1884_v38 = vadd.f32 %v1883_v54, %v1882_v19 }
 0x172   :  { %1837 = vadd.xlane.f32.xlu0 %v1836_v45  ;;  %v1886_v24 = vadd.f32 %v1885_v40, %v1884_v38 }
 0x174   :  { %1887 = vadd.xlane.f32.xlu1 %v1886_v24  ;;  %v3540_v43 = vpop.f32.mrb[48].mxu0  ;;  %v3548_v9 = vpop.f32.mrb[48].mxu1 }
 0x175   :  { %4276 = vst [vmem:[#allocation9_spill] sm:$0xff] %v3540_v43  ;;  %v1890_v26 = vsel %vm1639_vm2, %v3540_v43, 0.0  ;;  %v1924_v0 = vmul.f32 %v3540_v43, %v3540_v43  ;;  %v3546_v8 = vpop.f32.mrb[49].mxu0  ;;  %4278 = vst [vmem:[#allocation11_spill] sm:$0xff] %v3548_v9  ;;  %v1893_v24 = vsel %vm1639_vm2, %v3548_v9, 0.0  ;;  %v1926_v36 = vmul.f32 %v3548_v9, %v3548_v9  ;;  %v3558_v37 = vpop.f32.mrb[49].mxu1 }
 0x176   :  { %4277 = vst [vmem:[#allocation10_spill] sm:$0xff] %v3546_v8  ;;  %v1891_v30 = vsel %vm1639_vm2, %v3546_v8, 0.0  ;;  %v1925_v45 = vmul.f32 %v3546_v8, %v3546_v8  ;;  %v1349_v40 = vpop.f32.mrb[50].mxu0  ;;  %4279 = vst [vmem:[#allocation12_spill] sm:$0xff] %v3558_v37  ;;  %v1927_v22 = vmul.f32 %v3558_v37, %v3558_v37  ;;  %v1390_v47 = vpop.f32.mrb[50].mxu1  ;;  %v1895_v33 = vsel %vm1639_vm2, %v3558_v37, 0.0 }
 0x177   :  { %v1940_v42 = vsel %vm1639_vm2, %v1924_v0, 0.0  ;;  %v1892_v44 = vadd.f32 %v1891_v30, %v1890_v26  ;;  %v1350_v46 = vpop.f32.mrb[51].mxu0  ;;  %v1943_v54 = vsel %vm1639_vm2, %v1926_v36, 0.0  ;;  %v1391_v19 = vpop.f32.mrb[51].mxu1 }
 0x178   :  { %v1941_v15 = vsel %vm1639_vm2, %v1925_v45, 0.0  ;;  %v1945_v9 = vsel %vm1639_vm2, %v1927_v22, 0.0 }
 0x179   :  { %v1942_v38 = vadd.f32 %v1941_v15, %v1940_v42  ;;  %v1894_v40 = vadd.f32 %v1893_v24, %v1892_v44 }
 0x17b   :  { %v1944_v8 = vadd.f32 %v1943_v54, %v1942_v38  ;;  %v1896_v0 = vadd.f32 %v1895_v33, %v1894_v40 }
 0x17d   :  { %v1946_v26 = vadd.f32 %v1945_v9, %v1944_v8 }
 0x180   :  { %v3568_v30 = vpop.f32.mrb[52].mxu0  ;;  %v3576_v47 = vpop.f32.mrb[52].mxu1 }
 0x181   :  { %4280 = vst [vmem:[#allocation13_spill] sm:$0xff] %v3568_v30  ;;  %v1897_v46 = vsel %vm1639_vm2, %v3568_v30, 0.0  ;;  %v1928_v45 = vmul.f32 %v3568_v30, %v3568_v30  ;;  %v3574_v36 = vpop.f32.mrb[53].mxu0  ;;  %4282 = vst [vmem:[#allocation15_spill] sm:$0xff] %v3576_v47  ;;  %v3582_v9 = vpop.f32.mrb[53].mxu1  ;;  %v1901_v22 = vsel %vm1639_vm2, %v3576_v47, 0.0  ;;  %v1930_v15 = vmul.f32 %v3576_v47, %v3576_v47 }
 0x182   :  { %4281 = vst [vmem:[#allocation14_spill] sm:$0xff] %v3574_v36  ;;  %v1898_v19 = vadd.f32 %v1897_v46, %v1896_v0  ;;  %v1899_v24 = vsel %vm1639_vm2, %v3574_v36, 0.0  ;;  %v1929_v42 = vmul.f32 %v3574_v36, %v3574_v36  ;;  %v1431_v8 = vpop.f32.mrb[54].mxu0  ;;  %4283 = vst [vmem:[#allocation16_spill] sm:$0xff] %v3582_v9  ;;  %v1931_v33 = vmul.f32 %v3582_v9, %v3582_v9  ;;  %v1472_v38 = vpop.f32.mrb[54].mxu1 }
 0x183   :  { %v1947_v44 = vsel %vm1639_vm2, %v1928_v45, 0.0  ;;  %v1432_v54 = vpop.f32.mrb[55].mxu0  ;;  %v1473_v8 = vpop.f32.mrb[55].mxu1  ;;  %v1951_v36 = vsel %vm1639_vm2, %v1930_v15, 0.0  ;;  %v1903_v45 = vsel %vm1639_vm2, %v3582_v9, 0.0 }
 0x184   :  { %v1948_v40 = vadd.f32 %v1947_v44, %v1946_v26  ;;  %v1900_v0 = vadd.f32 %v1899_v24, %v1898_v19  ;;  %v1949_v46 = vsel %vm1639_vm2, %v1929_v42, 0.0  ;;  %v1953_v43 = vsel %vm1639_vm2, %v1931_v33, 0.0 }
 0x186   :  { %v1950_v30 = vadd.f32 %v1949_v46, %v1948_v40  ;;  %v1902_v37 = vadd.f32 %v1901_v22, %v1900_v0 }
 0x188   :  { %v1952_v47 = vadd.f32 %v1951_v36, %v1950_v30  ;;  %v1904_v54 = vadd.f32 %v1903_v45, %v1902_v37 }
 0x18a   :  { %v1954_v21 = vadd.f32 %v1953_v43, %v1952_v47 }
 0x18c   :  { %v3596_v57 = vpop.f32.mrb[56].mxu0  ;;  %v3604_v42 = vpop.f32.mrb[56].mxu1 }
 0x18d   :  { %4284 = vst [vmem:[#allocation17_spill] sm:$0xff] %v3596_v57  ;;  %v1905_v26 = vsel %vm1639_vm2, %v3596_v57, 0.0  ;;  %v1932_v19 = vmul.f32 %v3596_v57, %v3596_v57  ;;  %v3602_v24 = vpop.f32.mrb[57].mxu0  ;;  %4286 = vst [vmem:[#allocation19_spill] sm:$0xff] %v3604_v42  ;;  %v3610_v30 = vpop.f32.mrb[57].mxu1  ;;  %v1909_v47 = vsel %vm1639_vm2, %v3604_v42, 0.0  ;;  %v1934_v15 = vmul.f32 %v3604_v42, %v3604_v42 }
 0x18e   :  { %4285 = vst [vmem:[#allocation18_spill] sm:$0xff] %v3602_v24  ;;  %v1906_v44 = vadd.f32 %v1905_v26, %v1904_v54  ;;  %v1907_v22 = vsel %vm1639_vm2, %v3602_v24, 0.0  ;;  %v1933_v37 = vmul.f32 %v3602_v24, %v3602_v24  ;;  %v1513_v43 = vpop.f32.mrb[58].mxu0  ;;  %v1935_v38 = vmul.f32 %v3610_v30, %v3610_v30  ;;  %v1554_v40 = vpop.f32.mrb[58].mxu1 }
 0x18f   :  { %v1955_v36 = vsel %vm1639_vm2, %v1932_v19, 0.0  ;;  %v1514_v33 = vpop.f32.mrb[59].mxu0  ;;  %v1555_v45 = vpop.f32.mrb[59].mxu1  ;;  %v1959_v54 = vsel %vm1639_vm2, %v1934_v15, 0.0  ;;  %v1911_v26 = vsel %vm1639_vm2, %v3610_v30, 0.0 }
 0x190   :  { %v1956_v0 = vadd.f32 %v1955_v36, %v1954_v21  ;;  %v1908_v46 = vadd.f32 %v1907_v22, %v1906_v44  ;;  %v1957_v8 = vsel %vm1639_vm2, %v1933_v37, 0.0  ;;  %v1961_v24 = vsel %vm1639_vm2, %v1935_v38, 0.0 }
 0x192   :  { %v1958_v19 = vadd.f32 %v1957_v8, %v1956_v0  ;;  %v1910_v43 = vadd.f32 %v1909_v47, %v1908_v46 }
 0x194   :  { %v1960_v42 = vadd.f32 %v1959_v54, %v1958_v19  ;;  %v1912_v33 = vadd.f32 %v1911_v26, %v1910_v43 }
 0x196   :  { %v1962_v57 = vadd.f32 %v1961_v24, %v1960_v42 }
 0x198   :  { %v3624_v9 = vpop.f32.mrb[60].mxu0  ;;  %v3632_v37 = vpop.f32.mrb[60].mxu1 }
 0x199   :  { %4287 = vst [vmem:[#allocation20_spill] sm:$0xff] %v3624_v9  ;;  %v1913_v21 = vsel %vm1639_vm2, %v3624_v9, 0.0  ;;  %v1936_v44 = vmul.f32 %v3624_v9, %v3624_v9  ;;  %v3630_v22 = vpop.f32.mrb[61].mxu0  ;;  %4289 = vst [vmem:[#allocation22_spill] sm:$0xff] %v3632_v37  ;;  %v3638_v42 = vpop.f32.mrb[61].mxu1  ;;  %v1917_v40 = vsel %vm1639_vm2, %v3632_v37, 0.0  ;;  %v1938_v0 = vmul.f32 %v3632_v37, %v3632_v37 }
 0x19a   :  { %4288 = vst [vmem:[#allocation21_spill] sm:$0xff] %v3630_v22  ;;  %v1914_v36 = vadd.f32 %v1913_v21, %v1912_v33  ;;  %v1915_v47 = vsel %vm1639_vm2, %v3630_v22, 0.0  ;;  %v1937_v15 = vmul.f32 %v3630_v22, %v3630_v22  ;;  %v1595_v24 = vpop.f32.mrb[62].mxu0  ;;  %4290 = vst [vmem:[#allocation23_spill] sm:$0xff] %v3638_v42  ;;  %v1636_v8 = vpop.f32.mrb[62].mxu1  ;;  %v1939_v43 = vmul.f32 %v3638_v42, %v3638_v42 }
 0x19b   :  { %v1963_v38 = vsel %vm1639_vm2, %v1936_v44, 0.0  ;;  %v1596_v46 = vpop.f32.mrb[63].mxu0  ;;  %v1637_v19 = vpop.f32.mrb[63].mxu1  ;;  %v1967_v33 = vsel %vm1639_vm2, %v1938_v0, 0.0  ;;  %v1919_v24 = vsel %vm1639_vm2, %v3638_v42, 0.0 }
 0x19c   :  { %v1964_v45 = vadd.f32 %v1963_v38, %v1962_v57  ;;  %v1916_v54 = vadd.f32 %v1915_v47, %v1914_v36  ;;  %v1965_v26 = vsel %vm1639_vm2, %v1937_v15, 0.0  ;;  %v1969_v46 = vsel %vm1639_vm2, %v1939_v43, 0.0 }
 0x19e   :  { %v1918_v21 = vadd.f32 %v1917_v40, %v1916_v54  ;;  %v1966_v44 = vadd.f32 %v1965_v26, %v1964_v45 }
 0x19f   :  { %v1672_v36 = vpop.xlane.xlu0 %1671 }
 0x1a0   :  { %v1920_v22 = vadd.f32 %v1919_v24, %v1918_v21  ;;  %v1968_v9 = vadd.f32 %v1967_v33, %v1966_v44  ;;  %v1978_v24 = vld [vmem:[%s4244_s2] sm:$0xf] }
 0x1a1   :  { %v1721_v47 = vpop.xlane.xlu1 %1720 }
 0x1a2   :  { %1921 = vadd.xlane.f32.xlu0 %v1920_v22  ;;  %v1970_v57 = vadd.f32 %v1969_v46, %v1968_v9 }
 0x1a4   :  { %1971 = vadd.xlane.f32.xlu1 %v1970_v57 }
 0x1cf   :  { %v1754_v15 = vpop.xlane.xlu0 %1753 }
 0x1d0   :  { %v1755_v19 = vadd.f32 %v1754_v15, %v1672_v36  ;;  %v1982_v36 = vld [vmem:[%s4245_s3] sm:$0xf] }
 0x1d1   :  { %v1804_v38 = vpop.xlane.xlu1 %1803 }
 0x1d2   :  { %v1805_v0 = vadd.f32 %v1804_v38, %v1721_v47 }
 0x1ff   :  { %v1838_v8 = vpop.xlane.xlu0 %1837 }
 0x200   :  { %v1839_v40 = vadd.f32 %v1838_v8, %v1755_v19 }
 0x201   :  { %v1888_v37 = vpop.xlane.xlu1 %1887 }
 0x202   :  { %v1889_v54 = vadd.f32 %v1888_v37, %v1805_v0 }
 0x22f   :  { %v1922_v45 = vpop.xlane.xlu0 %1921 }
 0x230   :  { %v1923_v26 = vadd.f32 %v1922_v45, %v1839_v40  ;;  %v4293_v40 = vld [vmem:[#allocation2_spill] sm:$0xff]  ;;  %v4295_v45 = vld [vmem:[#allocation3_spill] sm:$0xff] }
 0x231   :  { %v1972_v42 = vpop.xlane.xlu1 %1971 }
 0x232   :  { %v1974_v21 = vmul.f32 0.00012207031, %v1923_v26  ;;  %v1973_v33 = vadd.f32 %v1972_v42, %v1889_v54  ;;  %v4297_v54 = vld [vmem:[#allocation4_spill] sm:$0xff]  ;;  %v4299_v26 = vld [vmem:[#allocation5_spill] sm:$0xff] }
 0x234   :  { %v1976_v44 = vmul.f32 %v1974_v21, %v1974_v21  ;;  %v1975_v43 = vmul.f32 0.00012207031, %v1973_v33  ;;  %v4303_v33 = vld [vmem:[#allocation7_spill] sm:$0xff] }
 0x236   :  { %v1977_v22 = vsub.f32 %v1975_v43, %v1976_v44  ;;  %v4305_v43 = vld [vmem:[#allocation8_spill] sm:$0xff] }
 0x238   :  { %v1979_v9 = vadd.f32 1e-05, %v1977_v22 }
 0x23a   :  { %2640 = vrsqrt.f32 %v1979_v9  ;;  %v4307_v9 = vld [vmem:[#allocation9_spill] sm:$0xff] }
 0x244   :  { %v2641_v46 = vpop.eup %2640 }
 0x245   :  { %v1981_v57 = vmul.f32 %v2641_v46, %v1978_v24  ;;  %v4309_v46 = vld [vmem:[#allocation10_spill] sm:$0xff] }
 0x247   :  { %1987 = vperm.xlu0 %2622, %v1981_v57   ;;  %v1983_v37 = vmul.f32 %v1981_v57, %v1974_v21  ;;  %v4301_v21 = vld [vmem:[#allocation6_spill] sm:$0xff] }
 0x249   :  { %v1984_v47 = vsub.f32 %v1982_v36, %v1983_v37  ;;  %v4311_v36 = vld [vmem:[#allocation11_spill] sm:$0xff] }
 0x24b   :  { %2008 = vperm.xlu1 %2623, %v1984_v47   ;;  %v4313_v47 = vld [vmem:[#allocation12_spill] sm:$0xff] }
 0x2c6   :  { %v3658_v42 = vpop.permute.xlu0 %1987 }
 0x2c7   :  { %v3662_v15 = vmul.f32 %v3658_v42, %v3204_v3  ;;  %v3666_v38 = vmul.f32 %v3658_v42, %v3210_v10  ;;  %v3670_v8 = vmul.f32 %v3658_v42, %v3212_v11  ;;  %v3674_v19 = vmul.f32 %v3658_v42, %v3222_v27 }
 0x2c8   :  { %v3678_v0 = vmul.f32 %v3658_v42, %v3232_v60  ;;  %v3682_v3 = vmul.f32 %v3658_v42, %v3238_v63  ;;  %v3686_v10 = vmul.f32 %v3658_v42, %v3240_v2  ;;  %v3690_v11 = vmul.f32 %v3658_v42, %v3246_v14 }
 0x2c9   :  { %v3694_v27 = vmul.f32 %v3658_v42, %v3260_v51  ;;  %v3698_v60 = vmul.f32 %v3658_v42, %v3266_v58  ;;  %v3702_v63 = vmul.f32 %v3658_v42, %v3268_v59  ;;  %v3706_v2 = vmul.f32 %v3658_v42, %v3274_v4 }
 0x2ca   :  { %v3710_v14 = vmul.f32 %v3658_v42, %v3288_v52  ;;  %v3714_v51 = vmul.f32 %v3658_v42, %v3294_v55  ;;  %v3718_v58 = vmul.f32 %v3658_v42, %v3296_v61  ;;  %v3722_v59 = vmul.f32 %v3658_v42, %v3304_v16 }
 0x2cb   :  { %v3726_v4 = vmul.f32 %v3658_v42, %v3316_v56  ;;  %v3730_v52 = vmul.f32 %v3658_v42, %v3322_v1  ;;  %v3734_v55 = vmul.f32 %v3658_v42, %v3324_v35  ;;  %v3738_v61 = vmul.f32 %v3658_v42, %v3334_v18 }
 0x2cc   :  { %v3742_v16 = vmul.f32 %v3658_v42, %v3344_v62  ;;  %v3746_v56 = vmul.f32 %v3658_v42, %v3350_v12  ;;  %v3750_v1 = vmul.f32 %v3658_v42, %v3352_v13  ;;  %v3754_v35 = vmul.f32 %v3658_v42, %v3358_v25 }
 0x2cd   :  { %v3758_v18 = vmul.f32 %v3658_v42, %v3372_v17  ;;  %v3762_v62 = vmul.f32 %v3658_v42, %v3378_v28  ;;  %v3766_v12 = vmul.f32 %v3658_v42, %v3380_v29  ;;  %v3770_v13 = vmul.f32 %v3658_v42, %v3386_v39 }
 0x2ce   :  { %v3774_v25 = vmul.f32 %v3658_v42, %v3400_v41  ;;  %v3778_v17 = vmul.f32 %v3658_v42, %v3406_v48  ;;  %v3782_v28 = vmul.f32 %v3658_v42, %v3408_v49  ;;  %v3786_v29 = vmul.f32 %v3658_v42, %v3414_v5 }
 0x2cf   :  { %v3790_v39 = vmul.f32 %v3658_v42, %v3428_v23  ;;  %v3794_v41 = vmul.f32 %v3658_v42, %v3434_v31  ;;  %v3798_v48 = vmul.f32 %v3658_v42, %v3436_v32  ;;  %v3802_v49 = vmul.f32 %v3658_v42, %v3446_v50 }
 0x2d0   :  { %v3806_v5 = vmul.f32 %v3658_v42, %v3456_v53  ;;  %v3810_v23 = vmul.f32 %v3658_v42, %v3462_v7  ;;  %v3814_v31 = vmul.f32 %v3658_v42, %v3464_v20  ;;  %v3818_v32 = vmul.f32 %v3658_v42, %v3470_v34 }
 0x2d1   :  { %v3822_v50 = vmul.f32 %v3658_v42, %v3484_v6  ;;  %v3826_v53 = vmul.f32 %v3658_v42, %v4293_v40  ;;  %v3830_v7 = vmul.f32 %v3658_v42, %v4295_v45  ;;  %v3834_v20 = vmul.f32 %v3658_v42, %v4297_v54  ;;  %v4315_v45 = vld [vmem:[#allocation13_spill] sm:$0xff] }
 0x2d2   :  { %4291 = vst [vmem:[#allocation24_spill] sm:$0xff] %v3818_v32  ;;  %v3838_v34 = vmul.f32 %v3658_v42, %v4299_v26  ;;  %v3842_v6 = vmul.f32 %v3658_v42, %v4301_v21  ;;  %v3846_v44 = vmul.f32 %v3658_v42, %v4303_v33  ;;  %v3850_v22 = vmul.f32 %v3658_v42, %v4305_v43  ;;  %v4317_v26 = vld [vmem:[#allocation14_spill] sm:$0xff]  ;;  %v4319_v33 = vld [vmem:[#allocation15_spill] sm:$0xff] }
 0x2d3   :  { %4292 = vst [vmem:[#allocation25_spill] sm:$0xff] %v3822_v50  ;;  %4294 = vst [vmem:[#allocation2_spill] sm:$0xff] %v3826_v53  ;;  %v3854_v24 = vmul.f32 %v3658_v42, %v4307_v9  ;;  %v3858_v57 = vmul.f32 %v3658_v42, %v4309_v46  ;;  %v3862_v37 = vmul.f32 %v3658_v42, %v4311_v36  ;;  %v4321_v9 = vld [vmem:[#allocation16_spill] sm:$0xff]  ;;  %v3884_v36 = vpop.permute.xlu1 %2008 }
 0x2d4   :  { %4296 = vst [vmem:[#allocation3_spill] sm:$0xff] %v3830_v7  ;;  %4298 = vst [vmem:[#allocation4_spill] sm:$0xff] %v3834_v20  ;;  %v3866_v40 = vmul.f32 %v3658_v42, %v4313_v47  ;;  %v3870_v54 = vmul.f32 %v3658_v42, %v4315_v45  ;;  %v3874_v21 = vmul.f32 %v3658_v42, %v4317_v26  ;;  %v4323_v47 = vld [vmem:[#allocation17_spill] sm:$0xff]  ;;  %v4325_v45 = vld [vmem:[#allocation18_spill] sm:$0xff] }
 0x2d5   :  { %4300 = vst [vmem:[#allocation5_spill] sm:$0xff] %v3838_v34  ;;  %4302 = vst [vmem:[#allocation6_spill] sm:$0xff] %v3842_v6  ;;  %v3878_v43 = vmul.f32 %v3658_v42, %v4319_v33  ;;  %v3882_v46 = vmul.f32 %v3658_v42, %v4321_v9  ;;  %v4327_v26 = vld [vmem:[#allocation19_spill] sm:$0xff]  ;;  %v3900_v33 = vmul.f32 %v3658_v42, %v3610_v30  ;;  %v4330_v9 = vld [vmem:[#allocation20_spill] sm:$0xff] }
 0x2d6   :  { %4304 = vst [vmem:[#allocation7_spill] sm:$0xff] %v3846_v44  ;;  %4306 = vst [vmem:[#allocation8_spill] sm:$0xff] %v3850_v22  ;;  %v2011_v30 = vadd.f32 %v3884_v36, %v3662_v15  ;;  %v2018_v15 = vadd.f32 %v3884_v36, %v3690_v11  ;;  %v2025_v11 = vadd.f32 %v3884_v36, %v3718_v58 }
 0x2d7   :  { %4308 = vst [vmem:[#allocation9_spill] sm:$0xff] %v3854_v24  ;;  %4310 = vst [vmem:[#allocation10_spill] sm:$0xff] %v3858_v57 }
 0x2d8   :  { %4312 = vst [vmem:[#allocation11_spill] sm:$0xff] %v3862_v37  ;;  %4314 = vst [vmem:[#allocation12_spill] sm:$0xff] %v3866_v40  ;;  %v3888_v40 = vmul.f32 %v3658_v42, %v4323_v47  ;;  %vm2027_vm3 = vcmp.ge.f32.partialorder %v2011_v30, 0.0  ;;  %vm2034_vm10 = vcmp.ge.f32.partialorder %v2018_v15, 0.0  ;;  %vm2041_vm1 = vcmp.ge.f32.partialorder %v2025_v11, 0.0 }
 0x2d9   :  { %4316 = vst [vmem:[#allocation13_spill] sm:$0xff] %v3870_v54  ;;  %4318 = vst [vmem:[#allocation14_spill] sm:$0xff] %v3874_v21  ;;  %v3892_v54 = vmul.f32 %v3658_v42, %v4325_v45  ;;  %v3896_v21 = vmul.f32 %v3658_v42, %v4327_v26  ;;  %v2057_v6 = vmul.f32 0.2, %v2025_v11 }
 0x2da   :  { %4320 = vst [vmem:[#allocation15_spill] sm:$0xff] %v3878_v43  ;;  %4322 = vst [vmem:[#allocation16_spill] sm:$0xff] %v3882_v46  ;;  %v3904_v46 = vmul.f32 %v3658_v42, %v4330_v9  ;;  %v4332_v43 = vld [vmem:[#allocation21_spill] sm:$0xff]  ;;  %v2013_v9 = vadd.f32 %v3884_v36, %v3670_v8  ;;  %v2020_v8 = vadd.f32 %v3884_v36, %v3698_v60  ;;  %v2043_v60 = vmul.f32 0.2, %v2011_v30 }
 0x2db   :  { %4324 = vst [vmem:[#allocation17_spill] sm:$0xff] %v3888_v40  ;;  %4326 = vst [vmem:[#allocation18_spill] sm:$0xff] %v3892_v54  ;;  %v3908_v47 = vmul.f32 %v3658_v42, %v4332_v43  ;;  %v4334_v40 = vld [vmem:[#allocation22_spill] sm:$0xff]  ;;  %v4336_v54 = vld [vmem:[#allocation23_spill] sm:$0xff]  ;;  %v2014_v43 = vadd.f32 %v3884_v36, %v3674_v19  ;;  %v2021_v19 = vadd.f32 %v3884_v36, %v3702_v63 }
 0x2dc   :  { %4328 = vst [vmem:[#allocation19_spill] sm:$0xff] %v3896_v21  ;;  %4329 = vst [vmem:[#allocation26_spill] sm:$0xff] %v3900_v33  ;;  %v3912_v45 = vmul.f32 %v3658_v42, %v4334_v40  ;;  %v3916_v26 = vmul.f32 %v3658_v42, %v4336_v54  ;;  %v2012_v33 = vadd.f32 %v3884_v36, %v3666_v38  ;;  %vm2029_vm5 = vcmp.ge.f32.partialorder %v2013_v9, 0.0 }
 0x2dd   :  { %4331 = vst [vmem:[#allocation20_spill] sm:$0xff] %v3904_v46  ;;  %4333 = vst [vmem:[#allocation21_spill] sm:$0xff] %v3908_v47  ;;  %v2015_v40 = vadd.f32 %v3884_v36, %v3678_v0  ;;  %v2017_v42 = vadd.f32 %v3884_v36, %v3686_v10  ;;  %v2019_v38 = vadd.f32 %v3884_v36, %v3694_v27  ;;  %vm2030_vm6 = vcmp.ge.f32.partialorder %v2014_v43, 0.0 }
 0x2de   :  { %4335 = vst [vmem:[#allocation22_spill] sm:$0xff] %v3912_v45  ;;  %4337 = vst [vmem:[#allocation23_spill] sm:$0xff] %v3916_v26  ;;  %v2016_v45 = vadd.f32 %v3884_v36, %v3682_v3  ;;  %v2022_v0 = vadd.f32 %v3884_v36, %v3706_v2  ;;  %v2023_v3 = vadd.f32 %v3884_v36, %v3710_v14  ;;  %vm2028_vm4 = vcmp.ge.f32.partialorder %v2012_v33, 0.0 }
 0x2df   :  { %v2024_v10 = vadd.f32 %v3884_v36, %v3714_v51  ;;  %v2026_v27 = vadd.f32 %v3884_v36, %v3722_v59  ;;  %vm2031_vm7 = vcmp.ge.f32.partialorder %v2015_v40, 0.0  ;;  %vm2033_vm9 = vcmp.ge.f32.partialorder %v2017_v42, 0.0 }
 0x2e0   :  { %vm2032_vm8 = vcmp.ge.f32.partialorder %v2016_v45, 0.0  ;;  %vm2035_vm11 = vcmp.ge.f32.partialorder %v2019_v38, 0.0  ;;  %vm2036_vm12 = vcmp.ge.f32.partialorder %v2020_v8, 0.0  ;;  %vm2037_vm13 = vcmp.ge.f32.partialorder %v2021_v19, 0.0 }
 0x2e1   :  { %vm2038_vm14 = vcmp.ge.f32.partialorder %v2022_v0, 0.0  ;;  %vm2039_vm15 = vcmp.ge.f32.partialorder %v2023_v3, 0.0  ;;  %vm2040_vm0 = vcmp.ge.f32.partialorder %v2024_v10, 0.0  ;;  %vm2042_vm2 = vcmp.ge.f32.partialorder %v2026_v27, 0.0 }
 0x2e2   :  { %v2044_v63 = vmul.f32 0.2, %v2012_v33  ;;  %v2045_v2 = vmul.f32 0.2, %v2013_v9  ;;  %v3952_v14 = vadd.f32 %v3726_v4, %v3884_v36  ;;  %v2046_v51 = vmul.f32 0.2, %v2014_v43 }
 0x2e3   :  { %v2047_v58 = vmul.f32 0.2, %v2015_v40  ;;  %v2048_v59 = vmul.f32 0.2, %v2016_v45  ;;  %v3956_v54 = vadd.f32 %v3730_v52, %v3884_v36  ;;  %v2049_v26 = vmul.f32 0.2, %v2017_v42 }
 0x2e4   :  { %v2050_v47 = vmul.f32 0.2, %v2018_v15  ;;  %v2051_v46 = vmul.f32 0.2, %v2019_v38  ;;  %v2059_v21 = vsel %vm2027_vm3, %v2011_v30, %v2043_v60  ;;  %v2052_v37 = vmul.f32 0.2, %v2020_v8 }
 0x2e5   :  { %v2053_v57 = vmul.f32 0.2, %v2021_v19  ;;  %v2054_v24 = vmul.f32 0.2, %v2022_v0  ;;  %v2060_v22 = vsel %vm2028_vm4, %v2012_v33, %v2044_v63  ;;  %v2055_v44 = vmul.f32 0.2, %v2023_v3 }
 0x2e6   :  { %v2056_v4 = vmul.f32 0.2, %v2024_v10  ;;  %v2061_v34 = vsel %vm2029_vm5, %v2013_v9, %v2045_v2  ;;  %v2058_v20 = vmul.f32 0.2, %v2026_v27  ;;  %v2062_v7 = vsel %vm2030_vm6, %v2014_v43, %v2046_v51 }
 0x2e7   :  { %v2063_v52 = vsel %vm2031_vm7, %v2015_v40, %v2047_v58  ;;  %v2064_v53 = vsel %vm2032_vm8, %v2016_v45, %v2048_v59  ;;  %v2065_v50 = vsel %vm2033_vm9, %v2017_v42, %v2049_v26  ;;  %v2066_v30 = vsel %vm2034_vm10, %v2018_v15, %v2050_v47 }
 0x2e8   :  { %v2067_v60 = vsel %vm2035_vm11, %v2019_v38, %v2051_v46  ;;  %v2068_v33 = vsel %vm2036_vm12, %v2020_v8, %v2052_v37  ;;  %v2069_v63 = vsel %vm2037_vm13, %v2021_v19, %v2053_v57  ;;  %v2070_v32 = vsel %vm2038_vm14, %v2022_v0, %v2054_v24 }
 0x2e9   :  { %v2071_v9 = vsel %vm2039_vm15, %v2023_v3, %v2055_v44  ;;  %v2072_v43 = vsel %vm2040_vm0, %v2024_v10, %v2056_v4  ;;  %v2073_v40 = vsel %vm2041_vm1, %v2025_v11, %v2057_v6  ;;  %v2074_v45 = vsel %vm2042_vm2, %v2026_v27, %v2058_v20 }
 0x2ea   :  { %v2091_v2 = vcombine.low %v2059_v21, %v2060_v22  ;;  %v2092_v26 = vcombine.low %v2061_v34, %v2062_v7  ;;  %v2093_v42 = vcombine.low %v2063_v52, %v2064_v53  ;;  %v2094_v47 = vcombine.low %v2065_v50, %v2066_v30 }
 0x2eb   :  { %v2095_v15 = vcombine.low %v2067_v60, %v2068_v33  ;;  %v2096_v46 = vcombine.low %v2069_v63, %v2070_v32  ;;  %v2097_v38 = vcombine.low %v2071_v9, %v2072_v43  ;;  %v2098_v37 = vcombine.low %v2073_v40, %v2074_v45 }
 0x2ec   :  { %2107 = vst [vmem:[%s4246_s4] sm:$0xff] %v2091_v2  ;;  %2108 = vst [vmem:[%s4246_s4 + $0x8] sm:$0xff] %v2092_v26  ;;  %v2133_v6 = vadd.f32 %v3734_v55, %v3884_v36  ;;  %v2134_v7 = vadd.f32 %v3738_v61, %v3884_v36  ;;  %v2135_v55 = vadd.f32 %v3742_v16, %v3884_v36  ;;  %vm2147_vm3 = vcmp.ge.f32.partialorder %v3952_v14, 0.0 }
 0x2ed   :  { %2109 = vst [vmem:[%s4246_s4 + $0x10] sm:$0xff] %v2093_v42  ;;  %2110 = vst [vmem:[%s4246_s4 + $0x18] sm:$0xff] %v2094_v47  ;;  %v2136_v61 = vadd.f32 %v3746_v56, %v3884_v36  ;;  %v2137_v32 = vadd.f32 %v3750_v1, %v3884_v36  ;;  %v2138_v50 = vadd.f32 %v3754_v35, %v3884_v36  ;;  %vm2148_vm4 = vcmp.ge.f32.partialorder %v3956_v54, 0.0 }
 0x2ee   :  { %2111 = vst [vmem:[%s4246_s4 + $0x20] sm:$0xff] %v2095_v15  ;;  %2112 = vst [vmem:[%s4246_s4 + $0x28] sm:$0xff] %v2096_v46  ;;  %v2139_v16 = vadd.f32 %v3758_v18, %v3884_v36  ;;  %v2140_v56 = vadd.f32 %v3762_v62, %v3884_v36  ;;  %v2141_v1 = vadd.f32 %v3766_v12, %v3884_v36  ;;  %vm2149_vm5 = vcmp.ge.f32.partialorder %v2133_v6, 0.0 }
 0x2ef   :  { %2113 = vst [vmem:[%s4246_s4 + $0x30] sm:$0xff] %v2097_v38  ;;  %2114 = vst [vmem:[%s4246_s4 + $0x38] sm:$0xff] %v2098_v37  ;;  %v2142_v35 = vadd.f32 %v3770_v13, %v3884_v36  ;;  %v2143_v53 = vadd.f32 %v3774_v25, %v3884_v36  ;;  %v2144_v20 = vadd.f32 %v3778_v17, %v3884_v36  ;;  %vm2150_vm6 = vcmp.ge.f32.partialorder %v2134_v7, 0.0 }
 0x2f0   :  { %v2145_v34 = vadd.f32 %v3782_v28, %v3884_v36  ;;  %v2146_v18 = vadd.f32 %v3786_v29, %v3884_v36  ;;  %vm2151_vm7 = vcmp.ge.f32.partialorder %v2135_v55, 0.0  ;;  %vm2152_vm8 = vcmp.ge.f32.partialorder %v2136_v61, 0.0 }
 0x2f1   :  { %vm2153_vm9 = vcmp.ge.f32.partialorder %v2137_v32, 0.0  ;;  %vm2154_vm10 = vcmp.ge.f32.partialorder %v2138_v50, 0.0  ;;  %vm2155_vm11 = vcmp.ge.f32.partialorder %v2139_v16, 0.0  ;;  %vm2156_vm12 = vcmp.ge.f32.partialorder %v2140_v56, 0.0 }
 0x2f2   :  { %vm2157_vm13 = vcmp.ge.f32.partialorder %v2141_v1, 0.0  ;;  %vm2158_vm14 = vcmp.ge.f32.partialorder %v2142_v35, 0.0  ;;  %vm2159_vm15 = vcmp.ge.f32.partialorder %v2143_v53, 0.0  ;;  %vm2160_vm0 = vcmp.ge.f32.partialorder %v2144_v20, 0.0 }
 0x2f3   :  { %vm2161_vm1 = vcmp.ge.f32.partialorder %v2145_v34, 0.0  ;;  %vm2162_vm2 = vcmp.ge.f32.partialorder %v2146_v18, 0.0  ;;  %v2163_v62 = vmul.f32 0.2, %v3952_v14  ;;  %v2164_v12 = vmul.f32 0.2, %v3956_v54 }
 0x2f4   :  { %v2165_v13 = vmul.f32 0.2, %v2133_v6  ;;  %v4032_v25 = vadd.f32 %v3790_v39, %v3884_v36  ;;  %v2166_v17 = vmul.f32 0.2, %v2134_v7  ;;  %v2167_v28 = vmul.f32 0.2, %v2135_v55 }
 0x2f5   :  { %v2168_v29 = vmul.f32 0.2, %v2136_v61  ;;  %v4036_v44 = vadd.f32 %v3794_v41, %v3884_v36  ;;  %v2169_v22 = vmul.f32 0.2, %v2137_v32  ;;  %v2170_v24 = vmul.f32 0.2, %v2138_v50 }
 0x2f6   :  { %v2171_v57 = vmul.f32 0.2, %v2139_v16  ;;  %v2179_v21 = vsel %vm2147_vm3, %v3952_v14, %v2163_v62  ;;  %v2172_v8 = vmul.f32 0.2, %v2140_v56  ;;  %v2173_v19 = vmul.f32 0.2, %v2141_v1 }
 0x2f7   :  { %v2174_v0 = vmul.f32 0.2, %v2142_v35  ;;  %v2180_v39 = vsel %vm2148_vm4, %v3956_v54, %v2164_v12  ;;  %v2175_v3 = vmul.f32 0.2, %v2143_v53  ;;  %v2176_v10 = vmul.f32 0.2, %v2144_v20 }
 0x2f8   :  { %v2177_v11 = vmul.f32 0.2, %v2145_v34  ;;  %v2181_v41 = vsel %vm2149_vm5, %v2133_v6, %v2165_v13  ;;  %v2178_v27 = vmul.f32 0.2, %v2146_v18  ;;  %v2182_v51 = vsel %vm2150_vm6, %v2134_v7, %v2166_v17  ;;  %v4338_v7 = vld [vmem:[#allocation24_spill] sm:$0xff] }
 0x2f9   :  { %v2183_v58 = vsel %vm2151_vm7, %v2135_v55, %v2167_v28  ;;  %v2184_v59 = vsel %vm2152_vm8, %v2136_v61, %v2168_v29  ;;  %v2185_v14 = vsel %vm2153_vm9, %v2137_v32, %v2169_v22  ;;  %v2186_v4 = vsel %vm2154_vm10, %v2138_v50, %v2170_v24  ;;  %v4339_v61 = vld [vmem:[#allocation25_spill] sm:$0xff]  ;;  %v4340_v32 = vld [vmem:[#allocation2_spill] sm:$0xff]  ;;  %v4341_v50 = vld [vmem:[#allocation3_spill] sm:$0xff] }
 0x2fa   :  { %v2187_v52 = vsel %vm2155_vm11, %v2139_v16, %v2171_v57  ;;  %v2188_v54 = vsel %vm2156_vm12, %v2140_v56, %v2172_v8  ;;  %v2189_v30 = vsel %vm2157_vm13, %v2141_v1, %v2173_v19  ;;  %v2190_v60 = vsel %vm2158_vm14, %v2142_v35, %v2174_v0  ;;  %v4342_v16 = vld [vmem:[#allocation4_spill] sm:$0xff]  ;;  %v4343_v1 = vld [vmem:[#allocation5_spill] sm:$0xff]  ;;  %v4348_v8 = vld [vmem:[#allocation10_spill] sm:$0xff] }
 0x2fb   :  { %v2191_v33 = vsel %vm2159_vm15, %v2143_v53, %v2175_v3  ;;  %v2192_v63 = vsel %vm2160_vm0, %v2144_v20, %v2176_v10  ;;  %v2193_v9 = vsel %vm2161_vm1, %v2145_v34, %v2177_v11  ;;  %v2194_v43 = vsel %vm2162_vm2, %v2146_v18, %v2178_v27  ;;  %v4344_v53 = vld [vmem:[#allocation6_spill] sm:$0xff]  ;;  %v4345_v34 = vld [vmem:[#allocation7_spill] sm:$0xff]  ;;  %v4346_v62 = vld [vmem:[#allocation8_spill] sm:$0xff] }
 0x2fc   :  { %v2211_v40 = vcombine.low %v2179_v21, %v2180_v39  ;;  %v2212_v45 = vcombine.low %v2181_v41, %v2182_v51  ;;  %v2213_v2 = vcombine.low %v2183_v58, %v2184_v59  ;;  %v2214_v26 = vcombine.low %v2185_v14, %v2186_v4  ;;  %v4347_v29 = vld [vmem:[#allocation9_spill] sm:$0xff] }
 0x2fd   :  { %v2215_v42 = vcombine.low %v2187_v52, %v2188_v54  ;;  %v2216_v47 = vcombine.low %v2189_v30, %v2190_v60  ;;  %v2217_v15 = vcombine.low %v2191_v33, %v2192_v63  ;;  %v2218_v46 = vcombine.low %v2193_v9, %v2194_v43 }
 0x2fe   :  { %2597 = vst [vmem:[%s4246_s4 + $0x40] sm:$0xff] %v2211_v40  ;;  %2598 = vst [vmem:[%s4246_s4 + $0x48] sm:$0xff] %v2212_v45  ;;  %v2254_v38 = vadd.f32 %v3798_v48, %v3884_v36  ;;  %v2255_v37 = vadd.f32 %v3802_v49, %v3884_v36  ;;  %v2256_v48 = vadd.f32 %v3806_v5, %v3884_v36  ;;  %vm2268_vm3 = vcmp.ge.f32.partialorder %v4032_v25, 0.0 }
 0x2ff   :  { %2599 = vst [vmem:[%s4246_s4 + $0x50] sm:$0xff] %v2213_v2  ;;  %2600 = vst [vmem:[%s4246_s4 + $0x58] sm:$0xff] %v2214_v26  ;;  %v2257_v49 = vadd.f32 %v3810_v23, %v3884_v36  ;;  %v2258_v6 = vadd.f32 %v3814_v31, %v3884_v36  ;;  %v2259_v55 = vadd.f32 %v4338_v7, %v3884_v36  ;;  %vm2269_vm4 = vcmp.ge.f32.partialorder %v4036_v44, 0.0 }
 0x300   :  { %2601 = vst [vmem:[%s4246_s4 + $0x60] sm:$0xff] %v2215_v42  ;;  %2602 = vst [vmem:[%s4246_s4 + $0x68] sm:$0xff] %v2216_v47  ;;  %v2260_v5 = vadd.f32 %v4339_v61, %v3884_v36  ;;  %v2261_v23 = vadd.f32 %v4340_v32, %v3884_v36  ;;  %v2262_v31 = vadd.f32 %v4341_v50, %v3884_v36  ;;  %vm2270_vm5 = vcmp.ge.f32.partialorder %v2254_v38, 0.0 }
 0x301   :  { %2603 = vst [vmem:[%s4246_s4 + $0x70] sm:$0xff] %v2217_v15  ;;  %2604 = vst [vmem:[%s4246_s4 + $0x78] sm:$0xff] %v2218_v46  ;;  %v2263_v56 = vadd.f32 %v4342_v16, %v3884_v36  ;;  %v2264_v35 = vadd.f32 %v4343_v1, %v3884_v36  ;;  %v2265_v20 = vadd.f32 %v4344_v53, %v3884_v36  ;;  %vm2271_vm6 = vcmp.ge.f32.partialorder %v2255_v37, 0.0 }
 0x302   :  { %v2266_v18 = vadd.f32 %v4345_v34, %v3884_v36  ;;  %v2267_v12 = vadd.f32 %v4346_v62, %v3884_v36  ;;  %vm2272_vm7 = vcmp.ge.f32.partialorder %v2256_v48, 0.0  ;;  %vm2273_vm8 = vcmp.ge.f32.partialorder %v2257_v49, 0.0 }
 0x303   :  { %vm2274_vm9 = vcmp.ge.f32.partialorder %v2258_v6, 0.0  ;;  %vm2275_vm10 = vcmp.ge.f32.partialorder %v2259_v55, 0.0  ;;  %vm2276_vm11 = vcmp.ge.f32.partialorder %v2260_v5, 0.0  ;;  %vm2277_vm12 = vcmp.ge.f32.partialorder %v2261_v23, 0.0 }
 0x304   :  { %vm2278_vm13 = vcmp.ge.f32.partialorder %v2262_v31, 0.0  ;;  %vm2279_vm14 = vcmp.ge.f32.partialorder %v2263_v56, 0.0  ;;  %vm2280_vm15 = vcmp.ge.f32.partialorder %v2264_v35, 0.0  ;;  %vm2281_vm0 = vcmp.ge.f32.partialorder %v2265_v20, 0.0 }
 0x305   :  { %vm2282_vm1 = vcmp.ge.f32.partialorder %v2266_v18, 0.0  ;;  %vm2283_vm2 = vcmp.ge.f32.partialorder %v2267_v12, 0.0  ;;  %v2284_v13 = vmul.f32 0.2, %v4032_v25  ;;  %v2285_v17 = vmul.f32 0.2, %v4036_v44 }
 0x306   :  { %v2286_v28 = vmul.f32 0.2, %v2254_v38  ;;  %v4116_v22 = vadd.f32 %v4347_v29, %v3884_v36  ;;  %v2287_v24 = vmul.f32 0.2, %v2255_v37  ;;  %v2288_v57 = vmul.f32 0.2, %v2256_v48 }
 0x307   :  { %v2289_v21 = vmul.f32 0.2, %v2257_v49  ;;  %v4120_v19 = vadd.f32 %v4348_v8, %v3884_v36  ;;  %v2290_v0 = vmul.f32 0.2, %v2258_v6  ;;  %v2291_v39 = vmul.f32 0.2, %v2259_v55 }
 0x308   :  { %v2292_v3 = vmul.f32 0.2, %v2260_v5  ;;  %v2300_v10 = vsel %vm2268_vm3, %v4032_v25, %v2284_v13  ;;  %v2293_v11 = vmul.f32 0.2, %v2261_v23  ;;  %v2294_v41 = vmul.f32 0.2, %v2262_v31 }
 0x309   :  { %v2295_v27 = vmul.f32 0.2, %v2263_v56  ;;  %v2301_v51 = vsel %vm2269_vm4, %v4036_v44, %v2285_v17  ;;  %v2296_v58 = vmul.f32 0.2, %v2264_v35  ;;  %v2297_v59 = vmul.f32 0.2, %v2265_v20 }
 0x30a   :  { %v2298_v14 = vmul.f32 0.2, %v2266_v18  ;;  %v2302_v4 = vsel %vm2270_vm5, %v2254_v38, %v2286_v28  ;;  %v2299_v52 = vmul.f32 0.2, %v2267_v12  ;;  %v2303_v54 = vsel %vm2271_vm6, %v2255_v37, %v2287_v24  ;;  %v4359_v17 = vld [vmem:[#allocation20_spill] sm:$0xff]  ;;  %v4360_v29 = vld [vmem:[#allocation21_spill] sm:$0xff] }
 0x30b   :  { %v2304_v30 = vsel %vm2272_vm7, %v2256_v48, %v2288_v57  ;;  %v2305_v60 = vsel %vm2273_vm8, %v2257_v49, %v2289_v21  ;;  %v2306_v25 = vsel %vm2274_vm9, %v2258_v6, %v2290_v0  ;;  %v2307_v33 = vsel %vm2275_vm10, %v2259_v55, %v2291_v39  ;;  %v4349_v6 = vld [vmem:[#allocation11_spill] sm:$0xff]  ;;  %v4350_v55 = vld [vmem:[#allocation12_spill] sm:$0xff]  ;;  %v4361_v57 = vld [vmem:[#allocation22_spill] sm:$0xff] }
 0x30c   :  { %v2308_v63 = vsel %vm2276_vm11, %v2260_v5, %v2292_v3  ;;  %v2309_v44 = vsel %vm2277_vm12, %v2261_v23, %v2293_v11  ;;  %v2310_v9 = vsel %vm2278_vm13, %v2262_v31, %v2294_v41  ;;  %v2311_v43 = vsel %vm2279_vm14, %v2263_v56, %v2295_v27  ;;  %v4351_v5 = vld [vmem:[#allocation13_spill] sm:$0xff]  ;;  %v4352_v23 = vld [vmem:[#allocation14_spill] sm:$0xff]  ;;  %v4353_v31 = vld [vmem:[#allocation15_spill] sm:$0xff] }
 0x30d   :  { %v2312_v40 = vsel %vm2280_vm15, %v2264_v35, %v2296_v58  ;;  %v2313_v45 = vsel %vm2281_vm0, %v2265_v20, %v2297_v59  ;;  %v2314_v2 = vsel %vm2282_vm1, %v2266_v18, %v2298_v14  ;;  %v2315_v26 = vsel %vm2283_vm2, %v2267_v12, %v2299_v52  ;;  %v4354_v56 = vld [vmem:[#allocation16_spill] sm:$0xff]  ;;  %v4355_v35 = vld [vmem:[#allocation17_spill] sm:$0xff]  ;;  %v4356_v20 = vld [vmem:[#allocation18_spill] sm:$0xff] }
 0x30e   :  { %v2332_v42 = vcombine.low %v2300_v10, %v2301_v51  ;;  %v2333_v47 = vcombine.low %v2302_v4, %v2303_v54  ;;  %v2334_v15 = vcombine.low %v2304_v30, %v2305_v60  ;;  %v2335_v46 = vcombine.low %v2306_v25, %v2307_v33  ;;  %v4357_v18 = vld [vmem:[#allocation19_spill] sm:$0xff]  ;;  %v4358_v12 = vld [vmem:[#allocation26_spill] sm:$0xff] }
 0x30f   :  { %v2336_v38 = vcombine.low %v2308_v63, %v2309_v44  ;;  %v2337_v37 = vcombine.low %v2310_v9, %v2311_v43  ;;  %v2338_v48 = vcombine.low %v2312_v40, %v2313_v45  ;;  %v2339_v49 = vcombine.low %v2314_v2, %v2315_v26  ;;  %v4362_v8 = vld [vmem:[#allocation23_spill] sm:$0xff] }
 0x310   :  { %2605 = vst [vmem:[%s4246_s4 + $0x80] sm:$0xff] %v2332_v42  ;;  %2606 = vst [vmem:[%s4246_s4 + $0x88] sm:$0xff] %v2333_v47  ;;  %v2375_v7 = vadd.f32 %v4349_v6, %v3884_v36  ;;  %v2376_v61 = vadd.f32 %v4350_v55, %v3884_v36  ;;  %v2377_v32 = vadd.f32 %v4351_v5, %v3884_v36  ;;  %vm2389_vm3 = vcmp.ge.f32.partialorder %v4116_v22, 0.0 }
 0x311   :  { %2607 = vst [vmem:[%s4246_s4 + $0x90] sm:$0xff] %v2334_v15  ;;  %2608 = vst [vmem:[%s4246_s4 + $0x98] sm:$0xff] %v2335_v46  ;;  %v2378_v50 = vadd.f32 %v4352_v23, %v3884_v36  ;;  %v2379_v16 = vadd.f32 %v4353_v31, %v3884_v36  ;;  %v2380_v1 = vadd.f32 %v4354_v56, %v3884_v36  ;;  %vm2390_vm4 = vcmp.ge.f32.partialorder %v4120_v19, 0.0 }
 0x312   :  { %2609 = vst [vmem:[%s4246_s4 + $0xa0] sm:$0xff] %v2336_v38  ;;  %2610 = vst [vmem:[%s4246_s4 + $0xa8] sm:$0xff] %v2337_v37  ;;  %v2381_v53 = vadd.f32 %v4355_v35, %v3884_v36  ;;  %v2382_v34 = vadd.f32 %v4356_v20, %v3884_v36  ;;  %v2383_v62 = vadd.f32 %v4357_v18, %v3884_v36  ;;  %vm2391_vm5 = vcmp.ge.f32.partialorder %v2375_v7, 0.0 }
 0x313   :  { %2611 = vst [vmem:[%s4246_s4 + $0xb0] sm:$0xff] %v2338_v48  ;;  %2612 = vst [vmem:[%s4246_s4 + $0xb8] sm:$0xff] %v2339_v49  ;;  %v2384_v13 = vadd.f32 %v4358_v12, %v3884_v36  ;;  %v2385_v28 = vadd.f32 %v4359_v17, %v3884_v36  ;;  %v2386_v24 = vadd.f32 %v4360_v29, %v3884_v36  ;;  %vm2392_vm6 = vcmp.ge.f32.partialorder %v2376_v61, 0.0 }
 0x314   :  { %v2387_v21 = vadd.f32 %v4361_v57, %v3884_v36  ;;  %v2388_v0 = vadd.f32 %v4362_v8, %v3884_v36  ;;  %vm2393_vm7 = vcmp.ge.f32.partialorder %v2377_v32, 0.0  ;;  %vm2394_vm8 = vcmp.ge.f32.partialorder %v2378_v50, 0.0 }
 0x315   :  { %vm2395_vm9 = vcmp.ge.f32.partialorder %v2379_v16, 0.0  ;;  %vm2396_vm10 = vcmp.ge.f32.partialorder %v2380_v1, 0.0  ;;  %vm2397_vm11 = vcmp.ge.f32.partialorder %v2381_v53, 0.0  ;;  %vm2398_vm12 = vcmp.ge.f32.partialorder %v2382_v34, 0.0 }
 0x316   :  { %vm2399_vm13 = vcmp.ge.f32.partialorder %v2383_v62, 0.0  ;;  %vm2400_vm14 = vcmp.ge.f32.partialorder %v2384_v13, 0.0  ;;  %vm2401_vm15 = vcmp.ge.f32.partialorder %v2385_v28, 0.0  ;;  %vm2402_vm0 = vcmp.ge.f32.partialorder %v2386_v24, 0.0 }
 0x317   :  { %vm2403_vm1 = vcmp.ge.f32.partialorder %v2387_v21, 0.0  ;;  %vm2404_vm2 = vcmp.ge.f32.partialorder %v2388_v0, 0.0  ;;  %v2405_v36 = vmul.f32 0.2, %v4116_v22  ;;  %v2406_v39 = vmul.f32 0.2, %v4120_v19 }
 0x318   :  { %v2407_v3 = vmul.f32 0.2, %v2375_v7  ;;  %v2408_v10 = vmul.f32 0.2, %v2376_v61  ;;  %v2409_v11 = vmul.f32 0.2, %v2377_v32 }
 0x319   :  { %v2410_v41 = vmul.f32 0.2, %v2378_v50  ;;  %v2411_v27 = vmul.f32 0.2, %v2379_v16  ;;  %v2412_v51 = vmul.f32 0.2, %v2380_v1  ;;  %v2421_v59 = vsel %vm2389_vm3, %v4116_v22, %v2405_v36 }
 0x31a   :  { %v2413_v58 = vmul.f32 0.2, %v2381_v53  ;;  %v2414_v14 = vmul.f32 0.2, %v2382_v34  ;;  %v2415_v4 = vmul.f32 0.2, %v2383_v62  ;;  %v2422_v54 = vsel %vm2390_vm4, %v4120_v19, %v2406_v39 }
 0x31b   :  { %v2416_v52 = vmul.f32 0.2, %v2384_v13  ;;  %v2417_v30 = vmul.f32 0.2, %v2385_v28  ;;  %v2418_v60 = vmul.f32 0.2, %v2386_v24  ;;  %v2423_v33 = vsel %vm2391_vm5, %v2375_v7, %v2407_v3 }
 0x31c   :  { %v2419_v25 = vmul.f32 0.2, %v2387_v21  ;;  %v2420_v63 = vmul.f32 0.2, %v2388_v0  ;;  %v2424_v44 = vsel %vm2392_vm6, %v2376_v61, %v2408_v10  ;;  %v2425_v9 = vsel %vm2393_vm7, %v2377_v32, %v2409_v11 }
 0x31d   :  { %v2426_v43 = vsel %vm2394_vm8, %v2378_v50, %v2410_v41  ;;  %v2427_v22 = vsel %vm2395_vm9, %v2379_v16, %v2411_v27  ;;  %v2428_v40 = vsel %vm2396_vm10, %v2380_v1, %v2412_v51  ;;  %v2429_v45 = vsel %vm2397_vm11, %v2381_v53, %v2413_v58 }
 0x31e   :  { %v2430_v19 = vsel %vm2398_vm12, %v2382_v34, %v2414_v14  ;;  %v2431_v2 = vsel %vm2399_vm13, %v2383_v62, %v2415_v4  ;;  %v2432_v26 = vsel %vm2400_vm14, %v2384_v13, %v2416_v52  ;;  %v2433_v42 = vsel %vm2401_vm15, %v2385_v28, %v2417_v30 }
 0x31f   :  { %v2434_v47 = vsel %vm2402_vm0, %v2386_v24, %v2418_v60  ;;  %v2435_v15 = vsel %vm2403_vm1, %v2387_v21, %v2419_v25  ;;  %v2436_v46 = vsel %vm2404_vm2, %v2388_v0, %v2420_v63  ;;  %v2453_v38 = vcombine.low %v2421_v59, %v2422_v54 }
 0x320   :  { %v2454_v37 = vcombine.low %v2423_v33, %v2424_v44  ;;  %v2455_v48 = vcombine.low %v2425_v9, %v2426_v43  ;;  %v2456_v49 = vcombine.low %v2427_v22, %v2428_v40  ;;  %v2457_v6 = vcombine.low %v2429_v45, %v2430_v19 }
 0x321   :  { %v2458_v7 = vcombine.low %v2431_v2, %v2432_v26  ;;  %v2459_v55 = vcombine.low %v2433_v42, %v2434_v47  ;;  %v2460_v61 = vcombine.low %v2435_v15, %v2436_v46  ;;  %2613 = vst [vmem:[%s4246_s4 + $0xc0] sm:$0xff] %v2453_v38 }
 0x322   :  { %2614 = vst [vmem:[%s4246_s4 + $0xc8] sm:$0xff] %v2454_v37  ;;  %2615 = vst [vmem:[%s4246_s4 + $0xd0] sm:$0xff] %v2455_v48 }
 0x323   :  { %2616 = vst [vmem:[%s4246_s4 + $0xd8] sm:$0xff] %v2456_v49  ;;  %2617 = vst [vmem:[%s4246_s4 + $0xe0] sm:$0xff] %v2457_v6 }
 0x324   :  { %2618 = vst [vmem:[%s4246_s4 + $0xe8] sm:$0xff] %v2458_v7  ;;  %2619 = vst [vmem:[%s4246_s4 + $0xf0] sm:$0xff] %v2459_v55 }
 0x325   :  { %2620 = vst [vmem:[%s4246_s4 + $0xf8] sm:$0xff] %v2460_v61 }

// kernel: generator_dc_forward.11
= control target key start
LH: loop header
LB: loop body
LE: loop exit
PB: predicated region body
PF: predicated region fallthrough
CT: control target
= control target key end

     0   :  { %s2597_s9 = smov 0   ;;  %s2599_s10 = smov 0   ;;  %s3301_s0 = inlined_call_operand.vmem [shape: bf16[4,3,36], index: 0, kind: input, shape index: {}]   ;;  %s3302_s1 = inlined_call_operand.vmem [shape: bf16[36,8192], index: 1, kind: input, shape index: {}]   ;;  %s3303_s2 = inlined_call_operand.vmem [shape: f32[4,3,8192], index: 2, kind: output, shape index: {}]  }
   0x1   :  { %s2601_s11 = smov 0  }
   0x2 LB: > { %s2232_s12 = sadd.s32 4294967295, %s2579_s11   ;;  %s2614_s13 = sadd.s32 1, %s2579_s11   ;;  %s2579_s11 = sphi %s2601_s11, %s3307_s11   ;;  %s2575_s10 = sphi %s2599_s10, %s3306_s10   ;;  %s2571_s9 = sphi %s2597_s9, %s3305_s9  }
   0x3   : > { %s37_s14 = ssub.s32 %s2579_s11, %s2614_s13  ;;  %s40_s15 = sadd.s32 1, %s2575_s10 }
   0x4   : > { %p38_p0 = scmp.eq.s32.totalorder %s37_s14, 0  ;;  %p47_p1 = scmp.ne.s32.totalorder %s2575_s10, %s2571_s9 }
   0x5   : > { %p48_p2 = scmp.eq.s32.totalorder %s2579_s11, 0  ;;  %p77_p3 = scmp.eq.s32.totalorder %s2232_s12, 3 }
   0x6   : > { %s2625_s16 = scalar_select %p38_p0, %s2575_s10, %s40_s15  }
   0x7   : > { %p49_p4 = por %p48_p2, %p47_p1  ;;  %p2627_p5 = por %p77_p3, %p47_p1 }
   0x8   : > { %p2235_p6 = scmp.ge.s32.totalorder %s2579_s11, 4 }
   0xa   : > { %102 = sbr.rel (%p2235_p6) target bundleno = 42 (0x2a), region = 20 }
  0x11   : > { %105 = sbr.rel (!%p49_p4) target bundleno = 42 (0x2a), region = 24  ;;  %s107_s18 = sand.u32 (%p49_p4), 1, %s2575_s10  }
  0x12   : > { %s2384_s19 = sshll.u32 (%p49_p4), %s2579_s11, 6  ;;  %s2386_s20 = smul.u32 (%p49_p4), 320, %s107_s18 }
  0x13   : > { %s2637_s23 = scalar_lea.vmem (%p49_p4), %s3302_s1, %s2384_s19 }
  0x14   : > { %v125_v0 = vld [vmem:[%s2637_s23] sm:$0xff] (%p49_p4)  ;;  %v127_v1 = vld [vmem:[%s2637_s23 + $0x8] sm:$0xff] (%p49_p4)  ;;  %v129_v2 = vld [vmem:[%s2637_s23 + $0x10] sm:$0xff] (%p49_p4)  ;;  %s2645_s24 = scalar_lea.vmem (%p49_p4), [#allocation2], %s2386_s20 }
  0x15   : > { %v131_v3 = vld [vmem:[%s2637_s23 + $0x18] sm:$0xff] (%p49_p4)  ;;  %v133_v4 = vld [vmem:[%s2637_s23 + $0x20] sm:$0xff] (%p49_p4)  ;;  %v135_v5 = vld [vmem:[%s2637_s23 + $0x28] sm:$0xff] (%p49_p4)  ;;  %126 = vst [vmem:[%s2645_s24] sm:$0xff] (%p49_p4), %v125_v0 }
  0x16   : > { %128 = vst [vmem:[%s2645_s24 + $0x8] sm:$0xff] (%p49_p4), %v127_v1  ;;  %130 = vst [vmem:[%s2645_s24 + $0x10] sm:$0xff] (%p49_p4), %v129_v2  ;;  %v137_v6 = vld [vmem:[%s2637_s23 + $0x30] sm:$0xff] (%p49_p4)  ;;  %v139_v7 = vld [vmem:[%s2637_s23 + $0x38] sm:$0xff] (%p49_p4) }
  0x17   : > { %132 = vst [vmem:[%s2645_s24 + $0x18] sm:$0xff] (%p49_p4), %v131_v3  ;;  %134 = vst [vmem:[%s2645_s24 + $0x20] sm:$0xff] (%p49_p4), %v133_v4  ;;  %v141_v8 = vld [vmem:[%s2637_s23 + $0x100] sm:$0xff] (%p49_p4)  ;;  %v143_v9 = vld [vmem:[%s2637_s23 + $0x108] sm:$0xff] (%p49_p4) }
  0x18   : > { %136 = vst [vmem:[%s2645_s24 + $0x28] sm:$0xff] %v135_v5  ;;  %138 = vst [vmem:[%s2645_s24 + $0x30] sm:$0xff] %v137_v6  ;;  %v145_v10 = vld [vmem:[%s2637_s23 + $0x110] sm:$0xff]  ;;  %v147_v11 = vld [vmem:[%s2637_s23 + $0x118] sm:$0xff] }
  0x19   : > { %140 = vst [vmem:[%s2645_s24 + $0x38] sm:$0xff] %v139_v7  ;;  %142 = vst [vmem:[%s2645_s24 + $0x40] sm:$0xff] %v141_v8  ;;  %v149_v12 = vld [vmem:[%s2637_s23 + $0x120] sm:$0xff]  ;;  %v151_v13 = vld [vmem:[%s2637_s23 + $0x128] sm:$0xff] }
  0x1a   : > { %144 = vst [vmem:[%s2645_s24 + $0x48] sm:$0xff] %v143_v9  ;;  %146 = vst [vmem:[%s2645_s24 + $0x50] sm:$0xff] %v145_v10  ;;  %v153_v14 = vld [vmem:[%s2637_s23 + $0x130] sm:$0xff]  ;;  %v155_v15 = vld [vmem:[%s2637_s23 + $0x138] sm:$0xff] }
  0x1b   : > { %148 = vst [vmem:[%s2645_s24 + $0x58] sm:$0xff] %v147_v11  ;;  %150 = vst [vmem:[%s2645_s24 + $0x60] sm:$0xff] %v149_v12  ;;  %v157_v16 = vld [vmem:[%s2637_s23 + $0x200] sm:$0xff]  ;;  %v159_v17 = vld [vmem:[%s2637_s23 + $0x208] sm:$0xff] }
  0x1c   : > { %152 = vst [vmem:[%s2645_s24 + $0x68] sm:$0xff] %v151_v13  ;;  %154 = vst [vmem:[%s2645_s24 + $0x70] sm:$0xff] %v153_v14  ;;  %v161_v18 = vld [vmem:[%s2637_s23 + $0x210] sm:$0xff]  ;;  %v163_v19 = vld [vmem:[%s2637_s23 + $0x218] sm:$0xff] }
  0x1d   : > { %156 = vst [vmem:[%s2645_s24 + $0x78] sm:$0xff] %v155_v15  ;;  %158 = vst [vmem:[%s2645_s24 + $0x80] sm:$0xff] %v157_v16  ;;  %v165_v20 = vld [vmem:[%s2637_s23 + $0x220] sm:$0xff]  ;;  %v167_v21 = vld [vmem:[%s2637_s23 + $0x228] sm:$0xff] }
  0x1e   : > { %160 = vst [vmem:[%s2645_s24 + $0x88] sm:$0xff] %v159_v17  ;;  %162 = vst [vmem:[%s2645_s24 + $0x90] sm:$0xff] %v161_v18  ;;  %v169_v22 = vld [vmem:[%s2637_s23 + $0x230] sm:$0xff]  ;;  %v171_v23 = vld [vmem:[%s2637_s23 + $0x238] sm:$0xff] }
  0x1f   : > { %164 = vst [vmem:[%s2645_s24 + $0x98] sm:$0xff] %v163_v19  ;;  %166 = vst [vmem:[%s2645_s24 + $0xa0] sm:$0xff] %v165_v20  ;;  %v173_v24 = vld [vmem:[%s2637_s23 + $0x300] sm:$0xff]  ;;  %v175_v25 = vld [vmem:[%s2637_s23 + $0x308] sm:$0xff] }
  0x20   : > { %168 = vst [vmem:[%s2645_s24 + $0xa8] sm:$0xff] %v167_v21  ;;  %170 = vst [vmem:[%s2645_s24 + $0xb0] sm:$0xff] %v169_v22  ;;  %v177_v26 = vld [vmem:[%s2637_s23 + $0x310] sm:$0xff]  ;;  %v179_v27 = vld [vmem:[%s2637_s23 + $0x318] sm:$0xff] }
  0x21   : > { %172 = vst [vmem:[%s2645_s24 + $0xb8] sm:$0xff] %v171_v23  ;;  %174 = vst [vmem:[%s2645_s24 + $0xc0] sm:$0xff] %v173_v24  ;;  %v181_v28 = vld [vmem:[%s2637_s23 + $0x320] sm:$0xff]  ;;  %v183_v29 = vld [vmem:[%s2637_s23 + $0x328] sm:$0xff] }
  0x22   : > { %176 = vst [vmem:[%s2645_s24 + $0xc8] sm:$0xff] %v175_v25  ;;  %178 = vst [vmem:[%s2645_s24 + $0xd0] sm:$0xff] %v177_v26  ;;  %v185_v30 = vld [vmem:[%s2637_s23 + $0x330] sm:$0xff]  ;;  %v187_v31 = vld [vmem:[%s2637_s23 + $0x338] sm:$0xff] }
  0x23   : > { %180 = vst [vmem:[%s2645_s24 + $0xd8] sm:$0xff] %v179_v27  ;;  %182 = vst [vmem:[%s2645_s24 + $0xe0] sm:$0xff] %v181_v28  ;;  %v189_v32 = vld [vmem:[%s2637_s23 + $0x400] sm:$0xff]  ;;  %v191_v33 = vld [vmem:[%s2637_s23 + $0x408] sm:$0xff] }
  0x24   : > { %184 = vst [vmem:[%s2645_s24 + $0xe8] sm:$0xff] %v183_v29  ;;  %186 = vst [vmem:[%s2645_s24 + $0xf0] sm:$0xff] %v185_v30  ;;  %v193_v34 = vld [vmem:[%s2637_s23 + $0x410] sm:$0xff]  ;;  %v195_v35 = vld [vmem:[%s2637_s23 + $0x418] sm:$0xff] }
  0x25   : > { %188 = vst [vmem:[%s2645_s24 + $0xf8] sm:$0xff] %v187_v31  ;;  %190 = vst [vmem:[%s2645_s24 + $0x100] sm:$0xff] %v189_v32  ;;  %v197_v36 = vld [vmem:[%s2637_s23 + $0x420] sm:$0xff]  ;;  %v199_v37 = vld [vmem:[%s2637_s23 + $0x428] sm:$0xff] }
  0x26   : > { %192 = vst [vmem:[%s2645_s24 + $0x108] sm:$0xff] %v191_v33  ;;  %194 = vst [vmem:[%s2645_s24 + $0x110] sm:$0xff] %v193_v34  ;;  %v201_v38 = vld [vmem:[%s2637_s23 + $0x430] sm:$0xff]  ;;  %v203_v39 = vld [vmem:[%s2637_s23 + $0x438] sm:$0xff] }
  0x27   : > { %196 = vst [vmem:[%s2645_s24 + $0x118] sm:$0xff] %v195_v35  ;;  %198 = vst [vmem:[%s2645_s24 + $0x120] sm:$0xff] %v197_v36 }
  0x28   : > { %200 = vst [vmem:[%s2645_s24 + $0x128] sm:$0xff] %v199_v37  ;;  %202 = vst [vmem:[%s2645_s24 + $0x130] sm:$0xff] %v201_v38 }
  0x29   : > { %204 = vst [vmem:[%s2645_s24 + $0x138] sm:$0xff] %v203_v39 }
  0x2a PF: > { %p2238_p7 = scmp.ge.s32.totalorder %s2579_s11, 1  ;;  %p209_p8 = scmp.lt.s32.totalorder %s2579_s11, 5 }
  0x2c   : > { %p210_p9 = pnand %p2238_p7, %p209_p8 }
  0x2d   : > { %s216_s25 = sand.u32 (!%p210_p9), 1, %s2571_s9   ;;  %v2581_v40 = vmov (!%p210_p9), 0   ;;  %vm484_vm0 = vcmask (!%p210_p9), 1041408   ;;  %v2794_v11 = vld [vmem:[%s3301_s0] sm:$0x3] (!%p210_p9)  ;;  %vm480_vm1 = vcmask (!%p210_p9), 293888  }
  0x2e   : > { %213 = sbr.rel (%p210_p9) target bundleno = 483 (0x1e3), region = 47  ;;  %565 = vmatprep.mubr.bf16.mxu0 (!%p210_p9), %v2581_v40  ;;  %606 = vmatprep.mubr.bf16.mxu1 (!%p210_p9), %v2581_v40  ;;  %s2239_s8 = sshll.u32 (!%p210_p9), %s216_s25, 8 }
  0x2f   : > { %s2387_s26 = smul.u32 (!%p210_p9), 320, %s216_s25  ;;  %s3184_s14 = scalar_lea.vmem (!%p210_p9), [#allocation3], %s2239_s8 }
  0x31   : > { %s2728_s27 = scalar_lea.vmem (!%p210_p9), [#allocation2], %s2387_s26 }
  0x32   : > { %v239_v41 = vld [vmem:[%s2728_s27] sm:$0xff] (!%p210_p9)  ;;  %v240_v43 = vld [vmem:[%s2728_s27 + $0x8] sm:$0xff] (!%p210_p9)  ;;  %v241_v63 = vld [vmem:[%s2728_s27 + $0x10] sm:$0xff] (!%p210_p9) }
  0x33   : > { %v247_v42 = vld [vmem:[%s2728_s27 + $0x40] sm:$0xff] (!%p210_p9)  ;;  %v248_v45 = vld [vmem:[%s2728_s27 + $0x48] sm:$0xff] (!%p210_p9)  ;;  %v249_v0 = vld [vmem:[%s2728_s27 + $0x50] sm:$0xff] (!%p210_p9) }
  0x34   : > { %v2733_v44 = vcombine.high (!%p210_p9), %v239_v41, %v247_v42  ;;  %v2736_v46 = vcombine.low (!%p210_p9), %v239_v41, %v247_v42  ;;  %v255_v47 = vld [vmem:[%s2728_s27 + $0x80] sm:$0xff] (!%p210_p9)  ;;  %v2740_v49 = vcombine.high (!%p210_p9), %v240_v43, %v248_v45  ;;  %v2742_v50 = vcombine.low (!%p210_p9), %v240_v43, %v248_v45  ;;  %v256_v52 = vld [vmem:[%s2728_s27 + $0x88] sm:$0xff] (!%p210_p9)  ;;  %v242_v1 = vld [vmem:[%s2728_s27 + $0x18] sm:$0xff] (!%p210_p9) }
  0x35   : > { %v263_v48 = vld [vmem:[%s2728_s27 + $0xc0] sm:$0xff]  ;;  %v264_v53 = vld [vmem:[%s2728_s27 + $0xc8] sm:$0xff]  ;;  %v250_v2 = vld [vmem:[%s2728_s27 + $0x58] sm:$0xff]  ;;  %v2777_v4 = vcombine.high %v241_v63, %v249_v0  ;;  %v2796_v12 = vcombine.low %v241_v63, %v249_v0  ;;  %s2385_s9 = sshll.u32 (%p2627_p5), %s2232_s12, 6 }
  0x36   : > { %v2744_v51 = vcombine.high %v255_v47, %v263_v48  ;;  %v271_v54 = vld [vmem:[%s2728_s27 + $0x100] sm:$0x33]  ;;  %533 = vmatprep.subr.bf16.mxu0 %v2733_v44  ;;  %v2750_v55 = vcombine.high %v256_v52, %v264_v53  ;;  %v272_v56 = vld [vmem:[%s2728_s27 + $0x108] sm:$0x33]  ;;  %574 = vmatprep.subr.bf16.mxu1 %v2740_v49  ;;  %v2755_v57 = vcombine.low %v255_v47, %v263_v48  ;;  %v257_v7 = vld [vmem:[%s2728_s27 + $0x90] sm:$0xff]  ;;  %s3228_s17 = scalar_lea.vmem (%p2627_p5), %s3303_s2, %s2385_s9 }
  0x37   : > { %534 = vmatpush1.bf16.msra.mxu0 %v2736_v46  ;;  %575 = vmatpush1.bf16.msra.mxu1 %v2742_v50  ;;  %v2759_v58 = vcombine.low %v256_v52, %v264_v53  ;;  %v2761_v59 = vcombine.high %v271_v54, %v271_v54  ;;  %v2272_v60 = vcombine.low %v271_v54, %v271_v54  ;;  %v265_v8 = vld [vmem:[%s2728_s27 + $0xd0] sm:$0xff]  ;;  %v258_v9 = vld [vmem:[%s2728_s27 + $0x98] sm:$0xff]  ;;  %v243_v24 = vld [vmem:[%s2728_s27 + $0x20] sm:$0xff] }
  0x38   : > { %535 = vmatprep.subr.bf16.mxu0 %v2744_v51  ;;  %576 = vmatprep.subr.bf16.mxu1 %v2750_v55  ;;  %v2764_v61 = vcombine.high %v272_v56, %v272_v56  ;;  %v2274_v62 = vcombine.low %v272_v56, %v272_v56  ;;  %v2784_v6 = vcombine.high %v242_v1, %v250_v2  ;;  %v266_v10 = vld [vmem:[%s2728_s27 + $0xd8] sm:$0xff]  ;;  %v273_v16 = vld [vmem:[%s2728_s27 + $0x110] sm:$0x33]  ;;  %v251_v25 = vld [vmem:[%s2728_s27 + $0x60] sm:$0xff] }
  0x39   : > { %v2775_v3 = vsel %vm484_vm0, %v2272_v60, 0  ;;  %v2800_v13 = vcombine.low %v242_v1, %v250_v2  ;;  %v2802_v14 = vcombine.high %v257_v7, %v265_v8  ;;  %v2805_v15 = vcombine.high %v258_v9, %v266_v10  ;;  %v274_v17 = vld [vmem:[%s2728_s27 + $0x118] sm:$0x33]  ;;  %v244_v26 = vld [vmem:[%s2728_s27 + $0x28] sm:$0xff]  ;;  %v259_v32 = vld [vmem:[%s2728_s27 + $0xa0] sm:$0xff] }
  0x3a   : > { %v2782_v5 = vsel %vm484_vm0, %v2274_v62, 0  ;;  %v2814_v18 = vcombine.low %v257_v7, %v265_v8  ;;  %v2818_v19 = vcombine.low %v258_v9, %v266_v10  ;;  %v2820_v20 = vcombine.high %v273_v16, %v273_v16  ;;  %v252_v27 = vld [vmem:[%s2728_s27 + $0x68] sm:$0xff]  ;;  %v267_v33 = vld [vmem:[%s2728_s27 + $0xe0] sm:$0xff]  ;;  %v245_v54 = vld [vmem:[%s2728_s27 + $0x30] sm:$0xff] }
  0x3b   : > { %536 = vmatpush1.bf16.msra.mxu0 %v2755_v57  ;;  %577 = vmatpush1.bf16.msra.mxu1 %v2759_v58  ;;  %v2276_v21 = vcombine.low %v273_v16, %v273_v16  ;;  %v2823_v22 = vcombine.high %v274_v17, %v274_v17  ;;  %v2278_v23 = vcombine.low %v274_v17, %v274_v17  ;;  %v260_v34 = vld [vmem:[%s2728_s27 + $0xa8] sm:$0xff]  ;;  %v275_v41 = vld [vmem:[%s2728_s27 + $0x120] sm:$0x33]  ;;  %v253_v56 = vld [vmem:[%s2728_s27 + $0x70] sm:$0xff] }
  0x3c   : > { %2288 = vmatprep.subr.msk.bf16.mxu0 %vm484_vm0, %v2761_v59  ;;  %2290 = vmatprep.subr.msk.bf16.mxu1 %vm484_vm0, %v2764_v61  ;;  %v2838_v29 = vcombine.high %v243_v24, %v251_v25  ;;  %v2845_v31 = vcombine.high %v244_v26, %v252_v27  ;;  %v268_v35 = vld [vmem:[%s2728_s27 + $0xe8] sm:$0xff]  ;;  %v2852_v36 = vcombine.low %v243_v24, %v251_v25  ;;  %v246_v60 = vld [vmem:[%s2728_s27 + $0x38] sm:$0xff]  ;;  %v261_v7 = vld [vmem:[%s2728_s27 + $0xb0] sm:$0xff] }
  0x3d   : > { %v2836_v28 = vsel %vm484_vm0, %v2276_v21, 0  ;;  %v2843_v30 = vsel %vm484_vm0, %v2278_v23, 0  ;;  %v2856_v37 = vcombine.low %v244_v26, %v252_v27  ;;  %v2858_v38 = vcombine.high %v259_v32, %v267_v33  ;;  %v276_v42 = vld [vmem:[%s2728_s27 + $0x128] sm:$0x33]  ;;  %v254_v62 = vld [vmem:[%s2728_s27 + $0x78] sm:$0xff]  ;;  %v269_v8 = vld [vmem:[%s2728_s27 + $0xf0] sm:$0xff] }
  0x3e   : > { %v2861_v39 = vcombine.high %v260_v34, %v268_v35  ;;  %v2870_v43 = vcombine.low %v259_v32, %v267_v33  ;;  %v2874_v45 = vcombine.low %v260_v34, %v268_v35  ;;  %v2876_v47 = vcombine.high %v275_v41, %v275_v41  ;;  %v262_v9 = vld [vmem:[%s2728_s27 + $0xb8] sm:$0xff]  ;;  %v277_v24 = vld [vmem:[%s2728_s27 + $0x130] sm:$0x33] }
  0x3f   : > { %538 = vmatpush1.bf16.msra.mxu0 %v2775_v3  ;;  %579 = vmatpush1.bf16.msra.mxu1 %v2782_v5  ;;  %v2280_v48 = vcombine.low %v275_v41, %v275_v41  ;;  %v2879_v52 = vcombine.high %v276_v42, %v276_v42  ;;  %v2282_v53 = vcombine.low %v276_v42, %v276_v42  ;;  %v270_v10 = vld [vmem:[%s2728_s27 + $0xf8] sm:$0xff] }
  0x40   : > { %615 = vmatprep.subr.bf16.mxu0 %v2777_v4  ;;  %656 = vmatprep.subr.bf16.mxu1 %v2784_v6  ;;  %v2894_v0 = vcombine.high %v245_v54, %v253_v56  ;;  %v2901_v2 = vcombine.high %v246_v60, %v254_v62  ;;  %v2908_v16 = vcombine.low %v245_v54, %v253_v56  ;;  %v278_v25 = vld [vmem:[%s2728_s27 + $0x138] sm:$0x33] }
  0x41   : > { %v2892_v63 = vsel %vm484_vm0, %v2280_v48, 0  ;;  %v2899_v1 = vsel %vm484_vm0, %v2282_v53, 0  ;;  %v2912_v17 = vcombine.low %v246_v60, %v254_v62  ;;  %v2914_v21 = vcombine.high %v261_v7, %v269_v8  ;;  %v2329_v48 = vld [vmem:[%s3301_s0 + $0x4] sm:$0x3] }
  0x42   : > { %2289 = vmatmul.mubr.msk.bf16.vlgmr.msra.gmra.mrb[0].mxu0 %vm480_vm1, %v2794_v11  ;;  %2291 = vmatmul.mubr.msk.bf16.vlgmr.msra.gmra.mrb[0].mxu1 %vm480_vm1, %v2794_v11  ;;  %v2917_v23 = vcombine.high %v262_v9, %v270_v10  ;;  %v2926_v26 = vcombine.low %v261_v7, %v269_v8  ;;  %v2930_v27 = vcombine.low %v262_v9, %v270_v10 }
  0x43   : > { %616 = vmatpush1.bf16.msra.mxu0 %v2796_v12  ;;  %657 = vmatpush1.bf16.msra.mxu1 %v2800_v13  ;;  %v2932_v32 = vcombine.high %v277_v24, %v277_v24  ;;  %v2284_v33 = vcombine.low %v277_v24, %v277_v24  ;;  %v2935_v34 = vcombine.high %v278_v25, %v278_v25 }
  0x44   : > { %617 = vmatprep.subr.bf16.mxu0 %v2802_v14  ;;  %658 = vmatprep.subr.bf16.mxu1 %v2805_v15  ;;  %v2286_v35 = vcombine.low %v278_v25, %v278_v25 }
  0x45   : > { %647 = vmatprep.mubr.bf16.mxu0 %v2581_v40  ;;  %688 = vmatprep.mubr.bf16.mxu1 %v2581_v40  ;;  %v2944_v41 = vsel %vm484_vm0, %v2284_v33, 0 }
  0x46   : > { %v2949_v42 = vsel %vm484_vm0, %v2286_v35, 0 }
  0x47   : > { %618 = vmatpush1.bf16.msra.mxu0 %v2814_v18  ;;  %659 = vmatpush1.bf16.msra.mxu1 %v2818_v19 }
  0x48   : > { %2292 = vmatprep.subr.msk.bf16.mxu0 %vm484_vm0, %v2820_v20  ;;  %2294 = vmatprep.subr.msk.bf16.mxu1 %vm484_vm0, %v2823_v22 }
  0x4b   : > { %620 = vmatpush1.bf16.msra.mxu0 %v2836_v28  ;;  %661 = vmatpush1.bf16.msra.mxu1 %v2843_v30 }
  0x4c   : > { %697 = vmatprep.subr.bf16.mxu0 %v2838_v29  ;;  %738 = vmatprep.subr.bf16.mxu1 %v2845_v31 }
  0x4e   : > { %2293 = vmatmul.mubr.msk.bf16.vlgmr.msra.gmra.mrb[4].mxu0 %vm480_vm1, %v2794_v11  ;;  %2295 = vmatmul.mubr.msk.bf16.vlgmr.msra.gmra.mrb[4].mxu1 %vm480_vm1, %v2794_v11 }
  0x4f   : > { %698 = vmatpush1.bf16.msra.mxu0 %v2852_v36  ;;  %739 = vmatpush1.bf16.msra.mxu1 %v2856_v37 }
  0x50   : > { %699 = vmatprep.subr.bf16.mxu0 %v2858_v38  ;;  %740 = vmatprep.subr.bf16.mxu1 %v2861_v39 }
  0x51   : > { %729 = vmatprep.mubr.bf16.mxu0 %v2581_v40  ;;  %770 = vmatprep.mubr.bf16.mxu1 %v2581_v40 }
  0x53   : > { %700 = vmatpush1.bf16.msra.mxu0 %v2870_v43  ;;  %741 = vmatpush1.bf16.msra.mxu1 %v2874_v45 }
  0x54   : > { %2296 = vmatprep.subr.msk.bf16.mxu0 %vm484_vm0, %v2876_v47  ;;  %2298 = vmatprep.subr.msk.bf16.mxu1 %vm484_vm0, %v2879_v52 }
  0x57   : > { %702 = vmatpush1.bf16.msra.mxu0 %v2892_v63  ;;  %743 = vmatpush1.bf16.msra.mxu1 %v2899_v1 }
  0x58   : > { %779 = vmatprep.subr.bf16.mxu0 %v2894_v0  ;;  %820 = vmatprep.subr.bf16.mxu1 %v2901_v2 }
  0x5a   : > { %2297 = vmatmul.mubr.msk.bf16.vlgmr.msra.gmra.mrb[8].mxu0 %vm480_vm1, %v2794_v11  ;;  %2299 = vmatmul.mubr.msk.bf16.vlgmr.msra.gmra.mrb[8].mxu1 %vm480_vm1, %v2794_v11 }
  0x5b   : > { %780 = vmatpush1.bf16.msra.mxu0 %v2908_v16  ;;  %821 = vmatpush1.bf16.msra.mxu1 %v2912_v17 }
  0x5c   : > { %781 = vmatprep.subr.bf16.mxu0 %v2914_v21  ;;  %822 = vmatprep.subr.bf16.mxu1 %v2917_v23 }
  0x5d   : > { %811 = vmatprep.mubr.bf16.mxu0 %v2581_v40  ;;  %852 = vmatprep.mubr.bf16.mxu1 %v2581_v40 }
  0x5f   : > { %782 = vmatpush1.bf16.msra.mxu0 %v2926_v26  ;;  %823 = vmatpush1.bf16.msra.mxu1 %v2930_v27 }
  0x60   : > { %2300 = vmatprep.subr.msk.bf16.mxu0 %vm484_vm0, %v2932_v32  ;;  %2302 = vmatprep.subr.msk.bf16.mxu1 %vm484_vm0, %v2935_v34 }
  0x63   : > { %784 = vmatpush1.bf16.msra.mxu0 %v2944_v41  ;;  %825 = vmatpush1.bf16.msra.mxu1 %v2949_v42 }
  0x64   : > { %922 = vmatprep.subr.bf16.mxu0 %v2733_v44  ;;  %963 = vmatprep.subr.bf16.mxu1 %v2740_v49 }
  0x66   : > { %2301 = vmatmul.mubr.msk.bf16.vlgmr.msra.gmra.mrb[12].mxu0 %vm480_vm1, %v2794_v11  ;;  %2303 = vmatmul.mubr.msk.bf16.vlgmr.msra.gmra.mrb[12].mxu1 %vm480_vm1, %v2794_v11  ;;  %v2304_v11 = vld [vmem:[%s3301_s0 + $0x2] sm:$0x3] }
  0x67   : > { %923 = vmatpush1.bf16.msra.mxu0 %v2736_v46  ;;  %964 = vmatpush1.bf16.msra.mxu1 %v2742_v50 }
  0x68   : > { %924 = vmatprep.subr.bf16.mxu0 %v2744_v51  ;;  %965 = vmatprep.subr.bf16.mxu1 %v2750_v55 }
  0x69   : > { %954 = vmatprep.mubr.bf16.mxu0 %v2581_v40  ;;  %995 = vmatprep.mubr.bf16.mxu1 %v2581_v40 }
  0x6b   : > { %925 = vmatpush1.bf16.msra.mxu0 %v2755_v57  ;;  %966 = vmatpush1.bf16.msra.mxu1 %v2759_v58 }
  0x6c   : > { %2305 = vmatprep.subr.msk.bf16.mxu0 %vm484_vm0, %v2761_v59  ;;  %2307 = vmatprep.subr.msk.bf16.mxu1 %vm484_vm0, %v2764_v61 }
  0x6f   : > { %927 = vmatpush1.bf16.msra.mxu0 %v2775_v3  ;;  %968 = vmatpush1.bf16.msra.mxu1 %v2782_v5 }
  0x70   : > { %1004 = vmatprep.subr.bf16.mxu0 %v2777_v4  ;;  %1045 = vmatprep.subr.bf16.mxu1 %v2784_v6 }
  0x72   : > { %2306 = vmatmul.mubr.msk.bf16.vlgmr.msra.gmra.mrb[16].mxu0 %vm480_vm1, %v2304_v11  ;;  %2308 = vmatmul.mubr.msk.bf16.vlgmr.msra.gmra.mrb[16].mxu1 %vm480_vm1, %v2304_v11 }
  0x73   : > { %1005 = vmatpush1.bf16.msra.mxu0 %v2796_v12  ;;  %1046 = vmatpush1.bf16.msra.mxu1 %v2800_v13 }
  0x74   : > { %1006 = vmatprep.subr.bf16.mxu0 %v2802_v14  ;;  %1047 = vmatprep.subr.bf16.mxu1 %v2805_v15 }
  0x75   : > { %1036 = vmatprep.mubr.bf16.mxu0 %v2581_v40  ;;  %1077 = vmatprep.mubr.bf16.mxu1 %v2581_v40 }
  0x77   : > { %1007 = vmatpush1.bf16.msra.mxu0 %v2814_v18  ;;  %1048 = vmatpush1.bf16.msra.mxu1 %v2818_v19 }
  0x78   : > { %2309 = vmatprep.subr.msk.bf16.mxu0 %vm484_vm0, %v2820_v20  ;;  %2311 = vmatprep.subr.msk.bf16.mxu1 %vm484_vm0, %v2823_v22 }
  0x7b   : > { %1009 = vmatpush1.bf16.msra.mxu0 %v2836_v28  ;;  %1050 = vmatpush1.bf16.msra.mxu1 %v2843_v30 }
  0x7c   : > { %1086 = vmatprep.subr.bf16.mxu0 %v2838_v29  ;;  %1127 = vmatprep.subr.bf16.mxu1 %v2845_v31 }
  0x7e   : > { %2310 = vmatmul.mubr.msk.bf16.vlgmr.msra.gmra.mrb[20].mxu0 %vm480_vm1, %v2304_v11  ;;  %2312 = vmatmul.mubr.msk.bf16.vlgmr.msra.gmra.mrb[20].mxu1 %vm480_vm1, %v2304_v11 }
  0x7f   : > { %1087 = vmatpush1.bf16.msra.mxu0 %v2852_v36  ;;  %1128 = vmatpush1.bf16.msra.mxu1 %v2856_v37 }
  0x80   : > { %1088 = vmatprep.subr.bf16.mxu0 %v2858_v38  ;;  %1129 = vmatprep.subr.bf16.mxu1 %v2861_v39 }
  0x81   : > { %1118 = vmatprep.mubr.bf16.mxu0 %v2581_v40  ;;  %1159 = vmatprep.mubr.bf16.mxu1 %v2581_v40 }
  0x83   : > { %1089 = vmatpush1.bf16.msra.mxu0 %v2870_v43  ;;  %1130 = vmatpush1.bf16.msra.mxu1 %v2874_v45 }
  0x84   : > { %2313 = vmatprep.subr.msk.bf16.mxu0 %vm484_vm0, %v2876_v47  ;;  %2315 = vmatprep.subr.msk.bf16.mxu1 %vm484_vm0, %v2879_v52 }
  0x87   : > { %1091 = vmatpush1.bf16.msra.mxu0 %v2892_v63  ;;  %1132 = vmatpush1.bf16.msra.mxu1 %v2899_v1 }
  0x88   : > { %1168 = vmatprep.subr.bf16.mxu0 %v2894_v0  ;;  %1209 = vmatprep.subr.bf16.mxu1 %v2901_v2 }
  0x8a   : > { %2314 = vmatmul.mubr.msk.bf16.vlgmr.msra.gmra.mrb[24].mxu0 %vm480_vm1, %v2304_v11  ;;  %2316 = vmatmul.mubr.msk.bf16.vlgmr.msra.gmra.mrb[24].mxu1 %vm480_vm1, %v2304_v11 }
  0x8b   : > { %1169 = vmatpush1.bf16.msra.mxu0 %v2908_v16  ;;  %1210 = vmatpush1.bf16.msra.mxu1 %v2912_v17 }
  0x8c   : > { %1170 = vmatprep.subr.bf16.mxu0 %v2914_v21  ;;  %1211 = vmatprep.subr.bf16.mxu1 %v2917_v23 }
  0x8d   : > { %1200 = vmatprep.mubr.bf16.mxu0 %v2581_v40  ;;  %1241 = vmatprep.mubr.bf16.mxu1 %v2581_v40 }
  0x8f   : > { %1171 = vmatpush1.bf16.msra.mxu0 %v2926_v26  ;;  %1212 = vmatpush1.bf16.msra.mxu1 %v2930_v27 }
  0x90   : > { %2317 = vmatprep.subr.msk.bf16.mxu0 %vm484_vm0, %v2932_v32  ;;  %2319 = vmatprep.subr.msk.bf16.mxu1 %vm484_vm0, %v2935_v34 }
  0x93   : > { %1173 = vmatpush1.bf16.msra.mxu0 %v2944_v41  ;;  %1214 = vmatpush1.bf16.msra.mxu1 %v2949_v42 }
  0x94   : > { %1312 = vmatprep.subr.bf16.mxu0 %v2733_v44  ;;  %1353 = vmatprep.subr.bf16.mxu1 %v2740_v49 }
  0x96   : > { %2318 = vmatmul.mubr.msk.bf16.vlgmr.msra.gmra.mrb[28].mxu0 %vm480_vm1, %v2304_v11  ;;  %2320 = vmatmul.mubr.msk.bf16.vlgmr.msra.gmra.mrb[28].mxu1 %vm480_vm1, %v2304_v11 }
  0x97   : > { %1313 = vmatpush1.bf16.msra.mxu0 %v2736_v46  ;;  %1354 = vmatpush1.bf16.msra.mxu1 %v2742_v50 }
  0x98   : > { %1314 = vmatprep.subr.bf16.mxu0 %v2744_v51  ;;  %1355 = vmatprep.subr.bf16.mxu1 %v2750_v55 }
  0x99   : > { %1344 = vmatprep.mubr.bf16.mxu0 %v2581_v40  ;;  %1385 = vmatprep.mubr.bf16.mxu1 %v2581_v40 }
  0x9b   : > { %1315 = vmatpush1.bf16.msra.mxu0 %v2755_v57  ;;  %1356 = vmatpush1.bf16.msra.mxu1 %v2759_v58 }
  0x9c   : > { %2330 = vmatprep.subr.msk.bf16.mxu0 %vm484_vm0, %v2761_v59  ;;  %2332 = vmatprep.subr.msk.bf16.mxu1 %vm484_vm0, %v2764_v61 }
  0x9f   : > { %1317 = vmatpush1.bf16.msra.mxu0 %v2775_v3  ;;  %1358 = vmatpush1.bf16.msra.mxu1 %v2782_v5 }
  0xa0   : > { %1394 = vmatprep.subr.bf16.mxu0 %v2777_v4  ;;  %1435 = vmatprep.subr.bf16.mxu1 %v2784_v6 }
  0xa2   : > { %2331 = vmatmul.mubr.msk.bf16.vlgmr.msra.gmra.mrb[32].mxu0 %vm480_vm1, %v2329_v48  ;;  %2333 = vmatmul.mubr.msk.bf16.vlgmr.msra.gmra.mrb[32].mxu1 %vm480_vm1, %v2329_v48 }
  0xa3   : > { %1395 = vmatpush1.bf16.msra.mxu0 %v2796_v12  ;;  %1436 = vmatpush1.bf16.msra.mxu1 %v2800_v13 }
  0xa4   : > { %1396 = vmatprep.subr.bf16.mxu0 %v2802_v14  ;;  %1437 = vmatprep.subr.bf16.mxu1 %v2805_v15 }
  0xa5   : > { %1426 = vmatprep.mubr.bf16.mxu0 %v2581_v40  ;;  %1467 = vmatprep.mubr.bf16.mxu1 %v2581_v40 }
  0xa7   : > { %1397 = vmatpush1.bf16.msra.mxu0 %v2814_v18  ;;  %1438 = vmatpush1.bf16.msra.mxu1 %v2818_v19 }
  0xa8   : > { %2334 = vmatprep.subr.msk.bf16.mxu0 %vm484_vm0, %v2820_v20  ;;  %2336 = vmatprep.subr.msk.bf16.mxu1 %vm484_vm0, %v2823_v22 }
  0xab   : > { %1399 = vmatpush1.bf16.msra.mxu0 %v2836_v28  ;;  %1440 = vmatpush1.bf16.msra.mxu1 %v2843_v30 }
  0xac   : > { %1476 = vmatprep.subr.bf16.mxu0 %v2838_v29  ;;  %1517 = vmatprep.subr.bf16.mxu1 %v2845_v31 }
  0xae   : > { %2335 = vmatmul.mubr.msk.bf16.vlgmr.msra.gmra.mrb[36].mxu0 %vm480_vm1, %v2329_v48  ;;  %2337 = vmatmul.mubr.msk.bf16.vlgmr.msra.gmra.mrb[36].mxu1 %vm480_vm1, %v2329_v48 }
  0xaf   : > { %1477 = vmatpush1.bf16.msra.mxu0 %v2852_v36  ;;  %1518 = vmatpush1.bf16.msra.mxu1 %v2856_v37 }
  0xb0   : > { %1478 = vmatprep.subr.bf16.mxu0 %v2858_v38  ;;  %1519 = vmatprep.subr.bf16.mxu1 %v2861_v39 }
  0xb1   : > { %1508 = vmatprep.mubr.bf16.mxu0 %v2581_v40  ;;  %1549 = vmatprep.mubr.bf16.mxu1 %v2581_v40 }
  0xb3   : > { %1479 = vmatpush1.bf16.msra.mxu0 %v2870_v43  ;;  %1520 = vmatpush1.bf16.msra.mxu1 %v2874_v45 }
  0xb4   : > { %2338 = vmatprep.subr.msk.bf16.mxu0 %vm484_vm0, %v2876_v47  ;;  %2340 = vmatprep.subr.msk.bf16.mxu1 %vm484_vm0, %v2879_v52 }
  0xb7   : > { %1481 = vmatpush1.bf16.msra.mxu0 %v2892_v63  ;;  %1522 = vmatpush1.bf16.msra.mxu1 %v2899_v1 }
  0xb8   : > { %1558 = vmatprep.subr.bf16.mxu0 %v2894_v0  ;;  %1599 = vmatprep.subr.bf16.mxu1 %v2901_v2 }
  0xba   : > { %2339 = vmatmul.mubr.msk.bf16.vlgmr.msra.gmra.mrb[40].mxu0 %vm480_vm1, %v2329_v48  ;;  %2341 = vmatmul.mubr.msk.bf16.vlgmr.msra.gmra.mrb[40].mxu1 %vm480_vm1, %v2329_v48 }
  0xbb   : > { %1559 = vmatpush1.bf16.msra.mxu0 %v2908_v16  ;;  %1600 = vmatpush1.bf16.msra.mxu1 %v2912_v17 }
  0xbc   : > { %1560 = vmatprep.subr.bf16.mxu0 %v2914_v21  ;;  %1601 = vmatprep.subr.bf16.mxu1 %v2917_v23 }
  0xbd   : > { %1590 = vmatprep.mubr.bf16.mxu0 %v2581_v40  ;;  %1631 = vmatprep.mubr.bf16.mxu1 %v2581_v40 }
  0xbf   : > { %1561 = vmatpush1.bf16.msra.mxu0 %v2926_v26  ;;  %1602 = vmatpush1.bf16.msra.mxu1 %v2930_v27 }
  0xc0   : > { %2342 = vmatprep.subr.msk.bf16.mxu0 %vm484_vm0, %v2932_v32  ;;  %2344 = vmatprep.subr.msk.bf16.mxu1 %vm484_vm0, %v2935_v34 }
  0xc3   : > { %1563 = vmatpush1.bf16.msra.mxu0 %v2944_v41  ;;  %1604 = vmatpush1.bf16.msra.mxu1 %v2949_v42 }
  0xc4   : > { %1702 = vmatprep.subr.bf16.mxu0 %v2733_v44  ;;  %1743 = vmatprep.subr.bf16.mxu1 %v2740_v49  ;;  %v2354_v44 = vld [vmem:[%s3301_s0 + $0x6] sm:$0x3] }
  0xc6   : > { %2343 = vmatmul.mubr.msk.bf16.vlgmr.msra.gmra.mrb[44].mxu0 %vm480_vm1, %v2329_v48  ;;  %2345 = vmatmul.mubr.msk.bf16.vlgmr.msra.gmra.mrb[44].mxu1 %vm480_vm1, %v2329_v48 }
  0xc7   : > { %1703 = vmatpush1.bf16.msra.mxu0 %v2736_v46  ;;  %1744 = vmatpush1.bf16.msra.mxu1 %v2742_v50 }
  0xc8   : > { %1704 = vmatprep.subr.bf16.mxu0 %v2744_v51  ;;  %1745 = vmatprep.subr.bf16.mxu1 %v2750_v55 }
  0xc9   : > { %1734 = vmatprep.mubr.bf16.mxu0 %v2581_v40  ;;  %1775 = vmatprep.mubr.bf16.mxu1 %v2581_v40 }
  0xcb   : > { %1705 = vmatpush1.bf16.msra.mxu0 %v2755_v57  ;;  %1746 = vmatpush1.bf16.msra.mxu1 %v2759_v58 }
  0xcc   : > { %2355 = vmatprep.subr.msk.bf16.mxu0 %vm484_vm0, %v2761_v59  ;;  %2357 = vmatprep.subr.msk.bf16.mxu1 %vm484_vm0, %v2764_v61 }
  0xcf   : > { %1707 = vmatpush1.bf16.msra.mxu0 %v2775_v3  ;;  %1748 = vmatpush1.bf16.msra.mxu1 %v2782_v5 }
  0xd0   : > { %1784 = vmatprep.subr.bf16.mxu0 %v2777_v4  ;;  %1825 = vmatprep.subr.bf16.mxu1 %v2784_v6 }
  0xd2   : > { %2356 = vmatmul.mubr.msk.bf16.vlgmr.msra.gmra.mrb[48].mxu0 %vm480_vm1, %v2354_v44  ;;  %2358 = vmatmul.mubr.msk.bf16.vlgmr.msra.gmra.mrb[48].mxu1 %vm480_vm1, %v2354_v44 }
  0xd3   : > { %1785 = vmatpush1.bf16.msra.mxu0 %v2796_v12  ;;  %1826 = vmatpush1.bf16.msra.mxu1 %v2800_v13 }
  0xd4   : > { %1786 = vmatprep.subr.bf16.mxu0 %v2802_v14  ;;  %1827 = vmatprep.subr.bf16.mxu1 %v2805_v15 }
  0xd5   : > { %1816 = vmatprep.mubr.bf16.mxu0 %v2581_v40  ;;  %1857 = vmatprep.mubr.bf16.mxu1 %v2581_v40 }
  0xd7   : > { %1787 = vmatpush1.bf16.msra.mxu0 %v2814_v18  ;;  %1828 = vmatpush1.bf16.msra.mxu1 %v2818_v19 }
  0xd8   : > { %2359 = vmatprep.subr.msk.bf16.mxu0 %vm484_vm0, %v2820_v20  ;;  %2361 = vmatprep.subr.msk.bf16.mxu1 %vm484_vm0, %v2823_v22 }
  0xdb   : > { %1789 = vmatpush1.bf16.msra.mxu0 %v2836_v28  ;;  %1830 = vmatpush1.bf16.msra.mxu1 %v2843_v30 }
  0xdc   : > { %1866 = vmatprep.subr.bf16.mxu0 %v2838_v29  ;;  %1907 = vmatprep.subr.bf16.mxu1 %v2845_v31 }
  0xde   : > { %2360 = vmatmul.mubr.msk.bf16.vlgmr.msra.gmra.mrb[52].mxu0 %vm480_vm1, %v2354_v44  ;;  %2362 = vmatmul.mubr.msk.bf16.vlgmr.msra.gmra.mrb[52].mxu1 %vm480_vm1, %v2354_v44 }
  0xdf   : > { %1867 = vmatpush1.bf16.msra.mxu0 %v2852_v36  ;;  %1908 = vmatpush1.bf16.msra.mxu1 %v2856_v37 }
  0xe0   : > { %1868 = vmatprep.subr.bf16.mxu0 %v2858_v38  ;;  %1909 = vmatprep.subr.bf16.mxu1 %v2861_v39 }
  0xe1   : > { %1898 = vmatprep.mubr.bf16.mxu0 %v2581_v40  ;;  %1939 = vmatprep.mubr.bf16.mxu1 %v2581_v40 }
  0xe3   : > { %1869 = vmatpush1.bf16.msra.mxu0 %v2870_v43  ;;  %1910 = vmatpush1.bf16.msra.mxu1 %v2874_v45 }
  0xe4   : > { %2363 = vmatprep.subr.msk.bf16.mxu0 %vm484_vm0, %v2876_v47  ;;  %2365 = vmatprep.subr.msk.bf16.mxu1 %vm484_vm0, %v2879_v52 }
  0xe7   : > { %1871 = vmatpush1.bf16.msra.mxu0 %v2892_v63  ;;  %1912 = vmatpush1.bf16.msra.mxu1 %v2899_v1 }
  0xe8   : > { %1948 = vmatprep.subr.bf16.mxu0 %v2894_v0  ;;  %1989 = vmatprep.subr.bf16.mxu1 %v2901_v2 }
  0xea   : > { %2364 = vmatmul.mubr.msk.bf16.vlgmr.msra.gmra.mrb[56].mxu0 %vm480_vm1, %v2354_v44  ;;  %2366 = vmatmul.mubr.msk.bf16.vlgmr.msra.gmra.mrb[56].mxu1 %vm480_vm1, %v2354_v44 }
  0xeb   : > { %1949 = vmatpush1.bf16.msra.mxu0 %v2908_v16  ;;  %1990 = vmatpush1.bf16.msra.mxu1 %v2912_v17 }
  0xec   : > { %1950 = vmatprep.subr.bf16.mxu0 %v2914_v21  ;;  %1991 = vmatprep.subr.bf16.mxu1 %v2917_v23 }
  0xed   : > { %1980 = vmatprep.mubr.bf16.mxu0 %v2581_v40  ;;  %2021 = vmatprep.mubr.bf16.mxu1 %v2581_v40 }
  0xef   : > { %1951 = vmatpush1.bf16.msra.mxu0 %v2926_v26  ;;  %1992 = vmatpush1.bf16.msra.mxu1 %v2930_v27 }
  0xf0   : > { %2367 = vmatprep.subr.msk.bf16.mxu0 %vm484_vm0, %v2932_v32  ;;  %2369 = vmatprep.subr.msk.bf16.mxu1 %vm484_vm0, %v2935_v34 }
  0xf3   : > { %1953 = vmatpush1.bf16.msra.mxu0 %v2944_v41  ;;  %1994 = vmatpush1.bf16.msra.mxu1 %v2949_v42 }
  0xf6   : > { %2368 = vmatmul.mubr.msk.bf16.vlgmr.msra.gmra.mrb[60].mxu0 %vm480_vm1, %v2354_v44  ;;  %2370 = vmatmul.mubr.msk.bf16.vlgmr.msra.gmra.mrb[60].mxu1 %vm480_vm1, %v2354_v44 }
 0x115   : > { %v567_v40 = vpop.f32.mrb[0].mxu0  ;;  %v608_v46 = vpop.f32.mrb[0].mxu1 }
 0x116   : > { %2429 = vtanh.f32 %v567_v40  ;;  %v569_v49 = vpop.f32.mrb[1].mxu0  ;;  %v610_v50 = vpop.f32.mrb[1].mxu1 }
 0x117   : > { %2431 = vtanh.f32 %v608_v46  ;;  %v571_v51 = vpop.f32.mrb[2].mxu0  ;;  %v612_v55 = vpop.f32.mrb[2].mxu1 }
 0x118   : > { %2433 = vtanh.f32 %v569_v49  ;;  %v572_v57 = vpop.f32.mrb[3].mxu0  ;;  %v613_v58 = vpop.f32.mrb[3].mxu1 }
 0x119   : > { %2435 = vtanh.f32 %v610_v50 }
 0x120   : > { %v2430_v59 = vpop.eup %2429 }
 0x121   : > { %v2432_v61 = vpop.eup %2431  ;;  %v649_v3 = vpop.f32.mrb[4].mxu0 }
 0x122   : > { %v2434_v4 = vpop.eup %2433  ;;  %2437 = vtanh.f32 %v649_v3  ;;  %v690_v5 = vpop.f32.mrb[4].mxu1 }
 0x123   : > { %v651_v6 = vpop.f32.mrb[5].mxu0  ;;  %v2436_v12 = vpop.eup %2435  ;;  %v893_v13 = vcombine.low %v2430_v59, %v2434_v4  ;;  %2439 = vtanh.f32 %v690_v5 }
 0x124   : > { %v692_v14 = vpop.f32.mrb[5].mxu1  ;;  %v653_v15 = vpop.f32.mrb[6].mxu0  ;;  %v894_v18 = vcombine.low %v2432_v61, %v2436_v12  ;;  %2441 = vtanh.f32 %v651_v6 }
 0x125   : > { %v694_v19 = vpop.f32.mrb[6].mxu1  ;;  %v654_v20 = vpop.f32.mrb[7].mxu0  ;;  %909 = vst [vmem:[%s3184_s14] sm:$0x77] %v893_v13  ;;  %2443 = vtanh.f32 %v692_v14 }
 0x126   : > { %v695_v22 = vpop.f32.mrb[7].mxu1  ;;  %910 = vst [vmem:[%s3184_s14 + $0x8] sm:$0x77] %v894_v18 }
 0x12c   : > { %v2438_v28 = vpop.eup %2437 }
 0x12d   : > { %v2440_v29 = vpop.eup %2439  ;;  %v731_v30 = vpop.f32.mrb[8].mxu0 }
 0x12e   : > { %v2442_v31 = vpop.eup %2441  ;;  %2445 = vtanh.f32 %v731_v30  ;;  %v772_v36 = vpop.f32.mrb[8].mxu1 }
 0x12f   : > { %v733_v37 = vpop.f32.mrb[9].mxu0  ;;  %v2444_v38 = vpop.eup %2443  ;;  %v895_v39 = vcombine.low %v2438_v28, %v2442_v31  ;;  %2447 = vtanh.f32 %v772_v36 }
 0x130   : > { %v774_v43 = vpop.f32.mrb[9].mxu1  ;;  %v735_v45 = vpop.f32.mrb[10].mxu0  ;;  %v896_v47 = vcombine.low %v2440_v29, %v2444_v38  ;;  %2449 = vtanh.f32 %v733_v37 }
 0x131   : > { %v776_v52 = vpop.f32.mrb[10].mxu1  ;;  %v736_v53 = vpop.f32.mrb[11].mxu0  ;;  %911 = vst [vmem:[%s3184_s14 + $0x10] sm:$0x77] %v895_v39  ;;  %2451 = vtanh.f32 %v774_v43 }
 0x132   : > { %v777_v54 = vpop.f32.mrb[11].mxu1  ;;  %912 = vst [vmem:[%s3184_s14 + $0x18] sm:$0x77] %v896_v47 }
 0x138   : > { %v2446_v56 = vpop.eup %2445 }
 0x139   : > { %v2448_v60 = vpop.eup %2447  ;;  %v813_v62 = vpop.f32.mrb[12].mxu0 }
 0x13a   : > { %v2450_v63 = vpop.eup %2449  ;;  %2453 = vtanh.f32 %v813_v62  ;;  %v854_v0 = vpop.f32.mrb[12].mxu1 }
 0x13b   : > { %v815_v1 = vpop.f32.mrb[13].mxu0  ;;  %v2452_v2 = vpop.eup %2451  ;;  %v897_v7 = vcombine.low %v2446_v56, %v2450_v63  ;;  %2455 = vtanh.f32 %v854_v0 }
 0x13c   : > { %v856_v8 = vpop.f32.mrb[13].mxu1  ;;  %v817_v9 = vpop.f32.mrb[14].mxu0  ;;  %v898_v10 = vcombine.low %v2448_v60, %v2452_v2  ;;  %2457 = vtanh.f32 %v815_v1 }
 0x13d   : > { %v858_v16 = vpop.f32.mrb[14].mxu1  ;;  %v818_v17 = vpop.f32.mrb[15].mxu0  ;;  %913 = vst [vmem:[%s3184_s14 + $0x20] sm:$0x77] %v897_v7  ;;  %2459 = vtanh.f32 %v856_v8 }
 0x13e   : > { %v859_v21 = vpop.f32.mrb[15].mxu1  ;;  %914 = vst [vmem:[%s3184_s14 + $0x28] sm:$0x77] %v898_v10 }
 0x144   : > { %v2454_v23 = vpop.eup %2453 }
 0x145   : > { %v2456_v24 = vpop.eup %2455  ;;  %v956_v25 = vpop.f32.mrb[16].mxu0 }
 0x146   : > { %v2458_v26 = vpop.eup %2457  ;;  %2461 = vtanh.f32 %v956_v25  ;;  %v997_v27 = vpop.f32.mrb[16].mxu1 }
 0x147   : > { %v958_v32 = vpop.f32.mrb[17].mxu0  ;;  %v2460_v33 = vpop.eup %2459  ;;  %v899_v34 = vcombine.low %v2454_v23, %v2458_v26  ;;  %2463 = vtanh.f32 %v997_v27 }
 0x148   : > { %v999_v35 = vpop.f32.mrb[17].mxu1  ;;  %v960_v41 = vpop.f32.mrb[18].mxu0  ;;  %v900_v42 = vcombine.low %v2456_v24, %v2460_v33  ;;  %2465 = vtanh.f32 %v958_v32 }
 0x149   : > { %v1001_v11 = vpop.f32.mrb[18].mxu1  ;;  %v961_v48 = vpop.f32.mrb[19].mxu0  ;;  %915 = vst [vmem:[%s3184_s14 + $0x30] sm:$0x77] %v899_v34  ;;  %2467 = vtanh.f32 %v999_v35 }
 0x14a   : > { %v1002_v44 = vpop.f32.mrb[19].mxu1  ;;  %916 = vst [vmem:[%s3184_s14 + $0x38] sm:$0x77] %v900_v42 }
 0x150   : > { %v2462_v40 = vpop.eup %2461 }
 0x151   : > { %v2464_v46 = vpop.eup %2463  ;;  %v1038_v49 = vpop.f32.mrb[20].mxu0 }
 0x152   : > { %v2466_v50 = vpop.eup %2465  ;;  %2469 = vtanh.f32 %v1038_v49  ;;  %v1079_v51 = vpop.f32.mrb[20].mxu1 }
 0x153   : > { %v1040_v55 = vpop.f32.mrb[21].mxu0  ;;  %v2468_v57 = vpop.eup %2467  ;;  %v1282_v58 = vcombine.low %v2462_v40, %v2466_v50  ;;  %2471 = vtanh.f32 %v1079_v51 }
 0x154   : > { %v1081_v59 = vpop.f32.mrb[21].mxu1  ;;  %v1042_v61 = vpop.f32.mrb[22].mxu0  ;;  %v1283_v3 = vcombine.low %v2464_v46, %v2468_v57  ;;  %2473 = vtanh.f32 %v1040_v55 }
 0x155   : > { %v1083_v4 = vpop.f32.mrb[22].mxu1  ;;  %v1043_v5 = vpop.f32.mrb[23].mxu0  ;;  %2321 = vst [vmem:[%s3184_s14 + $0x40] sm:$0x77] %v1282_v58  ;;  %2475 = vtanh.f32 %v1081_v59 }
 0x156   : > { %v1084_v6 = vpop.f32.mrb[23].mxu1  ;;  %2322 = vst [vmem:[%s3184_s14 + $0x48] sm:$0x77] %v1283_v3 }
 0x15c   : > { %v2470_v12 = vpop.eup %2469 }
 0x15d   : > { %v2472_v13 = vpop.eup %2471  ;;  %v1120_v14 = vpop.f32.mrb[24].mxu0 }
 0x15e   : > { %v2474_v15 = vpop.eup %2473  ;;  %2477 = vtanh.f32 %v1120_v14  ;;  %v1161_v18 = vpop.f32.mrb[24].mxu1 }
 0x15f   : > { %v1122_v19 = vpop.f32.mrb[25].mxu0  ;;  %v2476_v20 = vpop.eup %2475  ;;  %v1284_v22 = vcombine.low %v2470_v12, %v2474_v15  ;;  %2479 = vtanh.f32 %v1161_v18 }
 0x160   : > { %v1163_v28 = vpop.f32.mrb[25].mxu1  ;;  %v1124_v29 = vpop.f32.mrb[26].mxu0  ;;  %v1285_v30 = vcombine.low %v2472_v13, %v2476_v20  ;;  %2481 = vtanh.f32 %v1122_v19 }
 0x161   : > { %v1165_v31 = vpop.f32.mrb[26].mxu1  ;;  %v1125_v36 = vpop.f32.mrb[27].mxu0  ;;  %2323 = vst [vmem:[%s3184_s14 + $0x50] sm:$0x77] %v1284_v22  ;;  %2483 = vtanh.f32 %v1163_v28 }
 0x162   : > { %v1166_v37 = vpop.f32.mrb[27].mxu1  ;;  %2324 = vst [vmem:[%s3184_s14 + $0x58] sm:$0x77] %v1285_v30 }
 0x168   : > { %v2478_v38 = vpop.eup %2477 }
 0x169   : > { %v2480_v39 = vpop.eup %2479  ;;  %v1202_v43 = vpop.f32.mrb[28].mxu0 }
 0x16a   : > { %v2482_v45 = vpop.eup %2481  ;;  %2485 = vtanh.f32 %v1202_v43  ;;  %v1243_v47 = vpop.f32.mrb[28].mxu1 }
 0x16b   : > { %v1204_v52 = vpop.f32.mrb[29].mxu0  ;;  %v2484_v53 = vpop.eup %2483  ;;  %v1286_v54 = vcombine.low %v2478_v38, %v2482_v45  ;;  %2487 = vtanh.f32 %v1243_v47 }
 0x16c   : > { %v1245_v56 = vpop.f32.mrb[29].mxu1  ;;  %v1206_v60 = vpop.f32.mrb[30].mxu0  ;;  %v1287_v62 = vcombine.low %v2480_v39, %v2484_v53  ;;  %2489 = vtanh.f32 %v1204_v52 }
 0x16d   : > { %v1247_v63 = vpop.f32.mrb[30].mxu1  ;;  %v1207_v0 = vpop.f32.mrb[31].mxu0  ;;  %2325 = vst [vmem:[%s3184_s14 + $0x60] sm:$0x77] %v1286_v54  ;;  %2491 = vtanh.f32 %v1245_v56 }
 0x16e   : > { %v1248_v1 = vpop.f32.mrb[31].mxu1  ;;  %2326 = vst [vmem:[%s3184_s14 + $0x68] sm:$0x77] %v1287_v62 }
 0x174   : > { %v2486_v2 = vpop.eup %2485 }
 0x175   : > { %v2488_v7 = vpop.eup %2487  ;;  %v1346_v8 = vpop.f32.mrb[32].mxu0 }
 0x176   : > { %v2490_v9 = vpop.eup %2489  ;;  %2493 = vtanh.f32 %v1346_v8  ;;  %v1387_v10 = vpop.f32.mrb[32].mxu1 }
 0x177   : > { %v1348_v16 = vpop.f32.mrb[33].mxu0  ;;  %v2492_v17 = vpop.eup %2491  ;;  %v1288_v21 = vcombine.low %v2486_v2, %v2490_v9  ;;  %2495 = vtanh.f32 %v1387_v10 }
 0x178   : > { %v1389_v23 = vpop.f32.mrb[33].mxu1  ;;  %v1350_v24 = vpop.f32.mrb[34].mxu0  ;;  %v1289_v25 = vcombine.low %v2488_v7, %v2492_v17  ;;  %2497 = vtanh.f32 %v1348_v16 }
 0x179   : > { %v1391_v26 = vpop.f32.mrb[34].mxu1  ;;  %v1351_v27 = vpop.f32.mrb[35].mxu0  ;;  %2327 = vst [vmem:[%s3184_s14 + $0x70] sm:$0x77] %v1288_v21  ;;  %2499 = vtanh.f32 %v1389_v23 }
 0x17a   : > { %v1392_v32 = vpop.f32.mrb[35].mxu1  ;;  %2328 = vst [vmem:[%s3184_s14 + $0x78] sm:$0x77] %v1289_v25 }
 0x180   : > { %v2494_v33 = vpop.eup %2493 }
 0x181   : > { %v2496_v34 = vpop.eup %2495  ;;  %v1428_v35 = vpop.f32.mrb[36].mxu0 }
 0x182   : > { %v2498_v41 = vpop.eup %2497  ;;  %2501 = vtanh.f32 %v1428_v35  ;;  %v1469_v42 = vpop.f32.mrb[36].mxu1 }
 0x183   : > { %v1430_v11 = vpop.f32.mrb[37].mxu0  ;;  %v2500_v48 = vpop.eup %2499  ;;  %v1672_v44 = vcombine.low %v2494_v33, %v2498_v41  ;;  %2503 = vtanh.f32 %v1469_v42 }
 0x184   : > { %v1471_v40 = vpop.f32.mrb[37].mxu1  ;;  %v1432_v46 = vpop.f32.mrb[38].mxu0  ;;  %v1673_v49 = vcombine.low %v2496_v34, %v2500_v48  ;;  %2505 = vtanh.f32 %v1430_v11 }
 0x185   : > { %v1473_v50 = vpop.f32.mrb[38].mxu1  ;;  %v1433_v51 = vpop.f32.mrb[39].mxu0  ;;  %2346 = vst [vmem:[%s3184_s14 + $0x80] sm:$0x77] %v1672_v44  ;;  %2507 = vtanh.f32 %v1471_v40 }
 0x186   : > { %v1474_v55 = vpop.f32.mrb[39].mxu1  ;;  %2347 = vst [vmem:[%s3184_s14 + $0x88] sm:$0x77] %v1673_v49 }
 0x18c   : > { %v2502_v57 = vpop.eup %2501 }
 0x18d   : > { %v2504_v58 = vpop.eup %2503  ;;  %v1510_v59 = vpop.f32.mrb[40].mxu0 }
 0x18e   : > { %v2506_v61 = vpop.eup %2505  ;;  %2509 = vtanh.f32 %v1510_v59  ;;  %v1551_v3 = vpop.f32.mrb[40].mxu1 }
 0x18f   : > { %v1512_v4 = vpop.f32.mrb[41].mxu0  ;;  %v2508_v5 = vpop.eup %2507  ;;  %v1674_v6 = vcombine.low %v2502_v57, %v2506_v61  ;;  %2511 = vtanh.f32 %v1551_v3 }
 0x190   : > { %v1553_v12 = vpop.f32.mrb[41].mxu1  ;;  %v1514_v13 = vpop.f32.mrb[42].mxu0  ;;  %v1675_v14 = vcombine.low %v2504_v58, %v2508_v5  ;;  %2513 = vtanh.f32 %v1512_v4 }
 0x191   : > { %v1555_v15 = vpop.f32.mrb[42].mxu1  ;;  %v1515_v18 = vpop.f32.mrb[43].mxu0  ;;  %2348 = vst [vmem:[%s3184_s14 + $0x90] sm:$0x77] %v1674_v6  ;;  %2515 = vtanh.f32 %v1553_v12 }
 0x192   : > { %v1556_v19 = vpop.f32.mrb[43].mxu1  ;;  %2349 = vst [vmem:[%s3184_s14 + $0x98] sm:$0x77] %v1675_v14 }
 0x198   : > { %v2510_v20 = vpop.eup %2509 }
 0x199   : > { %v2512_v22 = vpop.eup %2511  ;;  %v1592_v28 = vpop.f32.mrb[44].mxu0 }
 0x19a   : > { %v2514_v29 = vpop.eup %2513  ;;  %2517 = vtanh.f32 %v1592_v28  ;;  %v1633_v30 = vpop.f32.mrb[44].mxu1 }
 0x19b   : > { %v1594_v31 = vpop.f32.mrb[45].mxu0  ;;  %v2516_v36 = vpop.eup %2515  ;;  %v1676_v37 = vcombine.low %v2510_v20, %v2514_v29  ;;  %2519 = vtanh.f32 %v1633_v30 }
 0x19c   : > { %v1635_v38 = vpop.f32.mrb[45].mxu1  ;;  %v1596_v39 = vpop.f32.mrb[46].mxu0  ;;  %v1677_v43 = vcombine.low %v2512_v22, %v2516_v36  ;;  %2521 = vtanh.f32 %v1594_v31 }
 0x19d   : > { %v1637_v45 = vpop.f32.mrb[46].mxu1  ;;  %v1597_v47 = vpop.f32.mrb[47].mxu0  ;;  %2350 = vst [vmem:[%s3184_s14 + $0xa0] sm:$0x77] %v1676_v37  ;;  %2523 = vtanh.f32 %v1635_v38 }
 0x19e   : > { %v1638_v52 = vpop.f32.mrb[47].mxu1  ;;  %2351 = vst [vmem:[%s3184_s14 + $0xa8] sm:$0x77] %v1677_v43  ;;  %v2109_v47 = vld [vmem:[%s3184_s14] sm:$0xff] (%p2627_p5) }
 0x19f   : > { %v2111_v52 = vld [vmem:[%s3184_s14 + $0x8] sm:$0xff] (%p2627_p5)  ;;  %2110 = vst [vmem:[%s3228_s17] sm:$0xff] (%p2627_p5), %v2109_v47 }
 0x1a0   : > { %2112 = vst [vmem:[%s3228_s17 + $0x8] sm:$0xff] (%p2627_p5), %v2111_v52 }
 0x1a4   : > { %v2518_v53 = vpop.eup %2517 }
 0x1a5   : > { %v2520_v54 = vpop.eup %2519  ;;  %v1736_v56 = vpop.f32.mrb[48].mxu0 }
 0x1a6   : > { %v2522_v60 = vpop.eup %2521  ;;  %2525 = vtanh.f32 %v1736_v56  ;;  %v1777_v62 = vpop.f32.mrb[48].mxu1  ;;  %v2117_v56 = vld [vmem:[%s3184_s14 + $0x20] sm:$0xff] (%p2627_p5) }
 0x1a7   : > { %v1738_v63 = vpop.f32.mrb[49].mxu0  ;;  %v2524_v0 = vpop.eup %2523  ;;  %v1678_v1 = vcombine.low %v2518_v53, %v2522_v60  ;;  %2527 = vtanh.f32 %v1777_v62  ;;  %v2113_v53 = vld [vmem:[%s3184_s14 + $0x10] sm:$0xff] (%p2627_p5)  ;;  %v2119_v60 = vld [vmem:[%s3184_s14 + $0x28] sm:$0xff] (%p2627_p5)  ;;  %2118 = vst [vmem:[%s3228_s17 + $0x20] sm:$0xff] (%p2627_p5), %v2117_v56 }
 0x1a8   : > { %v1779_v2 = vpop.f32.mrb[49].mxu1  ;;  %v1740_v7 = vpop.f32.mrb[50].mxu0  ;;  %v1679_v8 = vcombine.low %v2520_v54, %v2524_v0  ;;  %2529 = vtanh.f32 %v1738_v63  ;;  %v2115_v54 = vld [vmem:[%s3184_s14 + $0x18] sm:$0xff] (%p2627_p5)  ;;  %2114 = vst [vmem:[%s3228_s17 + $0x10] sm:$0xff] (%p2627_p5), %v2113_v53  ;;  %2120 = vst [vmem:[%s3228_s17 + $0x28] sm:$0xff] (%p2627_p5), %v2119_v60  ;;  %v2121_v62 = vld [vmem:[%s3184_s14 + $0x30] sm:$0xff] (%p2627_p5) }
 0x1a9   : > { %v1781_v9 = vpop.f32.mrb[50].mxu1  ;;  %v1741_v10 = vpop.f32.mrb[51].mxu0  ;;  %2352 = vst [vmem:[%s3184_s14 + $0xb0] sm:$0x77] %v1678_v1  ;;  %2531 = vtanh.f32 %v1779_v2  ;;  %2116 = vst [vmem:[%s3228_s17 + $0x18] sm:$0xff] (%p2627_p5), %v2115_v54  ;;  %v2123_v63 = vld [vmem:[%s3184_s14 + $0x38] sm:$0xff] (%p2627_p5) }
 0x1aa   : > { %v1782_v16 = vpop.f32.mrb[51].mxu1  ;;  %2353 = vst [vmem:[%s3184_s14 + $0xb8] sm:$0x77] %v1679_v8  ;;  %v2125_v0 = vld [vmem:[%s3184_s14 + $0x40] sm:$0xff] (%p2627_p5)  ;;  %2122 = vst [vmem:[%s3228_s17 + $0x30] sm:$0xff] (%p2627_p5), %v2121_v62  ;;  %v2127_v1 = vld [vmem:[%s3184_s14 + $0x48] sm:$0xff] (%p2627_p5) }
 0x1ab   : > { %2124 = vst [vmem:[%s3228_s17 + $0x38] sm:$0xff] (%p2627_p5), %v2123_v63  ;;  %2126 = vst [vmem:[%s3228_s17 + $0x100] sm:$0xff] (%p2627_p5), %v2125_v0  ;;  %v2129_v2 = vld [vmem:[%s3184_s14 + $0x50] sm:$0xff] (%p2627_p5)  ;;  %v2131_v7 = vld [vmem:[%s3184_s14 + $0x58] sm:$0xff] (%p2627_p5) }
 0x1ac   : > { %2128 = vst [vmem:[%s3228_s17 + $0x108] sm:$0xff] (%p2627_p5), %v2127_v1  ;;  %2130 = vst [vmem:[%s3228_s17 + $0x110] sm:$0xff] (%p2627_p5), %v2129_v2  ;;  %v2133_v8 = vld [vmem:[%s3184_s14 + $0x60] sm:$0xff] (%p2627_p5)  ;;  %v2135_v9 = vld [vmem:[%s3184_s14 + $0x68] sm:$0xff] (%p2627_p5) }
 0x1ad   : > { %2132 = vst [vmem:[%s3228_s17 + $0x118] sm:$0xff] (%p2627_p5), %v2131_v7  ;;  %v2137_v10 = vld [vmem:[%s3184_s14 + $0x70] sm:$0xff] (%p2627_p5)  ;;  %2134 = vst [vmem:[%s3228_s17 + $0x120] sm:$0xff] (%p2627_p5), %v2133_v8  ;;  %v2139_v16 = vld [vmem:[%s3184_s14 + $0x78] sm:$0xff] (%p2627_p5) }
 0x1ae   : > { %2136 = vst [vmem:[%s3228_s17 + $0x128] sm:$0xff] (%p2627_p5), %v2135_v9  ;;  %2138 = vst [vmem:[%s3228_s17 + $0x130] sm:$0xff] (%p2627_p5), %v2137_v10 }
 0x1af   : > { %2140 = vst [vmem:[%s3228_s17 + $0x138] sm:$0xff] (%p2627_p5), %v2139_v16 }
 0x1b0   : > { %v2526_v17 = vpop.eup %2525 }
 0x1b1   : > { %v2528_v21 = vpop.eup %2527  ;;  %v1818_v23 = vpop.f32.mrb[52].mxu0 }
 0x1b2   : > { %v2530_v24 = vpop.eup %2529  ;;  %2533 = vtanh.f32 %v1818_v23  ;;  %v1859_v25 = vpop.f32.mrb[52].mxu1  ;;  %v2145_v23 = vld [vmem:[%s3184_s14 + $0x90] sm:$0xff] (%p2627_p5) }
 0x1b3   : > { %v1820_v26 = vpop.f32.mrb[53].mxu0  ;;  %v2532_v27 = vpop.eup %2531  ;;  %v2062_v32 = vcombine.low %v2526_v17, %v2530_v24  ;;  %2535 = vtanh.f32 %v1859_v25  ;;  %v2141_v17 = vld [vmem:[%s3184_s14 + $0x80] sm:$0xff] (%p2627_p5)  ;;  %v2147_v24 = vld [vmem:[%s3184_s14 + $0x98] sm:$0xff] (%p2627_p5)  ;;  %2146 = vst [vmem:[%s3228_s17 + $0x210] sm:$0xff] (%p2627_p5), %v2145_v23 }
 0x1b4   : > { %v1861_v33 = vpop.f32.mrb[53].mxu1  ;;  %v1822_v34 = vpop.f32.mrb[54].mxu0  ;;  %v2063_v35 = vcombine.low %v2528_v21, %v2532_v27  ;;  %2537 = vtanh.f32 %v1820_v26  ;;  %v2143_v21 = vld [vmem:[%s3184_s14 + $0x88] sm:$0xff] (%p2627_p5)  ;;  %2142 = vst [vmem:[%s3228_s17 + $0x200] sm:$0xff] (%p2627_p5), %v2141_v17  ;;  %v2149_v25 = vld [vmem:[%s3184_s14 + $0xa0] sm:$0xff] (%p2627_p5)  ;;  %2148 = vst [vmem:[%s3228_s17 + $0x218] sm:$0xff] (%p2627_p5), %v2147_v24 }
 0x1b5   : > { %v1863_v41 = vpop.f32.mrb[54].mxu1  ;;  %v1823_v42 = vpop.f32.mrb[55].mxu0  ;;  %2371 = vst [vmem:[%s3184_s14 + $0xc0] sm:$0x77] %v2062_v32  ;;  %2539 = vtanh.f32 %v1861_v33  ;;  %2144 = vst [vmem:[%s3228_s17 + $0x208] sm:$0xff] (%p2627_p5), %v2143_v21  ;;  %v2151_v26 = vld [vmem:[%s3184_s14 + $0xa8] sm:$0xff] (%p2627_p5) }
 0x1b6   : > { %v1864_v11 = vpop.f32.mrb[55].mxu1  ;;  %2372 = vst [vmem:[%s3184_s14 + $0xc8] sm:$0x77] %v2063_v35  ;;  %2150 = vst [vmem:[%s3228_s17 + $0x220] sm:$0xff] (%p2627_p5), %v2149_v25  ;;  %v2153_v27 = vld [vmem:[%s3184_s14 + $0xb0] sm:$0xff] (%p2627_p5)  ;;  %v2155_v32 = vld [vmem:[%s3184_s14 + $0xb8] sm:$0xff] (%p2627_p5) }
 0x1b7   : > { %2152 = vst [vmem:[%s3228_s17 + $0x228] sm:$0xff] (%p2627_p5), %v2151_v26  ;;  %2154 = vst [vmem:[%s3228_s17 + $0x230] sm:$0xff] (%p2627_p5), %v2153_v27 }
 0x1b8   : > { %2156 = vst [vmem:[%s3228_s17 + $0x238] sm:$0xff] (%p2627_p5), %v2155_v32 }
 0x1bc   : > { %v2534_v48 = vpop.eup %2533  ;;  %v2157_v33 = vld [vmem:[%s3184_s14 + $0xc0] sm:$0xff] (%p2627_p5) }
 0x1bd   : > { %v2536_v44 = vpop.eup %2535  ;;  %v1900_v40 = vpop.f32.mrb[56].mxu0  ;;  %v2159_v34 = vld [vmem:[%s3184_s14 + $0xc8] sm:$0xff] (%p2627_p5)  ;;  %2158 = vst [vmem:[%s3228_s17 + $0x300] sm:$0xff] (%p2627_p5), %v2157_v33 }
 0x1be   : > { %v2538_v46 = vpop.eup %2537  ;;  %2541 = vtanh.f32 %v1900_v40  ;;  %v1941_v49 = vpop.f32.mrb[56].mxu1  ;;  %2160 = vst [vmem:[%s3228_s17 + $0x308] sm:$0xff] (%p2627_p5), %v2159_v34 }
 0x1bf   : > { %v1902_v50 = vpop.f32.mrb[57].mxu0  ;;  %v2540_v51 = vpop.eup %2539  ;;  %v2064_v55 = vcombine.low %v2534_v48, %v2538_v46  ;;  %2543 = vtanh.f32 %v1941_v49 }
 0x1c0   : > { %v1943_v57 = vpop.f32.mrb[57].mxu1  ;;  %v1904_v58 = vpop.f32.mrb[58].mxu0  ;;  %v2065_v59 = vcombine.low %v2536_v44, %v2540_v51  ;;  %2545 = vtanh.f32 %v1902_v50 }
 0x1c1   : > { %v1945_v61 = vpop.f32.mrb[58].mxu1  ;;  %v1905_v3 = vpop.f32.mrb[59].mxu0  ;;  %2373 = vst [vmem:[%s3184_s14 + $0xd0] sm:$0x77] %v2064_v55  ;;  %2547 = vtanh.f32 %v1943_v57 }
 0x1c2   : > { %v1946_v4 = vpop.f32.mrb[59].mxu1  ;;  %2374 = vst [vmem:[%s3184_s14 + $0xd8] sm:$0x77] %v2065_v59 }
 0x1c8   : > { %v2542_v5 = vpop.eup %2541  ;;  %v2161_v35 = vld [vmem:[%s3184_s14 + $0xd0] sm:$0xff] (%p2627_p5) }
 0x1c9   : > { %v2544_v6 = vpop.eup %2543  ;;  %v1982_v12 = vpop.f32.mrb[60].mxu0  ;;  %2162 = vst [vmem:[%s3228_s17 + $0x310] sm:$0xff] (%p2627_p5), %v2161_v35  ;;  %v2163_v41 = vld [vmem:[%s3184_s14 + $0xd8] sm:$0xff] (%p2627_p5) }
 0x1ca   : > { %v2546_v13 = vpop.eup %2545  ;;  %2549 = vtanh.f32 %v1982_v12  ;;  %v2023_v14 = vpop.f32.mrb[60].mxu1  ;;  %2164 = vst [vmem:[%s3228_s17 + $0x318] sm:$0xff] (%p2627_p5), %v2163_v41 }
 0x1cb   : > { %v1984_v15 = vpop.f32.mrb[61].mxu0  ;;  %v2548_v18 = vpop.eup %2547  ;;  %v2066_v19 = vcombine.low %v2542_v5, %v2546_v13  ;;  %2551 = vtanh.f32 %v2023_v14 }
 0x1cc   : > { %v2025_v20 = vpop.f32.mrb[61].mxu1  ;;  %v1986_v22 = vpop.f32.mrb[62].mxu0  ;;  %v2067_v28 = vcombine.low %v2544_v6, %v2548_v18  ;;  %2553 = vtanh.f32 %v1984_v15 }
 0x1cd   : > { %v2027_v29 = vpop.f32.mrb[62].mxu1  ;;  %v1987_v30 = vpop.f32.mrb[63].mxu0  ;;  %2375 = vst [vmem:[%s3184_s14 + $0xe0] sm:$0x77] %v2066_v19  ;;  %2555 = vtanh.f32 %v2025_v20 }
 0x1ce   : > { %v2028_v31 = vpop.f32.mrb[63].mxu1  ;;  %2376 = vst [vmem:[%s3184_s14 + $0xe8] sm:$0x77] %v2067_v28 }
 0x1d4   : > { %v2550_v36 = vpop.eup %2549  ;;  %2093 = sbr.rel (!%p2627_p5) target bundleno = 483 (0x1e3), region = 55  ;;  %v2165_v42 = vld [vmem:[%s3184_s14 + $0xe0] sm:$0xff] (%p2627_p5) }
 0x1d5   : > { %v2552_v37 = vpop.eup %2551  ;;  %v2167_v11 = vld [vmem:[%s3184_s14 + $0xe8] sm:$0xff] (%p2627_p5)  ;;  %2166 = vst [vmem:[%s3228_s17 + $0x320] sm:$0xff] (%p2627_p5), %v2165_v42 }
 0x1d6   : > { %v2554_v38 = vpop.eup %2553  ;;  %2168 = vst [vmem:[%s3228_s17 + $0x328] sm:$0xff] (%p2627_p5), %v2167_v11 }
 0x1d7   : > { %v2556_v39 = vpop.eup %2555  ;;  %v2068_v43 = vcombine.low %v2550_v36, %v2554_v38 }
 0x1d8   : > { %v2069_v45 = vcombine.low %v2552_v37, %v2556_v39 }
 0x1d9   : > { %2377 = vst [vmem:[%s3184_s14 + $0xf0] sm:$0x77] %v2068_v43 }
 0x1da   : > { %2378 = vst [vmem:[%s3184_s14 + $0xf8] sm:$0x77] %v2069_v45 }
 0x1e0   : > { %v2169_v48 = vld [vmem:[%s3184_s14 + $0xf0] sm:$0xff] }
 0x1e1   : > { %v2171_v44 = vld [vmem:[%s3184_s14 + $0xf8] sm:$0xff]  ;;  %2170 = vst [vmem:[%s3228_s17 + $0x330] sm:$0xff] %v2169_v48 }
 0x1e2   : > { %2172 = vst [vmem:[%s3228_s17 + $0x338] sm:$0xff] %v2171_v44 }
 0x1e3 PF: > { %p9_p10 = scmp.ge.s32.totalorder %s2614_s13, 6   ;;  %s3305_s9 = smov %s2575_s10 }
 0x1e4   : > { %s3306_s10 = smov %s2625_s16  ;;  %s3307_s11 = smov %s2614_s13 }
 0x1e5   :  { %11 = sbr.rel (!%p9_p10) target bundleno = 2 (0x2), region = 115 }

</bundles_post_ra>
